<compile_context>
chip_gen: v7x
topology: tpu7x:2x2x1
jax: 0.10.0
libtpu: 0.0.40
codegen_flags: <defaults>
</compile_context>

<pallas_src>
import jax
import jax.numpy as jnp
from jax import lax
from jax.experimental import pallas as pl
from jax.experimental.pallas import tpu as pltpu


# ---------------------------------------------------------------------------
# Pallas kernel: whole LeNet forward for one batch tile (TB images) per step.
# Input slab layout:  x_ref[iy, ox*TB + b]  (32, 32*TB) bf16
# Output layout:      o_ref[class, b]       (10, TB)    f32
# ---------------------------------------------------------------------------
def _lenet_kernel(x_ref, w1_ref, b1_ref, pm1_ref, w2_ref, b2_ref, pm2_ref,
                  w3_ref, b3_ref, w4_ref, b4_ref, w5_ref, b5_ref, o_ref):
    f32, bf16 = jnp.float32, jnp.bfloat16
    TB = x_ref.shape[1] // 32          # batch-tile size (lane-minor)

    # ---- conv1 (1->6, 5x5): banded GEMM, K = (kx, iy) = 160, N = 28*TB ----
    # 5 aligned lane slices (one per kx); ky lives in the band of w1.
    p1 = jnp.concatenate(
        [x_ref[:, kx * TB:(kx + 28) * TB] for kx in range(5)], axis=0)      # (160, 28*TB) bf16
    y1 = jnp.dot(w1_ref[...], p1, preferred_element_type=f32)               # (168, 28*TB) rows=(oc,oy)
    y1 = jnp.maximum(y1 + b1_ref[...], 0.0)

    # ---- pool1 (2x2 avg): oy pairs via one block-diag GEMM, ox pairs via
    #      TB-aligned lane-block adds.  c1 rows = (ic, py padded to 16). ----
    ypp = jnp.dot(pm1_ref[...], y1.astype(bf16), preferred_element_type=f32)  # (96, 28*TB)
    c1 = jnp.concatenate(
        [(ypp[:, (2 * px) * TB:(2 * px + 1) * TB]
          + ypp[:, (2 * px + 1) * TB:(2 * px + 2) * TB]).astype(bf16)
         for px in range(14)], axis=1)                                        # (96, 14*TB)

    # ---- conv2 (6->16, 5x5): ONE banded GEMM, K = (ic, kx, py16) = 480 ----
    p2 = jnp.concatenate(
        [c1[ic * 16:(ic + 1) * 16, kx * TB:(kx + 10) * TB]
         for ic in range(6) for kx in range(5)], axis=0)                      # (480, 10*TB)
    y2 = jnp.dot(w2_ref[...], p2, preferred_element_type=f32)                 # (160, 10*TB) rows=(oc,qy)
    y2 = jnp.maximum(y2 + b2_ref[...], 0.0)

    # ---- pool2 (2x2 avg) -> flattened features (rx, ic, ry) x batch ----
    yqp = jnp.dot(pm2_ref[...], y2.astype(bf16), preferred_element_type=f32)  # (80, 10*TB) rows=(ic,ry)
    a3 = jnp.concatenate(
        [(yqp[:, (2 * rx) * TB:(2 * rx + 1) * TB]
          + yqp[:, (2 * rx + 1) * TB:(2 * rx + 2) * TB]).astype(bf16)
         for rx in range(5)], axis=0)                                         # (400, TB)

    # ---- conv3 on 5x5 map == FC 400->120, then fc1, fc2, softmax ----
    h = jnp.dot(w3_ref[...], a3, preferred_element_type=f32) + b3_ref[...]    # (120, TB)
    h = jnp.maximum(h, 0.0)
    h = jnp.dot(w4_ref[...], h.astype(bf16), preferred_element_type=f32) + b4_ref[...]
    h = jnp.maximum(h, 0.0)                                                   # (84, TB)
    logits = jnp.dot(w5_ref[...], h.astype(bf16), preferred_element_type=f32) + b5_ref[...]
    logits = logits - jnp.max(logits, axis=0, keepdims=True)                  # (10, TB)
    e = jnp.exp(logits)
    o_ref[...] = e * pl.reciprocal(jnp.sum(e, axis=0, keepdims=True), approx=True)


# ---------------------------------------------------------------------------
# Host-side, done ONCE (outside jit): pack weights into kernel-friendly form.
# ---------------------------------------------------------------------------
def pack_params(p):
    f32, bf16 = jnp.float32, jnp.bfloat16

    # conv1 -> banded (168, 160): rows (oc, oy), cols (kx, iy); w[oc, iy-oy, kx].
    w1 = p["conv1_w"].reshape(6, 5, 5).astype(f32)                     # [oc, ky, kx]
    oy = jnp.arange(28)[:, None]
    iy = jnp.arange(32)[None, :]
    ky = iy - oy                                                       # (28, 32)
    band1 = jnp.where(((ky >= 0) & (ky <= 4))[None, :, :, None],
                      w1[:, jnp.clip(ky, 0, 4), :], 0.0)               # [oc, oy, iy, kx]
    w1b = band1.transpose(0, 1, 3, 2).reshape(168, 160)

    # pool1 block-diag (96, 168): rows (ic, py16), cols (oc, oy); 0.25 weights.
    r_ic, r_py = jnp.arange(96) // 16, jnp.arange(96) % 16
    c_oc, c_oy = jnp.arange(168) // 28, jnp.arange(168) % 28
    pm1 = jnp.where((r_ic[:, None] == c_oc[None, :]) & (r_py[:, None] < 14)
                    & (r_py[:, None] == c_oy[None, :] // 2), 0.25, 0.0)

    # conv2 -> banded (160, 480): rows (oc, qy), cols (ic, kx, py16).
    w2 = p["conv2_w"].astype(f32)                                      # [oc, ic, ky, kx]
    qy = jnp.arange(10)[:, None]
    py = jnp.arange(16)[None, :]
    ky2 = py - qy                                                      # (10, 16)
    band2 = jnp.where(((ky2 >= 0) & (ky2 <= 4))[None, None, :, :, None],
                      w2[:, :, jnp.clip(ky2, 0, 4), :], 0.0)           # [oc, ic, qy, py, kx]
    w2b = band2.transpose(0, 2, 1, 4, 3).reshape(160, 480)

    # pool2 block-diag (80, 160): rows (oc, ry), cols (oc, qy).
    r_oc, r_ry = jnp.arange(80) // 5, jnp.arange(80) % 5
    c_oc2, c_qy = jnp.arange(160) // 10, jnp.arange(160) % 10
    pm2 = jnp.where((r_oc[:, None] == c_oc2[None, :])
                    & (r_ry[:, None] == c_qy[None, :] // 2), 0.25, 0.0)

    # conv3 on a 5x5 map == FC; activation rows in the kernel are (rx, ic, ry).
    w3 = jnp.transpose(p["conv3_w"], (0, 3, 1, 2)).reshape(120, 400)

    return {
        "w1": w1b.astype(bf16),
        "b1": jnp.repeat(p["conv1_b"], 28).reshape(168, 1).astype(f32),
        "pm1": pm1.astype(bf16),
        "w2": w2b.astype(bf16),
        "b2": jnp.repeat(p["conv2_b"], 10).reshape(160, 1).astype(f32),
        "pm2": pm2.astype(bf16),
        "w3": w3.astype(bf16),
        "b3": p["conv3_b"].reshape(120, 1).astype(f32),
        "w4": p["fc1_w"].astype(bf16),                                 # (84, 120)
        "b4": p["fc1_b"].reshape(84, 1).astype(f32),
        "w5": p["fc2_w"].astype(bf16),                                 # (10, 84)
        "b5": p["fc2_b"].reshape(10, 1).astype(f32),
    }


def lenet_forward(x, pk, *, batch_tile=128):
    """x: (B, 1, 32, 32) float32 -> (B, 10) softmax probabilities."""
    B = x.shape[0]
    assert x.shape[1:] == (1, 32, 32), "LeNet expects 1x32x32 input"
    x2 = x.reshape(B, 32, 32)
    G = pl.cdiv(B, batch_tile)
    Bp = G * batch_tile
    if Bp != B:                                # pad batch to a whole tile
        x2 = jnp.pad(x2, ((0, Bp - B), (0, 0), (0, 0)))

    # Lane-dense input slab [iy, (tile, ix, b)]: every conv tap becomes an
    # aligned TB-multiple lane slice; layout plumbing only, no compute.
    xp = (x2.reshape(G, batch_tile, 32, 32)
            .transpose(2, 0, 3, 1)
            .reshape(32, G * 32 * batch_tile)
            .astype(jnp.bfloat16))

    out = pl.pallas_call(
        _lenet_kernel,
        out_shape=jax.ShapeDtypeStruct((10, Bp), jnp.float32),
        grid=(G,),
        in_specs=[
            pl.BlockSpec((32, 32 * batch_tile), lambda i: (0, i)),     # image tile
            pl.BlockSpec((168, 160), lambda i: (0, 0)),                # w1 (banded)
            pl.BlockSpec((168, 1), lambda i: (0, 0)),                  # b1
            pl.BlockSpec((96, 168), lambda i: (0, 0)),                 # pool1 matrix
            pl.BlockSpec((160, 480), lambda i: (0, 0)),                # w2 (banded)
            pl.BlockSpec((160, 1), lambda i: (0, 0)),                  # b2
            pl.BlockSpec((80, 160), lambda i: (0, 0)),                 # pool2 matrix
            pl.BlockSpec((120, 400), lambda i: (0, 0)),                # w3 (conv3 as FC)
            pl.BlockSpec((120, 1), lambda i: (0, 0)),                  # b3
            pl.BlockSpec((84, 120), lambda i: (0, 0)),                 # w4 (fc1)
            pl.BlockSpec((84, 1), lambda i: (0, 0)),                   # b4
            pl.BlockSpec((10, 84), lambda i: (0, 0)),                  # w5 (fc2)
            pl.BlockSpec((10, 1), lambda i: (0, 0)),                   # b5
        ],
        out_specs=pl.BlockSpec((10, batch_tile), lambda i: (0, i)),    # lane-dense output
        compiler_params=pltpu.CompilerParams(
            dimension_semantics=("parallel",),
            vmem_limit_bytes=32 * 1024 * 1024,   # safe on v5e/v6e/v7x; ~10 MB actually used
        ),
    )(xp, pk["w1"], pk["b1"], pk["pm1"], pk["w2"], pk["b2"], pk["pm2"],
      pk["w3"], pk["b3"], pk["w4"], pk["b4"], pk["w5"], pk["b5"])

    return out[:, :B].T                        # (B, 10)


# ---------------------------------------------------------------------------
# Deterministic parameter init (PyTorch-style uniform fan-in bounds)
# ---------------------------------------------------------------------------
def init_params(key):
    ks = jax.random.split(key, 10)

    def u(k, shape, fan_in):
        bound = 1.0 / (fan_in ** 0.5)
        return jax.random.uniform(k, shape, jnp.float32, -bound, bound)

    return {
        "conv1_w": u(ks[0], (6, 1, 5, 5), 1 * 5 * 5),
        "conv1_b": u(ks[1], (6,), 1 * 5 * 5),
        "conv2_w": u(ks[2], (16, 6, 5, 5), 6 * 5 * 5),
        "conv2_b": u(ks[3], (16,), 6 * 5 * 5),
        "conv3_w": u(ks[4], (120, 16, 5, 5), 16 * 5 * 5),
        "conv3_b": u(ks[5], (120,), 16 * 5 * 5),
        "fc1_w": u(ks[6], (84, 120), 120),     # PyTorch Linear: (out, in)
        "fc1_b": u(ks[7], (84,), 120),
        "fc2_w": u(ks[8], (10, 84), 84),
        "fc2_b": u(ks[9], (10,), 84),
    }


# Pure-JAX f32 reference for a sanity check against the fused bf16 kernel.
def reference_forward(x, p):
    def conv(a, w, b):
        y = lax.conv_general_dilated(a, w, (1, 1), "VALID",
                                     dimension_numbers=("NCHW", "OIHW", "NCHW"))
        return y + b.reshape(1, -1, 1, 1)

    def pool(a):
        B, C, H, W = a.shape
        return a.reshape(B, C, H // 2, 2, W // 2, 2).mean(axis=(3, 5))

    a = jax.nn.relu(conv(x, p["conv1_w"], p["conv1_b"]))
    a = pool(a)
    a = jax.nn.relu(conv(a, p["conv2_w"], p["conv2_b"]))
    a = pool(a)
    a = jax.nn.relu(conv(a, p["conv3_w"], p["conv3_b"]))
    a = a.reshape(a.shape[0], -1)
    a = jax.nn.relu(a @ p["fc1_w"].T + p["fc1_b"])
    logits = a @ p["fc2_w"].T + p["fc2_b"]
    return jax.nn.softmax(logits, axis=1)


if __name__ == "__main__":
    key = jax.random.PRNGKey(0)
    pkey, xkey = jax.random.split(key)
    params = init_params(pkey)
    packed = pack_params(params)               # one-time weight packing, outside jit

    # Two batch tiles of 128 -> grid=(2,), even, so both v7x TensorCores work.
    B = 256
    x = jax.random.normal(xkey, (B, 1, 32, 32), jnp.float32)

    out = jax.jit(lenet_forward)(x, packed)
    out = jax.block_until_ready(out)

    assert out.shape == (B, 10)
    assert bool(jnp.all(jnp.isfinite(out)))
    # approx reciprocal in the softmax -> rows sum to 1 up to ~1e-3
    assert bool(jnp.allclose(jnp.sum(out, axis=1), 1.0, atol=5e-3))

    # bf16 MXU operands -> allow a small tolerance vs the f32 reference.
    ref = reference_forward(x, params)
    err = float(jnp.max(jnp.abs(out - ref)))
    assert err < 3e-2, f"max abs error vs f32 reference: {err}"

    print("KERNEL_OK")
</pallas_src>

<mosaic_0001>
module attributes {stable_mosaic.version = 11 : i64} {
  func.func @_lenet_kernel(%arg0: i32, %arg1: memref<32x4096xbf16, #tpu.memory_space<vmem>>, %arg2: memref<168x160xbf16, #tpu.memory_space<vmem>>, %arg3: memref<168x1xf32, #tpu.memory_space<vmem>>, %arg4: memref<96x168xbf16, #tpu.memory_space<vmem>>, %arg5: memref<160x480xbf16, #tpu.memory_space<vmem>>, %arg6: memref<160x1xf32, #tpu.memory_space<vmem>>, %arg7: memref<80x160xbf16, #tpu.memory_space<vmem>>, %arg8: memref<120x400xbf16, #tpu.memory_space<vmem>>, %arg9: memref<120x1xf32, #tpu.memory_space<vmem>>, %arg10: memref<84x120xbf16, #tpu.memory_space<vmem>>, %arg11: memref<84x1xf32, #tpu.memory_space<vmem>>, %arg12: memref<10x84xbf16, #tpu.memory_space<vmem>>, %arg13: memref<10x1xf32, #tpu.memory_space<vmem>>, %arg14: memref<10x128xf32, #tpu.memory_space<vmem>>) attributes {dimension_semantics = [#tpu.dimension_semantics<parallel>], iteration_bounds = array<i64: 2>, scalar_prefetch = 0 : i64, scratch_operands = 0 : i64, tpu.core_type = #tpu.core_type<tc>, window_params = [{transform_indices = @transform_0, window_bounds = array<i64: 32, 4096>}, {pipeline_mode = #tpu.pipeline_mode<synchronous>, transform_indices = @transform_1, window_bounds = array<i64: 168, 160>}, {pipeline_mode = #tpu.pipeline_mode<synchronous>, transform_indices = @transform_2, window_bounds = array<i64: 168, 1>}, {pipeline_mode = #tpu.pipeline_mode<synchronous>, transform_indices = @transform_3, window_bounds = array<i64: 96, 168>}, {pipeline_mode = #tpu.pipeline_mode<synchronous>, transform_indices = @transform_4, window_bounds = array<i64: 160, 480>}, {pipeline_mode = #tpu.pipeline_mode<synchronous>, transform_indices = @transform_5, window_bounds = array<i64: 160, 1>}, {pipeline_mode = #tpu.pipeline_mode<synchronous>, transform_indices = @transform_6, window_bounds = array<i64: 80, 160>}, {pipeline_mode = #tpu.pipeline_mode<synchronous>, transform_indices = @transform_7, window_bounds = array<i64: 120, 400>}, {pipeline_mode = #tpu.pipeline_mode<synchronous>, transform_indices = @transform_8, window_bounds = array<i64: 120, 1>}, {pipeline_mode = #tpu.pipeline_mode<synchronous>, transform_indices = @transform_9, window_bounds = array<i64: 84, 120>}, {pipeline_mode = #tpu.pipeline_mode<synchronous>, transform_indices = @transform_10, window_bounds = array<i64: 84, 1>}, {pipeline_mode = #tpu.pipeline_mode<synchronous>, transform_indices = @transform_11, window_bounds = array<i64: 10, 84>}, {pipeline_mode = #tpu.pipeline_mode<synchronous>, transform_indices = @transform_12, window_bounds = array<i64: 10, 1>}, {transform_indices = @transform_13, window_bounds = array<i64: 10, 128>}]} {
    %c0 = arith.constant 0 : index
    %c0_0 = arith.constant 0 : index
    %0 = vector.load %arg1[%c0, %c0_0] : memref<32x4096xbf16, #tpu.memory_space<vmem>>, vector<32x3584xbf16>
    %c0_1 = arith.constant 0 : index
    %c128 = arith.constant 128 : index
    %1 = vector.load %arg1[%c0_1, %c128] : memref<32x4096xbf16, #tpu.memory_space<vmem>>, vector<32x3584xbf16>
    %c0_2 = arith.constant 0 : index
    %c256 = arith.constant 256 : index
    %2 = vector.load %arg1[%c0_2, %c256] : memref<32x4096xbf16, #tpu.memory_space<vmem>>, vector<32x3584xbf16>
    %c0_3 = arith.constant 0 : index
    %c384 = arith.constant 384 : index
    %3 = vector.load %arg1[%c0_3, %c384] : memref<32x4096xbf16, #tpu.memory_space<vmem>>, vector<32x3584xbf16>
    %c0_4 = arith.constant 0 : index
    %c512 = arith.constant 512 : index
    %4 = vector.load %arg1[%c0_4, %c512] : memref<32x4096xbf16, #tpu.memory_space<vmem>>, vector<32x3584xbf16>
    %5 = tpu.concatenate %0, %1, %2, %3, %4 in 0 : vector<32x3584xbf16>, vector<32x3584xbf16>, vector<32x3584xbf16>, vector<32x3584xbf16>, vector<32x3584xbf16> -> vector<160x3584xbf16>
    %c0_5 = arith.constant 0 : index
    %c0_6 = arith.constant 0 : index
    %6 = vector.load %arg2[%c0_5, %c0_6] : memref<168x160xbf16, #tpu.memory_space<vmem>>, vector<168x160xbf16>
    %cst = arith.constant dense<0.000000e+00> : vector<168x3584xf32>
    %7 = tpu.matmul %6, %5, %cst {dimension_numbers = #tpu.dot_dimension_numbers<[1], [0], [0], [1], [0, 0, 1, 1], [], []>} : vector<168x160xbf16>, vector<160x3584xbf16>, vector<168x3584xf32> -> vector<168x3584xf32>
    %c0_7 = arith.constant 0 : index
    %c0_8 = arith.constant 0 : index
    %8 = vector.load %arg3[%c0_7, %c0_8] : memref<168x1xf32, #tpu.memory_space<vmem>>, vector<168x1xf32>
    %9 = vector.broadcast %8 : vector<168x1xf32> to vector<168x3584xf32>
    %10 = arith.addf %7, %9 : vector<168x3584xf32>
    %cst_9 = arith.constant 0.000000e+00 : f32
    %11 = vector.broadcast %cst_9 : f32 to vector<168x3584xf32>
    %12 = arith.maximumf %10, %11 : vector<168x3584xf32>
    %c0_10 = arith.constant 0 : index
    %c0_11 = arith.constant 0 : index
    %13 = vector.load %arg4[%c0_10, %c0_11] : memref<96x168xbf16, #tpu.memory_space<vmem>>, vector<96x168xbf16>
    %14 = arith.truncf %12 : vector<168x3584xf32> to vector<168x3584xbf16>
    %cst_12 = arith.constant dense<0.000000e+00> : vector<96x3584xf32>
    %15 = tpu.matmul %13, %14, %cst_12 {dimension_numbers = #tpu.dot_dimension_numbers<[1], [0], [0], [1], [0, 0, 1, 1], [], []>} : vector<96x168xbf16>, vector<168x3584xbf16>, vector<96x3584xf32> -> vector<96x3584xf32>
    %16 = vector.extract_strided_slice %15 {offsets = [0, 0], sizes = [96, 128], strides = [1, 1]} : vector<96x3584xf32> to vector<96x128xf32>
    %17 = vector.extract_strided_slice %15 {offsets = [0, 128], sizes = [96, 128], strides = [1, 1]} : vector<96x3584xf32> to vector<96x128xf32>
    %18 = arith.addf %16, %17 : vector<96x128xf32>
    %19 = arith.truncf %18 : vector<96x128xf32> to vector<96x128xbf16>
    %20 = vector.extract_strided_slice %15 {offsets = [0, 256], sizes = [96, 128], strides = [1, 1]} : vector<96x3584xf32> to vector<96x128xf32>
    %21 = vector.extract_strided_slice %15 {offsets = [0, 384], sizes = [96, 128], strides = [1, 1]} : vector<96x3584xf32> to vector<96x128xf32>
    %22 = arith.addf %20, %21 : vector<96x128xf32>
    %23 = arith.truncf %22 : vector<96x128xf32> to vector<96x128xbf16>
    %24 = vector.extract_strided_slice %15 {offsets = [0, 512], sizes = [96, 128], strides = [1, 1]} : vector<96x3584xf32> to vector<96x128xf32>
    %25 = vector.extract_strided_slice %15 {offsets = [0, 640], sizes = [96, 128], strides = [1, 1]} : vector<96x3584xf32> to vector<96x128xf32>
    %26 = arith.addf %24, %25 : vector<96x128xf32>
    %27 = arith.truncf %26 : vector<96x128xf32> to vector<96x128xbf16>
    %28 = vector.extract_strided_slice %15 {offsets = [0, 768], sizes = [96, 128], strides = [1, 1]} : vector<96x3584xf32> to vector<96x128xf32>
    %29 = vector.extract_strided_slice %15 {offsets = [0, 896], sizes = [96, 128], strides = [1, 1]} : vector<96x3584xf32> to vector<96x128xf32>
    %30 = arith.addf %28, %29 : vector<96x128xf32>
    %31 = arith.truncf %30 : vector<96x128xf32> to vector<96x128xbf16>
    %32 = vector.extract_strided_slice %15 {offsets = [0, 1024], sizes = [96, 128], strides = [1, 1]} : vector<96x3584xf32> to vector<96x128xf32>
    %33 = vector.extract_strided_slice %15 {offsets = [0, 1152], sizes = [96, 128], strides = [1, 1]} : vector<96x3584xf32> to vector<96x128xf32>
    %34 = arith.addf %32, %33 : vector<96x128xf32>
    %35 = arith.truncf %34 : vector<96x128xf32> to vector<96x128xbf16>
    %36 = vector.extract_strided_slice %15 {offsets = [0, 1280], sizes = [96, 128], strides = [1, 1]} : vector<96x3584xf32> to vector<96x128xf32>
    %37 = vector.extract_strided_slice %15 {offsets = [0, 1408], sizes = [96, 128], strides = [1, 1]} : vector<96x3584xf32> to vector<96x128xf32>
    %38 = arith.addf %36, %37 : vector<96x128xf32>
    %39 = arith.truncf %38 : vector<96x128xf32> to vector<96x128xbf16>
    %40 = vector.extract_strided_slice %15 {offsets = [0, 1536], sizes = [96, 128], strides = [1, 1]} : vector<96x3584xf32> to vector<96x128xf32>
    %41 = vector.extract_strided_slice %15 {offsets = [0, 1664], sizes = [96, 128], strides = [1, 1]} : vector<96x3584xf32> to vector<96x128xf32>
    %42 = arith.addf %40, %41 : vector<96x128xf32>
    %43 = arith.truncf %42 : vector<96x128xf32> to vector<96x128xbf16>
    %44 = vector.extract_strided_slice %15 {offsets = [0, 1792], sizes = [96, 128], strides = [1, 1]} : vector<96x3584xf32> to vector<96x128xf32>
    %45 = vector.extract_strided_slice %15 {offsets = [0, 1920], sizes = [96, 128], strides = [1, 1]} : vector<96x3584xf32> to vector<96x128xf32>
    %46 = arith.addf %44, %45 : vector<96x128xf32>
    %47 = arith.truncf %46 : vector<96x128xf32> to vector<96x128xbf16>
    %48 = vector.extract_strided_slice %15 {offsets = [0, 2048], sizes = [96, 128], strides = [1, 1]} : vector<96x3584xf32> to vector<96x128xf32>
    %49 = vector.extract_strided_slice %15 {offsets = [0, 2176], sizes = [96, 128], strides = [1, 1]} : vector<96x3584xf32> to vector<96x128xf32>
    %50 = arith.addf %48, %49 : vector<96x128xf32>
    %51 = arith.truncf %50 : vector<96x128xf32> to vector<96x128xbf16>
    %52 = vector.extract_strided_slice %15 {offsets = [0, 2304], sizes = [96, 128], strides = [1, 1]} : vector<96x3584xf32> to vector<96x128xf32>
    %53 = vector.extract_strided_slice %15 {offsets = [0, 2432], sizes = [96, 128], strides = [1, 1]} : vector<96x3584xf32> to vector<96x128xf32>
    %54 = arith.addf %52, %53 : vector<96x128xf32>
    %55 = arith.truncf %54 : vector<96x128xf32> to vector<96x128xbf16>
    %56 = vector.extract_strided_slice %15 {offsets = [0, 2560], sizes = [96, 128], strides = [1, 1]} : vector<96x3584xf32> to vector<96x128xf32>
    %57 = vector.extract_strided_slice %15 {offsets = [0, 2688], sizes = [96, 128], strides = [1, 1]} : vector<96x3584xf32> to vector<96x128xf32>
    %58 = arith.addf %56, %57 : vector<96x128xf32>
    %59 = arith.truncf %58 : vector<96x128xf32> to vector<96x128xbf16>
    %60 = vector.extract_strided_slice %15 {offsets = [0, 2816], sizes = [96, 128], strides = [1, 1]} : vector<96x3584xf32> to vector<96x128xf32>
    %61 = vector.extract_strided_slice %15 {offsets = [0, 2944], sizes = [96, 128], strides = [1, 1]} : vector<96x3584xf32> to vector<96x128xf32>
    %62 = arith.addf %60, %61 : vector<96x128xf32>
    %63 = arith.truncf %62 : vector<96x128xf32> to vector<96x128xbf16>
    %64 = vector.extract_strided_slice %15 {offsets = [0, 3072], sizes = [96, 128], strides = [1, 1]} : vector<96x3584xf32> to vector<96x128xf32>
    %65 = vector.extract_strided_slice %15 {offsets = [0, 3200], sizes = [96, 128], strides = [1, 1]} : vector<96x3584xf32> to vector<96x128xf32>
    %66 = arith.addf %64, %65 : vector<96x128xf32>
    %67 = arith.truncf %66 : vector<96x128xf32> to vector<96x128xbf16>
    %68 = vector.extract_strided_slice %15 {offsets = [0, 3328], sizes = [96, 128], strides = [1, 1]} : vector<96x3584xf32> to vector<96x128xf32>
    %69 = vector.extract_strided_slice %15 {offsets = [0, 3456], sizes = [96, 128], strides = [1, 1]} : vector<96x3584xf32> to vector<96x128xf32>
    %70 = arith.addf %68, %69 : vector<96x128xf32>
    %71 = arith.truncf %70 : vector<96x128xf32> to vector<96x128xbf16>
    %72 = tpu.concatenate %19, %23, %27, %31, %35, %39, %43, %47, %51, %55, %59, %63, %67, %71 in 1 : vector<96x128xbf16>, vector<96x128xbf16>, vector<96x128xbf16>, vector<96x128xbf16>, vector<96x128xbf16>, vector<96x128xbf16>, vector<96x128xbf16>, vector<96x128xbf16>, vector<96x128xbf16>, vector<96x128xbf16>, vector<96x128xbf16>, vector<96x128xbf16>, vector<96x128xbf16>, vector<96x128xbf16> -> vector<96x1792xbf16>
    %73 = vector.extract_strided_slice %72 {offsets = [0, 0], sizes = [16, 1280], strides = [1, 1]} : vector<96x1792xbf16> to vector<16x1280xbf16>
    %74 = vector.extract_strided_slice %72 {offsets = [0, 128], sizes = [16, 1280], strides = [1, 1]} : vector<96x1792xbf16> to vector<16x1280xbf16>
    %75 = vector.extract_strided_slice %72 {offsets = [0, 256], sizes = [16, 1280], strides = [1, 1]} : vector<96x1792xbf16> to vector<16x1280xbf16>
    %76 = vector.extract_strided_slice %72 {offsets = [0, 384], sizes = [16, 1280], strides = [1, 1]} : vector<96x1792xbf16> to vector<16x1280xbf16>
    %77 = vector.extract_strided_slice %72 {offsets = [0, 512], sizes = [16, 1280], strides = [1, 1]} : vector<96x1792xbf16> to vector<16x1280xbf16>
    %78 = vector.extract_strided_slice %72 {offsets = [16, 0], sizes = [16, 1280], strides = [1, 1]} : vector<96x1792xbf16> to vector<16x1280xbf16>
    %79 = vector.extract_strided_slice %72 {offsets = [16, 128], sizes = [16, 1280], strides = [1, 1]} : vector<96x1792xbf16> to vector<16x1280xbf16>
    %80 = vector.extract_strided_slice %72 {offsets = [16, 256], sizes = [16, 1280], strides = [1, 1]} : vector<96x1792xbf16> to vector<16x1280xbf16>
    %81 = vector.extract_strided_slice %72 {offsets = [16, 384], sizes = [16, 1280], strides = [1, 1]} : vector<96x1792xbf16> to vector<16x1280xbf16>
    %82 = vector.extract_strided_slice %72 {offsets = [16, 512], sizes = [16, 1280], strides = [1, 1]} : vector<96x1792xbf16> to vector<16x1280xbf16>
    %83 = vector.extract_strided_slice %72 {offsets = [32, 0], sizes = [16, 1280], strides = [1, 1]} : vector<96x1792xbf16> to vector<16x1280xbf16>
    %84 = vector.extract_strided_slice %72 {offsets = [32, 128], sizes = [16, 1280], strides = [1, 1]} : vector<96x1792xbf16> to vector<16x1280xbf16>
    %85 = vector.extract_strided_slice %72 {offsets = [32, 256], sizes = [16, 1280], strides = [1, 1]} : vector<96x1792xbf16> to vector<16x1280xbf16>
    %86 = vector.extract_strided_slice %72 {offsets = [32, 384], sizes = [16, 1280], strides = [1, 1]} : vector<96x1792xbf16> to vector<16x1280xbf16>
    %87 = vector.extract_strided_slice %72 {offsets = [32, 512], sizes = [16, 1280], strides = [1, 1]} : vector<96x1792xbf16> to vector<16x1280xbf16>
    %88 = vector.extract_strided_slice %72 {offsets = [48, 0], sizes = [16, 1280], strides = [1, 1]} : vector<96x1792xbf16> to vector<16x1280xbf16>
    %89 = vector.extract_strided_slice %72 {offsets = [48, 128], sizes = [16, 1280], strides = [1, 1]} : vector<96x1792xbf16> to vector<16x1280xbf16>
    %90 = vector.extract_strided_slice %72 {offsets = [48, 256], sizes = [16, 1280], strides = [1, 1]} : vector<96x1792xbf16> to vector<16x1280xbf16>
    %91 = vector.extract_strided_slice %72 {offsets = [48, 384], sizes = [16, 1280], strides = [1, 1]} : vector<96x1792xbf16> to vector<16x1280xbf16>
    %92 = vector.extract_strided_slice %72 {offsets = [48, 512], sizes = [16, 1280], strides = [1, 1]} : vector<96x1792xbf16> to vector<16x1280xbf16>
    %93 = vector.extract_strided_slice %72 {offsets = [64, 0], sizes = [16, 1280], strides = [1, 1]} : vector<96x1792xbf16> to vector<16x1280xbf16>
    %94 = vector.extract_strided_slice %72 {offsets = [64, 128], sizes = [16, 1280], strides = [1, 1]} : vector<96x1792xbf16> to vector<16x1280xbf16>
    %95 = vector.extract_strided_slice %72 {offsets = [64, 256], sizes = [16, 1280], strides = [1, 1]} : vector<96x1792xbf16> to vector<16x1280xbf16>
    %96 = vector.extract_strided_slice %72 {offsets = [64, 384], sizes = [16, 1280], strides = [1, 1]} : vector<96x1792xbf16> to vector<16x1280xbf16>
    %97 = vector.extract_strided_slice %72 {offsets = [64, 512], sizes = [16, 1280], strides = [1, 1]} : vector<96x1792xbf16> to vector<16x1280xbf16>
    %98 = vector.extract_strided_slice %72 {offsets = [80, 0], sizes = [16, 1280], strides = [1, 1]} : vector<96x1792xbf16> to vector<16x1280xbf16>
    %99 = vector.extract_strided_slice %72 {offsets = [80, 128], sizes = [16, 1280], strides = [1, 1]} : vector<96x1792xbf16> to vector<16x1280xbf16>
    %100 = vector.extract_strided_slice %72 {offsets = [80, 256], sizes = [16, 1280], strides = [1, 1]} : vector<96x1792xbf16> to vector<16x1280xbf16>
    %101 = vector.extract_strided_slice %72 {offsets = [80, 384], sizes = [16, 1280], strides = [1, 1]} : vector<96x1792xbf16> to vector<16x1280xbf16>
    %102 = vector.extract_strided_slice %72 {offsets = [80, 512], sizes = [16, 1280], strides = [1, 1]} : vector<96x1792xbf16> to vector<16x1280xbf16>
    %103 = tpu.concatenate %73, %74, %75, %76, %77, %78, %79, %80, %81, %82, %83, %84, %85, %86, %87, %88 in 0 : vector<16x1280xbf16>, vector<16x1280xbf16>, vector<16x1280xbf16>, vector<16x1280xbf16>, vector<16x1280xbf16>, vector<16x1280xbf16>, vector<16x1280xbf16>, vector<16x1280xbf16>, vector<16x1280xbf16>, vector<16x1280xbf16>, vector<16x1280xbf16>, vector<16x1280xbf16>, vector<16x1280xbf16>, vector<16x1280xbf16>, vector<16x1280xbf16>, vector<16x1280xbf16> -> vector<256x1280xbf16>
    %104 = tpu.concatenate %89, %90, %91, %92, %93, %94, %95, %96, %97, %98, %99, %100, %101, %102 in 0 : vector<16x1280xbf16>, vector<16x1280xbf16>, vector<16x1280xbf16>, vector<16x1280xbf16>, vector<16x1280xbf16>, vector<16x1280xbf16>, vector<16x1280xbf16>, vector<16x1280xbf16>, vector<16x1280xbf16>, vector<16x1280xbf16>, vector<16x1280xbf16>, vector<16x1280xbf16>, vector<16x1280xbf16>, vector<16x1280xbf16> -> vector<224x1280xbf16>
    %105 = tpu.concatenate %103, %104 in 0 : vector<256x1280xbf16>, vector<224x1280xbf16> -> vector<480x1280xbf16>
    %c0_13 = arith.constant 0 : index
    %c0_14 = arith.constant 0 : index
    %106 = vector.load %arg5[%c0_13, %c0_14] : memref<160x480xbf16, #tpu.memory_space<vmem>>, vector<160x480xbf16>
    %cst_15 = arith.constant dense<0.000000e+00> : vector<160x1280xf32>
    %107 = tpu.matmul %106, %105, %cst_15 {dimension_numbers = #tpu.dot_dimension_numbers<[1], [0], [0], [1], [0, 0, 1, 1], [], []>} : vector<160x480xbf16>, vector<480x1280xbf16>, vector<160x1280xf32> -> vector<160x1280xf32>
    %c0_16 = arith.constant 0 : index
    %c0_17 = arith.constant 0 : index
    %108 = vector.load %arg6[%c0_16, %c0_17] : memref<160x1xf32, #tpu.memory_space<vmem>>, vector<160x1xf32>
    %109 = vector.broadcast %108 : vector<160x1xf32> to vector<160x1280xf32>
    %110 = arith.addf %107, %109 : vector<160x1280xf32>
    %cst_18 = arith.constant 0.000000e+00 : f32
    %111 = vector.broadcast %cst_18 : f32 to vector<160x1280xf32>
    %112 = arith.maximumf %110, %111 : vector<160x1280xf32>
    %c0_19 = arith.constant 0 : index
    %c0_20 = arith.constant 0 : index
    %113 = vector.load %arg7[%c0_19, %c0_20] : memref<80x160xbf16, #tpu.memory_space<vmem>>, vector<80x160xbf16>
    %114 = arith.truncf %112 : vector<160x1280xf32> to vector<160x1280xbf16>
    %cst_21 = arith.constant dense<0.000000e+00> : vector<80x1280xf32>
    %115 = tpu.matmul %113, %114, %cst_21 {dimension_numbers = #tpu.dot_dimension_numbers<[1], [0], [0], [1], [0, 0, 1, 1], [], []>} : vector<80x160xbf16>, vector<160x1280xbf16>, vector<80x1280xf32> -> vector<80x1280xf32>
    %116 = vector.extract_strided_slice %115 {offsets = [0, 0], sizes = [80, 128], strides = [1, 1]} : vector<80x1280xf32> to vector<80x128xf32>
    %117 = vector.extract_strided_slice %115 {offsets = [0, 128], sizes = [80, 128], strides = [1, 1]} : vector<80x1280xf32> to vector<80x128xf32>
    %118 = arith.addf %116, %117 : vector<80x128xf32>
    %119 = arith.truncf %118 : vector<80x128xf32> to vector<80x128xbf16>
    %120 = vector.extract_strided_slice %115 {offsets = [0, 256], sizes = [80, 128], strides = [1, 1]} : vector<80x1280xf32> to vector<80x128xf32>
    %121 = vector.extract_strided_slice %115 {offsets = [0, 384], sizes = [80, 128], strides = [1, 1]} : vector<80x1280xf32> to vector<80x128xf32>
    %122 = arith.addf %120, %121 : vector<80x128xf32>
    %123 = arith.truncf %122 : vector<80x128xf32> to vector<80x128xbf16>
    %124 = vector.extract_strided_slice %115 {offsets = [0, 512], sizes = [80, 128], strides = [1, 1]} : vector<80x1280xf32> to vector<80x128xf32>
    %125 = vector.extract_strided_slice %115 {offsets = [0, 640], sizes = [80, 128], strides = [1, 1]} : vector<80x1280xf32> to vector<80x128xf32>
    %126 = arith.addf %124, %125 : vector<80x128xf32>
    %127 = arith.truncf %126 : vector<80x128xf32> to vector<80x128xbf16>
    %128 = vector.extract_strided_slice %115 {offsets = [0, 768], sizes = [80, 128], strides = [1, 1]} : vector<80x1280xf32> to vector<80x128xf32>
    %129 = vector.extract_strided_slice %115 {offsets = [0, 896], sizes = [80, 128], strides = [1, 1]} : vector<80x1280xf32> to vector<80x128xf32>
    %130 = arith.addf %128, %129 : vector<80x128xf32>
    %131 = arith.truncf %130 : vector<80x128xf32> to vector<80x128xbf16>
    %132 = vector.extract_strided_slice %115 {offsets = [0, 1024], sizes = [80, 128], strides = [1, 1]} : vector<80x1280xf32> to vector<80x128xf32>
    %133 = vector.extract_strided_slice %115 {offsets = [0, 1152], sizes = [80, 128], strides = [1, 1]} : vector<80x1280xf32> to vector<80x128xf32>
    %134 = arith.addf %132, %133 : vector<80x128xf32>
    %135 = arith.truncf %134 : vector<80x128xf32> to vector<80x128xbf16>
    %136 = tpu.concatenate %119, %123, %127, %131, %135 in 0 : vector<80x128xbf16>, vector<80x128xbf16>, vector<80x128xbf16>, vector<80x128xbf16>, vector<80x128xbf16> -> vector<400x128xbf16>
    %c0_22 = arith.constant 0 : index
    %c0_23 = arith.constant 0 : index
    %137 = vector.load %arg8[%c0_22, %c0_23] : memref<120x400xbf16, #tpu.memory_space<vmem>>, vector<120x400xbf16>
    %cst_24 = arith.constant dense<0.000000e+00> : vector<120x128xf32>
    %138 = tpu.matmul %137, %136, %cst_24 {dimension_numbers = #tpu.dot_dimension_numbers<[1], [0], [0], [1], [0, 0, 1, 1], [], []>} : vector<120x400xbf16>, vector<400x128xbf16>, vector<120x128xf32> -> vector<120x128xf32>
    %c0_25 = arith.constant 0 : index
    %c0_26 = arith.constant 0 : index
    %139 = vector.load %arg9[%c0_25, %c0_26] : memref<120x1xf32, #tpu.memory_space<vmem>>, vector<120x1xf32>
    %140 = vector.broadcast %139 : vector<120x1xf32> to vector<120x128xf32>
    %141 = arith.addf %138, %140 : vector<120x128xf32>
    %cst_27 = arith.constant 0.000000e+00 : f32
    %142 = vector.broadcast %cst_27 : f32 to vector<120x128xf32>
    %143 = arith.maximumf %141, %142 : vector<120x128xf32>
    %c0_28 = arith.constant 0 : index
    %c0_29 = arith.constant 0 : index
    %144 = vector.load %arg10[%c0_28, %c0_29] : memref<84x120xbf16, #tpu.memory_space<vmem>>, vector<84x120xbf16>
    %145 = arith.truncf %143 : vector<120x128xf32> to vector<120x128xbf16>
    %cst_30 = arith.constant dense<0.000000e+00> : vector<84x128xf32>
    %146 = tpu.matmul %144, %145, %cst_30 {dimension_numbers = #tpu.dot_dimension_numbers<[1], [0], [0], [1], [0, 0, 1, 1], [], []>} : vector<84x120xbf16>, vector<120x128xbf16>, vector<84x128xf32> -> vector<84x128xf32>
    %c0_31 = arith.constant 0 : index
    %c0_32 = arith.constant 0 : index
    %147 = vector.load %arg11[%c0_31, %c0_32] : memref<84x1xf32, #tpu.memory_space<vmem>>, vector<84x1xf32>
    %148 = vector.broadcast %147 : vector<84x1xf32> to vector<84x128xf32>
    %149 = arith.addf %146, %148 : vector<84x128xf32>
    %cst_33 = arith.constant 0.000000e+00 : f32
    %150 = vector.broadcast %cst_33 : f32 to vector<84x128xf32>
    %151 = arith.maximumf %149, %150 : vector<84x128xf32>
    %c0_34 = arith.constant 0 : index
    %c0_35 = arith.constant 0 : index
    %152 = vector.load %arg12[%c0_34, %c0_35] : memref<10x84xbf16, #tpu.memory_space<vmem>>, vector<10x84xbf16>
    %153 = arith.truncf %151 : vector<84x128xf32> to vector<84x128xbf16>
    %cst_36 = arith.constant dense<0.000000e+00> : vector<10x128xf32>
    %154 = tpu.matmul %152, %153, %cst_36 {dimension_numbers = #tpu.dot_dimension_numbers<[1], [0], [0], [1], [0, 0, 1, 1], [], []>} : vector<10x84xbf16>, vector<84x128xbf16>, vector<10x128xf32> -> vector<10x128xf32>
    %c0_37 = arith.constant 0 : index
    %c0_38 = arith.constant 0 : index
    %155 = vector.load %arg13[%c0_37, %c0_38] : memref<10x1xf32, #tpu.memory_space<vmem>>, vector<10x1xf32>
    %156 = vector.broadcast %155 : vector<10x1xf32> to vector<10x128xf32>
    %157 = arith.addf %154, %156 : vector<10x128xf32>
    %cst_39 = arith.constant dense<0xFF800000> : vector<128xf32>
    %158 = vector.multi_reduction <maximumf>, %157, %cst_39 [0] : vector<10x128xf32> to vector<128xf32>
    %159 = vector.shape_cast %158 : vector<128xf32> to vector<1x128xf32>
    %160 = vector.broadcast %159 : vector<1x128xf32> to vector<10x128xf32>
    %161 = arith.subf %157, %160 : vector<10x128xf32>
    %162 = math.exp %161 : vector<10x128xf32>
    %cst_40 = arith.constant dense<0.000000e+00> : vector<128xf32>
    %163 = vector.multi_reduction <add>, %162, %cst_40 [0] : vector<10x128xf32> to vector<128xf32>
    %164 = vector.shape_cast %163 : vector<128xf32> to vector<1x128xf32>
    %165 = tpu.reciprocal %164 {approx = true} : vector<1x128xf32> -> vector<1x128xf32>
    %166 = vector.broadcast %165 : vector<1x128xf32> to vector<10x128xf32>
    %167 = arith.mulf %162, %166 : vector<10x128xf32>
    %c0_41 = arith.constant 0 : index
    %c0_42 = arith.constant 0 : index
    %168 = vector.load %arg14[%c0_41, %c0_42] : memref<10x128xf32, #tpu.memory_space<vmem>>, vector<10x128xf32>
    tpu.vector_store %arg14[%c0_41, %c0_42], %167 {strides = array<i32>} : memref<10x128xf32, #tpu.memory_space<vmem>>, vector<10x128xf32>,
    return
  }
  func.func @transform_0(%arg0: i32) -> (i32, i32) {
    %c0_i32 = arith.constant 0 : i32
    %c0_i32_0 = arith.constant 0 : i32
    return %c0_i32, %arg0 : i32, i32
  }
  func.func @transform_1(%arg0: i32) -> (i32, i32) {
    %c0_i32 = arith.constant 0 : i32
    %c0_i32_0 = arith.constant 0 : i32
    %c0_i32_1 = arith.constant 0 : i32
    return %c0_i32, %c0_i32_0 : i32, i32
  }
  func.func @transform_2(%arg0: i32) -> (i32, i32) {
    %c0_i32 = arith.constant 0 : i32
    %c0_i32_0 = arith.constant 0 : i32
    %c0_i32_1 = arith.constant 0 : i32
    return %c0_i32, %c0_i32_0 : i32, i32
  }
  func.func @transform_3(%arg0: i32) -> (i32, i32) {
    %c0_i32 = arith.constant 0 : i32
    %c0_i32_0 = arith.constant 0 : i32
    %c0_i32_1 = arith.constant 0 : i32
    return %c0_i32, %c0_i32_0 : i32, i32
  }
  func.func @transform_4(%arg0: i32) -> (i32, i32) {
    %c0_i32 = arith.constant 0 : i32
    %c0_i32_0 = arith.constant 0 : i32
    %c0_i32_1 = arith.constant 0 : i32
    return %c0_i32, %c0_i32_0 : i32, i32
  }
  func.func @transform_5(%arg0: i32) -> (i32, i32) {
    %c0_i32 = arith.constant 0 : i32
    %c0_i32_0 = arith.constant 0 : i32
    %c0_i32_1 = arith.constant 0 : i32
    return %c0_i32, %c0_i32_0 : i32, i32
  }
  func.func @transform_6(%arg0: i32) -> (i32, i32) {
    %c0_i32 = arith.constant 0 : i32
    %c0_i32_0 = arith.constant 0 : i32
    %c0_i32_1 = arith.constant 0 : i32
    return %c0_i32, %c0_i32_0 : i32, i32
  }
  func.func @transform_7(%arg0: i32) -> (i32, i32) {
    %c0_i32 = arith.constant 0 : i32
    %c0_i32_0 = arith.constant 0 : i32
    %c0_i32_1 = arith.constant 0 : i32
    return %c0_i32, %c0_i32_0 : i32, i32
  }
  func.func @transform_8(%arg0: i32) -> (i32, i32) {
    %c0_i32 = arith.constant 0 : i32
    %c0_i32_0 = arith.constant 0 : i32
    %c0_i32_1 = arith.constant 0 : i32
    return %c0_i32, %c0_i32_0 : i32, i32
  }
  func.func @transform_9(%arg0: i32) -> (i32, i32) {
    %c0_i32 = arith.constant 0 : i32
    %c0_i32_0 = arith.constant 0 : i32
    %c0_i32_1 = arith.constant 0 : i32
    return %c0_i32, %c0_i32_0 : i32, i32
  }
  func.func @transform_10(%arg0: i32) -> (i32, i32) {
    %c0_i32 = arith.constant 0 : i32
    %c0_i32_0 = arith.constant 0 : i32
    %c0_i32_1 = arith.constant 0 : i32
    return %c0_i32, %c0_i32_0 : i32, i32
  }
  func.func @transform_11(%arg0: i32) -> (i32, i32) {
    %c0_i32 = arith.constant 0 : i32
    %c0_i32_0 = arith.constant 0 : i32
    %c0_i32_1 = arith.constant 0 : i32
    return %c0_i32, %c0_i32_0 : i32, i32
  }
  func.func @transform_12(%arg0: i32) -> (i32, i32) {
    %c0_i32 = arith.constant 0 : i32
    %c0_i32_0 = arith.constant 0 : i32
    %c0_i32_1 = arith.constant 0 : i32
    return %c0_i32, %c0_i32_0 : i32, i32
  }
  func.func @transform_13(%arg0: i32) -> (i32, i32) {
    %c0_i32 = arith.constant 0 : i32
    %c0_i32_0 = arith.constant 0 : i32
    return %c0_i32, %arg0 : i32, i32
  }
}

</mosaic_0001>

<bundles_post_ra>
// kernel: lenet_forward.1
= control target key start
LH: loop header
LB: loop body
LE: loop exit
PB: predicated region body
PF: predicated region fallthrough
CT: control target
= control target key end

     0   :  { %s17172_s0 = inlined_call_operand.vmem [shape: bf16[32,8192], index: 0, kind: input, shape index: {}]   ;;  %s17173_s1 = inlined_call_operand.vmem [shape: bf16[168,160], index: 1, kind: input, shape index: {}]   ;;  %s17174_s2 = inlined_call_operand.vmem [shape: f32[168,1], index: 2, kind: input, shape index: {}]   ;;  %s17175_s3 = inlined_call_operand.vmem [shape: bf16[96,168], index: 3, kind: input, shape index: {}]   ;;  %s17176_s4 = inlined_call_operand.vmem [shape: bf16[160,480], index: 4, kind: input, shape index: {}]   ;;  %s17177_s5 = inlined_call_operand.vmem [shape: f32[160,1], index: 5, kind: input, shape index: {}]   ;;  %s17178_s6 = inlined_call_operand.vmem [shape: bf16[80,160], index: 6, kind: input, shape index: {}]   ;;  %s17179_s7 = inlined_call_operand.vmem [shape: bf16[120,400], index: 7, kind: input, shape index: {}]   ;;  %s17180_s8 = inlined_call_operand.vmem [shape: f32[120,1], index: 8, kind: input, shape index: {}]   ;;  %s17181_s9 = inlined_call_operand.vmem [shape: bf16[84,120], index: 9, kind: input, shape index: {}]   ;;  %s17182_s10 = inlined_call_operand.vmem [shape: f32[84,1], index: 10, kind: input, shape index: {}]   ;;  %s17183_s11 = inlined_call_operand.vmem [shape: bf16[10,84], index: 11, kind: input, shape index: {}]   ;;  %s17184_s12 = inlined_call_operand.vmem [shape: f32[10,1], index: 12, kind: input, shape index: {}]   ;;  %s17185_s13 = inlined_call_operand.hbm [shape: f32[10,256], index: 13, kind: output, shape index: {}]  }
   0x1   :  { %17253 = sst [smem:[#allocation160_spill]] %s17172_s0 }
   0x2   :  { %17254 = sst [smem:[#allocation161_spill]] %s17173_s1 }
   0x3   :  { %17255 = sst [smem:[#allocation162_spill]] %s17174_s2 }
   0x4   :  { %18 = vsyncpa [#allocation4], 0 }
   0x5   :  { %20 = vsyncpa [#allocation4 + $0x1], 0  ;;  %s11661_s25 = smov 0   ;;  %s11663_s26 = smov 0  }
   0x6   :  { %s11665_s27 = smov 0   ;;  %s11667_s28 = smov 0  }
   0x7 LB: > { %s17186_s29 = sadd.s32 4294967295, %s11582_s28   ;;  %s9991_s30 = sadd.s32 4294967294, %s11582_s28   ;;  %s11582_s28 = sphi %s11667_s28, %s17878_s28   ;;  %s11578_s27 = sphi %s11665_s27, %s17877_s27   ;;  %s11574_s26 = sphi %s11663_s26, %s17876_s26   ;;  %s11570_s25 = sphi %s11661_s25, %s17875_s25  }
   0x8   : > { %s11684_s14 = sadd.s32 1, %s11582_s28   ;;  %s33_s15 = sadd.s32 1, %s11578_s27 }
   0x9   : > { %s30_s16 = ssub.s32 %s11582_s28, %s11684_s14  ;;  %p40_p0 = scmp.ne.s32.totalorder %s11578_s27, %s11574_s26 }
   0xa   : > { %p31_p1 = scmp.eq.s32.totalorder %s30_s16, 0  ;;  %p41_p2 = scmp.eq.s32.totalorder %s11582_s28, 0 }
   0xb   : > { %p322_p3 = scmp.eq.s32.totalorder %s17186_s29, 1  ;;  %p327_p4 = scmp.ne.s32.totalorder %s11574_s26, %s11570_s25 }
   0xc   : > { %s11697_s17 = scalar_select %p31_p1, %s11578_s27, %s33_s15  }
   0xd   : > { %p42_p5 = por %p41_p2, %p40_p0  ;;  %p11699_p6 = por %p322_p3, %p40_p0 }
   0xe   : > { %p328_p7 = scmp.eq.s32.totalorder %s9991_s30, 1  ;;  %p9993_p9 = scmp.ge.s32.totalorder %s11582_s28, 2 }
  0x10   : > { %p11703_p8 = por %p328_p7, %p327_p4  ;;  %380 = sbr.rel (%p9993_p9) target bundleno = 65 (0x41), region = 64 }
  0x17   : > { %383 = sbr.rel (!%p42_p5) target bundleno = 65 (0x41), region = 68  ;;  %s385_s20 = sand.u32 (%p42_p5), 1, %s11578_s27  }
  0x18   : > { %s10645_s21 = sshll.u32 (%p42_p5), %s11582_s28, 7  ;;  %s9994_s22 = sshll.u32 (%p42_p5), %s385_s20, 9 }
  0x19   : > { %s17258_s0 = sld [smem:[#allocation160_spill]] (%p42_p5)  ;;  %s11720_s30 = scalar_lea.vmem (%p42_p5), [#allocation2], %s9994_s22 }
  0x1f   : > { %s11715_s15 = scalar_lea.vmem %s17258_s0, %s10645_s21 }
  0x20   : > { %v403_v0 = vld [vmem:[%s11715_s15] sm:$0xff]  ;;  %v405_v1 = vld [vmem:[%s11715_s15 + $0x8] sm:$0xff]  ;;  %v407_v2 = vld [vmem:[%s11715_s15 + $0x10] sm:$0xff] }
  0x21   : > { %404 = vst [vmem:[%s11720_s30] sm:$0xff] %v403_v0  ;;  %406 = vst [vmem:[%s11720_s30 + $0x8] sm:$0xff] %v405_v1  ;;  %v409_v3 = vld [vmem:[%s11715_s15 + $0x18] sm:$0xff]  ;;  %v411_v4 = vld [vmem:[%s11715_s15 + $0x20] sm:$0xff] }
  0x22   : > { %408 = vst [vmem:[%s11720_s30 + $0x10] sm:$0xff] %v407_v2  ;;  %v413_v5 = vld [vmem:[%s11715_s15 + $0x28] sm:$0xff]  ;;  %410 = vst [vmem:[%s11720_s30 + $0x18] sm:$0xff] %v409_v3  ;;  %v415_v6 = vld [vmem:[%s11715_s15 + $0x30] sm:$0xff] }
  0x23   : > { %412 = vst [vmem:[%s11720_s30 + $0x20] sm:$0xff] %v411_v4  ;;  %414 = vst [vmem:[%s11720_s30 + $0x28] sm:$0xff] %v413_v5  ;;  %v417_v7 = vld [vmem:[%s11715_s15 + $0x38] sm:$0xff]  ;;  %v419_v8 = vld [vmem:[%s11715_s15 + $0x40] sm:$0xff] }
  0x24   : > { %416 = vst [vmem:[%s11720_s30 + $0x30] sm:$0xff] %v415_v6  ;;  %418 = vst [vmem:[%s11720_s30 + $0x38] sm:$0xff] %v417_v7  ;;  %v421_v9 = vld [vmem:[%s11715_s15 + $0x48] sm:$0xff]  ;;  %v423_v10 = vld [vmem:[%s11715_s15 + $0x50] sm:$0xff] }
  0x25   : > { %420 = vst [vmem:[%s11720_s30 + $0x40] sm:$0xff] %v419_v8  ;;  %v425_v11 = vld [vmem:[%s11715_s15 + $0x58] sm:$0xff]  ;;  %422 = vst [vmem:[%s11720_s30 + $0x48] sm:$0xff] %v421_v9  ;;  %v427_v12 = vld [vmem:[%s11715_s15 + $0x60] sm:$0xff] }
  0x26   : > { %424 = vst [vmem:[%s11720_s30 + $0x50] sm:$0xff] %v423_v10  ;;  %426 = vst [vmem:[%s11720_s30 + $0x58] sm:$0xff] %v425_v11  ;;  %v429_v13 = vld [vmem:[%s11715_s15 + $0x68] sm:$0xff]  ;;  %v431_v14 = vld [vmem:[%s11715_s15 + $0x70] sm:$0xff] }
  0x27   : > { %428 = vst [vmem:[%s11720_s30 + $0x60] sm:$0xff] %v427_v12  ;;  %430 = vst [vmem:[%s11720_s30 + $0x68] sm:$0xff] %v429_v13  ;;  %v433_v15 = vld [vmem:[%s11715_s15 + $0x78] sm:$0xff]  ;;  %v435_v16 = vld [vmem:[%s11715_s15 + $0x100] sm:$0xff] }
  0x28   : > { %432 = vst [vmem:[%s11720_s30 + $0x70] sm:$0xff] %v431_v14  ;;  %v437_v17 = vld [vmem:[%s11715_s15 + $0x108] sm:$0xff]  ;;  %434 = vst [vmem:[%s11720_s30 + $0x78] sm:$0xff] %v433_v15  ;;  %v439_v18 = vld [vmem:[%s11715_s15 + $0x110] sm:$0xff] }
  0x29   : > { %436 = vst [vmem:[%s11720_s30 + $0x80] sm:$0xff] %v435_v16  ;;  %438 = vst [vmem:[%s11720_s30 + $0x88] sm:$0xff] %v437_v17  ;;  %v441_v19 = vld [vmem:[%s11715_s15 + $0x118] sm:$0xff]  ;;  %v443_v20 = vld [vmem:[%s11715_s15 + $0x120] sm:$0xff] }
  0x2a   : > { %440 = vst [vmem:[%s11720_s30 + $0x90] sm:$0xff] %v439_v18  ;;  %442 = vst [vmem:[%s11720_s30 + $0x98] sm:$0xff] %v441_v19  ;;  %v445_v21 = vld [vmem:[%s11715_s15 + $0x128] sm:$0xff]  ;;  %v447_v22 = vld [vmem:[%s11715_s15 + $0x130] sm:$0xff] }
  0x2b   : > { %444 = vst [vmem:[%s11720_s30 + $0xa0] sm:$0xff] %v443_v20  ;;  %v449_v23 = vld [vmem:[%s11715_s15 + $0x138] sm:$0xff]  ;;  %446 = vst [vmem:[%s11720_s30 + $0xa8] sm:$0xff] %v445_v21  ;;  %v451_v24 = vld [vmem:[%s11715_s15 + $0x140] sm:$0xff] }
  0x2c   : > { %448 = vst [vmem:[%s11720_s30 + $0xb0] sm:$0xff] %v447_v22  ;;  %450 = vst [vmem:[%s11720_s30 + $0xb8] sm:$0xff] %v449_v23  ;;  %v453_v25 = vld [vmem:[%s11715_s15 + $0x148] sm:$0xff]  ;;  %v455_v26 = vld [vmem:[%s11715_s15 + $0x150] sm:$0xff] }
  0x2d   : > { %452 = vst [vmem:[%s11720_s30 + $0xc0] sm:$0xff] %v451_v24  ;;  %454 = vst [vmem:[%s11720_s30 + $0xc8] sm:$0xff] %v453_v25  ;;  %v457_v27 = vld [vmem:[%s11715_s15 + $0x158] sm:$0xff]  ;;  %v459_v28 = vld [vmem:[%s11715_s15 + $0x160] sm:$0xff] }
  0x2e   : > { %456 = vst [vmem:[%s11720_s30 + $0xd0] sm:$0xff] %v455_v26  ;;  %v461_v29 = vld [vmem:[%s11715_s15 + $0x168] sm:$0xff]  ;;  %458 = vst [vmem:[%s11720_s30 + $0xd8] sm:$0xff] %v457_v27  ;;  %v463_v30 = vld [vmem:[%s11715_s15 + $0x170] sm:$0xff] }
  0x2f   : > { %460 = vst [vmem:[%s11720_s30 + $0xe0] sm:$0xff] %v459_v28  ;;  %462 = vst [vmem:[%s11720_s30 + $0xe8] sm:$0xff] %v461_v29  ;;  %v465_v31 = vld [vmem:[%s11715_s15 + $0x178] sm:$0xff]  ;;  %v467_v32 = vld [vmem:[%s11715_s15 + $0x200] sm:$0xff] }
  0x30   : > { %464 = vst [vmem:[%s11720_s30 + $0xf0] sm:$0xff] %v463_v30  ;;  %466 = vst [vmem:[%s11720_s30 + $0xf8] sm:$0xff] %v465_v31  ;;  %v469_v33 = vld [vmem:[%s11715_s15 + $0x208] sm:$0xff]  ;;  %v471_v34 = vld [vmem:[%s11715_s15 + $0x210] sm:$0xff] }
  0x31   : > { %468 = vst [vmem:[%s11720_s30 + $0x100] sm:$0xff] %v467_v32  ;;  %v473_v35 = vld [vmem:[%s11715_s15 + $0x218] sm:$0xff]  ;;  %470 = vst [vmem:[%s11720_s30 + $0x108] sm:$0xff] %v469_v33  ;;  %v475_v36 = vld [vmem:[%s11715_s15 + $0x220] sm:$0xff] }
  0x32   : > { %472 = vst [vmem:[%s11720_s30 + $0x110] sm:$0xff] %v471_v34  ;;  %474 = vst [vmem:[%s11720_s30 + $0x118] sm:$0xff] %v473_v35  ;;  %v477_v37 = vld [vmem:[%s11715_s15 + $0x228] sm:$0xff]  ;;  %v479_v38 = vld [vmem:[%s11715_s15 + $0x230] sm:$0xff] }
  0x33   : > { %476 = vst [vmem:[%s11720_s30 + $0x120] sm:$0xff] %v475_v36  ;;  %478 = vst [vmem:[%s11720_s30 + $0x128] sm:$0xff] %v477_v37  ;;  %v481_v39 = vld [vmem:[%s11715_s15 + $0x238] sm:$0xff]  ;;  %v483_v40 = vld [vmem:[%s11715_s15 + $0x240] sm:$0xff] }
  0x34   : > { %480 = vst [vmem:[%s11720_s30 + $0x130] sm:$0xff] %v479_v38  ;;  %v485_v41 = vld [vmem:[%s11715_s15 + $0x248] sm:$0xff]  ;;  %482 = vst [vmem:[%s11720_s30 + $0x138] sm:$0xff] %v481_v39  ;;  %v487_v42 = vld [vmem:[%s11715_s15 + $0x250] sm:$0xff] }
  0x35   : > { %484 = vst [vmem:[%s11720_s30 + $0x140] sm:$0xff] %v483_v40  ;;  %486 = vst [vmem:[%s11720_s30 + $0x148] sm:$0xff] %v485_v41  ;;  %v489_v43 = vld [vmem:[%s11715_s15 + $0x258] sm:$0xff]  ;;  %v491_v44 = vld [vmem:[%s11715_s15 + $0x260] sm:$0xff] }
  0x36   : > { %488 = vst [vmem:[%s11720_s30 + $0x150] sm:$0xff] %v487_v42  ;;  %490 = vst [vmem:[%s11720_s30 + $0x158] sm:$0xff] %v489_v43  ;;  %v493_v45 = vld [vmem:[%s11715_s15 + $0x268] sm:$0xff]  ;;  %v495_v46 = vld [vmem:[%s11715_s15 + $0x270] sm:$0xff] }
  0x37   : > { %492 = vst [vmem:[%s11720_s30 + $0x160] sm:$0xff] %v491_v44  ;;  %v497_v47 = vld [vmem:[%s11715_s15 + $0x278] sm:$0xff]  ;;  %494 = vst [vmem:[%s11720_s30 + $0x168] sm:$0xff] %v493_v45  ;;  %v499_v48 = vld [vmem:[%s11715_s15 + $0x300] sm:$0xff] }
  0x38   : > { %496 = vst [vmem:[%s11720_s30 + $0x170] sm:$0xff] %v495_v46  ;;  %498 = vst [vmem:[%s11720_s30 + $0x178] sm:$0xff] %v497_v47  ;;  %v501_v49 = vld [vmem:[%s11715_s15 + $0x308] sm:$0xff]  ;;  %v503_v50 = vld [vmem:[%s11715_s15 + $0x310] sm:$0xff] }
  0x39   : > { %500 = vst [vmem:[%s11720_s30 + $0x180] sm:$0xff] %v499_v48  ;;  %502 = vst [vmem:[%s11720_s30 + $0x188] sm:$0xff] %v501_v49  ;;  %v505_v51 = vld [vmem:[%s11715_s15 + $0x318] sm:$0xff]  ;;  %v507_v52 = vld [vmem:[%s11715_s15 + $0x320] sm:$0xff] }
  0x3a   : > { %504 = vst [vmem:[%s11720_s30 + $0x190] sm:$0xff] %v503_v50  ;;  %v509_v53 = vld [vmem:[%s11715_s15 + $0x328] sm:$0xff]  ;;  %506 = vst [vmem:[%s11720_s30 + $0x198] sm:$0xff] %v505_v51  ;;  %v511_v54 = vld [vmem:[%s11715_s15 + $0x330] sm:$0xff] }
  0x3b   : > { %508 = vst [vmem:[%s11720_s30 + $0x1a0] sm:$0xff] %v507_v52  ;;  %510 = vst [vmem:[%s11720_s30 + $0x1a8] sm:$0xff] %v509_v53  ;;  %v513_v55 = vld [vmem:[%s11715_s15 + $0x338] sm:$0xff]  ;;  %v515_v56 = vld [vmem:[%s11715_s15 + $0x340] sm:$0xff] }
  0x3c   : > { %512 = vst [vmem:[%s11720_s30 + $0x1b0] sm:$0xff] %v511_v54  ;;  %514 = vst [vmem:[%s11720_s30 + $0x1b8] sm:$0xff] %v513_v55  ;;  %v517_v57 = vld [vmem:[%s11715_s15 + $0x348] sm:$0xff]  ;;  %v519_v58 = vld [vmem:[%s11715_s15 + $0x350] sm:$0xff] }
  0x3d   : > { %516 = vst [vmem:[%s11720_s30 + $0x1c0] sm:$0xff] %v515_v56  ;;  %v521_v59 = vld [vmem:[%s11715_s15 + $0x358] sm:$0xff]  ;;  %518 = vst [vmem:[%s11720_s30 + $0x1c8] sm:$0xff] %v517_v57  ;;  %v523_v60 = vld [vmem:[%s11715_s15 + $0x360] sm:$0xff] }
  0x3e   : > { %520 = vst [vmem:[%s11720_s30 + $0x1d0] sm:$0xff] %v519_v58  ;;  %522 = vst [vmem:[%s11720_s30 + $0x1d8] sm:$0xff] %v521_v59  ;;  %v525_v61 = vld [vmem:[%s11715_s15 + $0x368] sm:$0xff]  ;;  %v527_v62 = vld [vmem:[%s11715_s15 + $0x370] sm:$0xff] }
  0x3f   : > { %524 = vst [vmem:[%s11720_s30 + $0x1e0] sm:$0xff] %v523_v60  ;;  %526 = vst [vmem:[%s11720_s30 + $0x1e8] sm:$0xff] %v525_v61  ;;  %v529_v63 = vld [vmem:[%s11715_s15 + $0x378] sm:$0xff] }
  0x40   : > { %528 = vst [vmem:[%s11720_s30 + $0x1f0] sm:$0xff] %v527_v62  ;;  %530 = vst [vmem:[%s11720_s30 + $0x1f8] sm:$0xff] %v529_v63 }
  0x41 PF: > { %p9997_p10 = scmp.ge.s32.totalorder %s11582_s28, 1  ;;  %p535_p11 = scmp.lt.s32.totalorder %s11582_s28, 3 }
  0x43   : > { %p536_p12 = pnand %p9997_p10, %p535_p11 }
  0x45   : > { %539 = sbr.rel (%p536_p12) target bundleno = 2871 (0xb37), region = 91 }
  0x4c   : > { %s11850_s16 = sand.u32 1, %s11574_s26   ;;  %s17259_s1 = sld [smem:[#allocation161_spill]]  ;;  %vm1886_vm0 = vcmask 261120   ;;  %v17187_v4 = vmov 0   ;;  %vm4875_vm1 = vcmask 1043456   ;;  %vm4856_vm2 = vcmask 326656  }
  0x4d   : > { %s9998_s22 = sshll.u32 %s11850_s16, 9  ;;  %11221 = vset.pattern.permute.xlu0 %v17187_v4  ;;  %11222 = vset.pattern.permute.xlu1 %v17187_v4  ;;  %s17260_s2 = sld [smem:[#allocation162_spill]]  ;;  %vm6864_vm3 = vcmask 785408   ;;  %vm9351_vm4 = vcmask 130048   ;;  %vm9696_vm5 = vcmask 982016   ;;  %vm11586_vm6 = vmmov 0  }
  0x4e   : > { %s11862_s23 = scalar_lea.vmem [#allocation2], %s9998_s22  ;;  %vm9838_vm7 = vcmask 1041408   ;;  %vm9834_vm8 = vcmask 687104   ;;  %s9999_s29 = sshll.u32 %s11850_s16, 4 }
  0x4f   : > { %v587_v1 = vld [vmem:[%s11862_s23] sm:$0xff]  ;;  %v588_v3 = vld [vmem:[%s11862_s23 + $0x8] sm:$0xff]  ;;  %v589_v32 = vld [vmem:[%s11862_s23 + $0x10] sm:$0xff]  ;;  %s17873_s21 = sadd.s32 4294967295, %s11582_s28   ;;  %s584_s24 = scalar_lea.vmem [#allocation3], %s9999_s29 }
  0x50   : > { %v601_v2 = vld [vmem:[%s11862_s23 + $0x80] sm:$0xff]  ;;  %v602_v6 = vld [vmem:[%s11862_s23 + $0x88] sm:$0xff]  ;;  %v603_v33 = vld [vmem:[%s11862_s23 + $0x90] sm:$0xff]  ;;  %s10642_s22 = sshll.u32 %s17873_s21, 7  ;;  %s9923_s15 = sshll.u32 %s584_s24, 4  ;;  %s17128_s15 = int_to_ptr.vmem [resolvable:$true] %s9923_s15 }
  0x51   : > { %v10001_v5 = vcombine.high %v587_v1, %v601_v2  ;;  %v10000_v7 = vcombine.low %v587_v1, %v601_v2  ;;  %v615_v8 = vld [vmem:[%s11862_s23 + $0x100] sm:$0xff]  ;;  %v10003_v10 = vcombine.high %v588_v3, %v602_v6  ;;  %v10002_v11 = vcombine.low %v588_v3, %v602_v6  ;;  %v616_v13 = vld [vmem:[%s11862_s23 + $0x108] sm:$0xff]  ;;  %v617_v37 = vld [vmem:[%s11862_s23 + $0x110] sm:$0xff]  ;;  %s17126_s20 = scalar_lea.hbm %s17185_s13, %s10642_s22  ;;  %s11587_s29 = smov [#allocation3]  }
  0x52   : > { %v11855_v0 = vld [vmem:[%s17259_s1 + $0x4] ss:$8 sps:$4 sm:$0xff]   ;;  %v11884_v36 = vcombine.high %v589_v32, %v603_v33  ;;  %v631_v38 = vld [vmem:[%s11862_s23 + $0x190] sm:$0xff]  ;;  %v11888_v39 = vcombine.low %v589_v32, %v603_v33  ;;  %v708_v51 = vld [vmem:[%s11862_s23 + $0x18] sm:$0xff]  ;;  %s11524_s21 = sshll.u32 %s11587_s29, 4  ;;  %s11525_s21 = int_to_ptr.vmem [resolvable:$false] %s11524_s21 }
  0x53   : > { %10198 = vmatprep.mubr.msk.bf16.mxu0 %vm1886_vm0, %v11855_v0  ;;  %10209 = vmatprep.mubr.msk.bf16.mxu1 %vm1886_vm0, %v11855_v0  ;;  %v629_v9 = vld [vmem:[%s11862_s23 + $0x180] sm:$0xff]  ;;  %v630_v14 = vld [vmem:[%s11862_s23 + $0x188] sm:$0xff]  ;;  %v11891_v40 = vcombine.high %v617_v37, %v631_v38  ;;  %v645_v41 = vld [vmem:[%s11862_s23 + $0x14] sm:$0xff]  ;;  %v11896_v43 = vcombine.low %v617_v37, %v631_v38  ;;  %s11526_s22 = scalar_lea.vmem %s11525_s21, 512  ;;  %p11527_p2 = scmp.lt.s32.totalorder %s17128_s15, %s11525_s21 }
  0x54   : > { %v10029_v12 = vcombine.high %v615_v8, %v629_v9  ;;  %v643_v15 = vld [vmem:[%s11862_s23 + $0x4] sm:$0xff]  ;;  %1920 = vmatprep.subr.bf16.mxu0 %v10001_v5  ;;  %v10031_v16 = vcombine.high %v616_v13, %v630_v14  ;;  %v644_v18 = vld [vmem:[%s11862_s23 + $0xc] sm:$0xff]  ;;  %2061 = vmatprep.subr.bf16.mxu1 %v10003_v10  ;;  %v10028_v20 = vcombine.low %v615_v8, %v629_v9  ;;  %v659_v42 = vld [vmem:[%s11862_s23 + $0x94] sm:$0xff] }
  0x55   : > { %v657_v17 = vld [vmem:[%s11862_s23 + $0x84] sm:$0xff]  ;;  %v658_v19 = vld [vmem:[%s11862_s23 + $0x8c] sm:$0xff]  ;;  %1921 = vmatpush1.bf16.msra.mxu0 %v10000_v7  ;;  %2062 = vmatpush1.bf16.msra.mxu1 %v10002_v11  ;;  %v10030_v21 = vcombine.low %v616_v13, %v630_v14  ;;  %v11899_v44 = vcombine.high %v645_v41, %v659_v42  ;;  %v673_v45 = vld [vmem:[%s11862_s23 + $0x114] sm:$0xff]  ;;  %v11907_v48 = vcombine.low %v645_v41, %v659_v42 }
  0x56   : > { %1922 = vmatprep.subr.bf16.mxu0 %v10029_v12  ;;  %v10057_v22 = vcombine.high %v643_v15, %v657_v17  ;;  %2063 = vmatprep.subr.bf16.mxu1 %v10031_v16  ;;  %v10059_v23 = vcombine.high %v644_v18, %v658_v19  ;;  %v671_v24 = vld [vmem:[%s11862_s23 + $0x104] sm:$0xff]  ;;  %v672_v26 = vld [vmem:[%s11862_s23 + $0x10c] sm:$0xff]  ;;  %v10056_v28 = vcombine.low %v643_v15, %v657_v17  ;;  %v687_v46 = vld [vmem:[%s11862_s23 + $0x194] sm:$0xff] }
  0x57   : > { %v685_v25 = vld [vmem:[%s11862_s23 + $0x184] sm:$0xff]  ;;  %v686_v27 = vld [vmem:[%s11862_s23 + $0x18c] sm:$0xff]  ;;  %v10058_v29 = vcombine.low %v644_v18, %v658_v19  ;;  %v11910_v49 = vcombine.high %v673_v45, %v687_v46  ;;  %v722_v52 = vld [vmem:[%s11862_s23 + $0x98] sm:$0xff]  ;;  %v11924_v55 = vcombine.low %v673_v45, %v687_v46 }
  0x58   : > { %v10085_v30 = vcombine.high %v671_v24, %v685_v25  ;;  %v10087_v31 = vcombine.high %v672_v26, %v686_v27  ;;  %v10084_v34 = vcombine.low %v671_v24, %v685_v25  ;;  %v10086_v35 = vcombine.low %v672_v26, %v686_v27  ;;  %v1664_v47 = vld [vmem:[%s17260_s2] sm:$0xff]  ;;  %v1666_v50 = vld [vmem:[%s17260_s2 + $0x10] sm:$0xff]  ;;  %v1665_v53 = vld [vmem:[%s17260_s2 + $0x8] sm:$0xff] }
  0x59   : > { %1923 = vmatpush1.bf16.msra.mxu0 %v10028_v20  ;;  %2064 = vmatpush1.bf16.msra.mxu1 %v10030_v21  ;;  %v1667_v54 = vld [vmem:[%s17260_s2 + $0x18] sm:$0xff]  ;;  %v1668_v58 = vld [vmem:[%s17260_s2 + $0x20] sm:$0xff]  ;;  %v11932_v59 = vcombine.high %v708_v51, %v722_v52  ;;  %v1669_v60 = vld [vmem:[%s17260_s2 + $0x28] sm:$0xff]  ;;  %v11939_v61 = vcombine.low %v708_v51, %v722_v52 }
  0x5a   : > { %1924 = vmatprep.subr.bf16.mxu0 %v10057_v22  ;;  %2065 = vmatprep.subr.bf16.mxu1 %v10059_v23  ;;  %v736_v56 = vld [vmem:[%s11862_s23 + $0x118] sm:$0xff]  ;;  %v1670_v62 = vld [vmem:[%s17260_s2 + $0x30] sm:$0xff]  ;;  %v11958_v3 = vld [vmem:[%s17259_s1] ss:$8 sps:$4 sm:$0xff]  }
  0x5b   : > { %1687 = vperm.xlu0 %11221, %v1664_v47   ;;  %1697 = vperm.xlu1 %11222, %v1666_v50   ;;  %v750_v57 = vld [vmem:[%s11862_s23 + $0x198] sm:$0xff]  ;;  %v1672_v5 = vld [vmem:[%s17260_s2 + $0x40] sm:$0xff]  ;;  %v1673_v7 = vld [vmem:[%s17260_s2 + $0x48] sm:$0xff] }
  0x5c   : > { %v11945_v63 = vcombine.high %v736_v56, %v750_v57  ;;  %v1671_v1 = vld [vmem:[%s17260_s2 + $0x38] sm:$0xff]  ;;  %v11953_v2 = vcombine.low %v736_v56, %v750_v57  ;;  %v12000_v13 = vld [vmem:[%s17259_s1 + $0x24] ss:$8 sps:$4 sm:$0xff]   ;;  %v12023_v22 = vld [vmem:[%s17259_s1 + $0x20] ss:$8 sps:$4 sm:$0xff]  }
  0x5d   : > { %1925 = vmatpush1.bf16.msra.mxu0 %v10056_v28  ;;  %2066 = vmatpush1.bf16.msra.mxu1 %v10058_v29  ;;  %v11967_v6 = vld [vmem:[%s17259_s1 + $0x14] ss:$8 sps:$4 sm:$0xff]   ;;  %v591_v19 = vld [vmem:[%s11862_s23 + $0x20] sm:$0xff]  ;;  %v710_v42 = vld [vmem:[%s11862_s23 + $0x28] sm:$0xff] }
  0x5e   : > { %1926 = vmatprep.subr.bf16.mxu0 %v10085_v30  ;;  %2067 = vmatprep.subr.bf16.mxu1 %v10087_v31  ;;  %v646_v8 = vld [vmem:[%s11862_s23 + $0x1c] sm:$0xff]  ;;  %v647_v30 = vld [vmem:[%s11862_s23 + $0x24] sm:$0xff]  ;;  %v1678_v33 = vld [vmem:[%s17260_s2 + $0x70] sm:$0xff] }
  0x5f   : > { %1692 = vperm.xlu0 %11221, %v1665_v53   ;;  %1702 = vperm.xlu1 %11222, %v1667_v54   ;;  %v660_v9 = vld [vmem:[%s11862_s23 + $0x9c] sm:$0xff]  ;;  %v661_v32 = vld [vmem:[%s11862_s23 + $0xa4] sm:$0xff] }
  0x60   : > { %v1675_v12 = vld [vmem:[%s17260_s2 + $0x58] sm:$0xff]  ;;  %v10062_v17 = vcombine.low %v646_v8, %v660_v9  ;;  %v605_v20 = vld [vmem:[%s11862_s23 + $0xa0] sm:$0xff]  ;;  %v12082_v41 = vcombine.low %v647_v30, %v661_v32  ;;  %v1681_v46 = vld [vmem:[%s17260_s2 + $0x88] sm:$0xff] }
  0x61   : > { %1927 = vmatpush1.bf16.msra.mxu0 %v10084_v34  ;;  %2068 = vmatpush1.bf16.msra.mxu1 %v10086_v35  ;;  %v674_v14 = vld [vmem:[%s11862_s23 + $0x11c] sm:$0xff]  ;;  %v12037_v28 = vcombine.high %v591_v19, %v605_v20  ;;  %v12060_v34 = vld [vmem:[%s17259_s1 + $0x30] ss:$8 sps:$4 sm:$0xff]   ;;  %v675_v38 = vld [vmem:[%s11862_s23 + $0x124] sm:$0xff] }
  0x62   : > { %1928 = vmatprep.subr.bf16.mxu0 %v10003_v10  ;;  %2069 = vmatprep.subr.bf16.mxu1 %v11884_v36  ;;  %v1674_v10 = vld [vmem:[%s17260_s2 + $0x50] sm:$0xff]  ;;  %v688_v15 = vld [vmem:[%s11862_s23 + $0x19c] sm:$0xff]  ;;  %v738_v51 = vld [vmem:[%s11862_s23 + $0x128] sm:$0xff] }
  0x63   : > { %1707 = vperm.xlu0 %11221, %v1668_v58   ;;  %1712 = vperm.xlu1 %11222, %v1669_v60   ;;  %v10091_v18 = vcombine.high %v674_v14, %v688_v15  ;;  %v12032_v24 = vld [vmem:[%s17259_s1 + $0x34] ss:$8 sps:$4 sm:$0xff]   ;;  %v10090_v25 = vcombine.low %v674_v14, %v688_v15  ;;  %v619_v26 = vld [vmem:[%s11862_s23 + $0x120] sm:$0xff]  ;;  %v752_v52 = vld [vmem:[%s11862_s23 + $0x1a8] sm:$0xff] }
  0x64   : > { %v633_v27 = vld [vmem:[%s11862_s23 + $0x1a0] sm:$0xff]  ;;  %v12115_v50 = vld [vmem:[%s17259_s1 + $0x54] ss:$8 sps:$4 sm:$0xff]   ;;  %v12125_v54 = vcombine.high %v738_v51, %v752_v52  ;;  %v12141_v57 = vcombine.low %v738_v51, %v752_v52  ;;  %v12146_v58 = vld [vmem:[%s17259_s1 + $0x50] ss:$8 sps:$4 sm:$0xff]  }
  0x65   : > { %1929 = vmatpush1.bf16.msra.mxu0 %v10002_v11  ;;  %2070 = vmatpush1.bf16.msra.mxu1 %v11888_v39  ;;  %v11991_v11 = vld [vmem:[%s17259_s1 + $0x10] ss:$8 sps:$4 sm:$0xff]   ;;  %v12073_v37 = vcombine.low %v619_v26, %v633_v27  ;;  %v1680_v45 = vld [vmem:[%s17260_s2 + $0x80] sm:$0xff] }
  0x66   : > { %1930 = vmatprep.subr.bf16.mxu0 %v10031_v16  ;;  %2071 = vmatprep.subr.bf16.mxu1 %v11891_v40  ;;  %v10063_v16 = vcombine.high %v646_v8, %v660_v9  ;;  %v1683_v56 = vld [vmem:[%s17260_s2 + $0x98] sm:$0xff]  ;;  %v1684_v60 = vld [vmem:[%s17260_s2 + $0xa0] sm:$0xff]  ;;  %v662_v14 = vld [vmem:[%s11862_s23 + $0xac] sm:$0xff] }
  0x67   : > { %1717 = vperm.xlu0 %11221, %v1670_v62   ;;  %1722 = vperm.xlu1 %11222, %v1671_v1   ;;  %v12175_v62 = vld [vmem:[%s17259_s1 + $0x74] ss:$8 sps:$4 sm:$0xff]   ;;  %v12191_v1 = vld [vmem:[%s17259_s1 + $0x84] ss:$8 sps:$4 sm:$0xff]   ;;  %v12221_v8 = vld [vmem:[%s17259_s1 + $0x90] ss:$8 sps:$4 sm:$0xff]  }
  0x68   : > { %v676_v15 = vld [vmem:[%s11862_s23 + $0x12c] sm:$0xff]  ;;  %v650_v51 = vld [vmem:[%s11862_s23 + $0x3c] sm:$0xff] }
  0x69   : > { %1931 = vmatpush1.bf16.msra.mxu0 %v10030_v21  ;;  %2072 = vmatpush1.bf16.msra.mxu1 %v11896_v43  ;;  %v1676_v21 = vld [vmem:[%s17260_s2 + $0x60] sm:$0xff] }
  0x6a   : > { %1932 = vmatprep.subr.bf16.mxu0 %v10059_v23  ;;  %2073 = vmatprep.subr.bf16.mxu1 %v11899_v44  ;;  %v1677_v23 = vld [vmem:[%s17260_s2 + $0x68] sm:$0xff]  ;;  %v664_v52 = vld [vmem:[%s11862_s23 + $0xbc] sm:$0xff] }
  0x6b   : > { %1727 = vperm.xlu0 %11221, %v1672_v5   ;;  %1732 = vperm.xlu1 %11222, %v1673_v7   ;;  %v12207_v5 = vld [vmem:[%s17259_s1 + $0x94] ss:$8 sps:$4 sm:$0xff]   ;;  %v1663_v7 = vld [vmem:[%s17259_s1 + $0xa0] sm:$0xff] }
  0x6c   : > { %v12223_v9 = vcombine.high %v1663_v7, %v1663_v7 }
  0x6d   : > { %1933 = vmatpush1.bf16.msra.mxu0 %v10058_v29  ;;  %2074 = vmatpush1.bf16.msra.mxu1 %v11907_v48  ;;  %v12041_v29 = vcombine.low %v591_v19, %v605_v20  ;;  %v593_v19 = vld [vmem:[%s11862_s23 + $0x30] sm:$0xff] }
  0x6e   : > { %1934 = vmatprep.subr.bf16.mxu0 %v10087_v31  ;;  %2075 = vmatprep.subr.bf16.mxu1 %v11910_v49  ;;  %v12046_v31 = vcombine.high %v619_v26, %v633_v27  ;;  %17261 = vst [vmem:[#allocation6_spill] sm:$0xff] %v12223_v9  ;;  %v607_v20 = vld [vmem:[%s11862_s23 + $0xb0] sm:$0xff] }
  0x6f   : > { %1737 = vperm.xlu0 %11221, %v1674_v10   ;;  %1742 = vperm.xlu1 %11222, %v1675_v12   ;;  %v12231_v10 = vcombine.low %v1663_v7, %v1663_v7  ;;  %v648_v12 = vld [vmem:[%s11862_s23 + $0x2c] sm:$0xff]  ;;  %v12270_v27 = vcombine.low %v593_v19, %v607_v20  ;;  %v6557_v7 = vld [vmem:[%s17177_s5 + $0x18] sm:$0xff] }
  0x70   : > { %v635_v26 = vld [vmem:[%s11862_s23 + $0x1b0] sm:$0xff] }
  0x71   : > { %1935 = vmatpush1.bf16.msra.mxu0 %v10086_v35  ;;  %2076 = vmatpush1.bf16.msra.mxu1 %v11924_v55  ;;  %v1679_v35 = vld [vmem:[%s17260_s2 + $0x78] sm:$0xff] }
  0x72   : > { %1936 = vmatprep.subr.bf16.mxu0 %v11884_v36  ;;  %2077 = vmatprep.subr.bf16.mxu1 %v11932_v59 }
  0x73   : > { %1747 = vperm.xlu0 %11221, %v1676_v21   ;;  %1752 = vperm.xlu1 %11222, %v1677_v23   ;;  %v10013_v23 = vcombine.high %v593_v19, %v607_v20  ;;  %v6559_v19 = vld [vmem:[%s17177_s5 + $0x28] sm:$0xff]  ;;  %v6556_v20 = vld [vmem:[%s17177_s5 + $0x10] sm:$0xff] }
  0x75   : > { %1937 = vmatpush1.bf16.msra.mxu0 %v11888_v39  ;;  %2078 = vmatpush1.bf16.msra.mxu1 %v11939_v61 }
  0x76   : > { %1938 = vmatprep.subr.bf16.mxu0 %v11891_v40  ;;  %2079 = vmatprep.subr.bf16.mxu1 %v11945_v63 }
  0x77   : > { %1757 = vperm.xlu0 %11221, %v1678_v33   ;;  %1762 = vperm.xlu1 %11222, %v1679_v35   ;;  %v677_v33 = vld [vmem:[%s11862_s23 + $0x134] sm:$0xff] }
  0x78   : > { %v691_v35 = vld [vmem:[%s11862_s23 + $0x1b4] sm:$0xff] }
  0x79   : > { %1939 = vmatpush1.bf16.msra.mxu0 %v11896_v43  ;;  %2080 = vmatpush1.bf16.msra.mxu1 %v11953_v2 }
  0x7a   : > { %2202 = vmatprep.subr.bf16.mxu0 %v11884_v36  ;;  %2343 = vmatprep.subr.bf16.mxu1 %v11932_v59  ;;  %v12069_v36 = vld [vmem:[%s17259_s1 + $0x44] ss:$8 sps:$4 sm:$0xff]  }
  0x7b   : > { %1767 = vperm.xlu0 %11221, %v1680_v45   ;;  %1772 = vperm.xlu1 %11222, %v1681_v46  }
  0x7c   : > { %1953 = vmatmul.mubr.bf16.vlgmr.msra.gmra.mrb[0].mxu0 %v11958_v3  ;;  %2094 = vmatmul.mubr.bf16.vlgmr.msra.gmra.mrb[0].mxu1 %v11958_v3 }
  0x7d   : > { %10199 = vmatprep.mubr.msk.bf16.mxu0 %vm1886_vm0, %v11967_v6  ;;  %10210 = vmatprep.mubr.msk.bf16.mxu1 %vm1886_vm0, %v11967_v6 }
  0x7e   : > { %2203 = vmatpush1.bf16.msra.mxu0 %v11888_v39  ;;  %2344 = vmatpush1.bf16.msra.mxu1 %v11939_v61  ;;  %v689_v39 = vld [vmem:[%s11862_s23 + $0x1a4] sm:$0xff] }
  0x7f   : > { %2204 = vmatprep.subr.bf16.mxu0 %v11891_v40  ;;  %2345 = vmatprep.subr.bf16.mxu1 %v11945_v63  ;;  %v12078_v40 = vcombine.high %v647_v30, %v661_v32  ;;  %v12102_v47 = vcombine.low %v675_v38, %v689_v39  ;;  %v663_v30 = vld [vmem:[%s11862_s23 + $0xb4] sm:$0xff] }
  0x80   : > { %1782 = vperm.xlu1 %11222, %v1683_v56  }
  0x82   : > { %2205 = vmatpush1.bf16.msra.mxu0 %v11896_v43  ;;  %2346 = vmatpush1.bf16.msra.mxu1 %v11953_v2  ;;  %v12087_v43 = vcombine.high %v675_v38, %v689_v39  ;;  %v12298_v38 = vcombine.high %v677_v33, %v691_v35  ;;  %v712_v39 = vld [vmem:[%s11862_s23 + $0x38] sm:$0xff] }
  0x83   : > { %2206 = vmatprep.subr.bf16.mxu0 %v11899_v44  ;;  %2347 = vmatprep.subr.bf16.mxu1 %v10063_v16  ;;  %v724_v44 = vld [vmem:[%s11862_s23 + $0xa8] sm:$0xff] }
  0x84   : > { %1963 = vmatmul.mubr.bf16.gmra.mrb[4].mxu0 %v11991_v11  ;;  %2104 = vmatmul.mubr.bf16.gmra.mrb[4].mxu1 %v11991_v11  ;;  %v12121_v53 = vcombine.low %v710_v42, %v724_v44 }
  0x85   : > { %10200 = vmatprep.mubr.msk.bf16.mxu0 %vm1886_vm0, %v12000_v13  ;;  %10211 = vmatprep.mubr.msk.bf16.mxu1 %vm1886_vm0, %v12000_v13 }
  0x86   : > { %2207 = vmatpush1.bf16.msra.mxu0 %v11907_v48  ;;  %2348 = vmatpush1.bf16.msra.mxu1 %v10062_v17  ;;  %v12107_v48 = vld [vmem:[%s17259_s1 + $0x40] ss:$8 sps:$4 sm:$0xff]  }
  0x87   : > { %2208 = vmatprep.subr.bf16.mxu0 %v11910_v49  ;;  %2349 = vmatprep.subr.bf16.mxu1 %v10091_v18  ;;  %v12110_v49 = vcombine.high %v710_v42, %v724_v44  ;;  %v754_v44 = vld [vmem:[%s11862_s23 + $0x1b8] sm:$0xff] }
  0x8a   : > { %2209 = vmatpush1.bf16.msra.mxu0 %v11924_v55  ;;  %2350 = vmatpush1.bf16.msra.mxu1 %v10090_v25  ;;  %v1682_v55 = vld [vmem:[%s17260_s2 + $0x90] sm:$0xff] }
  0x8b   : > { %2210 = vmatprep.subr.bf16.mxu0 %v11932_v59  ;;  %2351 = vmatprep.subr.bf16.mxu1 %v12037_v28  ;;  %v12152_v59 = vld [vmem:[%s17259_s1 + $0x64] ss:$8 sps:$4 sm:$0xff]  }
  0x8c   : > { %1973 = vmatmul.mubr.bf16.gmra.mrb[8].mxu0 %v12023_v22  ;;  %2114 = vmatmul.mubr.bf16.gmra.mrb[8].mxu1 %v12023_v22 }
  0x8d   : > { %10201 = vmatprep.mubr.msk.bf16.mxu0 %vm1886_vm0, %v12032_v24  ;;  %10212 = vmatprep.mubr.msk.bf16.mxu1 %vm1886_vm0, %v12032_v24 }
  0x8e   : > { %2211 = vmatpush1.bf16.msra.mxu0 %v11939_v61  ;;  %2352 = vmatpush1.bf16.msra.mxu1 %v12041_v29  ;;  %v12170_v61 = vld [vmem:[%s17259_s1 + $0x60] ss:$8 sps:$4 sm:$0xff]  }
  0x8f   : > { %2212 = vmatprep.subr.bf16.mxu0 %v11945_v63  ;;  %2353 = vmatprep.subr.bf16.mxu1 %v12046_v31  ;;  %v12186_v63 = vld [vmem:[%s17259_s1 + $0x70] ss:$8 sps:$4 sm:$0xff]  }
  0x90   : > { %1777 = vperm.xlu0 %11221, %v1682_v55   ;;  %v692_v55 = vld [vmem:[%s11862_s23 + $0x1bc] sm:$0xff] }
  0x92   : > { %2213 = vmatpush1.bf16.msra.mxu0 %v11953_v2  ;;  %2354 = vmatpush1.bf16.msra.mxu1 %v12073_v37  ;;  %v12202_v2 = vld [vmem:[%s17259_s1 + $0x80] ss:$8 sps:$4 sm:$0xff]  }
  0x93   : > { %2214 = vmatprep.subr.bf16.mxu0 %v10063_v16  ;;  %2355 = vmatprep.subr.bf16.mxu1 %v12078_v40  ;;  %v690_v16 = vld [vmem:[%s11862_s23 + $0x1ac] sm:$0xff] }
  0x94   : > { %1983 = vmatmul.mubr.bf16.gmra.mrb[12].mxu0 %v12060_v34  ;;  %2124 = vmatmul.mubr.bf16.gmra.mrb[12].mxu1 %v12060_v34  ;;  %v10094_v21 = vcombine.low %v676_v15, %v690_v16 }
  0x95   : > { %10202 = vmatprep.mubr.msk.bf16.mxu0 %vm1886_vm0, %v12069_v36  ;;  %10213 = vmatprep.mubr.msk.bf16.mxu1 %vm1886_vm0, %v12069_v36 }
  0x96   : > { %2215 = vmatpush1.bf16.msra.mxu0 %v10062_v17  ;;  %2356 = vmatpush1.bf16.msra.mxu1 %v12082_v41  ;;  %v10066_v17 = vcombine.low %v648_v12, %v662_v14 }
  0x97   : > { %2216 = vmatprep.subr.bf16.mxu0 %v10091_v18  ;;  %2357 = vmatprep.subr.bf16.mxu1 %v12087_v43  ;;  %v10095_v18 = vcombine.high %v676_v15, %v690_v16  ;;  %v637_v15 = vld [vmem:[%s11862_s23 + $0x1c0] sm:$0xff] }
  0x98   : > { %1787 = vperm.xlu0 %11221, %v1684_v60   ;;  %v609_v60 = vld [vmem:[%s11862_s23 + $0xc0] sm:$0xff] }
  0x9a   : > { %2217 = vmatpush1.bf16.msra.mxu0 %v10090_v25  ;;  %2358 = vmatpush1.bf16.msra.mxu1 %v12102_v47  ;;  %v621_v25 = vld [vmem:[%s11862_s23 + $0x130] sm:$0xff] }
  0x9b   : > { %2218 = vmatprep.subr.bf16.mxu0 %v12037_v28  ;;  %2359 = vmatprep.subr.bf16.mxu1 %v12110_v49 }
  0x9c   : > { %1993 = vmatmul.mubr.bf16.gmra.mrb[16].mxu0 %v12107_v48  ;;  %2134 = vmatmul.mubr.bf16.gmra.mrb[16].mxu1 %v12107_v48 }
  0x9d   : > { %10203 = vmatprep.mubr.msk.bf16.mxu0 %vm1886_vm0, %v12115_v50  ;;  %10214 = vmatprep.mubr.msk.bf16.mxu1 %vm1886_vm0, %v12115_v50 }
  0x9e   : > { %2219 = vmatpush1.bf16.msra.mxu0 %v12041_v29  ;;  %2360 = vmatpush1.bf16.msra.mxu1 %v12121_v53 }
  0x9f   : > { %2220 = vmatprep.subr.bf16.mxu0 %v12046_v31  ;;  %2361 = vmatprep.subr.bf16.mxu1 %v12125_v54 }
  0xa2   : > { %2221 = vmatpush1.bf16.msra.mxu0 %v12073_v37  ;;  %2362 = vmatpush1.bf16.msra.mxu1 %v12141_v57 }
  0xa3   : > { %2484 = vmatprep.subr.bf16.mxu0 %v12037_v28  ;;  %2625 = vmatprep.subr.bf16.mxu1 %v12110_v49  ;;  %v12273_v28 = vcombine.high %v621_v25, %v635_v26 }
  0xa4   : > { %2003 = vmatmul.mubr.bf16.gmra.mrb[20].mxu0 %v12146_v58  ;;  %2144 = vmatmul.mubr.bf16.gmra.mrb[20].mxu1 %v12146_v58 }
  0xa5   : > { %10204 = vmatprep.mubr.msk.bf16.mxu0 %vm1886_vm0, %v12152_v59  ;;  %10215 = vmatprep.mubr.msk.bf16.mxu1 %vm1886_vm0, %v12152_v59 }
  0xac   : > { %2013 = vmatmul.mubr.bf16.gmra.mrb[24].mxu0 %v12170_v61  ;;  %2154 = vmatmul.mubr.bf16.gmra.mrb[24].mxu1 %v12170_v61 }
  0xad   : > { %10205 = vmatprep.mubr.msk.bf16.mxu0 %vm1886_vm0, %v12175_v62  ;;  %10216 = vmatprep.mubr.msk.bf16.mxu1 %vm1886_vm0, %v12175_v62 }
  0xb4   : > { %2023 = vmatmul.mubr.bf16.gmra.mrb[28].mxu0 %v12186_v63  ;;  %2164 = vmatmul.mubr.bf16.gmra.mrb[28].mxu1 %v12186_v63 }
  0xb5   : > { %10206 = vmatprep.mubr.msk.bf16.mxu0 %vm1886_vm0, %v12191_v1  ;;  %10217 = vmatprep.mubr.msk.bf16.mxu1 %vm1886_vm0, %v12191_v1 }
  0xbc   : > { %2033 = vmatmul.mubr.bf16.gmra.mrb[32].mxu0 %v12202_v2  ;;  %2174 = vmatmul.mubr.bf16.gmra.mrb[32].mxu1 %v12202_v2 }
  0xbd   : > { %10207 = vmatprep.mubr.msk.bf16.mxu0 %vm1886_vm0, %v12207_v5  ;;  %10218 = vmatprep.mubr.msk.bf16.mxu1 %vm1886_vm0, %v12207_v5 }
  0xc4   : > { %2043 = vmatmul.mubr.bf16.gmra.mrb[36].mxu0 %v12221_v8  ;;  %2184 = vmatmul.mubr.bf16.gmra.mrb[36].mxu1 %v12221_v8 }
  0xc5   : > { %10208 = vmatprep.mubr.msk.bf16.mxu0 %vm1886_vm0, %v12223_v9  ;;  %10219 = vmatprep.mubr.msk.bf16.mxu1 %vm1886_vm0, %v12223_v9 }
  0xcc   : > { %2053 = vmatmul.mubr.bf16.gmra.mrb[40].mxu0 %v12231_v10  ;;  %2194 = vmatmul.mubr.bf16.gmra.mrb[40].mxu1 %v12231_v10 }
  0xcd   : > { %10220 = vmatprep.mubr.msk.bf16.mxu0 %vm1886_vm0, %v11855_v0  ;;  %10231 = vmatprep.mubr.msk.bf16.mxu1 %vm1886_vm0, %v11855_v0  ;;  %v10067_v0 = vcombine.high %v648_v12, %v662_v14 }
  0xd4   : > { %2235 = vmatmul.mubr.bf16.vlgmr.msra.gmra.mrb[44].mxu0 %v11958_v3  ;;  %2376 = vmatmul.mubr.bf16.vlgmr.msra.gmra.mrb[44].mxu1 %v11958_v3 }
  0xd5   : > { %10221 = vmatprep.mubr.msk.bf16.mxu0 %vm1886_vm0, %v11967_v6  ;;  %10232 = vmatprep.mubr.msk.bf16.mxu1 %vm1886_vm0, %v11967_v6 }
  0xd6   : > { %2485 = vmatpush1.bf16.msra.mxu0 %v12041_v29  ;;  %2626 = vmatpush1.bf16.msra.mxu1 %v12121_v53  ;;  %v649_v29 = vld [vmem:[%s11862_s23 + $0x34] sm:$0xff] }
  0xd7   : > { %2486 = vmatprep.subr.bf16.mxu0 %v12046_v31  ;;  %2627 = vmatprep.subr.bf16.mxu1 %v12125_v54  ;;  %v12285_v31 = vcombine.low %v621_v25, %v635_v26  ;;  %v12288_v32 = vcombine.high %v649_v29, %v663_v30 }
  0xda   : > { %2487 = vmatpush1.bf16.msra.mxu0 %v12073_v37  ;;  %2628 = vmatpush1.bf16.msra.mxu1 %v12141_v57  ;;  %v12294_v37 = vcombine.low %v649_v29, %v663_v30  ;;  %v6561_v29 = vld [vmem:[%s17177_s5 + $0x38] sm:$0xff]  ;;  %v6558_v30 = vld [vmem:[%s17177_s5 + $0x20] sm:$0xff] }
  0xdb   : > { %2488 = vmatprep.subr.bf16.mxu0 %v12078_v40  ;;  %2629 = vmatprep.subr.bf16.mxu1 %v10067_v0  ;;  %v726_v40 = vld [vmem:[%s11862_s23 + $0xb8] sm:$0xff] }
  0xdc   : > { %2245 = vmatmul.mubr.bf16.gmra.mrb[48].mxu0 %v11991_v11  ;;  %2386 = vmatmul.mubr.bf16.gmra.mrb[48].mxu1 %v11991_v11  ;;  %v12311_v42 = vcombine.high %v712_v39, %v726_v40  ;;  %v12316_v45 = vcombine.low %v712_v39, %v726_v40  ;;  %v12495_v39 = vpop.permute.xlu1 %1697  ;;  %v6560_v40 = vld [vmem:[%s17177_s5 + $0x30] sm:$0xff] }
  0xdd   : > { %10222 = vmatprep.mubr.msk.bf16.mxu0 %vm1886_vm0, %v12000_v13  ;;  %10233 = vmatprep.mubr.msk.bf16.mxu1 %vm1886_vm0, %v12000_v13 }
  0xde   : > { %2489 = vmatpush1.bf16.msra.mxu0 %v12082_v41  ;;  %2630 = vmatpush1.bf16.msra.mxu1 %v10066_v17  ;;  %v12308_v41 = vcombine.low %v677_v33, %v691_v35  ;;  %v742_v33 = vld [vmem:[%s11862_s23 + $0x148] sm:$0xff] }
  0xdf   : > { %2490 = vmatprep.subr.bf16.mxu0 %v12087_v43  ;;  %2631 = vmatprep.subr.bf16.mxu1 %v10095_v18  ;;  %v740_v43 = vld [vmem:[%s11862_s23 + $0x138] sm:$0xff]  ;;  %v756_v35 = vld [vmem:[%s11862_s23 + $0x1c8] sm:$0xff] }
  0xe0   : > { %v12320_v46 = vcombine.high %v740_v43, %v754_v44 }
  0xe2   : > { %2491 = vmatpush1.bf16.msra.mxu0 %v12102_v47  ;;  %2632 = vmatpush1.bf16.msra.mxu1 %v10094_v21  ;;  %v12330_v47 = vcombine.low %v740_v43, %v754_v44 }
  0xe3   : > { %2492 = vmatprep.subr.bf16.mxu0 %v12110_v49  ;;  %2633 = vmatprep.subr.bf16.mxu1 %v10013_v23  ;;  %v12371_v49 = vld [vmem:[%s17259_s1 + $0x4] ss:$8 sps:$4 sm:$0xff]  }
  0xe4   : > { %2255 = vmatmul.mubr.bf16.gmra.mrb[52].mxu0 %v12023_v22  ;;  %2396 = vmatmul.mubr.bf16.gmra.mrb[52].mxu1 %v12023_v22 }
  0xe5   : > { %10223 = vmatprep.mubr.msk.bf16.mxu0 %vm1886_vm0, %v12032_v24  ;;  %10234 = vmatprep.mubr.msk.bf16.mxu1 %vm1886_vm0, %v12032_v24 }
  0xe6   : > { %2493 = vmatpush1.bf16.msra.mxu0 %v12121_v53  ;;  %2634 = vmatpush1.bf16.msra.mxu1 %v12270_v27  ;;  %v6555_v53 = vld [vmem:[%s17177_s5 + $0x8] sm:$0xff] }
  0xe7   : > { %2494 = vmatprep.subr.bf16.mxu0 %v12125_v54  ;;  %2635 = vmatprep.subr.bf16.mxu1 %v12273_v28  ;;  %v678_v54 = vld [vmem:[%s11862_s23 + $0x13c] sm:$0xff] }
  0xe8   : > { %6581 = vperm.xlu0 %11221, %v6555_v53   ;;  %v10099_v56 = vcombine.high %v678_v54, %v692_v55  ;;  %v10098_v12 = vcombine.low %v678_v54, %v692_v55 }
  0xea   : > { %2495 = vmatpush1.bf16.msra.mxu0 %v12141_v57  ;;  %2636 = vmatpush1.bf16.msra.mxu1 %v12285_v31  ;;  %v595_v57 = vld [vmem:[%s11862_s23 + $0x40] sm:$0xff] }
  0xeb   : > { %2496 = vmatprep.subr.bf16.mxu0 %v10067_v0  ;;  %2637 = vmatprep.subr.bf16.mxu1 %v12288_v32  ;;  %v12413_v14 = vcombine.high %v595_v57, %v609_v60  ;;  %v623_v0 = vld [vmem:[%s11862_s23 + $0x140] sm:$0xff] }
  0xec   : > { %2265 = vmatmul.mubr.bf16.gmra.mrb[56].mxu0 %v12060_v34  ;;  %2406 = vmatmul.mubr.bf16.gmra.mrb[56].mxu1 %v12060_v34  ;;  %v12423_v16 = vcombine.high %v623_v0, %v637_v15 }
  0xed   : > { %10224 = vmatprep.mubr.msk.bf16.mxu0 %vm1886_vm0, %v12069_v36  ;;  %10235 = vmatprep.mubr.msk.bf16.mxu1 %vm1886_vm0, %v12069_v36 }
  0xee   : > { %2497 = vmatpush1.bf16.msra.mxu0 %v10066_v17  ;;  %2638 = vmatpush1.bf16.msra.mxu1 %v12294_v37  ;;  %v651_v17 = vld [vmem:[%s11862_s23 + $0x44] sm:$0xff] }
  0xef   : > { %2498 = vmatprep.subr.bf16.mxu0 %v10095_v18  ;;  %2639 = vmatprep.subr.bf16.mxu1 %v12298_v38  ;;  %v665_v18 = vld [vmem:[%s11862_s23 + $0xc4] sm:$0xff] }
  0xf0   : > { %6591 = vperm.xlu0 %11221, %v6557_v7   ;;  %v12450_v25 = vcombine.low %v651_v17, %v665_v18 }
  0xf2   : > { %2499 = vmatpush1.bf16.msra.mxu0 %v10094_v21  ;;  %2640 = vmatpush1.bf16.msra.mxu1 %v12308_v41  ;;  %v12444_v21 = vcombine.high %v651_v17, %v665_v18 }
  0xf3   : > { %2500 = vmatprep.subr.bf16.mxu0 %v10013_v23  ;;  %2641 = vmatprep.subr.bf16.mxu1 %v12311_v42 }
  0xf4   : > { %2275 = vmatmul.mubr.bf16.gmra.mrb[60].mxu0 %v12107_v48  ;;  %2416 = vmatmul.mubr.bf16.gmra.mrb[60].mxu1 %v12107_v48 }
  0xf5   : > { %10225 = vmatprep.mubr.msk.bf16.mxu0 %vm1886_vm0, %v12115_v50  ;;  %10236 = vmatprep.mubr.msk.bf16.mxu1 %vm1886_vm0, %v12115_v50 }
  0xf6   : > { %2501 = vmatpush1.bf16.msra.mxu0 %v12270_v27  ;;  %2642 = vmatpush1.bf16.msra.mxu1 %v12316_v45 }
  0xf7   : > { %2502 = vmatprep.subr.bf16.mxu0 %v12273_v28  ;;  %2643 = vmatprep.subr.bf16.mxu1 %v12320_v46 }
  0xf8   : > { %6601 = vperm.xlu0 %11221, %v6559_v19  }
  0xfa   : > { %2503 = vmatpush1.bf16.msra.mxu0 %v12285_v31  ;;  %2644 = vmatpush1.bf16.msra.mxu1 %v12330_v47 }
  0xfb   : > { %2766 = vmatprep.subr.bf16.mxu0 %v10013_v23  ;;  %2907 = vmatprep.subr.bf16.mxu1 %v12311_v42  ;;  %v693_v23 = vld [vmem:[%s11862_s23 + $0x1c4] sm:$0xff] }
  0xfc   : > { %2285 = vmatmul.mubr.bf16.gmra.mrb[64].mxu0 %v12146_v58  ;;  %2426 = vmatmul.mubr.bf16.gmra.mrb[64].mxu1 %v12146_v58 }
  0xfd   : > { %10226 = vmatprep.mubr.msk.bf16.mxu0 %vm1886_vm0, %v12152_v59  ;;  %10237 = vmatprep.mubr.msk.bf16.mxu1 %vm1886_vm0, %v12152_v59 }
  0xfe   : > { %6611 = vperm.xlu0 %11221, %v6561_v29  }
 0x104   : > { %2295 = vmatmul.mubr.bf16.gmra.mrb[68].mxu0 %v12170_v61  ;;  %2436 = vmatmul.mubr.bf16.gmra.mrb[68].mxu1 %v12170_v61 }
 0x105   : > { %10227 = vmatprep.mubr.msk.bf16.mxu0 %vm1886_vm0, %v12175_v62  ;;  %10238 = vmatprep.mubr.msk.bf16.mxu1 %vm1886_vm0, %v12175_v62 }
 0x10c   : > { %2305 = vmatmul.mubr.bf16.gmra.mrb[72].mxu0 %v12186_v63  ;;  %2446 = vmatmul.mubr.bf16.gmra.mrb[72].mxu1 %v12186_v63 }
 0x10d   : > { %10228 = vmatprep.mubr.msk.bf16.mxu0 %vm1886_vm0, %v12191_v1  ;;  %10239 = vmatprep.mubr.msk.bf16.mxu1 %vm1886_vm0, %v12191_v1 }
 0x114   : > { %2315 = vmatmul.mubr.bf16.gmra.mrb[76].mxu0 %v12202_v2  ;;  %2456 = vmatmul.mubr.bf16.gmra.mrb[76].mxu1 %v12202_v2 }
 0x115   : > { %10229 = vmatprep.mubr.msk.bf16.mxu0 %vm1886_vm0, %v12207_v5  ;;  %10240 = vmatprep.mubr.msk.bf16.mxu1 %vm1886_vm0, %v12207_v5 }
 0x11c   : > { %2325 = vmatmul.mubr.bf16.gmra.mrb[80].mxu0 %v12221_v8  ;;  %2466 = vmatmul.mubr.bf16.gmra.mrb[80].mxu1 %v12221_v8 }
 0x11d   : > { %10230 = vmatprep.mubr.msk.bf16.mxu0 %vm1886_vm0, %v12223_v9  ;;  %10241 = vmatprep.mubr.msk.bf16.mxu1 %vm1886_vm0, %v12223_v9 }
 0x124   : > { %2335 = vmatmul.mubr.bf16.gmra.mrb[84].mxu0 %v12231_v10  ;;  %2476 = vmatmul.mubr.bf16.gmra.mrb[84].mxu1 %v12231_v10 }
 0x125   : > { %10242 = vmatprep.mubr.msk.bf16.mxu0 %vm1886_vm0, %v12371_v49  ;;  %10253 = vmatprep.mubr.msk.bf16.mxu1 %vm1886_vm0, %v12371_v49 }
 0x12c   : > { %2517 = vmatmul.mubr.bf16.vlgmr.msra.gmra.mrb[88].mxu0 %v11958_v3  ;;  %2658 = vmatmul.mubr.bf16.vlgmr.msra.gmra.mrb[88].mxu1 %v11958_v3  ;;  %v10071_v3 = vcombine.high %v650_v51, %v664_v52 }
 0x12d   : > { %10243 = vmatprep.mubr.msk.bf16.mxu0 %vm1886_vm0, %v11967_v6  ;;  %10254 = vmatprep.mubr.msk.bf16.mxu1 %vm1886_vm0, %v11967_v6  ;;  %v10070_v6 = vcombine.low %v650_v51, %v664_v52 }
 0x12e   : > { %2767 = vmatpush1.bf16.msra.mxu0 %v12270_v27  ;;  %2908 = vmatpush1.bf16.msra.mxu1 %v12316_v45  ;;  %v714_v27 = vld [vmem:[%s11862_s23 + $0x48] sm:$0xff] }
 0x12f   : > { %2768 = vmatprep.subr.bf16.mxu0 %v12273_v28  ;;  %2909 = vmatprep.subr.bf16.mxu1 %v12320_v46  ;;  %v728_v28 = vld [vmem:[%s11862_s23 + $0xc8] sm:$0xff] }
 0x132   : > { %2769 = vmatpush1.bf16.msra.mxu0 %v12285_v31  ;;  %2910 = vmatpush1.bf16.msra.mxu1 %v12330_v47  ;;  %v12473_v31 = vcombine.high %v714_v27, %v728_v28 }
 0x133   : > { %2770 = vmatprep.subr.bf16.mxu0 %v12288_v32  ;;  %2911 = vmatprep.subr.bf16.mxu1 %v10071_v3  ;;  %v12475_v32 = vpop.permute.xlu0 %1687 }
 0x134   : > { %2527 = vmatmul.mubr.bf16.gmra.mrb[92].mxu0 %v11991_v11  ;;  %2668 = vmatmul.mubr.bf16.gmra.mrb[92].mxu1 %v11991_v11  ;;  %v6554_v11 = vld [vmem:[%s17177_s5] sm:$0xff] }
 0x135   : > { %10244 = vmatprep.mubr.msk.bf16.mxu0 %vm1886_vm0, %v12000_v13  ;;  %10255 = vmatprep.mubr.msk.bf16.mxu1 %vm1886_vm0, %v12000_v13  ;;  %v12419_v13 = vcombine.low %v595_v57, %v609_v60  ;;  %v6565_v60 = vld [vmem:[%s17177_s5 + $0x58] sm:$0xff] }
 0x136   : > { %2771 = vmatpush1.bf16.msra.mxu0 %v12294_v37  ;;  %2912 = vmatpush1.bf16.msra.mxu1 %v10070_v6  ;;  %v12485_v37 = vcombine.high %v742_v33, %v756_v35 }
 0x137   : > { %2772 = vmatprep.subr.bf16.mxu0 %v12298_v38  ;;  %2913 = vmatprep.subr.bf16.mxu1 %v10099_v56  ;;  %v6563_v38 = vld [vmem:[%s17177_s5 + $0x48] sm:$0xff] }
 0x138   : > { %6576 = vperm.xlu1 %11222, %v6554_v11   ;;  %6621 = vperm.xlu0 %11221, %v6563_v38  }
 0x13a   : > { %2773 = vmatpush1.bf16.msra.mxu0 %v12308_v41  ;;  %2914 = vmatpush1.bf16.msra.mxu1 %v10098_v12 }
 0x13b   : > { %2774 = vmatprep.subr.bf16.mxu0 %v12311_v42  ;;  %2915 = vmatprep.subr.bf16.mxu1 %v12413_v14  ;;  %v12505_v42 = vcombine.low %v742_v33, %v756_v35 }
 0x13c   : > { %2537 = vmatmul.mubr.bf16.gmra.mrb[96].mxu0 %v12023_v22  ;;  %2678 = vmatmul.mubr.bf16.gmra.mrb[96].mxu1 %v12023_v22  ;;  %v12441_v22 = vcombine.low %v623_v0, %v637_v15  ;;  %v6562_v15 = vld [vmem:[%s17177_s5 + $0x40] sm:$0xff] }
 0x13d   : > { %10245 = vmatprep.mubr.msk.bf16.mxu0 %vm1886_vm0, %v12032_v24  ;;  %10256 = vmatprep.mubr.msk.bf16.mxu1 %vm1886_vm0, %v12032_v24  ;;  %v679_v24 = vld [vmem:[%s11862_s23 + $0x144] sm:$0xff] }
 0x13e   : > { %2775 = vmatpush1.bf16.msra.mxu0 %v12316_v45  ;;  %2916 = vmatpush1.bf16.msra.mxu1 %v12419_v13  ;;  %v12454_v26 = vcombine.high %v679_v24, %v693_v23 }
 0x13f   : > { %2776 = vmatprep.subr.bf16.mxu0 %v12320_v46  ;;  %2917 = vmatprep.subr.bf16.mxu1 %v12423_v16 }
 0x140   : > { %6586 = vperm.xlu1 %11222, %v6556_v20   ;;  %6631 = vperm.xlu0 %11221, %v6565_v60  }
 0x142   : > { %2777 = vmatpush1.bf16.msra.mxu0 %v12330_v47  ;;  %2918 = vmatpush1.bf16.msra.mxu1 %v12441_v22 }
 0x143   : > { %2778 = vmatprep.subr.bf16.mxu0 %v10071_v3  ;;  %2919 = vmatprep.subr.bf16.mxu1 %v12444_v21 }
 0x144   : > { %2547 = vmatmul.mubr.bf16.gmra.mrb[100].mxu0 %v12060_v34  ;;  %2688 = vmatmul.mubr.bf16.gmra.mrb[100].mxu1 %v12060_v34  ;;  %v12470_v34 = vcombine.low %v679_v24, %v693_v23 }
 0x145   : > { %10246 = vmatprep.mubr.msk.bf16.mxu0 %vm1886_vm0, %v12069_v36  ;;  %10257 = vmatprep.mubr.msk.bf16.mxu1 %vm1886_vm0, %v12069_v36  ;;  %v12481_v36 = vcombine.low %v714_v27, %v728_v28  ;;  %v12536_v27 = vpop.permute.xlu1 %1702 }
 0x146   : > { %2779 = vmatpush1.bf16.msra.mxu0 %v10070_v6  ;;  %2920 = vmatpush1.bf16.msra.mxu1 %v12450_v25  ;;  %17264 = vst [vmem:[#allocation9_spill] sm:$0xff] %v12536_v27 }
 0x147   : > { %2780 = vmatprep.subr.bf16.mxu0 %v10099_v56  ;;  %2921 = vmatprep.subr.bf16.mxu1 %v12454_v26 }
 0x148   : > { %6596 = vperm.xlu1 %11222, %v6558_v30  }
 0x14a   : > { %2781 = vmatpush1.bf16.msra.mxu0 %v10098_v12  ;;  %2922 = vmatpush1.bf16.msra.mxu1 %v12470_v34 }
 0x14b   : > { %2782 = vmatprep.subr.bf16.mxu0 %v12413_v14  ;;  %2923 = vmatprep.subr.bf16.mxu1 %v12473_v31 }
 0x14c   : > { %2557 = vmatmul.mubr.bf16.gmra.mrb[104].mxu0 %v12107_v48  ;;  %2698 = vmatmul.mubr.bf16.gmra.mrb[104].mxu1 %v12107_v48  ;;  %v12501_v48 = vpop.permute.xlu0 %1692 }
 0x14d   : > { %10247 = vmatprep.mubr.msk.bf16.mxu0 %vm1886_vm0, %v12115_v50  ;;  %10258 = vmatprep.mubr.msk.bf16.mxu1 %vm1886_vm0, %v12115_v50 }
 0x14e   : > { %2783 = vmatpush1.bf16.msra.mxu0 %v12419_v13  ;;  %2924 = vmatpush1.bf16.msra.mxu1 %v12481_v36 }
 0x14f   : > { %v1954_v41 = vpop.f32.mrb[0].mxu0  ;;  %2784 = vmatprep.subr.bf16.mxu0 %v12423_v16  ;;  %v2095_v44 = vpop.f32.mrb[0].mxu1  ;;  %2925 = vmatprep.subr.bf16.mxu1 %v12485_v37 }
 0x150   : > { %v1955_v43 = vadd.f32 %v1954_v41, %v12475_v32  ;;  %v1956_v50 = vpop.f32.mrb[1].mxu0  ;;  %v2096_v46 = vadd.f32 %v2095_v44, %v12475_v32  ;;  %v2097_v51 = vpop.f32.mrb[1].mxu1  ;;  %6606 = vperm.xlu1 %11222, %v6560_v40  }
 0x151   : > { %v1957_v45 = vadd.f32 %v1956_v50, %v12475_v32  ;;  %v1958_v47 = vpop.f32.mrb[2].mxu0  ;;  %v2098_v53 = vadd.f32 %v2097_v51, %v12475_v32  ;;  %v2099_v54 = vpop.f32.mrb[2].mxu1 }
 0x152   : > { %v1959_v52 = vadd.f32 %v1958_v47, %v12501_v48  ;;  %v1960_v3 = vpop.f32.mrb[3].mxu0  ;;  %2785 = vmatpush1.bf16.msra.mxu0 %v12441_v22  ;;  %v3896_v55 = vmax.f32 %v2096_v46, 0.0  ;;  %v2100_v56 = vadd.f32 %v2099_v54, %v12501_v48  ;;  %v2101_v57 = vpop.f32.mrb[3].mxu1  ;;  %2926 = vmatpush1.bf16.msra.mxu1 %v12505_v42  ;;  %v3894_v7 = vmax.f32 %v1955_v43, 0.0 }
 0x153   : > { %v1961_v6 = vadd.f32 %v1960_v3, %v12501_v48  ;;  %3048 = vmatprep.subr.bf16.mxu0 %v12413_v14  ;;  %v3897_v11 = vmax.f32 %v2098_v53, 0.0  ;;  %v2102_v0 = vadd.f32 %v2101_v57, %v12501_v48  ;;  %3189 = vmatprep.subr.bf16.mxu1 %v12473_v31  ;;  %v3895_v17 = vmax.f32 %v1957_v45, 0.0  ;;  %v6569_v3 = vld [vmem:[%s17177_s5 + $0x78] sm:$0xff]  ;;  %v6566_v57 = vld [vmem:[%s17177_s5 + $0x60] sm:$0xff] }
 0x154   : > { %v3922_v12 = vmax.f32 %v1959_v52, 0.0  ;;  %2567 = vmatmul.mubr.bf16.gmra.mrb[108].mxu0 %v12146_v58  ;;  %v3924_v14 = vmax.f32 %v2100_v56, 0.0  ;;  %2708 = vmatmul.mubr.bf16.gmra.mrb[108].mxu1 %v12146_v58  ;;  %v6567_v58 = vld [vmem:[%s17177_s5 + $0x68] sm:$0xff] }
 0x155   : > { %v3923_v18 = vmax.f32 %v1961_v6, 0.0  ;;  %10248 = vmatprep.mubr.msk.bf16.mxu0 %vm1886_vm0, %v12152_v59  ;;  %v3925_v20 = vmax.f32 %v2102_v0, 0.0  ;;  %10259 = vmatprep.mubr.msk.bf16.mxu1 %vm1886_vm0, %v12152_v59  ;;  %v6564_v59 = vld [vmem:[%s17177_s5 + $0x50] sm:$0xff] }
 0x156   : > { %v12530_v19 = vpack.c.bf16 %v3922_v12, %v3894_v7  ;;  %v12534_v24 = vpack.c.bf16 %v3924_v14, %v3896_v55  ;;  %6616 = vperm.xlu1 %11222, %v6562_v15   ;;  %6641 = vperm.xlu0 %11221, %v6567_v58   ;;  %v12574_v14 = vpop.permute.xlu1 %1712 }
 0x157   : > { %v1964_v23 = vpop.f32.mrb[4].mxu0  ;;  %v12541_v28 = vpack.c.bf16 %v3923_v18, %v3895_v17  ;;  %v2105_v33 = vpop.f32.mrb[4].mxu1  ;;  %v12547_v35 = vpack.c.bf16 %v3925_v20, %v3897_v11 }
 0x158   : > { %17262 = vst [vmem:[#allocation7_spill] sm:$0xff] %v12530_v19  ;;  %17263 = vst [vmem:[#allocation8_spill] sm:$0xff] %v12534_v24  ;;  %v1965_v29 = vadd.f32 %v1964_v23, %v12495_v39  ;;  %v1966_v30 = vpop.f32.mrb[5].mxu0  ;;  %v2106_v40 = vadd.f32 %v2105_v33, %v12495_v39  ;;  %v2107_v43 = vpop.f32.mrb[5].mxu1 }
 0x159   : > { %17265 = vst [vmem:[#allocation10_spill] sm:$0xff] %v12541_v28  ;;  %17266 = vst [vmem:[#allocation11_spill] sm:$0xff] %v12547_v35  ;;  %v1967_v38 = vadd.f32 %v1966_v30, %v12495_v39  ;;  %v1968_v41 = vpop.f32.mrb[6].mxu0  ;;  %v2108_v44 = vadd.f32 %v2107_v43, %v12495_v39  ;;  %v2109_v46 = vpop.f32.mrb[6].mxu1 }
 0x15a   : > { %v1969_v50 = vadd.f32 %v1968_v41, %v12536_v27  ;;  %v1970_v45 = vpop.f32.mrb[7].mxu0  ;;  %v3952_v47 = vmax.f32 %v2106_v40, 0.0  ;;  %v2110_v52 = vadd.f32 %v2109_v46, %v12536_v27  ;;  %v2111_v53 = vpop.f32.mrb[7].mxu1  ;;  %6626 = vperm.xlu1 %11222, %v6564_v59   ;;  %v3950_v54 = vmax.f32 %v1965_v29, 0.0  ;;  %6651 = vperm.xlu0 %11221, %v6569_v3  }
 0x15b   : > { %v1971_v51 = vadd.f32 %v1970_v45, %v12536_v27  ;;  %v3953_v6 = vmax.f32 %v2108_v44, 0.0  ;;  %v2112_v56 = vadd.f32 %v2111_v53, %v12536_v27  ;;  %v3951_v60 = vmax.f32 %v1967_v38, 0.0  ;;  %v12564_v11 = vpop.permute.xlu0 %1707 }
 0x15c   : > { %v3978_v55 = vmax.f32 %v1969_v50, 0.0  ;;  %2577 = vmatmul.mubr.bf16.gmra.mrb[112].mxu0 %v12170_v61  ;;  %v3980_v12 = vmax.f32 %v2110_v52, 0.0  ;;  %2718 = vmatmul.mubr.bf16.gmra.mrb[112].mxu1 %v12170_v61  ;;  %v6571_v61 = vld [vmem:[%s17177_s5 + $0x88] sm:$0xff]  ;;  %v6573_v52 = vld [vmem:[%s17177_s5 + $0x98] sm:$0xff] }
 0x15d   : > { %v3979_v7 = vmax.f32 %v1971_v51, 0.0  ;;  %10249 = vmatprep.mubr.msk.bf16.mxu0 %vm1886_vm0, %v12175_v62  ;;  %v3981_v15 = vmax.f32 %v2112_v56, 0.0  ;;  %10260 = vmatprep.mubr.msk.bf16.mxu1 %vm1886_vm0, %v12175_v62  ;;  %v6568_v62 = vld [vmem:[%s17177_s5 + $0x70] sm:$0xff] }
 0x15e   : > { %v12568_v0 = vpack.c.bf16 %v3978_v55, %v3950_v54  ;;  %v12572_v17 = vpack.c.bf16 %v3980_v12, %v3952_v47  ;;  %6636 = vperm.xlu1 %11222, %v6566_v57   ;;  %6661 = vperm.xlu0 %11221, %v6571_v61  }
 0x15f   : > { %v1974_v18 = vpop.f32.mrb[8].mxu0  ;;  %v12579_v20 = vpack.c.bf16 %v3979_v7, %v3951_v60  ;;  %v2115_v29 = vpop.f32.mrb[8].mxu1  ;;  %v12585_v30 = vpack.c.bf16 %v3981_v15, %v3953_v6  ;;  %v6570_v6 = vld [vmem:[%s17177_s5 + $0x80] sm:$0xff] }
 0x160   : > { %17267 = vst [vmem:[#allocation12_spill] sm:$0xff] %v12568_v0  ;;  %17268 = vst [vmem:[#allocation13_spill] sm:$0xff] %v12572_v17  ;;  %v1975_v23 = vadd.f32 %v1974_v18, %v12564_v11  ;;  %v1976_v58 = vpop.f32.mrb[9].mxu0  ;;  %v2116_v59 = vadd.f32 %v2115_v29, %v12564_v11  ;;  %v2117_v40 = vpop.f32.mrb[9].mxu1 }
 0x161   : > { %17269 = vst [vmem:[#allocation14_spill] sm:$0xff] %v12579_v20  ;;  %17270 = vst [vmem:[#allocation15_spill] sm:$0xff] %v12585_v30  ;;  %v1977_v33 = vadd.f32 %v1976_v58, %v12564_v11  ;;  %v1978_v38 = vpop.f32.mrb[10].mxu0  ;;  %v2118_v43 = vadd.f32 %v2117_v40, %v12564_v11  ;;  %v2119_v44 = vpop.f32.mrb[10].mxu1 }
 0x162   : > { %v1979_v41 = vadd.f32 %v1978_v38, %v12574_v14  ;;  %v1980_v50 = vpop.f32.mrb[11].mxu0  ;;  %v4008_v45 = vmax.f32 %v2116_v59, 0.0  ;;  %v2120_v47 = vadd.f32 %v2119_v44, %v12574_v14  ;;  %v2121_v51 = vpop.f32.mrb[11].mxu1  ;;  %6646 = vperm.xlu1 %11222, %v6568_v62   ;;  %v4006_v53 = vmax.f32 %v1975_v23, 0.0  ;;  %6671 = vperm.xlu0 %11221, %v6573_v52  }
 0x163   : > { %v1981_v46 = vadd.f32 %v1980_v50, %v12574_v14  ;;  %v4009_v54 = vmax.f32 %v2118_v43, 0.0  ;;  %v2122_v55 = vadd.f32 %v2121_v51, %v12574_v14  ;;  %v4007_v56 = vmax.f32 %v1977_v33, 0.0  ;;  %v12602_v7 = vpop.permute.xlu0 %1717  ;;  %v12612_v23 = vpop.permute.xlu1 %1722 }
 0x164   : > { %v4034_v3 = vmax.f32 %v1979_v41, 0.0  ;;  %2587 = vmatmul.mubr.bf16.gmra.mrb[116].mxu0 %v12186_v63  ;;  %v4036_v60 = vmax.f32 %v2120_v47, 0.0  ;;  %2728 = vmatmul.mubr.bf16.gmra.mrb[116].mxu1 %v12186_v63  ;;  %17273 = vst [vmem:[#allocation18_spill] sm:$0xff] %v12612_v23  ;;  %v9116_v63 = vld [vmem:[%s17180_s8 + $0x8] sm:$0xff] }
 0x165   : > { %v4035_v57 = vmax.f32 %v1981_v46, 0.0  ;;  %10250 = vmatprep.mubr.msk.bf16.mxu0 %vm1886_vm0, %v12191_v1  ;;  %v4037_v15 = vmax.f32 %v2122_v55, 0.0  ;;  %10261 = vmatprep.mubr.msk.bf16.mxu1 %vm1886_vm0, %v12191_v1  ;;  %v6572_v1 = vld [vmem:[%s17177_s5 + $0x90] sm:$0xff] }
 0x166   : > { %v12606_v12 = vpack.c.bf16 %v4034_v3, %v4006_v53  ;;  %v12610_v18 = vpack.c.bf16 %v4036_v60, %v4008_v45  ;;  %6656 = vperm.xlu1 %11222, %v6570_v6   ;;  %9137 = vperm.xlu0 %11221, %v9116_v63   ;;  %v9118_v3 = vld [vmem:[%s17180_s8 + $0x18] sm:$0xff] }
 0x167   : > { %v1984_v61 = vpop.f32.mrb[12].mxu0  ;;  %v12617_v58 = vpack.c.bf16 %v4035_v57, %v4007_v56  ;;  %v2125_v33 = vpop.f32.mrb[12].mxu1  ;;  %v12623_v59 = vpack.c.bf16 %v4037_v15, %v4009_v54  ;;  %v9115_v57 = vld [vmem:[%s17180_s8] sm:$0xff] }
 0x168   : > { %17271 = vst [vmem:[#allocation16_spill] sm:$0xff] %v12606_v12  ;;  %17272 = vst [vmem:[#allocation17_spill] sm:$0xff] %v12610_v18  ;;  %v1985_v29 = vadd.f32 %v1984_v61, %v12602_v7  ;;  %v1986_v62 = vpop.f32.mrb[13].mxu0  ;;  %v2126_v40 = vadd.f32 %v2125_v33, %v12602_v7  ;;  %v2127_v43 = vpop.f32.mrb[13].mxu1 }
 0x169   : > { %17274 = vst [vmem:[#allocation19_spill] sm:$0xff] %v12617_v58  ;;  %17275 = vst [vmem:[#allocation20_spill] sm:$0xff] %v12623_v59  ;;  %v1987_v38 = vadd.f32 %v1986_v62, %v12602_v7  ;;  %v1988_v41 = vpop.f32.mrb[14].mxu0  ;;  %v2128_v44 = vadd.f32 %v2127_v43, %v12602_v7  ;;  %v2129_v46 = vpop.f32.mrb[14].mxu1 }
 0x16a   : > { %v1989_v50 = vadd.f32 %v1988_v41, %v12612_v23  ;;  %v1990_v45 = vpop.f32.mrb[15].mxu0  ;;  %v4064_v47 = vmax.f32 %v2126_v40, 0.0  ;;  %v2130_v52 = vadd.f32 %v2129_v46, %v12612_v23  ;;  %v2131_v53 = vpop.f32.mrb[15].mxu1  ;;  %6666 = vperm.xlu1 %11222, %v6572_v1   ;;  %v4062_v54 = vmax.f32 %v1985_v29, 0.0  ;;  %9147 = vperm.xlu0 %11221, %v9118_v3  }
 0x16b   : > { %v1991_v51 = vadd.f32 %v1990_v45, %v12612_v23  ;;  %v4065_v6 = vmax.f32 %v2128_v44, 0.0  ;;  %v2132_v56 = vadd.f32 %v2131_v53, %v12612_v23  ;;  %v4063_v60 = vmax.f32 %v1987_v38, 0.0  ;;  %v12640_v63 = vpop.permute.xlu0 %1727  ;;  %v12650_v38 = vpop.permute.xlu1 %1732 }
 0x16c   : > { %v4090_v55 = vmax.f32 %v1989_v50, 0.0  ;;  %2597 = vmatmul.mubr.bf16.gmra.mrb[120].mxu0 %v12202_v2  ;;  %v4092_v61 = vmax.f32 %v2130_v52, 0.0  ;;  %2738 = vmatmul.mubr.bf16.gmra.mrb[120].mxu1 %v12202_v2  ;;  %17278 = vst [vmem:[#allocation23_spill] sm:$0xff] %v12650_v38  ;;  %v9120_v2 = vld [vmem:[%s17180_s8 + $0x28] sm:$0xff] }
 0x16d   : > { %v4091_v15 = vmax.f32 %v1991_v51, 0.0  ;;  %10251 = vmatprep.mubr.msk.bf16.mxu0 %vm1886_vm0, %v12207_v5  ;;  %v4093_v62 = vmax.f32 %v2132_v56, 0.0  ;;  %10262 = vmatprep.mubr.msk.bf16.mxu1 %vm1886_vm0, %v12207_v5  ;;  %v9117_v5 = vld [vmem:[%s17180_s8 + $0x10] sm:$0xff] }
 0x16e   : > { %v12644_v29 = vpack.c.bf16 %v4090_v55, %v4062_v54  ;;  %v12648_v33 = vpack.c.bf16 %v4092_v61, %v4064_v47  ;;  %9132 = vperm.xlu1 %11222, %v9115_v57   ;;  %9157 = vperm.xlu0 %11221, %v9120_v2   ;;  %v9119_v2 = vld [vmem:[%s17180_s8 + $0x20] sm:$0xff] }
 0x16f   : > { %v1994_v1 = vpop.f32.mrb[16].mxu0  ;;  %v12655_v40 = vpack.c.bf16 %v4091_v15, %v4063_v60  ;;  %v2135_v50 = vpop.f32.mrb[16].mxu1  ;;  %v12661_v44 = vpack.c.bf16 %v4093_v62, %v4065_v6  ;;  %v9122_v60 = vld [vmem:[%s17180_s8 + $0x38] sm:$0xff] }
 0x170   : > { %17276 = vst [vmem:[#allocation21_spill] sm:$0xff] %v12644_v29  ;;  %17277 = vst [vmem:[#allocation22_spill] sm:$0xff] %v12648_v33  ;;  %v1995_v41 = vadd.f32 %v1994_v1, %v12640_v63  ;;  %v1996_v43 = vpop.f32.mrb[17].mxu0  ;;  %v2136_v46 = vadd.f32 %v2135_v50, %v12640_v63  ;;  %v2137_v51 = vpop.f32.mrb[17].mxu1  ;;  %v694_v29 = vld [vmem:[%s11862_s23 + $0x1cc] sm:$0xff] }
 0x171   : > { %17279 = vst [vmem:[#allocation24_spill] sm:$0xff] %v12655_v40  ;;  %17280 = vst [vmem:[#allocation25_spill] sm:$0xff] %v12661_v44  ;;  %v1997_v45 = vadd.f32 %v1996_v43, %v12640_v63  ;;  %v1998_v47 = vpop.f32.mrb[18].mxu0  ;;  %v2138_v53 = vadd.f32 %v2137_v51, %v12640_v63  ;;  %v2139_v54 = vpop.f32.mrb[18].mxu1 }
 0x172   : > { %v1999_v52 = vadd.f32 %v1998_v47, %v12650_v38  ;;  %v2000_v3 = vpop.f32.mrb[19].mxu0  ;;  %v4120_v55 = vmax.f32 %v2136_v46, 0.0  ;;  %v2140_v57 = vadd.f32 %v2139_v54, %v12650_v38  ;;  %v2141_v6 = vpop.f32.mrb[19].mxu1  ;;  %9142 = vperm.xlu1 %11222, %v9117_v5   ;;  %v4118_v15 = vmax.f32 %v1995_v41, 0.0  ;;  %9167 = vperm.xlu0 %11221, %v9122_v60  }
 0x173   : > { %v2001_v56 = vadd.f32 %v2000_v3, %v12650_v38  ;;  %v4121_v62 = vmax.f32 %v2138_v53, 0.0  ;;  %v2142_v1 = vadd.f32 %v2141_v6, %v12650_v38  ;;  %v4119_v43 = vmax.f32 %v1997_v45, 0.0  ;;  %v12678_v5 = vpop.permute.xlu0 %1737  ;;  %v12688_v45 = vpop.permute.xlu1 %1742 }
 0x174   : > { %v4146_v61 = vmax.f32 %v1999_v52, 0.0  ;;  %2607 = vmatmul.mubr.bf16.gmra.mrb[124].mxu0 %v12221_v8  ;;  %v4148_v46 = vmax.f32 %v2140_v57, 0.0  ;;  %2748 = vmatmul.mubr.bf16.gmra.mrb[124].mxu1 %v12221_v8  ;;  %17281 = vst [vmem:[#allocation26_spill] sm:$0xff] %v12678_v5  ;;  %17284 = vst [vmem:[#allocation29_spill] sm:$0xff] %v12688_v45  ;;  %v9124_v8 = vld [vmem:[%s17180_s8 + $0x48] sm:$0xff]  ;;  %v9121_v57 = vld [vmem:[%s17180_s8 + $0x30] sm:$0xff] }
 0x175   : > { %v4147_v50 = vmax.f32 %v2001_v56, 0.0  ;;  %10252 = vmatprep.mubr.msk.bf16.mxu0 %vm1886_vm0, %v12223_v9  ;;  %v4149_v47 = vmax.f32 %v2142_v1, 0.0  ;;  %10263 = vmatprep.mubr.msk.bf16.mxu1 %vm1886_vm0, %v12223_v9 }
 0x176   : > { %v12682_v41 = vpack.c.bf16 %v4146_v61, %v4118_v15  ;;  %v12686_v51 = vpack.c.bf16 %v4148_v46, %v4120_v55  ;;  %9152 = vperm.xlu1 %11222, %v9119_v2   ;;  %9177 = vperm.xlu0 %11221, %v9124_v8   ;;  %v9123_v8 = vld [vmem:[%s17180_s8 + $0x40] sm:$0xff] }
 0x177   : > { %v2004_v52 = vpop.f32.mrb[20].mxu0  ;;  %v12693_v53 = vpack.c.bf16 %v4147_v50, %v4119_v43  ;;  %v2145_v56 = vpop.f32.mrb[20].mxu1  ;;  %v12699_v55 = vpack.c.bf16 %v4149_v47, %v4121_v62  ;;  %v9126_v47 = vld [vmem:[%s17180_s8 + $0x58] sm:$0xff] }
 0x178   : > { %17282 = vst [vmem:[#allocation27_spill] sm:$0xff] %v12682_v41  ;;  %17283 = vst [vmem:[#allocation28_spill] sm:$0xff] %v12686_v51  ;;  %v2005_v3 = vadd.f32 %v2004_v52, %v12678_v5  ;;  %v2006_v54 = vpop.f32.mrb[21].mxu0  ;;  %v2146_v60 = vadd.f32 %v2145_v56, %v12678_v5  ;;  %v2147_v61 = vpop.f32.mrb[21].mxu1 }
 0x179   : > { %17285 = vst [vmem:[#allocation30_spill] sm:$0xff] %v12693_v53  ;;  %17286 = vst [vmem:[#allocation31_spill] sm:$0xff] %v12699_v55  ;;  %v2007_v6 = vadd.f32 %v2006_v54, %v12678_v5  ;;  %v2008_v15 = vpop.f32.mrb[22].mxu0  ;;  %v2148_v2 = vadd.f32 %v2147_v61, %v12678_v5  ;;  %v2149_v50 = vpop.f32.mrb[22].mxu1 }
 0x17a   : > { %v2009_v1 = vadd.f32 %v2008_v15, %v12688_v45  ;;  %v2010_v43 = vpop.f32.mrb[23].mxu0  ;;  %v4176_v46 = vmax.f32 %v2146_v60, 0.0  ;;  %v2150_v4 = vadd.f32 %v2149_v50, %v12688_v45  ;;  %v2151_v62 = vpop.f32.mrb[23].mxu1  ;;  %9162 = vperm.xlu1 %11222, %v9121_v57   ;;  %v4174_v54 = vmax.f32 %v2005_v3, 0.0  ;;  %9187 = vperm.xlu0 %11221, %v9126_v47  }
 0x17b   : > { %v2011_v52 = vadd.f32 %v2010_v43, %v12688_v45  ;;  %v4177_v51 = vmax.f32 %v2148_v2, 0.0  ;;  %v2152_v15 = vadd.f32 %v2151_v62, %v12688_v45  ;;  %v4175_v60 = vmax.f32 %v2007_v6, 0.0  ;;  %v12716_v57 = vpop.permute.xlu0 %1747  ;;  %v12726_v6 = vpop.permute.xlu1 %1752 }
 0x17c   : > { %v4202_v56 = vmax.f32 %v2009_v1, 0.0  ;;  %2617 = vmatmul.mubr.bf16.gmra.mrb[128].mxu0 %v12231_v10  ;;  %v4204_v43 = vmax.f32 %v2150_v4, 0.0  ;;  %2758 = vmatmul.mubr.bf16.gmra.mrb[128].mxu1 %v12231_v10  ;;  %v9128_v4 = vld [vmem:[%s17180_s8 + $0x68] sm:$0xff] }
 0x17d   : > { %v4203_v61 = vmax.f32 %v2011_v52, 0.0  ;;  %10264 = vmatprep.mubr.msk.bf16.mxu0 %vm1886_vm0, %v12371_v49  ;;  %v4205_v1 = vmax.f32 %v2152_v15, 0.0  ;;  %10275 = vmatprep.mubr.msk.bf16.mxu1 %vm1886_vm0, %v12371_v49  ;;  %v9125_v49 = vld [vmem:[%s17180_s8 + $0x50] sm:$0xff] }
 0x17e   : > { %v12720_v3 = vpack.c.bf16 %v4202_v56, %v4174_v54  ;;  %v12724_v2 = vpack.c.bf16 %v4204_v43, %v4176_v46  ;;  %9172 = vperm.xlu1 %11222, %v9123_v8   ;;  %9197 = vperm.xlu0 %11221, %v9128_v4   ;;  %v652_v4 = vld [vmem:[%s11862_s23 + $0x4c] sm:$0xff] }
 0x17f   : > { %v2014_v50 = vpop.f32.mrb[24].mxu0  ;;  %v12731_v52 = vpack.c.bf16 %v4203_v61, %v4175_v60  ;;  %v2155_v56 = vpop.f32.mrb[24].mxu1  ;;  %v12737_v46 = vpack.c.bf16 %v4205_v1, %v4177_v51 }
 0x180   : > { %17287 = vst [vmem:[#allocation32_spill] sm:$0xff] %v12720_v3  ;;  %17288 = vst [vmem:[#allocation33_spill] sm:$0xff] %v12724_v2  ;;  %v2015_v62 = vadd.f32 %v2014_v50, %v12716_v57  ;;  %v2016_v54 = vpop.f32.mrb[25].mxu0  ;;  %v2156_v47 = vadd.f32 %v2155_v56, %v12716_v57  ;;  %v2157_v8 = vpop.f32.mrb[25].mxu1 }
 0x181   : > { %17289 = vst [vmem:[#allocation34_spill] sm:$0xff] %v12731_v52  ;;  %17290 = vst [vmem:[#allocation35_spill] sm:$0xff] %v12737_v46  ;;  %v2018_v15 = vpop.f32.mrb[26].mxu0  ;;  %v2017_v43 = vadd.f32 %v2016_v54, %v12716_v57  ;;  %v2158_v60 = vadd.f32 %v2157_v8, %v12716_v57  ;;  %v2159_v50 = vpop.f32.mrb[26].mxu1 }
 0x182   : > { %v2019_v2 = vadd.f32 %v2018_v15, %v12726_v6  ;;  %v2020_v61 = vpop.f32.mrb[27].mxu0  ;;  %v4232_v3 = vmax.f32 %v2156_v47, 0.0  ;;  %v2160_v51 = vadd.f32 %v2159_v50, %v12726_v6  ;;  %v2161_v1 = vpop.f32.mrb[27].mxu1  ;;  %9182 = vperm.xlu1 %11222, %v9125_v49   ;;  %v4230_v56 = vmax.f32 %v2015_v62, 0.0  ;;  %v12749_v15 = vld [vmem:[%s17259_s1] ss:$8 sps:$4 sm:$0xff]  }
 0x183   : > { %v2021_v52 = vadd.f32 %v2020_v61, %v12726_v6  ;;  %v4233_v41 = vmax.f32 %v2158_v60, 0.0  ;;  %v2162_v54 = vadd.f32 %v2161_v1, %v12726_v6  ;;  %v666_v47 = vld [vmem:[%s11862_s23 + $0xcc] sm:$0xff]  ;;  %v12755_v50 = vpop.permute.xlu0 %1757  ;;  %v9602_v62 = vld [vmem:[%s17182_s10] sm:$0xff]  ;;  %v4231_v49 = vmax.f32 %v2017_v43, 0.0  ;;  %v12777_v53 = vpop.permute.xlu1 %1762 }
 0x184   : > { %v4258_v46 = vmax.f32 %v2019_v2, 0.0  ;;  %2799 = vmatmul.mubr.bf16.vlgmr.msra.gmra.mrb[132].mxu0 %v12749_v15  ;;  %v4260_v61 = vmax.f32 %v2160_v51, 0.0  ;;  %2940 = vmatmul.mubr.bf16.vlgmr.msra.gmra.mrb[132].mxu1 %v12749_v15  ;;  %v12760_v2 = vld [vmem:[%s17259_s1 + $0x14] ss:$8 sps:$4 sm:$0xff]   ;;  %v9127_v51 = vld [vmem:[%s17180_s8 + $0x60] sm:$0xff] }
 0x185   : > { %v4259_v8 = vmax.f32 %v2021_v52, 0.0  ;;  %10265 = vmatprep.mubr.msk.bf16.mxu0 %vm1886_vm0, %v12760_v2  ;;  %v4261_v52 = vmax.f32 %v2162_v54, 0.0  ;;  %10276 = vmatprep.mubr.msk.bf16.mxu1 %vm1886_vm0, %v12760_v2 }
 0x186   : > { %v12767_v60 = vpack.c.bf16 %v4258_v46, %v4230_v56  ;;  %3049 = vmatpush1.bf16.msra.mxu0 %v12419_v13  ;;  %v12775_v1 = vpack.c.bf16 %v4260_v61, %v4232_v3  ;;  %3190 = vmatpush1.bf16.msra.mxu1 %v12481_v36  ;;  %v12781_v46 = vcombine.high %v652_v4, %v666_v47 }
 0x187   : > { %v2024_v55 = vpop.f32.mrb[28].mxu0  ;;  %3050 = vmatprep.subr.bf16.mxu0 %v12423_v16  ;;  %v2165_v56 = vpop.f32.mrb[28].mxu1  ;;  %3191 = vmatprep.subr.bf16.mxu1 %v12485_v37  ;;  %v12785_v3 = vpack.c.bf16 %v4259_v8, %v4231_v49  ;;  %v12787_v54 = vpack.c.bf16 %v4261_v52, %v4233_v41  ;;  %v680_v16 = vld [vmem:[%s11862_s23 + $0x14c] sm:$0xff]  ;;  %v12800_v52 = vcombine.low %v652_v4, %v666_v47 }
 0x188   : > { %17291 = vst [vmem:[#allocation36_spill] sm:$0xff] %v12767_v60  ;;  %17292 = vst [vmem:[#allocation37_spill] sm:$0xff] %v12775_v1  ;;  %v2025_v43 = vadd.f32 %v2024_v55, %v12755_v50  ;;  %v2026_v13 = vpop.f32.mrb[29].mxu0  ;;  %9615 = vperm.xlu0 %11221, %v9602_v62   ;;  %v2166_v1 = vadd.f32 %v2165_v56, %v12755_v50  ;;  %v2167_v33 = vpop.f32.mrb[29].mxu1  ;;  %9192 = vperm.xlu1 %11222, %v9127_v51   ;;  %v611_v56 = vld [vmem:[%s11862_s23 + $0xd0] sm:$0xff] }
 0x189   : > { %17293 = vst [vmem:[#allocation38_spill] sm:$0xff] %v12785_v3  ;;  %17294 = vst [vmem:[#allocation39_spill] sm:$0xff] %v12787_v54  ;;  %v2027_v61 = vadd.f32 %v2026_v13, %v12755_v50  ;;  %v2028_v60 = vpop.f32.mrb[30].mxu0  ;;  %v2168_v44 = vadd.f32 %v2167_v33, %v12755_v50  ;;  %v2169_v18 = vpop.f32.mrb[30].mxu1  ;;  %v12819_v13 = vld [vmem:[%s17259_s1 + $0x24] ss:$8 sps:$4 sm:$0xff]  }
 0x18a   : > { %v2029_v55 = vadd.f32 %v2028_v60, %v12777_v53  ;;  %v2030_v40 = vpop.f32.mrb[31].mxu0  ;;  %3051 = vmatpush1.bf16.msra.mxu0 %v12441_v22  ;;  %v4288_v41 = vmax.f32 %v2166_v1, 0.0  ;;  %v2170_v62 = vadd.f32 %v2169_v18, %v12777_v53  ;;  %v2171_v49 = vpop.f32.mrb[31].mxu1  ;;  %3192 = vmatpush1.bf16.msra.mxu1 %v12505_v42  ;;  %v4286_v60 = vmax.f32 %v2025_v43, 0.0  ;;  %v12806_v22 = vld [vmem:[%s17259_s1 + $0x10] ss:$8 sps:$4 sm:$0xff]  }
 0x18b   : > { %v2031_v8 = vadd.f32 %v2030_v40, %v12777_v53  ;;  %3052 = vmatprep.subr.bf16.mxu0 %v12444_v21  ;;  %v2172_v51 = vadd.f32 %v2171_v49, %v12777_v53  ;;  %3193 = vmatprep.subr.bf16.mxu1 %v12781_v46  ;;  %v12810_v18 = vcombine.high %v680_v16, %v694_v29  ;;  %v597_v40 = vld [vmem:[%s11862_s23 + $0x50] sm:$0xff]  ;;  %v4287_v21 = vmax.f32 %v2027_v61, 0.0  ;;  %v12814_v43 = vpop.permute.xlu0 %1767  ;;  %v12837_v54 = vpop.permute.xlu1 %1772 }
 0x18c   : > { %v4314_v33 = vmax.f32 %v2029_v55, 0.0  ;;  %2809 = vmatmul.mubr.bf16.gmra.mrb[136].mxu0 %v12806_v22  ;;  %v4289_v4 = vmax.f32 %v2168_v44, 0.0  ;;  %v4316_v1 = vmax.f32 %v2170_v62, 0.0  ;;  %2950 = vmatmul.mubr.bf16.gmra.mrb[136].mxu1 %v12806_v22  ;;  %v9604_v61 = vld [vmem:[%s17182_s10 + $0x10] sm:$0xff] }
 0x18d   : > { %v4315_v47 = vmax.f32 %v2031_v8, 0.0  ;;  %10266 = vmatprep.mubr.msk.bf16.mxu0 %vm1886_vm0, %v12819_v13  ;;  %v4317_v55 = vmax.f32 %v2172_v51, 0.0  ;;  %10277 = vmatprep.mubr.msk.bf16.mxu1 %vm1886_vm0, %v12819_v13  ;;  %v9129_v8 = vld [vmem:[%s17180_s8 + $0x70] sm:$0xff] }
 0x18e   : > { %v12827_v44 = vpack.c.bf16 %v4314_v33, %v4286_v60  ;;  %3053 = vmatpush1.bf16.msra.mxu0 %v12450_v25  ;;  %v12835_v62 = vpack.c.bf16 %v4316_v1, %v4288_v41  ;;  %3194 = vmatpush1.bf16.msra.mxu1 %v12800_v52  ;;  %v12841_v60 = vcombine.low %v680_v16, %v694_v29  ;;  %v639_v29 = vld [vmem:[%s11862_s23 + $0x1d0] sm:$0xff] }
 0x18f   : > { %v2034_v49 = vpop.f32.mrb[32].mxu0  ;;  %3054 = vmatprep.subr.bf16.mxu0 %v12454_v26  ;;  %v12843_v33 = vpack.c.bf16 %v4315_v47, %v4287_v21  ;;  %3195 = vmatprep.subr.bf16.mxu1 %v12810_v18  ;;  %v12847_v41 = vcombine.high %v597_v40, %v611_v56  ;;  %v625_v26 = vld [vmem:[%s11862_s23 + $0x150] sm:$0xff]  ;;  %v12853_v16 = vpack.c.bf16 %v4317_v55, %v4289_v4  ;;  %v12899_v58 = vpop.permute.xlu1 %1782 }
 0x190   : > { %17295 = vst [vmem:[#allocation40_spill] sm:$0xff] %v12827_v44  ;;  %17296 = vst [vmem:[#allocation41_spill] sm:$0xff] %v12835_v62  ;;  %v2035_v25 = vadd.f32 %v2034_v49, %v12814_v43  ;;  %v2036_v51 = vpop.f32.mrb[33].mxu0  ;;  %v2175_v44 = vpop.f32.mrb[32].mxu1  ;;  %9625 = vperm.xlu0 %11221, %v9604_v61   ;;  %9202 = vperm.xlu1 %11222, %v9129_v8   ;;  %v12862_v4 = vcombine.low %v597_v40, %v611_v56 }
 0x191   : > { %17297 = vst [vmem:[#allocation42_spill] sm:$0xff] %v12843_v33  ;;  %v2037_v1 = vadd.f32 %v2036_v51, %v12814_v43  ;;  %v2176_v62 = vadd.f32 %v2175_v44, %v12814_v43  ;;  %v2038_v3 = vpop.f32.mrb[34].mxu0  ;;  %v2177_v12 = vpop.f32.mrb[33].mxu1  ;;  %17298 = vst [vmem:[#allocation43_spill] sm:$0xff] %v12853_v16  ;;  %v12872_v8 = vcombine.high %v625_v26, %v639_v29 }
 0x192   : > { %v2039_v21 = vadd.f32 %v2038_v3, %v12837_v54  ;;  %v2178_v47 = vadd.f32 %v2177_v12, %v12814_v43  ;;  %v2040_v49 = vpop.f32.mrb[35].mxu0  ;;  %v2179_v33 = vpop.f32.mrb[34].mxu1  ;;  %3055 = vmatpush1.bf16.msra.mxu0 %v12470_v34  ;;  %3196 = vmatpush1.bf16.msra.mxu1 %v12841_v60  ;;  %v4342_v3 = vmax.f32 %v2035_v25, 0.0  ;;  %v12868_v34 = vld [vmem:[%s17259_s1 + $0x20] ss:$8 sps:$4 sm:$0xff]  }
 0x193   : > { %v4344_v61 = vmax.f32 %v2176_v62, 0.0  ;;  %v2041_v51 = vadd.f32 %v2040_v49, %v12837_v54  ;;  %v2180_v44 = vadd.f32 %v2179_v33, %v12837_v54  ;;  %v2181_v59 = vpop.f32.mrb[35].mxu1  ;;  %3056 = vmatprep.subr.bf16.mxu0 %v12473_v31  ;;  %3197 = vmatprep.subr.bf16.mxu1 %v12847_v41  ;;  %v653_v62 = vld [vmem:[%s11862_s23 + $0x54] sm:$0xff]  ;;  %v4343_v31 = vmax.f32 %v2037_v1, 0.0  ;;  %v12876_v25 = vpop.permute.xlu0 %1777  ;;  %v9606_v1 = vld [vmem:[%s17182_s10 + $0x20] sm:$0xff] }
 0x194   : > { %v4370_v12 = vmax.f32 %v2039_v21, 0.0  ;;  %v2182_v55 = vadd.f32 %v2181_v59, %v12837_v54  ;;  %2819 = vmatmul.mubr.bf16.gmra.mrb[140].mxu0 %v12868_v34  ;;  %v4345_v40 = vmax.f32 %v2178_v47, 0.0  ;;  %2960 = vmatmul.mubr.bf16.gmra.mrb[140].mxu1 %v12868_v34  ;;  %v12881_v59 = vld [vmem:[%s17259_s1 + $0x34] ss:$8 sps:$4 sm:$0xff]  }
 0x195   : > { %v4371_v56 = vmax.f32 %v2041_v51, 0.0  ;;  %v4372_v33 = vmax.f32 %v2180_v44, 0.0  ;;  %10267 = vmatprep.mubr.msk.bf16.mxu0 %vm1886_vm0, %v12881_v59  ;;  %v667_v21 = vld [vmem:[%s11862_s23 + $0xd4] sm:$0xff]  ;;  %10278 = vmatprep.mubr.msk.bf16.mxu1 %vm1886_vm0, %v12881_v59  ;;  %v9603_v51 = vld [vmem:[%s17182_s10 + $0x8] sm:$0xff] }
 0x196   : > { %v12889_v47 = vpack.c.bf16 %v4370_v12, %v4342_v3  ;;  %v4373_v49 = vmax.f32 %v2182_v55, 0.0  ;;  %3057 = vmatpush1.bf16.msra.mxu0 %v12481_v36  ;;  %3198 = vmatpush1.bf16.msra.mxu1 %v12862_v4  ;;  %v12903_v3 = vcombine.low %v625_v26, %v639_v29  ;;  %v695_v26 = vld [vmem:[%s11862_s23 + $0x1d4] sm:$0xff] }
 0x197   : > { %v12897_v44 = vpack.c.bf16 %v4372_v33, %v4344_v61  ;;  %v2044_v16 = vpop.f32.mrb[36].mxu0  ;;  %3058 = vmatprep.subr.bf16.mxu0 %v12485_v37  ;;  %v12905_v12 = vpack.c.bf16 %v4371_v56, %v4343_v31  ;;  %3199 = vmatprep.subr.bf16.mxu1 %v12872_v8  ;;  %v12909_v61 = vcombine.high %v653_v62, %v667_v21  ;;  %v681_v37 = vld [vmem:[%s11862_s23 + $0x154] sm:$0xff] }
 0x198   : > { %17299 = vst [vmem:[#allocation44_spill] sm:$0xff] %v12889_v47  ;;  %v2045_v36 = vadd.f32 %v2044_v16, %v12876_v25  ;;  %v2046_v55 = vpop.f32.mrb[37].mxu0  ;;  %v2185_v47 = vpop.f32.mrb[36].mxu1  ;;  %9635 = vperm.xlu0 %11221, %v9606_v1   ;;  %9620 = vperm.xlu1 %11222, %v9603_v51   ;;  %v12915_v29 = vpack.c.bf16 %v4373_v49, %v4345_v40 }
 0x199   : > { %17300 = vst [vmem:[#allocation45_spill] sm:$0xff] %v12897_v44  ;;  %17301 = vst [vmem:[#allocation46_spill] sm:$0xff] %v12905_v12  ;;  %v2047_v33 = vadd.f32 %v2046_v55, %v12876_v25  ;;  %v2186_v44 = vadd.f32 %v2185_v47, %v12876_v25  ;;  %v2048_v17 = vpop.f32.mrb[38].mxu0  ;;  %v2187_v0 = vpop.f32.mrb[37].mxu1  ;;  %v12924_v40 = vcombine.low %v653_v62, %v667_v21 }
 0x19a   : > { %17302 = vst [vmem:[#allocation47_spill] sm:$0xff] %v12915_v29  ;;  %v2049_v16 = vadd.f32 %v2048_v17, %v12899_v58  ;;  %v2188_v31 = vadd.f32 %v2187_v0, %v12876_v25  ;;  %v2050_v56 = vpop.f32.mrb[39].mxu0  ;;  %v2189_v12 = vpop.f32.mrb[38].mxu1  ;;  %3059 = vmatpush1.bf16.msra.mxu0 %v12505_v42  ;;  %3200 = vmatpush1.bf16.msra.mxu1 %v12903_v3  ;;  %v4398_v17 = vmax.f32 %v2045_v36, 0.0  ;;  %v12930_v42 = vld [vmem:[%s17259_s1 + $0x30] ss:$8 sps:$4 sm:$0xff]  }
 0x19b   : > { %v4400_v1 = vmax.f32 %v2186_v44, 0.0  ;;  %v2051_v55 = vadd.f32 %v2050_v56, %v12899_v58  ;;  %v2190_v47 = vadd.f32 %v2189_v12, %v12899_v58  ;;  %v2191_v30 = vpop.f32.mrb[39].mxu1  ;;  %3060 = vmatprep.subr.bf16.mxu0 %v12781_v46  ;;  %3201 = vmatprep.subr.bf16.mxu1 %v12909_v61  ;;  %v12934_v51 = vcombine.high %v681_v37, %v695_v26  ;;  %v716_v44 = vld [vmem:[%s11862_s23 + $0x58] sm:$0xff] }
 0x19c   : > { %v4426_v0 = vmax.f32 %v2049_v16, 0.0  ;;  %v2192_v49 = vadd.f32 %v2191_v30, %v12899_v58  ;;  %2829 = vmatmul.mubr.bf16.gmra.mrb[144].mxu0 %v12930_v42  ;;  %v4399_v46 = vmax.f32 %v2047_v33, 0.0  ;;  %v4401_v62 = vmax.f32 %v2188_v31, 0.0  ;;  %2970 = vmatmul.mubr.bf16.gmra.mrb[144].mxu1 %v12930_v42  ;;  %v12941_v30 = vld [vmem:[%s17259_s1 + $0x44] ss:$8 sps:$4 sm:$0xff]   ;;  %v730_v36 = vld [vmem:[%s11862_s23 + $0xd8] sm:$0xff] }
 0x19d   : > { %v4427_v21 = vmax.f32 %v2051_v55, 0.0  ;;  %v4428_v12 = vmax.f32 %v2190_v47, 0.0  ;;  %10268 = vmatprep.mubr.msk.bf16.mxu0 %vm1886_vm0, %v12941_v30  ;;  %v9608_v16 = vld [vmem:[%s17182_s10 + $0x30] sm:$0xff]  ;;  %10279 = vmatprep.mubr.msk.bf16.mxu1 %vm1886_vm0, %v12941_v30  ;;  %v9605_v31 = vld [vmem:[%s17182_s10 + $0x18] sm:$0xff] }
 0x19e   : > { %v12949_v56 = vpack.c.bf16 %v4426_v0, %v4398_v17  ;;  %v4429_v33 = vmax.f32 %v2192_v49, 0.0  ;;  %3061 = vmatpush1.bf16.msra.mxu0 %v12800_v52  ;;  %3202 = vmatpush1.bf16.msra.mxu1 %v12924_v40  ;;  %v12963_v17 = vcombine.low %v681_v37, %v695_v26  ;;  %v758_v29 = vld [vmem:[%s11862_s23 + $0x1d8] sm:$0xff] }
 0x19f   : > { %v12957_v55 = vpack.c.bf16 %v4428_v12, %v4400_v1  ;;  %v12959_v47 = vpop.f32.mrb[40].mxu0  ;;  %3062 = vmatprep.subr.bf16.mxu0 %v12810_v18  ;;  %v12965_v0 = vpack.c.bf16 %v4427_v21, %v4399_v46  ;;  %v12969_v52 = vpop.f32.mrb[40].mxu1  ;;  %3203 = vmatprep.subr.bf16.mxu1 %v12934_v51  ;;  %v12983_v21 = vcombine.low %v716_v44, %v730_v36 }
 0x1a0   : > { %17303 = vst [vmem:[#allocation48_spill] sm:$0xff] %v12949_v56  ;;  %17305 = vst [vmem:[#allocation50_spill] sm:$0xff] %v12959_v47  ;;  %v12967_v49 = vpop.f32.mrb[41].mxu0  ;;  %v12972_v56 = vcombine.high %v716_v44, %v730_v36  ;;  %9645 = vperm.xlu0 %11221, %v9608_v16   ;;  %v12974_v12 = vpop.f32.mrb[41].mxu1  ;;  %9630 = vperm.xlu1 %11222, %v9605_v31   ;;  %v12978_v18 = vpack.c.bf16 %v4429_v33, %v4401_v62  ;;  %v12988_v16 = vld [vmem:[%s17259_s1 + $0x40] ss:$8 sps:$4 sm:$0xff]  }
 0x1a1   : > { %17304 = vst [vmem:[#allocation49_spill] sm:$0xff] %v12957_v55  ;;  %17306 = vst [vmem:[#allocation51_spill] sm:$0xff] %v12965_v0  ;;  %v2058_v1 = vpop.f32.mrb[42].mxu0  ;;  %v744_v55 = vld [vmem:[%s11862_s23 + $0x158] sm:$0xff]  ;;  %v2199_v26 = vpop.f32.mrb[42].mxu1  ;;  %v9610_v44 = vld [vmem:[%s17182_s10 + $0x40] sm:$0xff] }
 0x1a2   : > { %17307 = vst [vmem:[#allocation52_spill] sm:$0xff] %v12967_v49  ;;  %17308 = vst [vmem:[#allocation53_spill] sm:$0xff] %v12969_v52  ;;  %v2059_v37 = vpop.f32.mrb[43].mxu0  ;;  %3063 = vmatpush1.bf16.msra.mxu0 %v12841_v60  ;;  %v2200_v46 = vpop.f32.mrb[43].mxu1  ;;  %3204 = vmatpush1.bf16.msra.mxu1 %v12963_v17  ;;  %v12992_v62 = vcombine.high %v744_v55, %v758_v29  ;;  %v12998_v60 = vld [vmem:[%s17259_s1 + $0x54] ss:$8 sps:$4 sm:$0xff]   ;;  %v13013_v31 = vcombine.low %v744_v55, %v758_v29 }
 0x1a3   : > { %17309 = vst [vmem:[#allocation54_spill] sm:$0xff] %v12974_v12  ;;  %17310 = vst [vmem:[#allocation55_spill] sm:$0xff] %v12978_v18  ;;  %3064 = vmatprep.subr.bf16.mxu0 %v12847_v41  ;;  %3205 = vmatprep.subr.bf16.mxu1 %v12972_v56  ;;  %v9607_v36 = vld [vmem:[%s17182_s10 + $0x28] sm:$0xff] }
 0x1a4   : > { %2839 = vmatmul.mubr.bf16.gmra.mrb[148].mxu0 %v12988_v16  ;;  %2980 = vmatmul.mubr.bf16.gmra.mrb[148].mxu1 %v12988_v16 }
 0x1a5   : > { %10269 = vmatprep.mubr.msk.bf16.mxu0 %vm1886_vm0, %v12998_v60  ;;  %10280 = vmatprep.mubr.msk.bf16.mxu1 %vm1886_vm0, %v12998_v60 }
 0x1a6   : > { %3065 = vmatpush1.bf16.msra.mxu0 %v12862_v4  ;;  %3206 = vmatpush1.bf16.msra.mxu1 %v12983_v21 }
 0x1a7   : > { %v2236_v33 = vpop.f32.mrb[44].mxu0  ;;  %3066 = vmatprep.subr.bf16.mxu0 %v12872_v8  ;;  %v2377_v26 = vpop.f32.mrb[44].mxu1  ;;  %3207 = vmatprep.subr.bf16.mxu1 %v12992_v62 }
 0x1a8   : > { %v2237_v1 = vadd.f32 %v2236_v33, %v12475_v32  ;;  %v2238_v37 = vpop.f32.mrb[45].mxu0  ;;  %9655 = vperm.xlu0 %11221, %v9610_v44   ;;  %v2378_v18 = vadd.f32 %v2377_v26, %v12475_v32  ;;  %v2379_v12 = vpop.f32.mrb[45].mxu1  ;;  %9640 = vperm.xlu1 %11222, %v9607_v36  }
 0x1a9   : > { %v2239_v46 = vadd.f32 %v2238_v37, %v12475_v32  ;;  %v2240_v0 = vpop.f32.mrb[46].mxu0  ;;  %v2380_v49 = vadd.f32 %v2379_v12, %v12475_v32  ;;  %v2381_v55 = vpop.f32.mrb[46].mxu1 }
 0x1aa   : > { %v2241_v52 = vadd.f32 %v2240_v0, %v12501_v48  ;;  %v2242_v29 = vpop.f32.mrb[47].mxu0  ;;  %3067 = vmatpush1.bf16.msra.mxu0 %v12903_v3  ;;  %v3900_v33 = vmax.f32 %v2378_v18, 0.0  ;;  %v2382_v44 = vadd.f32 %v2381_v55, %v12501_v48  ;;  %v2383_v20 = vpop.f32.mrb[47].mxu1  ;;  %3208 = vmatpush1.bf16.msra.mxu1 %v13013_v31  ;;  %v9612_v0 = vld [vmem:[%s17182_s10 + $0x50] sm:$0xf]  ;;  %v3898_v36 = vmax.f32 %v2237_v1, 0.0 }
 0x1ab   : > { %v2243_v47 = vadd.f32 %v2242_v29, %v12501_v48  ;;  %3330 = vmatprep.subr.bf16.mxu0 %v12847_v41  ;;  %v3901_v37 = vmax.f32 %v2380_v49, 0.0  ;;  %v2384_v26 = vadd.f32 %v2383_v20, %v12501_v48  ;;  %v13033_v18 = vld [vmem:[%s17259_s1 + $0x50] ss:$8 sps:$4 sm:$0xff]   ;;  %3471 = vmatprep.subr.bf16.mxu1 %v12972_v56  ;;  %v3899_v29 = vmax.f32 %v2239_v46, 0.0  ;;  %v13044_v20 = vld [vmem:[%s17259_s1 + $0x64] ss:$8 sps:$4 sm:$0xff]  }
 0x1ac   : > { %v3926_v12 = vmax.f32 %v2241_v52, 0.0  ;;  %2849 = vmatmul.mubr.bf16.gmra.mrb[152].mxu0 %v13033_v18  ;;  %v9609_v41 = vld [vmem:[%s17182_s10 + $0x38] sm:$0xff]  ;;  %v3928_v1 = vmax.f32 %v2382_v44, 0.0  ;;  %2990 = vmatmul.mubr.bf16.gmra.mrb[152].mxu1 %v13033_v18  ;;  %v9817_v44 = vld [vmem:[%s17184_s12] sm:$0xff] }
 0x1ad   : > { %v3927_v55 = vmax.f32 %v2243_v47, 0.0  ;;  %10270 = vmatprep.mubr.msk.bf16.mxu0 %vm1886_vm0, %v13044_v20  ;;  %v3929_v52 = vmax.f32 %v2384_v26, 0.0  ;;  %10281 = vmatprep.mubr.msk.bf16.mxu1 %vm1886_vm0, %v13044_v20 }
 0x1ae   : > { %v13048_v49 = vpack.c.bf16 %v3926_v12, %v3898_v36  ;;  %9665 = vperm.xlu0 %11221, %v9612_v0   ;;  %v13052_v46 = vpack.c.bf16 %v3928_v1, %v3900_v33  ;;  %9650 = vperm.xlu1 %11222, %v9609_v41   ;;  %v9611_v12 = vld [vmem:[%s17182_s10 + $0x48] sm:$0xff] }
 0x1af   : > { %v2246_v47 = vpop.f32.mrb[48].mxu0  ;;  %v13057_v24 = vpack.c.bf16 %v3927_v55, %v3899_v29  ;;  %v2387_v36 = vpop.f32.mrb[48].mxu1  ;;  %v13063_v26 = vpack.c.bf16 %v3929_v52, %v3901_v37 }
 0x1b0   : > { %17311 = vst [vmem:[#allocation56_spill] sm:$0xff] %v13048_v49  ;;  %17312 = vst [vmem:[#allocation57_spill] sm:$0xff] %v13052_v46  ;;  %v2247_v19 = vadd.f32 %v2246_v47, %v12495_v39  ;;  %v2248_v35 = vpop.f32.mrb[49].mxu0  ;;  %v2388_v0 = vadd.f32 %v2387_v36, %v12495_v39  ;;  %v2389_v1 = vpop.f32.mrb[49].mxu1 }
 0x1b1   : > { %17313 = vst [vmem:[#allocation58_spill] sm:$0xff] %v13057_v24  ;;  %17314 = vst [vmem:[#allocation59_spill] sm:$0xff] %v13063_v26  ;;  %v2249_v33 = vadd.f32 %v2248_v35, %v12495_v39  ;;  %v2250_v41 = vpop.f32.mrb[50].mxu0  ;;  %v2390_v29 = vadd.f32 %v2389_v1, %v12495_v39  ;;  %v2391_v47 = vpop.f32.mrb[50].mxu1 }
 0x1b2   : > { %v2251_v46 = vadd.f32 %v2250_v41, %v12536_v27  ;;  %v2252_v55 = vpop.f32.mrb[51].mxu0  ;;  %9821 = vperm.xlu0 %11221, %v9817_v44   ;;  %v3956_v49 = vmax.f32 %v2388_v0, 0.0  ;;  %v2392_v28 = vadd.f32 %v2391_v47, %v12536_v27  ;;  %v2393_v37 = vpop.f32.mrb[51].mxu1  ;;  %9660 = vperm.xlu1 %11222, %v9611_v12   ;;  %v3954_v52 = vmax.f32 %v2247_v19, 0.0  ;;  %v13075_v41 = vld [vmem:[%s17259_s1 + $0x60] ss:$8 sps:$4 sm:$0xff]  }
 0x1b3   : > { %v2253_v24 = vadd.f32 %v2252_v55, %v12536_v27  ;;  %v3957_v26 = vmax.f32 %v2390_v29, 0.0  ;;  %v2394_v36 = vadd.f32 %v2393_v37, %v12536_v27  ;;  %17315 = vst [vmem:[#allocation60_spill] sm:$0xff] %v13075_v41  ;;  %v9818_v44 = vld [vmem:[%s17184_s12 + $0x8] sm:$0x3]  ;;  %v3955_v0 = vmax.f32 %v2249_v33, 0.0 }
 0x1b4   : > { %v3982_v35 = vmax.f32 %v2251_v46, 0.0  ;;  %2859 = vmatmul.mubr.bf16.gmra.mrb[156].mxu0 %v13075_v41  ;;  %v3984_v55 = vmax.f32 %v2392_v28, 0.0  ;;  %3000 = vmatmul.mubr.bf16.gmra.mrb[156].mxu1 %v13075_v41  ;;  %v13085_v19 = vld [vmem:[%s17259_s1 + $0x74] ss:$8 sps:$4 sm:$0xff]  }
 0x1b5   : > { %v3983_v1 = vmax.f32 %v2253_v24, 0.0  ;;  %10271 = vmatprep.mubr.msk.bf16.mxu0 %vm1886_vm0, %v13085_v19  ;;  %v3985_v12 = vmax.f32 %v2394_v36, 0.0  ;;  %10282 = vmatprep.mubr.msk.bf16.mxu1 %vm1886_vm0, %v13085_v19 }
 0x1b6   : > { %v13089_v46 = vpack.c.bf16 %v3982_v35, %v3954_v52  ;;  %v13093_v29 = vpack.c.bf16 %v3984_v55, %v3956_v49  ;;  %9826 = vperm.xlu1 %11222, %v9818_v44  }
 0x1b7   : > { %v2256_v24 = vpop.f32.mrb[52].mxu0  ;;  %v13095_v28 = vpack.c.bf16 %v3983_v1, %v3955_v0  ;;  %v2397_v37 = vpop.f32.mrb[52].mxu1  ;;  %v13098_v41 = vpack.c.bf16 %v3985_v12, %v3957_v26 }
 0x1b8   : > { %17316 = vst [vmem:[#allocation61_spill] sm:$0xff] %v13089_v46  ;;  %17317 = vst [vmem:[#allocation62_spill] sm:$0xff] %v13093_v29  ;;  %v2257_v33 = vadd.f32 %v2256_v24, %v12564_v11  ;;  %v2258_v47 = vpop.f32.mrb[53].mxu0  ;;  %v2398_v52 = vadd.f32 %v2397_v37, %v12564_v11  ;;  %v2399_v36 = vpop.f32.mrb[53].mxu1  ;;  %v13110_v37 = vld [vmem:[%s17259_s1 + $0x70] ss:$8 sps:$4 sm:$0xff]  }
 0x1b9   : > { %17318 = vst [vmem:[#allocation63_spill] sm:$0xff] %v13095_v28  ;;  %17319 = vst [vmem:[#allocation64_spill] sm:$0xff] %v13098_v41  ;;  %v2259_v27 = vadd.f32 %v2258_v47, %v12564_v11  ;;  %v2260_v35 = vpop.f32.mrb[54].mxu0  ;;  %v2400_v49 = vadd.f32 %v2399_v36, %v12564_v11  ;;  %v2401_v44 = vpop.f32.mrb[54].mxu1 }
 0x1ba   : > { %v2261_v46 = vadd.f32 %v2260_v35, %v12574_v14  ;;  %v2262_v55 = vpop.f32.mrb[55].mxu0  ;;  %v4012_v0 = vmax.f32 %v2398_v52, 0.0  ;;  %v2402_v24 = vadd.f32 %v2401_v44, %v12574_v14  ;;  %v2403_v29 = vpop.f32.mrb[55].mxu1  ;;  %v4010_v26 = vmax.f32 %v2257_v33, 0.0  ;;  %17320 = vst [vmem:[#allocation65_spill] sm:$0xff] %v13110_v37 }
 0x1bb   : > { %v2263_v1 = vadd.f32 %v2262_v55, %v12574_v14  ;;  %v4013_v41 = vmax.f32 %v2400_v49, 0.0  ;;  %v2404_v47 = vadd.f32 %v2403_v29, %v12574_v14  ;;  %v4011_v35 = vmax.f32 %v2259_v27, 0.0  ;;  %v13117_v33 = vld [vmem:[%s17259_s1 + $0x84] ss:$8 sps:$4 sm:$0xff]  }
 0x1bc   : > { %v4038_v12 = vmax.f32 %v2261_v46, 0.0  ;;  %2869 = vmatmul.mubr.bf16.gmra.mrb[160].mxu0 %v13110_v37  ;;  %v4040_v52 = vmax.f32 %v2402_v24, 0.0  ;;  %3010 = vmatmul.mubr.bf16.gmra.mrb[160].mxu1 %v13110_v37 }
 0x1bd   : > { %v4039_v36 = vmax.f32 %v2263_v1, 0.0  ;;  %10272 = vmatprep.mubr.msk.bf16.mxu0 %vm1886_vm0, %v13117_v33  ;;  %v4041_v29 = vmax.f32 %v2404_v47, 0.0  ;;  %10283 = vmatprep.mubr.msk.bf16.mxu1 %vm1886_vm0, %v13117_v33 }
 0x1be   : > { %v13121_v46 = vpack.c.bf16 %v4038_v12, %v4010_v26  ;;  %v13125_v49 = vpack.c.bf16 %v4040_v52, %v4012_v0 }
 0x1bf   : > { %v2266_v27 = vpop.f32.mrb[56].mxu0  ;;  %v13127_v55 = vpack.c.bf16 %v4039_v36, %v4011_v35  ;;  %v2407_v24 = vpop.f32.mrb[56].mxu1  ;;  %v13130_v28 = vpack.c.bf16 %v4041_v29, %v4013_v41 }
 0x1c0   : > { %17321 = vst [vmem:[#allocation66_spill] sm:$0xff] %v13121_v46  ;;  %17322 = vst [vmem:[#allocation67_spill] sm:$0xff] %v13125_v49  ;;  %v2267_v44 = vadd.f32 %v2266_v27, %v12602_v7  ;;  %v2268_v1 = vpop.f32.mrb[57].mxu0  ;;  %v2408_v26 = vadd.f32 %v2407_v24, %v12602_v7  ;;  %v2409_v47 = vpop.f32.mrb[57].mxu1  ;;  %v13142_v24 = vld [vmem:[%s17259_s1 + $0x80] ss:$8 sps:$4 sm:$0xff]  }
 0x1c1   : > { %17323 = vst [vmem:[#allocation68_spill] sm:$0xff] %v13127_v55  ;;  %17324 = vst [vmem:[#allocation69_spill] sm:$0xff] %v13130_v28  ;;  %v2269_v37 = vadd.f32 %v2268_v1, %v12602_v7  ;;  %v2270_v12 = vpop.f32.mrb[58].mxu0  ;;  %v2410_v0 = vadd.f32 %v2409_v47, %v12602_v7  ;;  %v2411_v49 = vpop.f32.mrb[58].mxu1 }
 0x1c2   : > { %v2271_v46 = vadd.f32 %v2270_v12, %v12612_v23  ;;  %v2272_v52 = vpop.f32.mrb[59].mxu0  ;;  %v4068_v35 = vmax.f32 %v2408_v26, 0.0  ;;  %v2412_v27 = vadd.f32 %v2411_v49, %v12612_v23  ;;  %v2413_v55 = vpop.f32.mrb[59].mxu1  ;;  %v4066_v41 = vmax.f32 %v2267_v44, 0.0  ;;  %17325 = vst [vmem:[#allocation70_spill] sm:$0xff] %v13142_v24 }
 0x1c3   : > { %v2273_v36 = vadd.f32 %v2272_v52, %v12612_v23  ;;  %v4069_v28 = vmax.f32 %v2410_v0, 0.0  ;;  %v2414_v1 = vadd.f32 %v2413_v55, %v12612_v23  ;;  %v4067_v12 = vmax.f32 %v2269_v37, 0.0  ;;  %v13149_v49 = vld [vmem:[%s17259_s1 + $0x94] ss:$8 sps:$4 sm:$0xff]  }
 0x1c4   : > { %v4094_v29 = vmax.f32 %v2271_v46, 0.0  ;;  %2879 = vmatmul.mubr.bf16.gmra.mrb[164].mxu0 %v13142_v24  ;;  %v4096_v26 = vmax.f32 %v2412_v27, 0.0  ;;  %3020 = vmatmul.mubr.bf16.gmra.mrb[164].mxu1 %v13142_v24 }
 0x1c5   : > { %v4095_v47 = vmax.f32 %v2273_v36, 0.0  ;;  %10273 = vmatprep.mubr.msk.bf16.mxu0 %vm1886_vm0, %v13149_v49  ;;  %v4097_v55 = vmax.f32 %v2414_v1, 0.0  ;;  %10284 = vmatprep.mubr.msk.bf16.mxu1 %vm1886_vm0, %v13149_v49 }
 0x1c6   : > { %v13153_v46 = vpack.c.bf16 %v4094_v29, %v4066_v41  ;;  %v13157_v44 = vpack.c.bf16 %v4096_v26, %v4068_v35 }
 0x1c7   : > { %v2276_v37 = vpop.f32.mrb[60].mxu0  ;;  %v13159_v0 = vpack.c.bf16 %v4095_v47, %v4067_v12  ;;  %v2417_v27 = vpop.f32.mrb[60].mxu1  ;;  %v13162_v24 = vpack.c.bf16 %v4097_v55, %v4069_v28 }
 0x1c8   : > { %17326 = vst [vmem:[#allocation71_spill] sm:$0xff] %v13153_v46  ;;  %17327 = vst [vmem:[#allocation72_spill] sm:$0xff] %v13157_v44  ;;  %v2277_v52 = vadd.f32 %v2276_v37, %v12640_v63  ;;  %v2278_v36 = vpop.f32.mrb[61].mxu0  ;;  %v2418_v41 = vadd.f32 %v2417_v27, %v12640_v63  ;;  %v2419_v1 = vpop.f32.mrb[61].mxu1  ;;  %v13174_v27 = vld [vmem:[%s17259_s1 + $0x90] ss:$8 sps:$4 sm:$0xff]  }
 0x1c9   : > { %17328 = vst [vmem:[#allocation73_spill] sm:$0xff] %v13159_v0  ;;  %17329 = vst [vmem:[#allocation74_spill] sm:$0xff] %v13162_v24  ;;  %v2279_v23 = vadd.f32 %v2278_v36, %v12640_v63  ;;  %v2280_v29 = vpop.f32.mrb[62].mxu0  ;;  %v2420_v35 = vadd.f32 %v2419_v1, %v12640_v63  ;;  %v2421_v44 = vpop.f32.mrb[62].mxu1 }
 0x1ca   : > { %v2281_v46 = vadd.f32 %v2280_v29, %v12650_v38  ;;  %v2282_v26 = vpop.f32.mrb[63].mxu0  ;;  %v4124_v12 = vmax.f32 %v2418_v41, 0.0  ;;  %v2422_v37 = vadd.f32 %v2421_v44, %v12650_v38  ;;  %v2423_v0 = vpop.f32.mrb[63].mxu1  ;;  %v4122_v28 = vmax.f32 %v2277_v52, 0.0  ;;  %17330 = vst [vmem:[#allocation75_spill] sm:$0xff] %v13174_v27 }
 0x1cb   : > { %v2283_v47 = vadd.f32 %v2282_v26, %v12650_v38  ;;  %v4125_v24 = vmax.f32 %v2420_v35, 0.0  ;;  %v2424_v36 = vadd.f32 %v2423_v0, %v12650_v38  ;;  %v4123_v29 = vmax.f32 %v2279_v23, 0.0 }
 0x1cc   : > { %v4150_v55 = vmax.f32 %v2281_v46, 0.0  ;;  %2889 = vmatmul.mubr.bf16.gmra.mrb[168].mxu0 %v13174_v27  ;;  %v4152_v41 = vmax.f32 %v2422_v37, 0.0  ;;  %3030 = vmatmul.mubr.bf16.gmra.mrb[168].mxu1 %v13174_v27 }
 0x1cd   : > { %v4151_v1 = vmax.f32 %v2283_v47, 0.0  ;;  %10274 = vmatprep.mubr.msk.bf16.mxu0 %vm1886_vm0, %v12223_v9  ;;  %v4153_v46 = vmax.f32 %v2424_v36, 0.0  ;;  %10285 = vmatprep.mubr.msk.bf16.mxu1 %vm1886_vm0, %v12223_v9 }
 0x1ce   : > { %v13180_v44 = vpack.c.bf16 %v4150_v55, %v4122_v28  ;;  %v13184_v0 = vpack.c.bf16 %v4152_v41, %v4124_v12 }
 0x1cf   : > { %v2286_v52 = vpop.f32.mrb[64].mxu0  ;;  %v13186_v35 = vpack.c.bf16 %v4151_v1, %v4123_v29  ;;  %v2427_v47 = vpop.f32.mrb[64].mxu1  ;;  %v13189_v37 = vpack.c.bf16 %v4153_v46, %v4125_v24 }
 0x1d0   : > { %17331 = vst [vmem:[#allocation76_spill] sm:$0xff] %v13180_v44  ;;  %17332 = vst [vmem:[#allocation77_spill] sm:$0xff] %v13184_v0  ;;  %v2287_v23 = vadd.f32 %v2286_v52, %v12678_v5  ;;  %v2288_v26 = vpop.f32.mrb[65].mxu0  ;;  %v2428_v28 = vadd.f32 %v2427_v47, %v12678_v5  ;;  %v2429_v36 = vpop.f32.mrb[65].mxu1 }
 0x1d1   : > { %17333 = vst [vmem:[#allocation78_spill] sm:$0xff] %v13186_v35  ;;  %17334 = vst [vmem:[#allocation79_spill] sm:$0xff] %v13189_v37  ;;  %v2289_v27 = vadd.f32 %v2288_v26, %v12678_v5  ;;  %v2290_v55 = vpop.f32.mrb[66].mxu0  ;;  %v2430_v12 = vadd.f32 %v2429_v36, %v12678_v5  ;;  %v2431_v0 = vpop.f32.mrb[66].mxu1 }
 0x1d2   : > { %v2291_v44 = vadd.f32 %v2290_v55, %v12688_v45  ;;  %v2292_v41 = vpop.f32.mrb[67].mxu0  ;;  %v4180_v29 = vmax.f32 %v2428_v28, 0.0  ;;  %v2432_v52 = vadd.f32 %v2431_v0, %v12688_v45  ;;  %v2433_v35 = vpop.f32.mrb[67].mxu1  ;;  %v4178_v24 = vmax.f32 %v2287_v23, 0.0  ;;  %v13203_v28 = vld [vmem:[%s17259_s1 + $0x4] ss:$8 sps:$4 sm:$0xff]  }
 0x1d3   : > { %v2293_v1 = vadd.f32 %v2292_v41, %v12688_v45  ;;  %v4181_v37 = vmax.f32 %v2430_v12, 0.0  ;;  %v2434_v26 = vadd.f32 %v2433_v35, %v12688_v45  ;;  %v4179_v47 = vmax.f32 %v2289_v27, 0.0 }
 0x1d4   : > { %v4206_v46 = vmax.f32 %v2291_v44, 0.0  ;;  %2899 = vmatmul.mubr.bf16.gmra.mrb[172].mxu0 %v12231_v10  ;;  %v4208_v55 = vmax.f32 %v2432_v52, 0.0  ;;  %3040 = vmatmul.mubr.bf16.gmra.mrb[172].mxu1 %v12231_v10 }
 0x1d5   : > { %v4207_v9 = vmax.f32 %v2293_v1, 0.0  ;;  %10286 = vmatprep.mubr.msk.bf16.mxu0 %vm1886_vm0, %v13203_v28  ;;  %v4209_v44 = vmax.f32 %v2434_v26, 0.0  ;;  %10297 = vmatprep.mubr.msk.bf16.mxu1 %vm1886_vm0, %v13203_v28 }
 0x1d6   : > { %v13207_v0 = vpack.c.bf16 %v4206_v46, %v4178_v24  ;;  %v13211_v35 = vpack.c.bf16 %v4208_v55, %v4180_v29 }
 0x1d7   : > { %v2296_v27 = vpop.f32.mrb[68].mxu0  ;;  %v13213_v23 = vpack.c.bf16 %v4207_v9, %v4179_v47  ;;  %v2437_v41 = vpop.f32.mrb[68].mxu1  ;;  %v13216_v1 = vpack.c.bf16 %v4209_v44, %v4181_v37 }
 0x1d8   : > { %17335 = vst [vmem:[#allocation80_spill] sm:$0xff] %v13207_v0  ;;  %17336 = vst [vmem:[#allocation81_spill] sm:$0xff] %v13211_v35  ;;  %v2297_v36 = vadd.f32 %v2296_v27, %v12716_v57  ;;  %v2298_v12 = vpop.f32.mrb[69].mxu0  ;;  %v2438_v24 = vadd.f32 %v2437_v41, %v12716_v57  ;;  %v2439_v26 = vpop.f32.mrb[69].mxu1 }
 0x1d9   : > { %17337 = vst [vmem:[#allocation82_spill] sm:$0xff] %v13213_v23  ;;  %17338 = vst [vmem:[#allocation83_spill] sm:$0xff] %v13216_v1  ;;  %v2299_v52 = vadd.f32 %v2298_v12, %v12716_v57  ;;  %v2300_v46 = vpop.f32.mrb[70].mxu0  ;;  %v2440_v29 = vadd.f32 %v2439_v26, %v12716_v57  ;;  %v2441_v9 = vpop.f32.mrb[70].mxu1 }
 0x1da   : > { %v2301_v0 = vadd.f32 %v2300_v46, %v12726_v6  ;;  %v2302_v55 = vpop.f32.mrb[71].mxu0  ;;  %v4236_v47 = vmax.f32 %v2438_v24, 0.0  ;;  %v2442_v37 = vadd.f32 %v2441_v9, %v12726_v6  ;;  %v2443_v44 = vpop.f32.mrb[71].mxu1  ;;  %v4234_v35 = vmax.f32 %v2297_v36, 0.0  ;;  %v654_v24 = vld [vmem:[%s11862_s23 + $0x5c] sm:$0xff] }
 0x1db   : > { %v2303_v27 = vadd.f32 %v2302_v55, %v12726_v6  ;;  %v4237_v1 = vmax.f32 %v2440_v29, 0.0  ;;  %v2444_v41 = vadd.f32 %v2443_v44, %v12726_v6  ;;  %v4235_v46 = vmax.f32 %v2299_v52, 0.0  ;;  %v668_v55 = vld [vmem:[%s11862_s23 + $0xdc] sm:$0xff] }
 0x1dc   : > { %v4262_v12 = vmax.f32 %v2301_v0, 0.0  ;;  %3081 = vmatmul.mubr.bf16.vlgmr.msra.gmra.mrb[176].mxu0 %v12749_v15  ;;  %v4264_v26 = vmax.f32 %v2442_v37, 0.0  ;;  %3222 = vmatmul.mubr.bf16.vlgmr.msra.gmra.mrb[176].mxu1 %v12749_v15  ;;  %v13244_v37 = vcombine.high %v654_v24, %v668_v55  ;;  %v696_v44 = vld [vmem:[%s11862_s23 + $0x1dc] sm:$0xff] }
 0x1dd   : > { %v4263_v23 = vmax.f32 %v2303_v27, 0.0  ;;  %10287 = vmatprep.mubr.msk.bf16.mxu0 %vm1886_vm0, %v12760_v2  ;;  %v4265_v0 = vmax.f32 %v2444_v41, 0.0  ;;  %10298 = vmatprep.mubr.msk.bf16.mxu1 %vm1886_vm0, %v12760_v2  ;;  %v682_v2 = vld [vmem:[%s11862_s23 + $0x15c] sm:$0xff] }
 0x1de   : > { %v13231_v9 = vpack.c.bf16 %v4262_v12, %v4234_v35  ;;  %3331 = vmatpush1.bf16.msra.mxu0 %v12862_v4  ;;  %v13236_v36 = vpack.c.bf16 %v4264_v26, %v4236_v47  ;;  %3472 = vmatpush1.bf16.msra.mxu1 %v12983_v21 }
 0x1df   : > { %v2306_v52 = vpop.f32.mrb[72].mxu0  ;;  %3332 = vmatprep.subr.bf16.mxu0 %v12872_v8  ;;  %v13240_v15 = vpack.c.bf16 %v4263_v23, %v4235_v46  ;;  %v2447_v35 = vpop.f32.mrb[72].mxu1  ;;  %3473 = vmatprep.subr.bf16.mxu1 %v12992_v62  ;;  %v13248_v4 = vpack.c.bf16 %v4265_v0, %v4237_v1 }
 0x1e0   : > { %17339 = vst [vmem:[#allocation84_spill] sm:$0xff] %v13231_v9  ;;  %17340 = vst [vmem:[#allocation85_spill] sm:$0xff] %v13236_v36  ;;  %v2307_v29 = vadd.f32 %v2306_v52, %v12755_v50  ;;  %v2308_v27 = vpop.f32.mrb[73].mxu0  ;;  %v2448_v12 = vadd.f32 %v2447_v35, %v12755_v50  ;;  %v2449_v8 = vpop.f32.mrb[73].mxu1  ;;  %v13255_v36 = vcombine.low %v654_v24, %v668_v55 }
 0x1e1   : > { %17341 = vst [vmem:[#allocation86_spill] sm:$0xff] %v13248_v4  ;;  %v2309_v47 = vadd.f32 %v2308_v27, %v12755_v50  ;;  %v2310_v41 = vpop.f32.mrb[74].mxu0  ;;  %v2450_v46 = vadd.f32 %v2449_v8, %v12755_v50  ;;  %v2451_v52 = vpop.f32.mrb[74].mxu1  ;;  %v13261_v35 = vcombine.high %v682_v2, %v696_v44 }
 0x1e2   : > { %v2311_v23 = vadd.f32 %v2310_v41, %v12777_v53  ;;  %v2312_v26 = vpop.f32.mrb[75].mxu0  ;;  %3333 = vmatpush1.bf16.msra.mxu0 %v12903_v3  ;;  %v4292_v9 = vmax.f32 %v2448_v12, 0.0  ;;  %v2452_v0 = vadd.f32 %v2451_v52, %v12777_v53  ;;  %v2453_v27 = vpop.f32.mrb[75].mxu1  ;;  %3474 = vmatpush1.bf16.msra.mxu1 %v13013_v31  ;;  %v4290_v41 = vmax.f32 %v2307_v29, 0.0 }
 0x1e3   : > { %v2313_v1 = vadd.f32 %v2312_v26, %v12777_v53  ;;  %3334 = vmatprep.subr.bf16.mxu0 %v12909_v61  ;;  %v4293_v4 = vmax.f32 %v2450_v46, 0.0  ;;  %v2454_v3 = vadd.f32 %v2453_v27, %v12777_v53  ;;  %3475 = vmatprep.subr.bf16.mxu1 %v13244_v37  ;;  %v4291_v24 = vmax.f32 %v2309_v47, 0.0  ;;  %v599_v61 = vld [vmem:[%s11862_s23 + $0x60] sm:$0xff] }
 0x1e4   : > { %v4318_v8 = vmax.f32 %v2311_v23, 0.0  ;;  %3091 = vmatmul.mubr.bf16.gmra.mrb[180].mxu0 %v12806_v22  ;;  %v4320_v12 = vmax.f32 %v2452_v0, 0.0  ;;  %3232 = vmatmul.mubr.bf16.gmra.mrb[180].mxu1 %v12806_v22  ;;  %v613_v26 = vld [vmem:[%s11862_s23 + $0xe0] sm:$0xff]  ;;  %v13280_v22 = vcombine.low %v682_v2, %v696_v44 }
 0x1e5   : > { %v4319_v55 = vmax.f32 %v2313_v1, 0.0  ;;  %10288 = vmatprep.mubr.msk.bf16.mxu0 %vm1886_vm0, %v12819_v13  ;;  %v4321_v23 = vmax.f32 %v2454_v3, 0.0  ;;  %10299 = vmatprep.mubr.msk.bf16.mxu1 %vm1886_vm0, %v12819_v13  ;;  %v13286_v13 = vcombine.high %v599_v61, %v613_v26 }
 0x1e6   : > { %v13271_v29 = vpack.c.bf16 %v4318_v8, %v4290_v41  ;;  %3335 = vmatpush1.bf16.msra.mxu0 %v12924_v40  ;;  %v13276_v47 = vpack.c.bf16 %v4320_v12, %v4292_v9  ;;  %3476 = vmatpush1.bf16.msra.mxu1 %v13255_v36  ;;  %v627_v40 = vld [vmem:[%s11862_s23 + $0x160] sm:$0xff] }
 0x1e7   : > { %v2316_v46 = vpop.f32.mrb[76].mxu0  ;;  %3336 = vmatprep.subr.bf16.mxu0 %v12934_v51  ;;  %v13282_v52 = vpack.c.bf16 %v4319_v55, %v4291_v24  ;;  %v2457_v27 = vpop.f32.mrb[76].mxu1  ;;  %3477 = vmatprep.subr.bf16.mxu1 %v13261_v35  ;;  %v641_v9 = vld [vmem:[%s11862_s23 + $0x1e0] sm:$0xff]  ;;  %v13290_v41 = vpack.c.bf16 %v4321_v23, %v4293_v4 }
 0x1e8   : > { %17342 = vst [vmem:[#allocation87_spill] sm:$0xff] %v13271_v29  ;;  %17343 = vst [vmem:[#allocation88_spill] sm:$0xff] %v13276_v47  ;;  %v2317_v1 = vadd.f32 %v2316_v46, %v12814_v43  ;;  %v2318_v0 = vpop.f32.mrb[77].mxu0  ;;  %v2458_v51 = vadd.f32 %v2457_v27, %v12814_v43  ;;  %v2459_v44 = vpop.f32.mrb[77].mxu1  ;;  %v13297_v46 = vcombine.low %v599_v61, %v613_v26 }
 0x1e9   : > { %17344 = vst [vmem:[#allocation89_spill] sm:$0xff] %v13290_v41  ;;  %v2319_v8 = vadd.f32 %v2318_v0, %v12814_v43  ;;  %v2320_v2 = vpop.f32.mrb[78].mxu0  ;;  %v2460_v24 = vadd.f32 %v2459_v44, %v12814_v43  ;;  %v2461_v12 = vpop.f32.mrb[78].mxu1  ;;  %v13303_v27 = vcombine.high %v627_v40, %v641_v9 }
 0x1ea   : > { %v2321_v3 = vadd.f32 %v2320_v2, %v12837_v54  ;;  %v2322_v55 = vpop.f32.mrb[79].mxu0  ;;  %3337 = vmatpush1.bf16.msra.mxu0 %v12963_v17  ;;  %v4348_v47 = vmax.f32 %v2458_v51, 0.0  ;;  %v2462_v23 = vadd.f32 %v2461_v12, %v12837_v54  ;;  %v2463_v0 = vpop.f32.mrb[79].mxu1  ;;  %3478 = vmatpush1.bf16.msra.mxu1 %v13280_v22  ;;  %v4346_v2 = vmax.f32 %v2317_v1, 0.0 }
 0x1eb   : > { %v2323_v4 = vadd.f32 %v2322_v55, %v12837_v54  ;;  %3338 = vmatprep.subr.bf16.mxu0 %v12972_v56  ;;  %v4349_v29 = vmax.f32 %v2460_v24, 0.0  ;;  %v2464_v17 = vadd.f32 %v2463_v0, %v12837_v54  ;;  %3479 = vmatprep.subr.bf16.mxu1 %v13286_v13  ;;  %v4347_v61 = vmax.f32 %v2319_v8, 0.0  ;;  %v655_v56 = vld [vmem:[%s11862_s23 + $0x64] sm:$0xff] }
 0x1ec   : > { %v4374_v44 = vmax.f32 %v2321_v3, 0.0  ;;  %3101 = vmatmul.mubr.bf16.gmra.mrb[184].mxu0 %v12868_v34  ;;  %v4376_v51 = vmax.f32 %v2462_v23, 0.0  ;;  %3242 = vmatmul.mubr.bf16.gmra.mrb[184].mxu1 %v12868_v34  ;;  %v669_v55 = vld [vmem:[%s11862_s23 + $0xe4] sm:$0xff]  ;;  %v13322_v34 = vcombine.low %v627_v40, %v641_v9 }
 0x1ed   : > { %v4375_v26 = vmax.f32 %v2323_v4, 0.0  ;;  %10289 = vmatprep.mubr.msk.bf16.mxu0 %vm1886_vm0, %v12881_v59  ;;  %v4377_v3 = vmax.f32 %v2464_v17, 0.0  ;;  %10300 = vmatprep.mubr.msk.bf16.mxu1 %vm1886_vm0, %v12881_v59  ;;  %v13328_v59 = vcombine.high %v655_v56, %v669_v55 }
 0x1ee   : > { %v13313_v1 = vpack.c.bf16 %v4374_v44, %v4346_v2  ;;  %3339 = vmatpush1.bf16.msra.mxu0 %v12983_v21  ;;  %v13318_v8 = vpack.c.bf16 %v4376_v51, %v4348_v47  ;;  %3480 = vmatpush1.bf16.msra.mxu1 %v13297_v46  ;;  %v683_v21 = vld [vmem:[%s11862_s23 + $0x164] sm:$0xff] }
 0x1ef   : > { %v2326_v24 = vpop.f32.mrb[80].mxu0  ;;  %3340 = vmatprep.subr.bf16.mxu0 %v12992_v62  ;;  %v13324_v12 = vpack.c.bf16 %v4375_v26, %v4347_v61  ;;  %v2467_v0 = vpop.f32.mrb[80].mxu1  ;;  %3481 = vmatprep.subr.bf16.mxu1 %v13303_v27  ;;  %v697_v47 = vld [vmem:[%s11862_s23 + $0x1e4] sm:$0xff]  ;;  %v13332_v2 = vpack.c.bf16 %v4377_v3, %v4349_v29 }
 0x1f0   : > { %17345 = vst [vmem:[#allocation90_spill] sm:$0xff] %v13313_v1  ;;  %17346 = vst [vmem:[#allocation91_spill] sm:$0xff] %v13318_v8  ;;  %v2327_v4 = vadd.f32 %v2326_v24, %v12876_v25  ;;  %v2328_v23 = vpop.f32.mrb[81].mxu0  ;;  %v2468_v62 = vadd.f32 %v2467_v0, %v12876_v25  ;;  %v2469_v9 = vpop.f32.mrb[81].mxu1  ;;  %v13339_v24 = vcombine.low %v655_v56, %v669_v55 }
 0x1f1   : > { %17347 = vst [vmem:[#allocation92_spill] sm:$0xff] %v13324_v12  ;;  %17348 = vst [vmem:[#allocation93_spill] sm:$0xff] %v13332_v2  ;;  %v2329_v44 = vadd.f32 %v2328_v23, %v12876_v25  ;;  %v2330_v40 = vpop.f32.mrb[82].mxu0  ;;  %v2470_v61 = vadd.f32 %v2469_v9, %v12876_v25  ;;  %v2471_v51 = vpop.f32.mrb[82].mxu1  ;;  %v13345_v0 = vcombine.high %v683_v21, %v697_v47 }
 0x1f2   : > { %v2331_v17 = vadd.f32 %v2330_v40, %v12899_v58  ;;  %v2332_v26 = vpop.f32.mrb[83].mxu0  ;;  %3341 = vmatpush1.bf16.msra.mxu0 %v13013_v31  ;;  %v4404_v8 = vmax.f32 %v2468_v62, 0.0  ;;  %v2472_v3 = vadd.f32 %v2471_v51, %v12899_v58  ;;  %v2473_v23 = vpop.f32.mrb[83].mxu1  ;;  %3482 = vmatpush1.bf16.msra.mxu1 %v13322_v34  ;;  %v4402_v40 = vmax.f32 %v2327_v4, 0.0 }
 0x1f3   : > { %v2333_v29 = vadd.f32 %v2332_v26, %v12899_v58  ;;  %3342 = vmatprep.subr.bf16.mxu0 %v13244_v37  ;;  %v4405_v1 = vmax.f32 %v2470_v61, 0.0  ;;  %v2474_v31 = vadd.f32 %v2473_v23, %v12899_v58  ;;  %3483 = vmatprep.subr.bf16.mxu1 %v13328_v59  ;;  %v4403_v56 = vmax.f32 %v2329_v44, 0.0  ;;  %v718_v37 = vld [vmem:[%s11862_s23 + $0x68] sm:$0xff] }
 0x1f4   : > { %v4430_v9 = vmax.f32 %v2331_v17, 0.0  ;;  %3111 = vmatmul.mubr.bf16.gmra.mrb[188].mxu0 %v12930_v42  ;;  %v4432_v62 = vmax.f32 %v2472_v3, 0.0  ;;  %3252 = vmatmul.mubr.bf16.gmra.mrb[188].mxu1 %v12930_v42  ;;  %v732_v26 = vld [vmem:[%s11862_s23 + $0xe8] sm:$0xff]  ;;  %v13366_v42 = vcombine.low %v683_v21, %v697_v47 }
 0x1f5   : > { %v4431_v55 = vmax.f32 %v2333_v29, 0.0  ;;  %10290 = vmatprep.mubr.msk.bf16.mxu0 %vm1886_vm0, %v12941_v30  ;;  %v4433_v4 = vmax.f32 %v2474_v31, 0.0  ;;  %10301 = vmatprep.mubr.msk.bf16.mxu1 %vm1886_vm0, %v12941_v30  ;;  %v13375_v30 = vcombine.high %v718_v37, %v732_v26  ;;  %v13386_v31 = vcombine.low %v718_v37, %v732_v26 }
 0x1f6   : > { %v13355_v51 = vpack.c.bf16 %v4430_v9, %v4402_v40  ;;  %3343 = vmatpush1.bf16.msra.mxu0 %v13255_v36  ;;  %v13360_v44 = vpack.c.bf16 %v4432_v62, %v4404_v8  ;;  %3484 = vmatpush1.bf16.msra.mxu1 %v13339_v24  ;;  %v746_v40 = vld [vmem:[%s11862_s23 + $0x168] sm:$0xff] }
 0x1f7   : > { %v13362_v17 = vpop.f32.mrb[84].mxu0  ;;  %3344 = vmatprep.subr.bf16.mxu0 %v13261_v35  ;;  %v13368_v61 = vpack.c.bf16 %v4431_v55, %v4403_v56  ;;  %v13372_v3 = vpop.f32.mrb[84].mxu1  ;;  %3485 = vmatprep.subr.bf16.mxu1 %v13345_v0  ;;  %v13377_v36 = vpack.c.bf16 %v4433_v4, %v4405_v1  ;;  %v760_v9 = vld [vmem:[%s11862_s23 + $0x1e8] sm:$0xff] }
 0x1f8   : > { %17349 = vst [vmem:[#allocation94_spill] sm:$0xff] %v13355_v51  ;;  %17350 = vst [vmem:[#allocation95_spill] sm:$0xff] %v13360_v44  ;;  %v13370_v29 = vpop.f32.mrb[85].mxu0  ;;  %v13379_v23 = vpop.f32.mrb[85].mxu1  ;;  %v13390_v1 = vcombine.high %v746_v40, %v760_v9  ;;  %v13400_v56 = vcombine.low %v746_v40, %v760_v9 }
 0x1f9   : > { %17351 = vst [vmem:[#allocation96_spill] sm:$0xff] %v13368_v61  ;;  %17352 = vst [vmem:[#allocation97_spill] sm:$0xff] %v13370_v29  ;;  %v2340_v8 = vpop.f32.mrb[86].mxu0  ;;  %v2481_v21 = vpop.f32.mrb[86].mxu1 }
 0x1fa   : > { %17353 = vst [vmem:[#allocation98_spill] sm:$0xff] %v13372_v3  ;;  %17354 = vst [vmem:[#allocation99_spill] sm:$0xff] %v13377_v36  ;;  %v2341_v35 = vpop.f32.mrb[87].mxu0  ;;  %3345 = vmatpush1.bf16.msra.mxu0 %v13280_v22  ;;  %v2482_v47 = vpop.f32.mrb[87].mxu1  ;;  %3486 = vmatpush1.bf16.msra.mxu1 %v13366_v42  ;;  %v13697_v3 = vld [vmem:[%s17259_s1 + $0x30] ss:$8 sps:$4 sm:$0xff]  }
 0x1fb   : > { %17355 = vst [vmem:[#allocation100_spill] sm:$0xff] %v13379_v23  ;;  %3346 = vmatprep.subr.bf16.mxu0 %v13286_v13  ;;  %3487 = vmatprep.subr.bf16.mxu1 %v13375_v30 }
 0x1fc   : > { %3121 = vmatmul.mubr.bf16.gmra.mrb[192].mxu0 %v12988_v16  ;;  %3262 = vmatmul.mubr.bf16.gmra.mrb[192].mxu1 %v12988_v16 }
 0x1fd   : > { %10291 = vmatprep.mubr.msk.bf16.mxu0 %vm1886_vm0, %v12998_v60  ;;  %10302 = vmatprep.mubr.msk.bf16.mxu1 %vm1886_vm0, %v12998_v60 }
 0x1fe   : > { %3347 = vmatpush1.bf16.msra.mxu0 %v13297_v46  ;;  %3488 = vmatpush1.bf16.msra.mxu1 %v13386_v31 }
 0x1ff   : > { %v2518_v22 = vpop.f32.mrb[88].mxu0  ;;  %3348 = vmatprep.subr.bf16.mxu0 %v13303_v27  ;;  %v2659_v37 = vpop.f32.mrb[88].mxu1  ;;  %3489 = vmatprep.subr.bf16.mxu1 %v13390_v1 }
 0x200   : > { %v2519_v55 = vadd.f32 %v2518_v22, %v12475_v32  ;;  %v2520_v62 = vpop.f32.mrb[89].mxu0  ;;  %v2660_v26 = vadd.f32 %v2659_v37, %v12475_v32  ;;  %v2661_v4 = vpop.f32.mrb[89].mxu1 }
 0x201   : > { %v2521_v16 = vadd.f32 %v2520_v62, %v12475_v32  ;;  %v2522_v60 = vpop.f32.mrb[90].mxu0  ;;  %v2662_v35 = vadd.f32 %v2661_v4, %v12475_v32  ;;  %v2663_v47 = vpop.f32.mrb[90].mxu1 }
 0x202   : > { %v2523_v8 = vadd.f32 %v2522_v60, %v12501_v48  ;;  %v2524_v21 = vpop.f32.mrb[91].mxu0  ;;  %3349 = vmatpush1.bf16.msra.mxu0 %v13322_v34  ;;  %v3904_v40 = vmax.f32 %v2660_v26, 0.0  ;;  %v2664_v22 = vadd.f32 %v2663_v47, %v12501_v48  ;;  %v2665_v44 = vpop.f32.mrb[91].mxu1  ;;  %3490 = vmatpush1.bf16.msra.mxu1 %v13400_v56  ;;  %v3902_v62 = vmax.f32 %v2519_v55, 0.0 }
 0x203   : > { %v2525_v9 = vadd.f32 %v2524_v21, %v12501_v48  ;;  %3612 = vmatprep.subr.bf16.mxu0 %v13286_v13  ;;  %v3905_v51 = vmax.f32 %v2662_v35, 0.0  ;;  %v2666_v60 = vadd.f32 %v2665_v44, %v12501_v48  ;;  %3753 = vmatprep.subr.bf16.mxu1 %v13375_v30  ;;  %v3903_v4 = vmax.f32 %v2521_v16, 0.0 }
 0x204   : > { %v3930_v37 = vmax.f32 %v2523_v8, 0.0  ;;  %3131 = vmatmul.mubr.bf16.gmra.mrb[196].mxu0 %v13033_v18  ;;  %v3932_v36 = vmax.f32 %v2664_v22, 0.0  ;;  %3272 = vmatmul.mubr.bf16.gmra.mrb[196].mxu1 %v13033_v18 }
 0x205   : > { %v3931_v26 = vmax.f32 %v2525_v9, 0.0  ;;  %10292 = vmatprep.mubr.msk.bf16.mxu0 %vm1886_vm0, %v13044_v20  ;;  %v3933_v13 = vmax.f32 %v2666_v60, 0.0  ;;  %10303 = vmatprep.mubr.msk.bf16.mxu1 %vm1886_vm0, %v13044_v20  ;;  %v17360_v60 = vld [vmem:[#allocation9_spill] sm:$0xff] }
 0x206   : > { %v13419_v21 = vpack.c.bf16 %v3930_v37, %v3902_v62  ;;  %v13423_v55 = vpack.c.bf16 %v3932_v36, %v3904_v40 }
 0x207   : > { %v2528_v44 = vpop.f32.mrb[92].mxu0  ;;  %v13425_v8 = vpack.c.bf16 %v3931_v26, %v3903_v4  ;;  %v2669_v47 = vpop.f32.mrb[92].mxu1  ;;  %v13428_v9 = vpack.c.bf16 %v3933_v13, %v3905_v51 }
 0x208   : > { %17356 = vst [vmem:[#allocation101_spill] sm:$0xff] %v13419_v21  ;;  %17357 = vst [vmem:[#allocation102_spill] sm:$0xff] %v13423_v55  ;;  %v2529_v16 = vadd.f32 %v2528_v44, %v12495_v39  ;;  %v2530_v35 = vpop.f32.mrb[93].mxu0  ;;  %v2670_v22 = vadd.f32 %v2669_v47, %v12495_v39  ;;  %v2671_v37 = vpop.f32.mrb[93].mxu1  ;;  %v17361_v47 = vld [vmem:[#allocation60_spill] sm:$0xff] }
 0x209   : > { %17358 = vst [vmem:[#allocation103_spill] sm:$0xff] %v13425_v8  ;;  %17359 = vst [vmem:[#allocation104_spill] sm:$0xff] %v13428_v9  ;;  %v2531_v18 = vadd.f32 %v2530_v35, %v12495_v39  ;;  %v2532_v62 = vpop.f32.mrb[94].mxu0  ;;  %v2672_v20 = vadd.f32 %v2671_v37, %v12495_v39  ;;  %v2673_v40 = vpop.f32.mrb[94].mxu1 }
 0x20a   : > { %v2533_v21 = vadd.f32 %v2532_v62, %v17360_v60  ;;  %v2534_v36 = vpop.f32.mrb[95].mxu0  ;;  %v3960_v4 = vmax.f32 %v2670_v22, 0.0  ;;  %v2674_v44 = vadd.f32 %v2673_v40, %v17360_v60  ;;  %v2675_v55 = vpop.f32.mrb[95].mxu1  ;;  %v3958_v51 = vmax.f32 %v2529_v16, 0.0 }
 0x20b   : > { %v2535_v26 = vadd.f32 %v2534_v36, %v17360_v60  ;;  %v3961_v9 = vmax.f32 %v2672_v20, 0.0  ;;  %v2676_v35 = vadd.f32 %v2675_v55, %v17360_v60  ;;  %v3959_v8 = vmax.f32 %v2531_v18, 0.0 }
 0x20c   : > { %v3986_v13 = vmax.f32 %v2533_v21, 0.0  ;;  %3141 = vmatmul.mubr.bf16.gmra.mrb[200].mxu0 %v17361_v47  ;;  %v3988_v62 = vmax.f32 %v2674_v44, 0.0  ;;  %3282 = vmatmul.mubr.bf16.gmra.mrb[200].mxu1 %v17361_v47 }
 0x20d   : > { %v3987_v61 = vmax.f32 %v2535_v26, 0.0  ;;  %10293 = vmatprep.mubr.msk.bf16.mxu0 %vm1886_vm0, %v13085_v19  ;;  %v3989_v37 = vmax.f32 %v2676_v35, 0.0  ;;  %10304 = vmatprep.mubr.msk.bf16.mxu1 %vm1886_vm0, %v13085_v19 }
 0x20e   : > { %v13441_v22 = vpack.c.bf16 %v3986_v13, %v3958_v51  ;;  %v13445_v21 = vpack.c.bf16 %v3988_v62, %v3960_v4 }
 0x20f   : > { %v2538_v16 = vpop.f32.mrb[96].mxu0  ;;  %v13447_v55 = vpack.c.bf16 %v3987_v61, %v3959_v8  ;;  %v2679_v36 = vpop.f32.mrb[96].mxu1  ;;  %v13450_v40 = vpack.c.bf16 %v3989_v37, %v3961_v9 }
 0x210   : > { %17362 = vst [vmem:[#allocation9_spill] sm:$0xff] %v13441_v22  ;;  %17363 = vst [vmem:[#allocation60_spill] sm:$0xff] %v13445_v21  ;;  %v2539_v18 = vadd.f32 %v2538_v16, %v12564_v11  ;;  %v2540_v20 = vpop.f32.mrb[97].mxu0  ;;  %v2680_v44 = vadd.f32 %v2679_v36, %v12564_v11  ;;  %v2681_v13 = vpop.f32.mrb[97].mxu1  ;;  %v17366_v36 = vld [vmem:[#allocation65_spill] sm:$0xff] }
 0x211   : > { %17364 = vst [vmem:[#allocation105_spill] sm:$0xff] %v13447_v55  ;;  %17365 = vst [vmem:[#allocation106_spill] sm:$0xff] %v13450_v40  ;;  %v2541_v26 = vadd.f32 %v2540_v20, %v12564_v11  ;;  %v2542_v51 = vpop.f32.mrb[98].mxu0  ;;  %v2682_v19 = vadd.f32 %v2681_v13, %v12564_v11  ;;  %v2683_v47 = vpop.f32.mrb[98].mxu1 }
 0x212   : > { %v2543_v35 = vadd.f32 %v2542_v51, %v12574_v14  ;;  %v2544_v4 = vpop.f32.mrb[99].mxu0  ;;  %v4016_v61 = vmax.f32 %v2680_v44, 0.0  ;;  %v2684_v62 = vadd.f32 %v2683_v47, %v12574_v14  ;;  %v2685_v16 = vpop.f32.mrb[99].mxu1  ;;  %v4014_v9 = vmax.f32 %v2539_v18, 0.0 }
 0x213   : > { %v2545_v8 = vadd.f32 %v2544_v4, %v12574_v14  ;;  %v4017_v21 = vmax.f32 %v2682_v19, 0.0  ;;  %v2686_v20 = vadd.f32 %v2685_v16, %v12574_v14  ;;  %v4015_v22 = vmax.f32 %v2541_v26, 0.0 }
 0x214   : > { %v4042_v37 = vmax.f32 %v2543_v35, 0.0  ;;  %3151 = vmatmul.mubr.bf16.gmra.mrb[204].mxu0 %v17366_v36  ;;  %v4044_v51 = vmax.f32 %v2684_v62, 0.0  ;;  %3292 = vmatmul.mubr.bf16.gmra.mrb[204].mxu1 %v17366_v36 }
 0x215   : > { %v4043_v40 = vmax.f32 %v2545_v8, 0.0  ;;  %10294 = vmatprep.mubr.msk.bf16.mxu0 %vm1886_vm0, %v13117_v33  ;;  %v4045_v13 = vmax.f32 %v2686_v20, 0.0  ;;  %10305 = vmatprep.mubr.msk.bf16.mxu1 %vm1886_vm0, %v13117_v33  ;;  %v17371_v20 = vld [vmem:[#allocation18_spill] sm:$0xff] }
 0x216   : > { %v13463_v44 = vpack.c.bf16 %v4042_v37, %v4014_v9  ;;  %v13467_v18 = vpack.c.bf16 %v4044_v51, %v4016_v61 }
 0x217   : > { %v2548_v35 = vpop.f32.mrb[100].mxu0  ;;  %v13469_v19 = vpack.c.bf16 %v4043_v40, %v4015_v22  ;;  %v2689_v47 = vpop.f32.mrb[100].mxu1  ;;  %v13472_v8 = vpack.c.bf16 %v4045_v13, %v4017_v21 }
 0x218   : > { %17367 = vst [vmem:[#allocation65_spill] sm:$0xff] %v13463_v44  ;;  %17368 = vst [vmem:[#allocation107_spill] sm:$0xff] %v13467_v18  ;;  %v2549_v26 = vadd.f32 %v2548_v35, %v12602_v7  ;;  %v2550_v4 = vpop.f32.mrb[101].mxu0  ;;  %v2690_v16 = vadd.f32 %v2689_v47, %v12602_v7  ;;  %v2691_v37 = vpop.f32.mrb[101].mxu1  ;;  %v17372_v47 = vld [vmem:[#allocation70_spill] sm:$0xff] }
 0x219   : > { %17369 = vst [vmem:[#allocation108_spill] sm:$0xff] %v13469_v19  ;;  %17370 = vst [vmem:[#allocation109_spill] sm:$0xff] %v13472_v8  ;;  %v2551_v62 = vadd.f32 %v2550_v4, %v12602_v7  ;;  %v2552_v9 = vpop.f32.mrb[102].mxu0  ;;  %v2692_v33 = vadd.f32 %v2691_v37, %v12602_v7  ;;  %v2693_v51 = vpop.f32.mrb[102].mxu1 }
 0x21a   : > { %v2553_v36 = vadd.f32 %v2552_v9, %v17371_v20  ;;  %v2554_v61 = vpop.f32.mrb[103].mxu0  ;;  %v4072_v22 = vmax.f32 %v2690_v16, 0.0  ;;  %v2694_v35 = vadd.f32 %v2693_v51, %v17371_v20  ;;  %v2695_v18 = vpop.f32.mrb[103].mxu1  ;;  %v4070_v21 = vmax.f32 %v2549_v26, 0.0 }
 0x21b   : > { %v2555_v40 = vadd.f32 %v2554_v61, %v17371_v20  ;;  %v4073_v44 = vmax.f32 %v2692_v33, 0.0  ;;  %v2696_v4 = vadd.f32 %v2695_v18, %v17371_v20  ;;  %v4071_v8 = vmax.f32 %v2551_v62, 0.0 }
 0x21c   : > { %v4098_v13 = vmax.f32 %v2553_v36, 0.0  ;;  %3161 = vmatmul.mubr.bf16.gmra.mrb[208].mxu0 %v17372_v47  ;;  %v4100_v9 = vmax.f32 %v2694_v35, 0.0  ;;  %3302 = vmatmul.mubr.bf16.gmra.mrb[208].mxu1 %v17372_v47 }
 0x21d   : > { %v4099_v19 = vmax.f32 %v2555_v40, 0.0  ;;  %10295 = vmatprep.mubr.msk.bf16.mxu0 %vm1886_vm0, %v13149_v49  ;;  %v4101_v37 = vmax.f32 %v2696_v4, 0.0  ;;  %10306 = vmatprep.mubr.msk.bf16.mxu1 %vm1886_vm0, %v13149_v49 }
 0x21e   : > { %v13485_v16 = vpack.c.bf16 %v4098_v13, %v4070_v21  ;;  %v13489_v26 = vpack.c.bf16 %v4100_v9, %v4072_v22 }
 0x21f   : > { %v2558_v36 = vpop.f32.mrb[104].mxu0  ;;  %v13491_v18 = vpack.c.bf16 %v4099_v19, %v4071_v8  ;;  %v2699_v61 = vpop.f32.mrb[104].mxu1  ;;  %v13494_v51 = vpack.c.bf16 %v4101_v37, %v4073_v44 }
 0x220   : > { %17373 = vst [vmem:[#allocation18_spill] sm:$0xff] %v13485_v16  ;;  %17374 = vst [vmem:[#allocation70_spill] sm:$0xff] %v13489_v26  ;;  %v2559_v62 = vadd.f32 %v2558_v36, %v12640_v63  ;;  %v2560_v33 = vpop.f32.mrb[105].mxu0  ;;  %v2700_v35 = vadd.f32 %v2699_v61, %v12640_v63  ;;  %v2701_v13 = vpop.f32.mrb[105].mxu1  ;;  %v17377_v61 = vld [vmem:[#allocation75_spill] sm:$0xff] }
 0x221   : > { %17375 = vst [vmem:[#allocation110_spill] sm:$0xff] %v13491_v18  ;;  %17376 = vst [vmem:[#allocation111_spill] sm:$0xff] %v13494_v51  ;;  %v2561_v40 = vadd.f32 %v2560_v33, %v12640_v63  ;;  %v2562_v21 = vpop.f32.mrb[106].mxu0  ;;  %v2702_v49 = vadd.f32 %v2701_v13, %v12640_v63  ;;  %v2703_v47 = vpop.f32.mrb[106].mxu1  ;;  %v17378_v13 = vld [vmem:[#allocation6_spill] sm:$0xff] }
 0x222   : > { %v2563_v4 = vadd.f32 %v2562_v21, %v12650_v38  ;;  %v2564_v22 = vpop.f32.mrb[107].mxu0  ;;  %v4128_v19 = vmax.f32 %v2700_v35, 0.0  ;;  %v2704_v9 = vadd.f32 %v2703_v47, %v12650_v38  ;;  %v2705_v36 = vpop.f32.mrb[107].mxu1  ;;  %v4126_v44 = vmax.f32 %v2559_v62, 0.0 }
 0x223   : > { %v2565_v8 = vadd.f32 %v2564_v22, %v12650_v38  ;;  %v4129_v26 = vmax.f32 %v2702_v49, 0.0  ;;  %v2706_v33 = vadd.f32 %v2705_v36, %v12650_v38  ;;  %v4127_v16 = vmax.f32 %v2561_v40, 0.0 }
 0x224   : > { %v4154_v37 = vmax.f32 %v2563_v4, 0.0  ;;  %3171 = vmatmul.mubr.bf16.gmra.mrb[212].mxu0 %v17377_v61  ;;  %v4156_v21 = vmax.f32 %v2704_v9, 0.0  ;;  %3312 = vmatmul.mubr.bf16.gmra.mrb[212].mxu1 %v17377_v61 }
 0x225   : > { %v4155_v51 = vmax.f32 %v2565_v8, 0.0  ;;  %10296 = vmatprep.mubr.msk.bf16.mxu0 %vm1886_vm0, %v17378_v13  ;;  %v4157_v22 = vmax.f32 %v2706_v33, 0.0  ;;  %10307 = vmatprep.mubr.msk.bf16.mxu1 %vm1886_vm0, %v17378_v13 }
 0x226   : > { %v13507_v35 = vpack.c.bf16 %v4154_v37, %v4126_v44  ;;  %v13511_v62 = vpack.c.bf16 %v4156_v21, %v4128_v19 }
 0x227   : > { %v2568_v4 = vpop.f32.mrb[108].mxu0  ;;  %v13513_v49 = vpack.c.bf16 %v4155_v51, %v4127_v16  ;;  %v2709_v8 = vpop.f32.mrb[108].mxu1  ;;  %v13516_v9 = vpack.c.bf16 %v4157_v22, %v4129_v26 }
 0x228   : > { %17379 = vst [vmem:[#allocation75_spill] sm:$0xff] %v13507_v35  ;;  %17380 = vst [vmem:[#allocation6_spill] sm:$0xff] %v13511_v62  ;;  %v2569_v40 = vadd.f32 %v2568_v4, %v12678_v5  ;;  %v2570_v47 = vpop.f32.mrb[109].mxu0  ;;  %v2710_v44 = vadd.f32 %v2709_v8, %v12678_v5  ;;  %v2711_v33 = vpop.f32.mrb[109].mxu1 }
 0x229   : > { %17381 = vst [vmem:[#allocation112_spill] sm:$0xff] %v13513_v49  ;;  %17382 = vst [vmem:[#allocation113_spill] sm:$0xff] %v13516_v9  ;;  %v2571_v36 = vadd.f32 %v2570_v47, %v12678_v5  ;;  %v2572_v37 = vpop.f32.mrb[110].mxu0  ;;  %v2712_v19 = vadd.f32 %v2711_v33, %v12678_v5  ;;  %v2713_v62 = vpop.f32.mrb[110].mxu1 }
 0x22a   : > { %v2573_v61 = vadd.f32 %v2572_v37, %v12688_v45  ;;  %v2574_v21 = vpop.f32.mrb[111].mxu0  ;;  %v4184_v16 = vmax.f32 %v2710_v44, 0.0  ;;  %v2714_v4 = vadd.f32 %v2713_v62, %v12688_v45  ;;  %v2715_v35 = vpop.f32.mrb[111].mxu1  ;;  %v4182_v26 = vmax.f32 %v2569_v40, 0.0 }
 0x22b   : > { %v2575_v51 = vadd.f32 %v2574_v21, %v12688_v45  ;;  %v4185_v9 = vmax.f32 %v2712_v19, 0.0  ;;  %v2716_v47 = vadd.f32 %v2715_v35, %v12688_v45  ;;  %v4183_v8 = vmax.f32 %v2571_v36, 0.0 }
 0x22c   : > { %v4210_v22 = vmax.f32 %v2573_v61, 0.0  ;;  %3181 = vmatmul.mubr.bf16.gmra.mrb[216].mxu0 %v12231_v10  ;;  %v4212_v37 = vmax.f32 %v2714_v4, 0.0  ;;  %3322 = vmatmul.mubr.bf16.gmra.mrb[216].mxu1 %v12231_v10 }
 0x22d   : > { %v4211_v49 = vmax.f32 %v2575_v51, 0.0  ;;  %10308 = vmatprep.mubr.msk.bf16.mxu0 %vm1886_vm0, %v13203_v28  ;;  %v4213_v33 = vmax.f32 %v2716_v47, 0.0  ;;  %10319 = vmatprep.mubr.msk.bf16.mxu1 %vm1886_vm0, %v13203_v28 }
 0x22e   : > { %v13529_v44 = vpack.c.bf16 %v4210_v22, %v4182_v26  ;;  %v13533_v62 = vpack.c.bf16 %v4212_v37, %v4184_v16 }
 0x22f   : > { %v2578_v40 = vpop.f32.mrb[112].mxu0  ;;  %v13535_v35 = vpack.c.bf16 %v4211_v49, %v4183_v8  ;;  %v2719_v19 = vpop.f32.mrb[112].mxu1  ;;  %v13538_v21 = vpack.c.bf16 %v4213_v33, %v4185_v9 }
 0x230   : > { %17383 = vst [vmem:[#allocation114_spill] sm:$0xff] %v13529_v44  ;;  %17384 = vst [vmem:[#allocation115_spill] sm:$0xff] %v13533_v62  ;;  %v2579_v36 = vadd.f32 %v2578_v40, %v12716_v57  ;;  %v2580_v61 = vpop.f32.mrb[113].mxu0  ;;  %v2720_v4 = vadd.f32 %v2719_v19, %v12716_v57  ;;  %v2721_v22 = vpop.f32.mrb[113].mxu1  ;;  %v13550_v44 = vld [vmem:[%s17259_s1] ss:$8 sps:$4 sm:$0xff]  }
 0x231   : > { %17385 = vst [vmem:[#allocation116_spill] sm:$0xff] %v13535_v35  ;;  %17386 = vst [vmem:[#allocation117_spill] sm:$0xff] %v13538_v21  ;;  %v2581_v51 = vadd.f32 %v2580_v61, %v12716_v57  ;;  %v2582_v26 = vpop.f32.mrb[114].mxu0  ;;  %v2722_v16 = vadd.f32 %v2721_v22, %v12716_v57  ;;  %v2723_v47 = vpop.f32.mrb[114].mxu1  ;;  %v670_v22 = vld [vmem:[%s11862_s23 + $0xec] sm:$0xff] }
 0x232   : > { %v2583_v28 = vadd.f32 %v2582_v26, %v12726_v6  ;;  %v2584_v49 = vpop.f32.mrb[115].mxu0  ;;  %v4240_v8 = vmax.f32 %v2720_v4, 0.0  ;;  %v2724_v9 = vadd.f32 %v2723_v47, %v12726_v6  ;;  %v2725_v33 = vpop.f32.mrb[115].mxu1  ;;  %v4238_v40 = vmax.f32 %v2579_v36, 0.0  ;;  %v656_v26 = vld [vmem:[%s11862_s23 + $0x6c] sm:$0xff] }
 0x233   : > { %v2585_v37 = vadd.f32 %v2584_v49, %v12726_v6  ;;  %v4241_v62 = vmax.f32 %v2722_v16, 0.0  ;;  %v2726_v19 = vadd.f32 %v2725_v33, %v12726_v6  ;;  %v4239_v4 = vmax.f32 %v2581_v51, 0.0  ;;  %v13567_v51 = vld [vmem:[%s17259_s1 + $0x14] ss:$8 sps:$4 sm:$0xff]   ;;  %v684_v33 = vld [vmem:[%s11862_s23 + $0x16c] sm:$0xff] }
 0x234   : > { %v4266_v61 = vmax.f32 %v2583_v28, 0.0  ;;  %3363 = vmatmul.mubr.bf16.vlgmr.msra.gmra.mrb[220].mxu0 %v13550_v44  ;;  %v4268_v49 = vmax.f32 %v2724_v9, 0.0  ;;  %3504 = vmatmul.mubr.bf16.vlgmr.msra.gmra.mrb[220].mxu1 %v13550_v44 }
 0x235   : > { %v4267_v21 = vmax.f32 %v2585_v37, 0.0  ;;  %3613 = vmatpush1.bf16.msra.mxu0 %v13297_v46  ;;  %v4269_v28 = vmax.f32 %v2726_v19, 0.0  ;;  %3754 = vmatpush1.bf16.msra.mxu1 %v13386_v31  ;;  %v13571_v46 = vcombine.high %v656_v26, %v670_v22 }
 0x236   : > { %v13557_v36 = vpack.c.bf16 %v4266_v61, %v4238_v40  ;;  %3614 = vmatprep.subr.bf16.mxu0 %v13303_v27  ;;  %v13561_v16 = vpack.c.bf16 %v4268_v49, %v4240_v8  ;;  %3755 = vmatprep.subr.bf16.mxu1 %v13390_v1  ;;  %v698_v40 = vld [vmem:[%s11862_s23 + $0x1ec] sm:$0xff] }
 0x237   : > { %v2588_v47 = vpop.f32.mrb[116].mxu0  ;;  %10309 = vmatprep.mubr.msk.bf16.mxu0 %vm1886_vm0, %v13567_v51  ;;  %v13573_v37 = vpack.c.bf16 %v4267_v21, %v4239_v4  ;;  %v2729_v8 = vpop.f32.mrb[116].mxu1  ;;  %10320 = vmatprep.mubr.msk.bf16.mxu1 %vm1886_vm0, %v13567_v51  ;;  %v13580_v61 = vpack.c.bf16 %v4269_v28, %v4241_v62  ;;  %v13589_v62 = vcombine.low %v656_v26, %v670_v22  ;;  %v699_v26 = vld [vmem:[%s11862_s23 + $0x70] sm:$0xff] }
 0x238   : > { %17387 = vst [vmem:[#allocation118_spill] sm:$0xff] %v13557_v36  ;;  %17388 = vst [vmem:[#allocation119_spill] sm:$0xff] %v13561_v16  ;;  %v2589_v9 = vadd.f32 %v2588_v47, %v12755_v50  ;;  %v2590_v27 = vpop.f32.mrb[117].mxu0  ;;  %v2730_v49 = vadd.f32 %v2729_v8, %v12755_v50  ;;  %v2731_v21 = vpop.f32.mrb[117].mxu1  ;;  %v700_v22 = vld [vmem:[%s11862_s23 + $0xf0] sm:$0xff] }
 0x239   : > { %17389 = vst [vmem:[#allocation120_spill] sm:$0xff] %v13573_v37  ;;  %17390 = vst [vmem:[#allocation121_spill] sm:$0xff] %v13580_v61  ;;  %v2591_v19 = vadd.f32 %v2590_v27, %v12755_v50  ;;  %3615 = vmatpush1.bf16.msra.mxu0 %v13322_v34  ;;  %v2592_v16 = vpop.f32.mrb[118].mxu0  ;;  %3756 = vmatpush1.bf16.msra.mxu1 %v13400_v56  ;;  %v2732_v47 = vadd.f32 %v2731_v21, %v12755_v50  ;;  %v2733_v37 = vpop.f32.mrb[118].mxu1 }
 0x23a   : > { %v2593_v4 = vadd.f32 %v2592_v16, %v12777_v53  ;;  %v2594_v36 = vpop.f32.mrb[119].mxu0  ;;  %3616 = vmatprep.subr.bf16.mxu0 %v13328_v59  ;;  %v4296_v28 = vmax.f32 %v2730_v49, 0.0  ;;  %v2734_v34 = vadd.f32 %v2733_v37, %v12777_v53  ;;  %v2735_v8 = vpop.f32.mrb[119].mxu1  ;;  %3757 = vmatprep.subr.bf16.mxu1 %v13571_v46  ;;  %v13594_v61 = vcombine.high %v684_v33, %v698_v40  ;;  %v13600_v59 = vld [vmem:[%s17259_s1 + $0x10] ss:$8 sps:$4 sm:$0xff]  }
 0x23b   : > { %v2595_v27 = vadd.f32 %v2594_v36, %v12777_v53  ;;  %v4294_v16 = vmax.f32 %v2589_v9, 0.0  ;;  %v4297_v35 = vmax.f32 %v2732_v47, 0.0  ;;  %v2736_v18 = vadd.f32 %v2735_v8, %v12777_v53 }
 0x23c   : > { %v4322_v21 = vmax.f32 %v2593_v4, 0.0  ;;  %3373 = vmatmul.mubr.bf16.gmra.mrb[224].mxu0 %v13600_v59  ;;  %v4295_v36 = vmax.f32 %v2591_v19, 0.0  ;;  %v4324_v49 = vmax.f32 %v2734_v34, 0.0  ;;  %3514 = vmatmul.mubr.bf16.gmra.mrb[224].mxu1 %v13600_v59  ;;  %v13611_v47 = vcombine.low %v684_v33, %v698_v40  ;;  %v702_v34 = vld [vmem:[%s11862_s23 + $0x1f0] sm:$0xff] }
 0x23d   : > { %v4323_v37 = vmax.f32 %v2595_v27, 0.0  ;;  %3617 = vmatpush1.bf16.msra.mxu0 %v13339_v24  ;;  %v4325_v4 = vmax.f32 %v2736_v18, 0.0  ;;  %3758 = vmatpush1.bf16.msra.mxu1 %v13589_v62  ;;  %v13619_v24 = vld [vmem:[%s17259_s1 + $0x24] ss:$8 sps:$4 sm:$0xff]   ;;  %v13623_v18 = vcombine.high %v699_v26, %v700_v22 }
 0x23e   : > { %v13607_v9 = vpack.c.bf16 %v4322_v21, %v4294_v16  ;;  %3618 = vmatprep.subr.bf16.mxu0 %v13345_v0  ;;  %v13613_v8 = vpack.c.bf16 %v4324_v49, %v4296_v28  ;;  %3759 = vmatprep.subr.bf16.mxu1 %v13594_v61  ;;  %v701_v28 = vld [vmem:[%s11862_s23 + $0x170] sm:$0xff] }
 0x23f   : > { %v2598_v19 = vpop.f32.mrb[120].mxu0  ;;  %10310 = vmatprep.mubr.msk.bf16.mxu0 %vm1886_vm0, %v13619_v24  ;;  %v13625_v27 = vpack.c.bf16 %v4323_v37, %v4295_v36  ;;  %v2739_v40 = vpop.f32.mrb[120].mxu1  ;;  %10321 = vmatprep.mubr.msk.bf16.mxu1 %vm1886_vm0, %v13619_v24  ;;  %v13632_v16 = vpack.c.bf16 %v4325_v4, %v4297_v35  ;;  %v13641_v35 = vcombine.low %v699_v26, %v700_v22  ;;  %v703_v26 = vld [vmem:[%s11862_s23 + $0x74] sm:$0xff] }
 0x240   : > { %17391 = vst [vmem:[#allocation122_spill] sm:$0xff] %v13607_v9  ;;  %17392 = vst [vmem:[#allocation123_spill] sm:$0xff] %v13613_v8  ;;  %v2599_v0 = vadd.f32 %v2598_v19, %v12814_v43  ;;  %v2600_v33 = vpop.f32.mrb[121].mxu0  ;;  %v2740_v49 = vadd.f32 %v2739_v40, %v12814_v43  ;;  %v2741_v36 = vpop.f32.mrb[121].mxu1  ;;  %v704_v22 = vld [vmem:[%s11862_s23 + $0xf4] sm:$0xff] }
 0x241   : > { %17393 = vst [vmem:[#allocation124_spill] sm:$0xff] %v13625_v27  ;;  %17394 = vst [vmem:[#allocation125_spill] sm:$0xff] %v13632_v16  ;;  %v2601_v21 = vadd.f32 %v2600_v33, %v12814_v43  ;;  %3619 = vmatpush1.bf16.msra.mxu0 %v13366_v42  ;;  %v2602_v8 = vpop.f32.mrb[122].mxu0  ;;  %3760 = vmatpush1.bf16.msra.mxu1 %v13611_v47  ;;  %v2742_v19 = vadd.f32 %v2741_v36, %v12814_v43  ;;  %v2743_v27 = vpop.f32.mrb[122].mxu1 }
 0x242   : > { %v2603_v37 = vadd.f32 %v2602_v8, %v12837_v54  ;;  %v2604_v9 = vpop.f32.mrb[123].mxu0  ;;  %3620 = vmatprep.subr.bf16.mxu0 %v13375_v30  ;;  %v4352_v4 = vmax.f32 %v2740_v49, 0.0  ;;  %v2744_v42 = vadd.f32 %v2743_v27, %v12837_v54  ;;  %v2745_v40 = vpop.f32.mrb[123].mxu1  ;;  %3761 = vmatprep.subr.bf16.mxu1 %v13623_v18  ;;  %v13646_v16 = vcombine.high %v701_v28, %v702_v34  ;;  %v13652_v30 = vld [vmem:[%s17259_s1 + $0x20] ss:$8 sps:$4 sm:$0xff]  }
 0x243   : > { %v2605_v33 = vadd.f32 %v2604_v9, %v12837_v54  ;;  %v4350_v8 = vmax.f32 %v2599_v0, 0.0  ;;  %v4353_v55 = vmax.f32 %v2742_v19, 0.0  ;;  %v2746_v2 = vadd.f32 %v2745_v40, %v12837_v54 }
 0x244   : > { %v4378_v36 = vmax.f32 %v2603_v37, 0.0  ;;  %3383 = vmatmul.mubr.bf16.gmra.mrb[228].mxu0 %v13652_v30  ;;  %v4351_v9 = vmax.f32 %v2601_v21, 0.0  ;;  %v4380_v49 = vmax.f32 %v2744_v42, 0.0  ;;  %3524 = vmatmul.mubr.bf16.gmra.mrb[228].mxu1 %v13652_v30  ;;  %v13663_v19 = vcombine.low %v701_v28, %v702_v34  ;;  %v706_v42 = vld [vmem:[%s11862_s23 + $0x1f4] sm:$0xff] }
 0x245   : > { %v4379_v27 = vmax.f32 %v2605_v33, 0.0  ;;  %3621 = vmatpush1.bf16.msra.mxu0 %v13386_v31  ;;  %v4381_v37 = vmax.f32 %v2746_v2, 0.0  ;;  %3762 = vmatpush1.bf16.msra.mxu1 %v13641_v35  ;;  %v13671_v31 = vld [vmem:[%s17259_s1 + $0x34] ss:$8 sps:$4 sm:$0xff]   ;;  %v10117_v2 = vcombine.high %v703_v26, %v704_v22 }
 0x246   : > { %v13659_v0 = vpack.c.bf16 %v4378_v36, %v4350_v8  ;;  %3622 = vmatprep.subr.bf16.mxu0 %v13390_v1  ;;  %v13665_v40 = vpack.c.bf16 %v4380_v49, %v4352_v4  ;;  %3763 = vmatprep.subr.bf16.mxu1 %v13646_v16  ;;  %v705_v4 = vld [vmem:[%s11862_s23 + $0x174] sm:$0xff] }
 0x247   : > { %v2608_v21 = vpop.f32.mrb[124].mxu0  ;;  %10311 = vmatprep.mubr.msk.bf16.mxu0 %vm1886_vm0, %v13671_v31  ;;  %v13675_v33 = vpack.c.bf16 %v4379_v27, %v4351_v9  ;;  %v2749_v34 = vpop.f32.mrb[124].mxu1  ;;  %10322 = vmatprep.mubr.msk.bf16.mxu1 %vm1886_vm0, %v13671_v31  ;;  %v13682_v8 = vpack.c.bf16 %v4381_v37, %v4353_v55  ;;  %v10116_v55 = vcombine.low %v703_v26, %v704_v22  ;;  %v734_v26 = vld [vmem:[%s11862_s23 + $0xf8] sm:$0xff] }
 0x248   : > { %17395 = vst [vmem:[#allocation126_spill] sm:$0xff] %v13659_v0  ;;  %17396 = vst [vmem:[#allocation127_spill] sm:$0xff] %v13665_v40  ;;  %v2609_v1 = vadd.f32 %v2608_v21, %v12876_v25  ;;  %v2610_v28 = vpop.f32.mrb[125].mxu0  ;;  %v2750_v49 = vadd.f32 %v2749_v34, %v12876_v25  ;;  %v2751_v9 = vpop.f32.mrb[125].mxu1 }
 0x249   : > { %17397 = vst [vmem:[#allocation128_spill] sm:$0xff] %v13675_v33  ;;  %17398 = vst [vmem:[#allocation129_spill] sm:$0xff] %v13682_v8  ;;  %v2611_v36 = vadd.f32 %v2610_v28, %v12876_v25  ;;  %3623 = vmatpush1.bf16.msra.mxu0 %v13400_v56  ;;  %v2612_v40 = vpop.f32.mrb[126].mxu0  ;;  %3764 = vmatpush1.bf16.msra.mxu1 %v13663_v19  ;;  %v2752_v21 = vadd.f32 %v2751_v9, %v12876_v25  ;;  %v2753_v33 = vpop.f32.mrb[126].mxu1 }
 0x24a   : > { %v2613_v27 = vadd.f32 %v2612_v40, %v12899_v58  ;;  %v2614_v0 = vpop.f32.mrb[127].mxu0  ;;  %3624 = vmatprep.subr.bf16.mxu0 %v13571_v46  ;;  %v4408_v37 = vmax.f32 %v2750_v49, 0.0  ;;  %v2754_v56 = vadd.f32 %v2753_v33, %v12899_v58  ;;  %v2755_v34 = vpop.f32.mrb[127].mxu1  ;;  %3765 = vmatprep.subr.bf16.mxu1 %v10117_v2  ;;  %v10119_v8 = vcombine.high %v705_v4, %v706_v42  ;;  %v720_v46 = vld [vmem:[%s11862_s23 + $0x78] sm:$0xff] }
 0x24b   : > { %v2615_v28 = vadd.f32 %v2614_v0, %v12899_v58  ;;  %v4406_v12 = vmax.f32 %v2609_v1, 0.0  ;;  %v4409_v40 = vmax.f32 %v2752_v21, 0.0  ;;  %v2756_v9 = vadd.f32 %v2755_v34, %v12899_v58 }
 0x24c   : > { %v4434_v23 = vmax.f32 %v2613_v27, 0.0  ;;  %3393 = vmatmul.mubr.bf16.gmra.mrb[232].mxu0 %v13697_v3  ;;  %v4407_v22 = vmax.f32 %v2611_v36, 0.0  ;;  %v4436_v33 = vmax.f32 %v2754_v56, 0.0  ;;  %3534 = vmatmul.mubr.bf16.gmra.mrb[232].mxu1 %v13697_v3  ;;  %v10118_v49 = vcombine.low %v705_v4, %v706_v42  ;;  %v13714_v36 = vld [vmem:[%s17259_s1 + $0x44] ss:$8 sps:$4 sm:$0xff]   ;;  %v748_v4 = vld [vmem:[%s11862_s23 + $0x178] sm:$0xff] }
 0x24d   : > { %v4435_v0 = vmax.f32 %v2615_v28, 0.0  ;;  %3625 = vmatpush1.bf16.msra.mxu0 %v13589_v62  ;;  %v4437_v1 = vmax.f32 %v2756_v9, 0.0  ;;  %3766 = vmatpush1.bf16.msra.mxu1 %v10116_v55  ;;  %v762_v42 = vld [vmem:[%s11862_s23 + $0x1f8] sm:$0xff]  ;;  %v10146_v34 = vcombine.low %v720_v46, %v734_v26 }
 0x24e   : > { %v13704_v2 = vpack.c.bf16 %v4434_v23, %v4406_v12  ;;  %3626 = vmatprep.subr.bf16.mxu0 %v13594_v61  ;;  %v13707_v27 = vpack.c.bf16 %v4436_v33, %v4408_v37  ;;  %3767 = vmatprep.subr.bf16.mxu1 %v10119_v8  ;;  %v10147_v12 = vcombine.high %v720_v46, %v734_v26 }
 0x24f   : > { %v13709_v21 = vpop.f32.mrb[128].mxu0  ;;  %10312 = vmatprep.mubr.msk.bf16.mxu0 %vm1886_vm0, %v13714_v36  ;;  %v13718_v23 = vpack.c.bf16 %v4435_v0, %v4407_v22  ;;  %v13722_v61 = vpop.f32.mrb[128].mxu1  ;;  %10323 = vmatprep.mubr.msk.bf16.mxu1 %vm1886_vm0, %v13714_v36  ;;  %v13728_v8 = vpack.c.bf16 %v4437_v1, %v4409_v40  ;;  %v10175_v22 = vcombine.high %v748_v4, %v762_v42  ;;  %v13737_v0 = vld [vmem:[%s17259_s1 + $0x40] ss:$8 sps:$4 sm:$0xff]   ;;  %v13746_v40 = vld [vmem:[%s17259_s1 + $0x54] ss:$8 sps:$4 sm:$0xff]  }
 0x250   : > { %17399 = vst [vmem:[#allocation130_spill] sm:$0xff] %v13704_v2  ;;  %17400 = vst [vmem:[#allocation131_spill] sm:$0xff] %v13707_v27  ;;  %v13720_v62 = vpop.f32.mrb[129].mxu0  ;;  %v13731_v37 = vpop.f32.mrb[129].mxu1 }
 0x251   : > { %17401 = vst [vmem:[#allocation132_spill] sm:$0xff] %v13709_v21  ;;  %17402 = vst [vmem:[#allocation133_spill] sm:$0xff] %v13718_v23  ;;  %3627 = vmatpush1.bf16.msra.mxu0 %v13611_v47  ;;  %v2622_v55 = vpop.f32.mrb[130].mxu0  ;;  %3768 = vmatpush1.bf16.msra.mxu1 %v10118_v49  ;;  %v2763_v56 = vpop.f32.mrb[130].mxu1  ;;  %v10174_v47 = vcombine.low %v748_v4, %v762_v42  ;;  %v17407_v42 = vld [vmem:[#allocation10_spill] sm:$0xff] }
 0x252   : > { %17403 = vst [vmem:[#allocation134_spill] sm:$0xff] %v13720_v62  ;;  %17404 = vst [vmem:[#allocation135_spill] sm:$0xff] %v13722_v61  ;;  %v2623_v28 = vpop.f32.mrb[131].mxu0  ;;  %3628 = vmatprep.subr.bf16.mxu0 %v13623_v18  ;;  %v2764_v9 = vpop.f32.mrb[131].mxu1  ;;  %3769 = vmatprep.subr.bf16.mxu1 %v10147_v12 }
 0x253   : > { %17405 = vst [vmem:[#allocation136_spill] sm:$0xff] %v13728_v8  ;;  %17406 = vst [vmem:[#allocation137_spill] sm:$0xff] %v13731_v37 }
 0x254   : > { %3403 = vmatmul.mubr.bf16.gmra.mrb[236].mxu0 %v13737_v0  ;;  %3544 = vmatmul.mubr.bf16.gmra.mrb[236].mxu1 %v13737_v0 }
 0x255   : > { %3629 = vmatpush1.bf16.msra.mxu0 %v13641_v35  ;;  %3770 = vmatpush1.bf16.msra.mxu1 %v10146_v34  ;;  %v17408_v34 = vld [vmem:[#allocation11_spill] sm:$0xff] }
 0x256   : > { %3630 = vmatprep.subr.bf16.mxu0 %v13646_v16  ;;  %3771 = vmatprep.subr.bf16.mxu1 %v10175_v22 }
 0x257   : > { %v2800_v18 = vpop.f32.mrb[132].mxu0  ;;  %10313 = vmatprep.mubr.msk.bf16.mxu0 %vm1886_vm0, %v13746_v40  ;;  %v2941_v33 = vpop.f32.mrb[132].mxu1  ;;  %10324 = vmatprep.mubr.msk.bf16.mxu1 %vm1886_vm0, %v13746_v40 }
 0x258   : > { %v2801_v46 = vadd.f32 %v2800_v18, %v12475_v32  ;;  %v2802_v26 = vpop.f32.mrb[133].mxu0  ;;  %v2942_v35 = vadd.f32 %v2941_v33, %v12475_v32  ;;  %v2943_v49 = vpop.f32.mrb[133].mxu1 }
 0x259   : > { %v2803_v16 = vadd.f32 %v2802_v26, %v12475_v32  ;;  %3631 = vmatpush1.bf16.msra.mxu0 %v13663_v19  ;;  %v2804_v1 = vpop.f32.mrb[134].mxu0  ;;  %3772 = vmatpush1.bf16.msra.mxu1 %v10174_v47  ;;  %v2944_v4 = vadd.f32 %v2943_v49, %v12475_v32  ;;  %v2945_v28 = vpop.f32.mrb[134].mxu1 }
 0x25a   : > { %v2805_v12 = vadd.f32 %v2804_v1, %v12501_v48  ;;  %4960 = vmatprep.subr.bf16.mxu0 %v17407_v42  ;;  %v2806_v55 = vpop.f32.mrb[135].mxu0  ;;  %v3908_v56 = vmax.f32 %v2942_v35, 0.0  ;;  %5053 = vmatprep.subr.bf16.mxu1 %v17408_v34  ;;  %v2946_v22 = vadd.f32 %v2945_v28, %v12501_v48  ;;  %v2947_v18 = vpop.f32.mrb[135].mxu1  ;;  %v3906_v19 = vmax.f32 %v2801_v46, 0.0  ;;  %v13766_v1 = vld [vmem:[%s17259_s1 + $0x50] ss:$8 sps:$4 sm:$0xff]  }
 0x25b   : > { %v2807_v9 = vadd.f32 %v2806_v55, %v12501_v48  ;;  %v3909_v33 = vmax.f32 %v2944_v4, 0.0  ;;  %v2948_v47 = vadd.f32 %v2947_v18, %v12501_v48  ;;  %v3907_v35 = vmax.f32 %v2803_v16, 0.0  ;;  %v13773_v46 = vld [vmem:[%s17259_s1 + $0x64] ss:$8 sps:$4 sm:$0xff]  }
 0x25c   : > { %v3934_v26 = vmax.f32 %v2805_v12, 0.0  ;;  %3413 = vmatmul.mubr.bf16.gmra.mrb[240].mxu0 %v13766_v1  ;;  %v3936_v42 = vmax.f32 %v2946_v22, 0.0  ;;  %3554 = vmatmul.mubr.bf16.gmra.mrb[240].mxu1 %v13766_v1 }
 0x25d   : > { %v3935_v49 = vmax.f32 %v2807_v9, 0.0  ;;  %10314 = vmatprep.mubr.msk.bf16.mxu0 %vm1886_vm0, %v13773_v46  ;;  %v3937_v4 = vmax.f32 %v2948_v47, 0.0  ;;  %10325 = vmatprep.mubr.msk.bf16.mxu1 %vm1886_vm0, %v13773_v46 }
 0x25e   : > { %v13777_v12 = vpack.c.bf16 %v3934_v26, %v3906_v19  ;;  %v13781_v55 = vpack.c.bf16 %v3936_v42, %v3908_v56 }
 0x25f   : > { %v2810_v16 = vpop.f32.mrb[136].mxu0  ;;  %v13783_v28 = vpack.c.bf16 %v3935_v49, %v3907_v35  ;;  %v2951_v22 = vpop.f32.mrb[136].mxu1  ;;  %v13786_v18 = vpack.c.bf16 %v3937_v4, %v3909_v33 }
 0x260   : > { %17409 = vst [vmem:[#allocation10_spill] sm:$0xff] %v13777_v12  ;;  %17410 = vst [vmem:[#allocation11_spill] sm:$0xff] %v13781_v55  ;;  %v2811_v34 = vadd.f32 %v2810_v16, %v12495_v39  ;;  %v2812_v9 = vpop.f32.mrb[137].mxu0  ;;  %v2952_v19 = vadd.f32 %v2951_v22, %v12495_v39  ;;  %v2953_v47 = vpop.f32.mrb[137].mxu1  ;;  %v13798_v22 = vld [vmem:[%s17259_s1 + $0x60] ss:$8 sps:$4 sm:$0xff]  }
 0x261   : > { %17411 = vst [vmem:[#allocation138_spill] sm:$0xff] %v13783_v28  ;;  %17412 = vst [vmem:[#allocation139_spill] sm:$0xff] %v13786_v18  ;;  %v2813_v27 = vadd.f32 %v2812_v9, %v12495_v39  ;;  %v2814_v26 = vpop.f32.mrb[138].mxu0  ;;  %v2954_v56 = vadd.f32 %v2953_v47, %v12495_v39  ;;  %v2955_v55 = vpop.f32.mrb[138].mxu1 }
 0x262   : > { %v2815_v12 = vadd.f32 %v2814_v26, %v17360_v60  ;;  %v2816_v42 = vpop.f32.mrb[139].mxu0  ;;  %v3964_v35 = vmax.f32 %v2952_v19, 0.0  ;;  %v2956_v16 = vadd.f32 %v2955_v55, %v17360_v60  ;;  %v2957_v28 = vpop.f32.mrb[139].mxu1  ;;  %v3962_v33 = vmax.f32 %v2811_v34, 0.0  ;;  %v13805_v55 = vld [vmem:[%s17259_s1 + $0x74] ss:$8 sps:$4 sm:$0xff]  }
 0x263   : > { %v2817_v49 = vadd.f32 %v2816_v42, %v17360_v60  ;;  %v3965_v18 = vmax.f32 %v2954_v56, 0.0  ;;  %v2958_v9 = vadd.f32 %v2957_v28, %v17360_v60  ;;  %v3963_v26 = vmax.f32 %v2813_v27, 0.0 }
 0x264   : > { %v3990_v4 = vmax.f32 %v2815_v12, 0.0  ;;  %3423 = vmatmul.mubr.bf16.gmra.mrb[244].mxu0 %v13798_v22  ;;  %v3992_v19 = vmax.f32 %v2956_v16, 0.0  ;;  %3564 = vmatmul.mubr.bf16.gmra.mrb[244].mxu1 %v13798_v22 }
 0x265   : > { %v3991_v47 = vmax.f32 %v2817_v49, 0.0  ;;  %10315 = vmatprep.mubr.msk.bf16.mxu0 %vm1886_vm0, %v13805_v55  ;;  %v3993_v28 = vmax.f32 %v2958_v9, 0.0  ;;  %10326 = vmatprep.mubr.msk.bf16.mxu1 %vm1886_vm0, %v13805_v55 }
 0x266   : > { %v13809_v12 = vpack.c.bf16 %v3990_v4, %v3962_v33  ;;  %v13813_v34 = vpack.c.bf16 %v3992_v19, %v3964_v35 }
 0x267   : > { %v2820_v27 = vpop.f32.mrb[140].mxu0  ;;  %v13815_v56 = vpack.c.bf16 %v3991_v47, %v3963_v26  ;;  %v2961_v16 = vpop.f32.mrb[140].mxu1  ;;  %v13818_v2 = vpack.c.bf16 %v3993_v28, %v3965_v18 }
 0x268   : > { %17413 = vst [vmem:[#allocation140_spill] sm:$0xff] %v13809_v12  ;;  %17414 = vst [vmem:[#allocation141_spill] sm:$0xff] %v13813_v34  ;;  %v2821_v42 = vadd.f32 %v2820_v27, %v12564_v11  ;;  %v2822_v49 = vpop.f32.mrb[141].mxu0  ;;  %v2962_v33 = vadd.f32 %v2961_v16, %v12564_v11  ;;  %v2963_v9 = vpop.f32.mrb[141].mxu1  ;;  %v13830_v16 = vld [vmem:[%s17259_s1 + $0x70] ss:$8 sps:$4 sm:$0xff]  }
 0x269   : > { %17415 = vst [vmem:[#allocation142_spill] sm:$0xff] %v13815_v56  ;;  %17416 = vst [vmem:[#allocation143_spill] sm:$0xff] %v13818_v2  ;;  %v2823_v8 = vadd.f32 %v2822_v49, %v12564_v11  ;;  %v2824_v4 = vpop.f32.mrb[142].mxu0  ;;  %v2964_v35 = vadd.f32 %v2963_v9, %v12564_v11  ;;  %v2965_v34 = vpop.f32.mrb[142].mxu1 }
 0x26a   : > { %v2825_v12 = vadd.f32 %v2824_v4, %v12574_v14  ;;  %v2826_v19 = vpop.f32.mrb[143].mxu0  ;;  %v4020_v26 = vmax.f32 %v2962_v33, 0.0  ;;  %v2966_v27 = vadd.f32 %v2965_v34, %v12574_v14  ;;  %v2967_v56 = vpop.f32.mrb[143].mxu1  ;;  %v4018_v18 = vmax.f32 %v2821_v42, 0.0  ;;  %v13837_v34 = vld [vmem:[%s17259_s1 + $0x84] ss:$8 sps:$4 sm:$0xff]  }
 0x26b   : > { %v2827_v47 = vadd.f32 %v2826_v19, %v12574_v14  ;;  %v4021_v2 = vmax.f32 %v2964_v35, 0.0  ;;  %v2968_v49 = vadd.f32 %v2967_v56, %v12574_v14  ;;  %v4019_v4 = vmax.f32 %v2823_v8, 0.0 }
 0x26c   : > { %v4046_v28 = vmax.f32 %v2825_v12, 0.0  ;;  %3433 = vmatmul.mubr.bf16.gmra.mrb[248].mxu0 %v13830_v16  ;;  %v4048_v33 = vmax.f32 %v2966_v27, 0.0  ;;  %3574 = vmatmul.mubr.bf16.gmra.mrb[248].mxu1 %v13830_v16 }
 0x26d   : > { %v4047_v9 = vmax.f32 %v2827_v47, 0.0  ;;  %10316 = vmatprep.mubr.msk.bf16.mxu0 %vm1886_vm0, %v13837_v34  ;;  %v4049_v56 = vmax.f32 %v2968_v49, 0.0  ;;  %10327 = vmatprep.mubr.msk.bf16.mxu1 %vm1886_vm0, %v13837_v34 }
 0x26e   : > { %v13841_v12 = vpack.c.bf16 %v4046_v28, %v4018_v18  ;;  %v13845_v42 = vpack.c.bf16 %v4048_v33, %v4020_v26 }
 0x26f   : > { %v2830_v8 = vpop.f32.mrb[144].mxu0  ;;  %v13847_v35 = vpack.c.bf16 %v4047_v9, %v4019_v4  ;;  %v2971_v27 = vpop.f32.mrb[144].mxu1  ;;  %v13850_v23 = vpack.c.bf16 %v4049_v56, %v4021_v2 }
 0x270   : > { %17417 = vst [vmem:[#allocation144_spill] sm:$0xff] %v13841_v12  ;;  %17418 = vst [vmem:[#allocation145_spill] sm:$0xff] %v13845_v42  ;;  %v2831_v19 = vadd.f32 %v2830_v8, %v12602_v7  ;;  %v2832_v47 = vpop.f32.mrb[145].mxu0  ;;  %v2972_v18 = vadd.f32 %v2971_v27, %v12602_v7  ;;  %v2973_v49 = vpop.f32.mrb[145].mxu1  ;;  %v13862_v27 = vld [vmem:[%s17259_s1 + $0x80] ss:$8 sps:$4 sm:$0xff]  }
 0x271   : > { %17419 = vst [vmem:[#allocation146_spill] sm:$0xff] %v13847_v35  ;;  %17420 = vst [vmem:[#allocation147_spill] sm:$0xff] %v13850_v23  ;;  %v2833_v37 = vadd.f32 %v2832_v47, %v12602_v7  ;;  %v2834_v28 = vpop.f32.mrb[146].mxu0  ;;  %v2974_v26 = vadd.f32 %v2973_v49, %v12602_v7  ;;  %v2975_v42 = vpop.f32.mrb[146].mxu1 }
 0x272   : > { %v2835_v12 = vadd.f32 %v2834_v28, %v17371_v20  ;;  %v2836_v33 = vpop.f32.mrb[147].mxu0  ;;  %v4076_v4 = vmax.f32 %v2972_v18, 0.0  ;;  %v2976_v8 = vadd.f32 %v2975_v42, %v17371_v20  ;;  %v2977_v35 = vpop.f32.mrb[147].mxu1  ;;  %v4074_v2 = vmax.f32 %v2831_v19, 0.0  ;;  %v13869_v42 = vld [vmem:[%s17259_s1 + $0x94] ss:$8 sps:$4 sm:$0xff]  }
 0x273   : > { %v2837_v9 = vadd.f32 %v2836_v33, %v17371_v20  ;;  %v4077_v23 = vmax.f32 %v2974_v26, 0.0  ;;  %v2978_v47 = vadd.f32 %v2977_v35, %v17371_v20  ;;  %v4075_v28 = vmax.f32 %v2833_v37, 0.0 }
 0x274   : > { %v4102_v56 = vmax.f32 %v2835_v12, 0.0  ;;  %3443 = vmatmul.mubr.bf16.gmra.mrb[252].mxu0 %v13862_v27  ;;  %v4104_v18 = vmax.f32 %v2976_v8, 0.0  ;;  %3584 = vmatmul.mubr.bf16.gmra.mrb[252].mxu1 %v13862_v27 }
 0x275   : > { %v4103_v49 = vmax.f32 %v2837_v9, 0.0  ;;  %10317 = vmatprep.mubr.msk.bf16.mxu0 %vm1886_vm0, %v13869_v42  ;;  %v4105_v35 = vmax.f32 %v2978_v47, 0.0  ;;  %10328 = vmatprep.mubr.msk.bf16.mxu1 %vm1886_vm0, %v13869_v42 }
 0x276   : > { %v13873_v12 = vpack.c.bf16 %v4102_v56, %v4074_v2  ;;  %v13877_v19 = vpack.c.bf16 %v4104_v18, %v4076_v4 }
 0x277   : > { %v2840_v37 = vpop.f32.mrb[148].mxu0  ;;  %v13879_v26 = vpack.c.bf16 %v4103_v49, %v4075_v28  ;;  %v2981_v8 = vpop.f32.mrb[148].mxu1  ;;  %v13882_v61 = vpack.c.bf16 %v4105_v35, %v4077_v23 }
 0x278   : > { %17421 = vst [vmem:[#allocation148_spill] sm:$0xff] %v13873_v12  ;;  %17422 = vst [vmem:[#allocation149_spill] sm:$0xff] %v13877_v19  ;;  %v2841_v33 = vadd.f32 %v2840_v37, %v12640_v63  ;;  %v2842_v9 = vpop.f32.mrb[149].mxu0  ;;  %v2982_v2 = vadd.f32 %v2981_v8, %v12640_v63  ;;  %v2983_v47 = vpop.f32.mrb[149].mxu1  ;;  %v13894_v8 = vld [vmem:[%s17259_s1 + $0x90] ss:$8 sps:$4 sm:$0xff]  }
 0x279   : > { %17423 = vst [vmem:[#allocation150_spill] sm:$0xff] %v13879_v26  ;;  %17424 = vst [vmem:[#allocation151_spill] sm:$0xff] %v13882_v61  ;;  %v2843_v62 = vadd.f32 %v2842_v9, %v12640_v63  ;;  %v2844_v56 = vpop.f32.mrb[150].mxu0  ;;  %v2984_v4 = vadd.f32 %v2983_v47, %v12640_v63  ;;  %v2985_v19 = vpop.f32.mrb[150].mxu1 }
 0x27a   : > { %v2845_v12 = vadd.f32 %v2844_v56, %v12650_v38  ;;  %v2846_v18 = vpop.f32.mrb[151].mxu0  ;;  %v4132_v28 = vmax.f32 %v2982_v2, 0.0  ;;  %v2986_v37 = vadd.f32 %v2985_v19, %v12650_v38  ;;  %v2987_v26 = vpop.f32.mrb[151].mxu1  ;;  %v4130_v23 = vmax.f32 %v2841_v33, 0.0 }
 0x27b   : > { %v2847_v49 = vadd.f32 %v2846_v18, %v12650_v38  ;;  %v4133_v61 = vmax.f32 %v2984_v4, 0.0  ;;  %v2988_v9 = vadd.f32 %v2987_v26, %v12650_v38  ;;  %v4131_v56 = vmax.f32 %v2843_v62, 0.0 }
 0x27c   : > { %v4158_v35 = vmax.f32 %v2845_v12, 0.0  ;;  %3453 = vmatmul.mubr.bf16.gmra.mrb[0].mxu0 %v13894_v8  ;;  %v4160_v2 = vmax.f32 %v2986_v37, 0.0  ;;  %3594 = vmatmul.mubr.bf16.gmra.mrb[0].mxu1 %v13894_v8 }
 0x27d   : > { %v4159_v47 = vmax.f32 %v2847_v49, 0.0  ;;  %10318 = vmatprep.mubr.msk.bf16.mxu0 %vm1886_vm0, %v17378_v13  ;;  %v4161_v12 = vmax.f32 %v2988_v9, 0.0  ;;  %10329 = vmatprep.mubr.msk.bf16.mxu1 %vm1886_vm0, %v17378_v13 }
 0x27e   : > { %v13900_v19 = vpack.c.bf16 %v4158_v35, %v4130_v23  ;;  %v13904_v26 = vpack.c.bf16 %v4160_v2, %v4132_v28 }
 0x27f   : > { %v2850_v33 = vpop.f32.mrb[152].mxu0  ;;  %v13906_v4 = vpack.c.bf16 %v4159_v47, %v4131_v56  ;;  %v2991_v49 = vpop.f32.mrb[152].mxu1  ;;  %v13909_v37 = vpack.c.bf16 %v4161_v12, %v4133_v61 }
 0x280   : > { %17425 = vst [vmem:[#allocation152_spill] sm:$0xff] %v13900_v19  ;;  %17426 = vst [vmem:[#allocation153_spill] sm:$0xff] %v13904_v26  ;;  %v2851_v62 = vadd.f32 %v2850_v33, %v12678_v5  ;;  %v2852_v18 = vpop.f32.mrb[153].mxu0  ;;  %v2992_v23 = vadd.f32 %v2991_v49, %v12678_v5  ;;  %v2993_v9 = vpop.f32.mrb[153].mxu1 }
 0x281   : > { %17427 = vst [vmem:[#allocation154_spill] sm:$0xff] %v13906_v4  ;;  %17428 = vst [vmem:[#allocation155_spill] sm:$0xff] %v13909_v37  ;;  %v2853_v21 = vadd.f32 %v2852_v18, %v12678_v5  ;;  %v2854_v35 = vpop.f32.mrb[154].mxu0  ;;  %v2994_v28 = vadd.f32 %v2993_v9, %v12678_v5  ;;  %v2995_v26 = vpop.f32.mrb[154].mxu1 }
 0x282   : > { %v2855_v19 = vadd.f32 %v2854_v35, %v12688_v45  ;;  %v2856_v2 = vpop.f32.mrb[155].mxu0  ;;  %v4188_v56 = vmax.f32 %v2992_v23, 0.0  ;;  %v2996_v33 = vadd.f32 %v2995_v26, %v12688_v45  ;;  %v2997_v4 = vpop.f32.mrb[155].mxu1  ;;  %v4186_v61 = vmax.f32 %v2851_v62, 0.0  ;;  %v11447_v23 = vld [vmem:[%s17259_s1 + $0x4] ss:$8 sps:$4 sm:$0xff]  }
 0x283   : > { %v2857_v47 = vadd.f32 %v2856_v2, %v12688_v45  ;;  %v4189_v37 = vmax.f32 %v2994_v28, 0.0  ;;  %v2998_v18 = vadd.f32 %v2997_v4, %v12688_v45  ;;  %v4187_v49 = vmax.f32 %v2853_v21, 0.0  ;;  %s11520_s1 = scalar_lea.vmem %s17128_s15, 256 }
 0x284   : > { %v4214_v12 = vmax.f32 %v2855_v19, 0.0  ;;  %3463 = vmatmul.mubr.bf16.gmra.mrb[4].mxu0 %v12231_v10  ;;  %v4216_v35 = vmax.f32 %v2996_v33, 0.0  ;;  %3604 = vmatmul.mubr.bf16.gmra.mrb[4].mxu1 %v12231_v10  ;;  %p11521_p13 = scmp.ne.s32.totalorder %s17128_s15, %s11520_s1  ;;  %p11528_p3 = scmp.lt.s32.totalorder %s11526_s22, %s11520_s1 }
 0x285   : > { %v4215_v29 = vmax.f32 %v2857_v47, 0.0  ;;  %10330 = vmatprep.mubr.msk.bf16.mxu0 %vm1886_vm0, %v11447_v23  ;;  %v4217_v62 = vmax.f32 %v2998_v18, 0.0  ;;  %10341 = vmatprep.mubr.msk.bf16.mxu1 %vm1886_vm0, %v11447_v23 }
 0x286   : > { %v13924_v26 = vpack.c.bf16 %v4214_v12, %v4186_v61  ;;  %v13927_v19 = vpack.c.bf16 %v4216_v35, %v4188_v56  ;;  %p11522_p0 = pnand %p11521_p13, %p11699_p6  ;;  %p11529_p4 = por %p11528_p3, %p11527_p2 }
 0x287   : > { %v2860_v4 = vpop.f32.mrb[156].mxu0  ;;  %v13929_v9 = vpack.c.bf16 %v4215_v29, %v4187_v49  ;;  %v3001_v28 = vpop.f32.mrb[156].mxu1  ;;  %v13932_v47 = vpack.c.bf16 %v4217_v62, %v4189_v37 }
 0x288   : > { %17429 = vst [vmem:[#allocation156_spill] sm:$0xff] %v13924_v26  ;;  %17430 = vst [vmem:[#allocation157_spill] sm:$0xff] %v13927_v19  ;;  %v2861_v21 = vadd.f32 %v2860_v4, %v12716_v57  ;;  %v2862_v2 = vpop.f32.mrb[157].mxu0  ;;  %v3002_v33 = vadd.f32 %v3001_v28, %v12716_v57  ;;  %v3003_v61 = vpop.f32.mrb[157].mxu1  ;;  %p11523_p1 = pneg %p11522_p0 }
 0x289   : > { %17431 = vst [vmem:[#allocation158_spill] sm:$0xff] %v13929_v9  ;;  %17432 = vst [vmem:[#allocation159_spill] sm:$0xff] %v13932_v47  ;;  %v2863_v41 = vadd.f32 %v2862_v2, %v12716_v57  ;;  %v2864_v12 = vpop.f32.mrb[158].mxu0  ;;  %v3004_v18 = vadd.f32 %v3003_v61, %v12716_v57  ;;  %v3005_v35 = vpop.f32.mrb[158].mxu1  ;;  %v17435_v9 = vld [vmem:[#allocation8_spill] sm:$0xff] }
 0x28a   : > { %v2865_v56 = vadd.f32 %v2864_v12, %v12726_v6  ;;  %v2866_v23 = vpop.f32.mrb[159].mxu0  ;;  %v4244_v29 = vmax.f32 %v3002_v33, 0.0  ;;  %v3006_v49 = vadd.f32 %v3005_v35, %v12726_v6  ;;  %v3007_v19 = vpop.f32.mrb[159].mxu1  ;;  %v4242_v37 = vmax.f32 %v2861_v21, 0.0  ;;  %v17433_v12 = vld [vmem:[#allocation7_spill] sm:$0xff]  ;;  %p11530_p5 = pnand %p11529_p4, %p11523_p1 }
 0x28b   : > { %v2867_v4 = vadd.f32 %v2866_v23, %v12726_v6  ;;  %v4245_v62 = vmax.f32 %v3004_v18, 0.0  ;;  %v3008_v28 = vadd.f32 %v3007_v19, %v12726_v6  ;;  %v4243_v2 = vmax.f32 %v2863_v41, 0.0  ;;  %v17436_v23 = vld [vmem:[#allocation14_spill] sm:$0xff]  ;;  %v17438_v18 = vld [vmem:[#allocation15_spill] sm:$0xff] }
 0x28c   : > { %v4270_v26 = vmax.f32 %v2865_v56, 0.0  ;;  %3645 = vmatmul.mubr.bf16.vlgmr.msra.gmra.mrb[8].mxu0 %v13550_v44  ;;  %v4272_v47 = vmax.f32 %v3006_v49, 0.0  ;;  %3786 = vmatmul.mubr.bf16.vlgmr.msra.gmra.mrb[8].mxu1 %v13550_v44 }
 0x28d   : > { %v4271_v61 = vmax.f32 %v2867_v4, 0.0  ;;  %4961 = vmatpush1.bf16.msra.mxu0 %v17433_v12  ;;  %v4273_v35 = vmax.f32 %v3008_v28, 0.0  ;;  %5054 = vmatpush1.bf16.msra.mxu1 %v17435_v9  ;;  %v17439_v4 = vld [vmem:[#allocation12_spill] sm:$0xff] }
 0x28e   : > { %v13944_v33 = vpack.c.bf16 %v4270_v26, %v4242_v37  ;;  %4962 = vmatprep.subr.bf16.mxu0 %v17436_v23  ;;  %v13948_v21 = vpack.c.bf16 %v4272_v47, %v4244_v29  ;;  %5055 = vmatprep.subr.bf16.mxu1 %v17438_v18  ;;  %v17441_v23 = vld [vmem:[#allocation19_spill] sm:$0xff]  ;;  %v17442_v18 = vld [vmem:[#allocation20_spill] sm:$0xff] }
 0x28f   : > { %v2870_v19 = vpop.f32.mrb[160].mxu0  ;;  %10331 = vmatprep.mubr.msk.bf16.mxu0 %vm1886_vm0, %v13567_v51  ;;  %v13953_v41 = vpack.c.bf16 %v4271_v61, %v4243_v2  ;;  %v3011_v56 = vpop.f32.mrb[160].mxu1  ;;  %10342 = vmatprep.mubr.msk.bf16.mxu1 %vm1886_vm0, %v13567_v51  ;;  %v13958_v9 = vpack.c.bf16 %v4273_v35, %v4245_v62  ;;  %v17440_v2 = vld [vmem:[#allocation13_spill] sm:$0xff] }
 0x290   : > { %17434 = vst [vmem:[#allocation7_spill] sm:$0xff] %v13944_v33  ;;  %17437 = vst [vmem:[#allocation8_spill] sm:$0xff] %v13948_v21  ;;  %v2871_v44 = vadd.f32 %v2870_v19, %v12755_v50  ;;  %v2872_v26 = vpop.f32.mrb[161].mxu0  ;;  %v3012_v47 = vadd.f32 %v3011_v56, %v12755_v50  ;;  %v3013_v49 = vpop.f32.mrb[161].mxu1 }
 0x291   : > { %v2873_v29 = vadd.f32 %v2872_v26, %v12755_v50  ;;  %4963 = vmatpush1.bf16.msra.mxu0 %v17439_v4  ;;  %v2874_v37 = vpop.f32.mrb[162].mxu0  ;;  %v3014_v28 = vadd.f32 %v3013_v49, %v12755_v50  ;;  %5056 = vmatpush1.bf16.msra.mxu1 %v17440_v2  ;;  %v3015_v12 = vpop.f32.mrb[162].mxu1 }
 0x292   : > { %v2875_v61 = vadd.f32 %v2874_v37, %v12777_v53  ;;  %4964 = vmatprep.subr.bf16.mxu0 %v17441_v23  ;;  %v2876_v51 = vpop.f32.mrb[163].mxu0  ;;  %v4300_v62 = vmax.f32 %v3012_v47, 0.0  ;;  %v3016_v35 = vadd.f32 %v3015_v12, %v12777_v53  ;;  %5057 = vmatprep.subr.bf16.mxu1 %v17442_v18  ;;  %v3017_v56 = vpop.f32.mrb[163].mxu1  ;;  %v4298_v26 = vmax.f32 %v2871_v44, 0.0  ;;  %v17443_v47 = vld [vmem:[#allocation16_spill] sm:$0xff]  ;;  %v17445_v18 = vld [vmem:[#allocation17_spill] sm:$0xff] }
 0x293   : > { %v2877_v19 = vadd.f32 %v2876_v51, %v12777_v53  ;;  %v4301_v4 = vmax.f32 %v3014_v28, 0.0  ;;  %v3018_v49 = vadd.f32 %v3017_v56, %v12777_v53  ;;  %v4299_v37 = vmax.f32 %v2873_v29, 0.0  ;;  %v17446_v51 = vld [vmem:[#allocation24_spill] sm:$0xff]  ;;  %v17448_v28 = vld [vmem:[#allocation25_spill] sm:$0xff] }
 0x294   : > { %v4326_v21 = vmax.f32 %v2875_v61, 0.0  ;;  %3655 = vmatmul.mubr.bf16.gmra.mrb[12].mxu0 %v13600_v59  ;;  %v4328_v2 = vmax.f32 %v3016_v35, 0.0  ;;  %3796 = vmatmul.mubr.bf16.gmra.mrb[12].mxu1 %v13600_v59 }
 0x295   : > { %v4327_v33 = vmax.f32 %v2877_v19, 0.0  ;;  %4965 = vmatpush1.bf16.msra.mxu0 %v17443_v47  ;;  %v4329_v23 = vmax.f32 %v3018_v49, 0.0  ;;  %5058 = vmatpush1.bf16.msra.mxu1 %v17445_v18  ;;  %v17449_v49 = vld [vmem:[#allocation21_spill] sm:$0xff] }
 0x296   : > { %v13974_v12 = vpack.c.bf16 %v4326_v21, %v4298_v26  ;;  %4966 = vmatprep.subr.bf16.mxu0 %v17446_v51  ;;  %v13978_v44 = vpack.c.bf16 %v4328_v2, %v4300_v62  ;;  %5059 = vmatprep.subr.bf16.mxu1 %v17448_v28  ;;  %v17451_v51 = vld [vmem:[#allocation30_spill] sm:$0xff]  ;;  %v17452_v28 = vld [vmem:[#allocation31_spill] sm:$0xff] }
 0x297   : > { %v2880_v61 = vpop.f32.mrb[164].mxu0  ;;  %10332 = vmatprep.mubr.msk.bf16.mxu0 %vm1886_vm0, %v13619_v24  ;;  %v13983_v29 = vpack.c.bf16 %v4327_v33, %v4299_v37  ;;  %v3021_v35 = vpop.f32.mrb[164].mxu1  ;;  %10343 = vmatprep.mubr.msk.bf16.mxu1 %vm1886_vm0, %v13619_v24  ;;  %v13988_v19 = vpack.c.bf16 %v4329_v23, %v4301_v4  ;;  %v17450_v37 = vld [vmem:[#allocation22_spill] sm:$0xff] }
 0x298   : > { %17444 = vst [vmem:[#allocation14_spill] sm:$0xff] %v13974_v12  ;;  %17447 = vst [vmem:[#allocation15_spill] sm:$0xff] %v13978_v44  ;;  %v2881_v59 = vadd.f32 %v2880_v61, %v12814_v43  ;;  %v2882_v21 = vpop.f32.mrb[165].mxu0  ;;  %v3022_v62 = vadd.f32 %v3021_v35, %v12814_v43  ;;  %v3023_v26 = vpop.f32.mrb[165].mxu1 }
 0x299   : > { %v2883_v56 = vadd.f32 %v2882_v21, %v12814_v43  ;;  %4967 = vmatpush1.bf16.msra.mxu0 %v17449_v49  ;;  %v2884_v2 = vpop.f32.mrb[166].mxu0  ;;  %v3024_v33 = vadd.f32 %v3023_v26, %v12814_v43  ;;  %5060 = vmatpush1.bf16.msra.mxu1 %v17450_v37  ;;  %v3025_v18 = vpop.f32.mrb[166].mxu1 }
 0x29a   : > { %v2885_v47 = vadd.f32 %v2884_v2, %v12837_v54  ;;  %4968 = vmatprep.subr.bf16.mxu0 %v17451_v51  ;;  %v2886_v24 = vpop.f32.mrb[167].mxu0  ;;  %v4356_v4 = vmax.f32 %v3022_v62, 0.0  ;;  %v3026_v23 = vadd.f32 %v3025_v18, %v12837_v54  ;;  %5061 = vmatprep.subr.bf16.mxu1 %v17452_v28  ;;  %v3027_v35 = vpop.f32.mrb[167].mxu1  ;;  %v4354_v21 = vmax.f32 %v2881_v59, 0.0  ;;  %v17453_v62 = vld [vmem:[#allocation27_spill] sm:$0xff]  ;;  %v17455_v28 = vld [vmem:[#allocation28_spill] sm:$0xff] }
 0x29b   : > { %v2887_v61 = vadd.f32 %v2886_v24, %v12837_v54  ;;  %v4357_v49 = vmax.f32 %v3024_v33, 0.0  ;;  %v3028_v26 = vadd.f32 %v3027_v35, %v12837_v54  ;;  %v4355_v2 = vmax.f32 %v2883_v56, 0.0  ;;  %v17456_v24 = vld [vmem:[#allocation34_spill] sm:$0xff]  ;;  %v17458_v33 = vld [vmem:[#allocation35_spill] sm:$0xff] }
 0x29c   : > { %v4382_v44 = vmax.f32 %v2885_v47, 0.0  ;;  %3665 = vmatmul.mubr.bf16.gmra.mrb[16].mxu0 %v13652_v30  ;;  %v4384_v37 = vmax.f32 %v3026_v23, 0.0  ;;  %3806 = vmatmul.mubr.bf16.gmra.mrb[16].mxu1 %v13652_v30 }
 0x29d   : > { %v4383_v12 = vmax.f32 %v2887_v61, 0.0  ;;  %4969 = vmatpush1.bf16.msra.mxu0 %v17453_v62  ;;  %v4385_v51 = vmax.f32 %v3028_v26, 0.0  ;;  %5062 = vmatpush1.bf16.msra.mxu1 %v17455_v28  ;;  %v17461_v26 = vld [vmem:[#allocation32_spill] sm:$0xff] }
 0x29e   : > { %v14004_v18 = vpack.c.bf16 %v4382_v44, %v4354_v21  ;;  %4970 = vmatprep.subr.bf16.mxu0 %v17456_v24  ;;  %v14008_v59 = vpack.c.bf16 %v4384_v37, %v4356_v4  ;;  %5063 = vmatprep.subr.bf16.mxu1 %v17458_v33  ;;  %v17463_v24 = vld [vmem:[#allocation38_spill] sm:$0xff]  ;;  %v17464_v33 = vld [vmem:[#allocation39_spill] sm:$0xff] }
 0x29f   : > { %v2890_v47 = vpop.f32.mrb[168].mxu0  ;;  %10333 = vmatprep.mubr.msk.bf16.mxu0 %vm1886_vm0, %v13671_v31  ;;  %v14013_v56 = vpack.c.bf16 %v4383_v12, %v4355_v2  ;;  %v3031_v23 = vpop.f32.mrb[168].mxu1  ;;  %10344 = vmatprep.mubr.msk.bf16.mxu1 %vm1886_vm0, %v13671_v31  ;;  %v14018_v61 = vpack.c.bf16 %v4385_v51, %v4357_v49  ;;  %v17462_v2 = vld [vmem:[#allocation33_spill] sm:$0xff] }
 0x2a0   : > { %17454 = vst [vmem:[#allocation12_spill] sm:$0xff] %v14004_v18  ;;  %17457 = vst [vmem:[#allocation13_spill] sm:$0xff] %v14008_v59  ;;  %v2891_v30 = vadd.f32 %v2890_v47, %v12876_v25  ;;  %v2892_v44 = vpop.f32.mrb[169].mxu0  ;;  %v3032_v4 = vadd.f32 %v3031_v23, %v12876_v25  ;;  %v3033_v21 = vpop.f32.mrb[169].mxu1 }
 0x2a1   : > { %17459 = vst [vmem:[#allocation19_spill] sm:$0xff] %v14013_v56  ;;  %17460 = vst [vmem:[#allocation20_spill] sm:$0xff] %v14018_v61  ;;  %v2893_v35 = vadd.f32 %v2892_v44, %v12876_v25  ;;  %4971 = vmatpush1.bf16.msra.mxu0 %v17461_v26  ;;  %v2894_v37 = vpop.f32.mrb[170].mxu0  ;;  %v3034_v12 = vadd.f32 %v3033_v21, %v12876_v25  ;;  %5064 = vmatpush1.bf16.msra.mxu1 %v17462_v2  ;;  %v3035_v28 = vpop.f32.mrb[170].mxu1  ;;  %v17468_v61 = vld [vmem:[#allocation42_spill] sm:$0xff] }
 0x2a2   : > { %v2895_v62 = vadd.f32 %v2894_v37, %v12899_v58  ;;  %4972 = vmatprep.subr.bf16.mxu0 %v17463_v24  ;;  %v2896_v31 = vpop.f32.mrb[171].mxu0  ;;  %v4412_v49 = vmax.f32 %v3032_v4, 0.0  ;;  %v3036_v51 = vadd.f32 %v3035_v28, %v12899_v58  ;;  %5065 = vmatprep.subr.bf16.mxu1 %v17464_v33  ;;  %v3037_v23 = vpop.f32.mrb[171].mxu1  ;;  %v4410_v26 = vmax.f32 %v2891_v30, 0.0  ;;  %v17465_v4 = vld [vmem:[#allocation36_spill] sm:$0xff]  ;;  %v17467_v33 = vld [vmem:[#allocation37_spill] sm:$0xff] }
 0x2a3   : > { %v2897_v47 = vadd.f32 %v2896_v31, %v12899_v58  ;;  %v14030_v44 = vpop.permute.xlu0 %1787  ;;  %v4413_v21 = vmax.f32 %v3034_v12, 0.0  ;;  %v3038_v2 = vadd.f32 %v3037_v23, %v12899_v58  ;;  %v4411_v37 = vmax.f32 %v2893_v35, 0.0  ;;  %v17469_v30 = vld [vmem:[#allocation50_spill] sm:$0xff]  ;;  %v17471_v23 = vld [vmem:[#allocation43_spill] sm:$0xff] }
 0x2a4   : > { %v4438_v59 = vmax.f32 %v2895_v62, 0.0  ;;  %3675 = vmatmul.mubr.bf16.gmra.mrb[20].mxu0 %v13697_v3  ;;  %v4440_v24 = vmax.f32 %v3036_v51, 0.0  ;;  %3816 = vmatmul.mubr.bf16.gmra.mrb[20].mxu1 %v13697_v3  ;;  %v2055_v12 = vadd.f32 %v17469_v30, %v14030_v44  ;;  %v17479_v30 = vld [vmem:[#allocation41_spill] sm:$0xff] }
 0x2a5   : > { %v4439_v18 = vmax.f32 %v2897_v47, 0.0  ;;  %4973 = vmatpush1.bf16.msra.mxu0 %v17465_v4  ;;  %v4441_v31 = vmax.f32 %v3038_v2, 0.0  ;;  %5066 = vmatpush1.bf16.msra.mxu1 %v17467_v33  ;;  %v17474_v47 = vld [vmem:[#allocation53_spill] sm:$0xff] }
 0x2a6   : > { %v14036_v28 = vpack.c.bf16 %v4438_v59, %v4410_v26  ;;  %4974 = vmatprep.subr.bf16.mxu0 %v17468_v61  ;;  %v14042_v62 = vpack.c.bf16 %v4440_v24, %v4412_v49  ;;  %5067 = vmatprep.subr.bf16.mxu1 %v17471_v23  ;;  %v17473_v59 = vld [vmem:[#allocation52_spill] sm:$0xff]  ;;  %v2196_v61 = vadd.f32 %v17474_v47, %v14030_v44  ;;  %v17476_v24 = vld [vmem:[#allocation54_spill] sm:$0xff] }
 0x2a7   : > { %v14045_v35 = vpop.f32.mrb[172].mxu0  ;;  %10334 = vmatprep.mubr.msk.bf16.mxu0 %vm1886_vm0, %v13714_v36  ;;  %v14049_v3 = vpack.c.bf16 %v4439_v18, %v4411_v37  ;;  %v2057_v51 = vadd.f32 %v17473_v59, %v14030_v44  ;;  %v14055_v26 = vpop.f32.mrb[172].mxu1  ;;  %10345 = vmatprep.mubr.msk.bf16.mxu1 %vm1886_vm0, %v13714_v36  ;;  %v14061_v49 = vpack.c.bf16 %v4441_v31, %v4413_v21  ;;  %v17478_v37 = vld [vmem:[#allocation40_spill] sm:$0xff]  ;;  %v17480_v23 = vld [vmem:[#allocation46_spill] sm:$0xff] }
 0x2a8   : > { %17466 = vst [vmem:[#allocation16_spill] sm:$0xff] %v14036_v28  ;;  %17470 = vst [vmem:[#allocation17_spill] sm:$0xff] %v14042_v62  ;;  %v14057_v2 = vpop.f32.mrb[173].mxu0  ;;  %v2198_v4 = vadd.f32 %v17476_v24, %v14030_v44  ;;  %v14065_v18 = vpop.f32.mrb[173].mxu1  ;;  %v4454_v62 = vmax.f32 %v2055_v12, 0.0  ;;  %v17481_v28 = vld [vmem:[#allocation47_spill] sm:$0xff] }
 0x2a9   : > { %17472 = vst [vmem:[#allocation24_spill] sm:$0xff] %v14049_v3  ;;  %17475 = vst [vmem:[#allocation25_spill] sm:$0xff] %v14061_v49  ;;  %4975 = vmatpush1.bf16.msra.mxu0 %v17478_v37  ;;  %v2904_v33 = vpop.f32.mrb[174].mxu0  ;;  %5068 = vmatpush1.bf16.msra.mxu1 %v17479_v30  ;;  %v3045_v47 = vpop.f32.mrb[174].mxu1  ;;  %v4455_v21 = vmax.f32 %v2057_v51, 0.0  ;;  %v4456_v31 = vmax.f32 %v2196_v61, 0.0 }
 0x2aa   : > { %17477 = vst [vmem:[#allocation21_spill] sm:$0xff] %v14065_v18  ;;  %4976 = vmatprep.subr.bf16.mxu0 %v17480_v23  ;;  %v2905_v59 = vpop.f32.mrb[175].mxu0  ;;  %5069 = vmatprep.subr.bf16.mxu1 %v17481_v28  ;;  %v3046_v36 = vpop.f32.mrb[175].mxu1  ;;  %v4457_v24 = vmax.f32 %v2198_v4, 0.0  ;;  %v17482_v49 = vld [vmem:[#allocation44_spill] sm:$0xff]  ;;  %v17483_v37 = vld [vmem:[#allocation45_spill] sm:$0xff]  ;;  %v4774_v30 = vpack.c.bf16 %v4454_v62, %v4454_v62 }
 0x2ab   : > { %v17484_v33 = vld [vmem:[#allocation51_spill] sm:$0xff]  ;;  %v4775_v28 = vpack.c.bf16 %v4455_v21, %v4455_v21  ;;  %v4776_v51 = vpack.c.bf16 %v4456_v31, %v4456_v31  ;;  %v17486_v36 = vld [vmem:[#allocation48_spill] sm:$0xff]  ;;  %v17487_v31 = vld [vmem:[#allocation49_spill] sm:$0xff] }
 0x2ac   : > { %3685 = vmatmul.mubr.bf16.gmra.mrb[24].mxu0 %v13737_v0  ;;  %3826 = vmatmul.mubr.bf16.gmra.mrb[24].mxu1 %v13737_v0  ;;  %v17485_v23 = vld [vmem:[#allocation55_spill] sm:$0xff]  ;;  %v4777_v0 = vpack.c.bf16 %v4457_v24, %v4457_v24 }
 0x2ad   : > { %4977 = vmatpush1.bf16.msra.mxu0 %v17482_v49  ;;  %5070 = vmatpush1.bf16.msra.mxu1 %v17483_v37 }
 0x2ae   : > { %4978 = vmatprep.subr.bf16.mxu0 %v17484_v33  ;;  %5071 = vmatprep.subr.bf16.mxu1 %v17485_v23 }
 0x2af   : > { %v3082_v12 = vpop.f32.mrb[176].mxu0  ;;  %10335 = vmatprep.mubr.msk.bf16.mxu0 %vm1886_vm0, %v13746_v40  ;;  %v3223_v4 = vpop.f32.mrb[176].mxu1  ;;  %10346 = vmatprep.mubr.msk.bf16.mxu1 %vm1886_vm0, %v13746_v40 }
 0x2b0   : > { %v3083_v61 = vadd.f32 %v3082_v12, %v12475_v32  ;;  %v3084_v59 = vpop.f32.mrb[177].mxu0  ;;  %v3224_v49 = vadd.f32 %v3223_v4, %v12475_v32  ;;  %v3225_v47 = vpop.f32.mrb[177].mxu1 }
 0x2b1   : > { %v3085_v62 = vadd.f32 %v3084_v59, %v12475_v32  ;;  %4979 = vmatpush1.bf16.msra.mxu0 %v17486_v36  ;;  %v3086_v37 = vpop.f32.mrb[178].mxu0  ;;  %v3226_v21 = vadd.f32 %v3225_v47, %v12475_v32  ;;  %5072 = vmatpush1.bf16.msra.mxu1 %v17487_v31  ;;  %v3227_v23 = vpop.f32.mrb[178].mxu1  ;;  %v4877_v59 = vsel %vm4875_vm1, %v4774_v30, 0  ;;  %v17488_v30 = vld [vmem:[#allocation58_spill] sm:$0xff] }
 0x2b2   : > { %v3087_v33 = vadd.f32 %v3086_v37, %v12501_v48  ;;  %10364 = vmatprep.subr.msk.bf16.mxu0 %vm4875_vm1, %v4775_v28  ;;  %v3088_v12 = vpop.f32.mrb[179].mxu0  ;;  %v3228_v40 = vadd.f32 %v3227_v23, %v12501_v48  ;;  %10371 = vmatprep.subr.msk.bf16.mxu1 %vm4875_vm1, %v4777_v0  ;;  %v3229_v4 = vpop.f32.mrb[179].mxu1  ;;  %v3910_v36 = vmax.f32 %v3083_v61, 0.0  ;;  %v4883_v37 = vsel %vm4875_vm1, %v4776_v51, 0 }
 0x2b3   : > { %v3089_v24 = vadd.f32 %v3088_v12, %v12501_v48  ;;  %v3230_v47 = vadd.f32 %v3229_v4, %v12501_v48  ;;  %v3912_v31 = vmax.f32 %v3224_v49, 0.0  ;;  %v3911_v28 = vmax.f32 %v3085_v62, 0.0 }
 0x2b4   : > { %v3938_v3 = vmax.f32 %v3087_v33, 0.0  ;;  %3695 = vmatmul.mubr.bf16.gmra.mrb[28].mxu0 %v13766_v1  ;;  %v3940_v56 = vmax.f32 %v3228_v40, 0.0  ;;  %3836 = vmatmul.mubr.bf16.gmra.mrb[28].mxu1 %v13766_v1  ;;  %v3913_v0 = vmax.f32 %v3226_v21, 0.0  ;;  %v17490_v33 = vld [vmem:[#allocation59_spill] sm:$0xff] }
 0x2b5   : > { %v3939_v18 = vmax.f32 %v3089_v24, 0.0  ;;  %4981 = vmatpush1.bf16.msra.mxu0 %v4877_v59  ;;  %v3941_v12 = vmax.f32 %v3230_v47, 0.0  ;;  %5074 = vmatpush1.bf16.msra.mxu1 %v4883_v37 }
 0x2b6   : > { %v14097_v23 = vpack.c.bf16 %v3938_v3, %v3910_v36  ;;  %5146 = vmatprep.subr.bf16.mxu0 %v17488_v30  ;;  %v14100_v61 = vpack.c.bf16 %v3940_v56, %v3912_v31  ;;  %5239 = vmatprep.subr.bf16.mxu1 %v17490_v33 }
 0x2b7   : > { %v3092_v4 = vpop.f32.mrb[180].mxu0  ;;  %10336 = vmatprep.mubr.msk.bf16.mxu0 %vm1886_vm0, %v13773_v46  ;;  %v14105_v51 = vpack.c.bf16 %v3939_v18, %v3911_v28  ;;  %v3233_v49 = vpop.f32.mrb[180].mxu1  ;;  %10347 = vmatprep.mubr.msk.bf16.mxu1 %vm1886_vm0, %v13773_v46  ;;  %v14110_v3 = vpack.c.bf16 %v3941_v12, %v3913_v0 }
 0x2b8   : > { %17489 = vst [vmem:[#allocation22_spill] sm:$0xff] %v14100_v61  ;;  %v3093_v1 = vadd.f32 %v3092_v4, %v12495_v39  ;;  %v3094_v62 = vpop.f32.mrb[181].mxu0  ;;  %v3234_v56 = vadd.f32 %v3233_v49, %v12495_v39  ;;  %v3235_v40 = vpop.f32.mrb[181].mxu1 }
 0x2b9   : > { %v3095_v21 = vadd.f32 %v3094_v62, %v12495_v39  ;;  %v3096_v24 = vpop.f32.mrb[182].mxu0  ;;  %v3236_v59 = vadd.f32 %v3235_v40, %v12495_v39  ;;  %v3237_v36 = vpop.f32.mrb[182].mxu1 }
 0x2ba   : > { %v3097_v18 = vadd.f32 %v3096_v24, %v17360_v60  ;;  %v3098_v47 = vpop.f32.mrb[183].mxu0  ;;  %v3238_v37 = vadd.f32 %v3237_v36, %v17360_v60  ;;  %v3239_v28 = vpop.f32.mrb[183].mxu1  ;;  %v3966_v46 = vmax.f32 %v3093_v1, 0.0  ;;  %v3968_v30 = vmax.f32 %v3234_v56, 0.0 }
 0x2bb   : > { %v3099_v31 = vadd.f32 %v3098_v47, %v17360_v60  ;;  %v3240_v12 = vadd.f32 %v3239_v28, %v17360_v60  ;;  %v3967_v33 = vmax.f32 %v3095_v21, 0.0  ;;  %v3969_v62 = vmax.f32 %v3236_v59, 0.0 }
 0x2bc   : > { %v3994_v0 = vmax.f32 %v3097_v18, 0.0  ;;  %3705 = vmatmul.mubr.bf16.gmra.mrb[32].mxu0 %v13798_v22  ;;  %v3996_v4 = vmax.f32 %v3238_v37, 0.0  ;;  %3846 = vmatmul.mubr.bf16.gmra.mrb[32].mxu1 %v13798_v22 }
 0x2bd   : > { %v3995_v49 = vmax.f32 %v3099_v31, 0.0  ;;  %10337 = vmatprep.mubr.msk.bf16.mxu0 %vm1886_vm0, %v13805_v55  ;;  %v3997_v24 = vmax.f32 %v3240_v12, 0.0  ;;  %10348 = vmatprep.mubr.msk.bf16.mxu1 %vm1886_vm0, %v13805_v55 }
 0x2be   : > { %v14123_v40 = vpack.c.bf16 %v3994_v0, %v3966_v46  ;;  %v14127_v1 = vpack.c.bf16 %v3996_v4, %v3968_v30 }
 0x2bf   : > { %v3102_v18 = vpop.f32.mrb[184].mxu0  ;;  %v14129_v36 = vpack.c.bf16 %v3995_v49, %v3967_v33  ;;  %v3243_v21 = vpop.f32.mrb[184].mxu1  ;;  %v14132_v22 = vpack.c.bf16 %v3997_v24, %v3969_v62 }
 0x2c0   : > { %17491 = vst [vmem:[#allocation30_spill] sm:$0xff] %v14123_v40  ;;  %17492 = vst [vmem:[#allocation31_spill] sm:$0xff] %v14127_v1  ;;  %v3103_v56 = vadd.f32 %v3102_v18, %v12564_v11  ;;  %v3104_v47 = vpop.f32.mrb[185].mxu0  ;;  %v3244_v37 = vadd.f32 %v3243_v21, %v12564_v11  ;;  %v3245_v31 = vpop.f32.mrb[185].mxu1  ;;  %v17537_v40 = vld [vmem:[#allocation77_spill] sm:$0xff] }
 0x2c1   : > { %17493 = vst [vmem:[#allocation27_spill] sm:$0xff] %v14129_v36  ;;  %17494 = vst [vmem:[#allocation28_spill] sm:$0xff] %v14132_v22  ;;  %v3105_v59 = vadd.f32 %v3104_v47, %v12564_v11  ;;  %v3106_v28 = vpop.f32.mrb[186].mxu0  ;;  %v3246_v46 = vadd.f32 %v3245_v31, %v12564_v11  ;;  %v3247_v0 = vpop.f32.mrb[186].mxu1  ;;  %v17548_v22 = vld [vmem:[#allocation85_spill] sm:$0xff] }
 0x2c2   : > { %v3107_v55 = vadd.f32 %v3106_v28, %v12574_v14  ;;  %v3108_v12 = vpop.f32.mrb[187].mxu0  ;;  %v3248_v30 = vadd.f32 %v3247_v0, %v12574_v14  ;;  %v3249_v4 = vpop.f32.mrb[187].mxu1  ;;  %v4022_v49 = vmax.f32 %v3103_v56, 0.0  ;;  %v4024_v18 = vmax.f32 %v3244_v37, 0.0 }
 0x2c3   : > { %v3109_v33 = vadd.f32 %v3108_v12, %v12574_v14  ;;  %v3250_v24 = vadd.f32 %v3249_v4, %v12574_v14  ;;  %v4023_v21 = vmax.f32 %v3105_v59, 0.0  ;;  %v4025_v31 = vmax.f32 %v3246_v46, 0.0 }
 0x2c4   : > { %v4050_v62 = vmax.f32 %v3107_v55, 0.0  ;;  %3715 = vmatmul.mubr.bf16.gmra.mrb[36].mxu0 %v13830_v16  ;;  %v4052_v47 = vmax.f32 %v3248_v30, 0.0  ;;  %3856 = vmatmul.mubr.bf16.gmra.mrb[36].mxu1 %v13830_v16 }
 0x2c5   : > { %v4051_v1 = vmax.f32 %v3109_v33, 0.0  ;;  %10338 = vmatprep.mubr.msk.bf16.mxu0 %vm1886_vm0, %v13837_v34  ;;  %v4053_v0 = vmax.f32 %v3250_v24, 0.0  ;;  %10349 = vmatprep.mubr.msk.bf16.mxu1 %vm1886_vm0, %v13837_v34 }
 0x2c6   : > { %v14145_v28 = vpack.c.bf16 %v4050_v62, %v4022_v49  ;;  %v14149_v56 = vpack.c.bf16 %v4052_v47, %v4024_v18 }
 0x2c7   : > { %v3112_v55 = vpop.f32.mrb[188].mxu0  ;;  %v14151_v12 = vpack.c.bf16 %v4051_v1, %v4023_v21  ;;  %v3253_v59 = vpop.f32.mrb[188].mxu1  ;;  %v14154_v16 = vpack.c.bf16 %v4053_v0, %v4025_v31 }
 0x2c8   : > { %17495 = vst [vmem:[#allocation34_spill] sm:$0xff] %v14145_v28  ;;  %17496 = vst [vmem:[#allocation35_spill] sm:$0xff] %v14149_v56  ;;  %v3113_v37 = vadd.f32 %v3112_v55, %v12602_v7  ;;  %v3114_v30 = vpop.f32.mrb[189].mxu0  ;;  %v3254_v33 = vadd.f32 %v3253_v59, %v12602_v7  ;;  %v3255_v4 = vpop.f32.mrb[189].mxu1 }
 0x2c9   : > { %17497 = vst [vmem:[#allocation32_spill] sm:$0xff] %v14151_v12  ;;  %17498 = vst [vmem:[#allocation33_spill] sm:$0xff] %v14154_v16  ;;  %v3115_v46 = vadd.f32 %v3114_v30, %v12602_v7  ;;  %v3116_v49 = vpop.f32.mrb[190].mxu0  ;;  %v3256_v62 = vadd.f32 %v3255_v4, %v12602_v7  ;;  %v3257_v24 = vpop.f32.mrb[190].mxu1  ;;  %v17525_v16 = vld [vmem:[#allocation67_spill] sm:$0xff] }
 0x2ca   : > { %v3117_v34 = vadd.f32 %v3116_v49, %v17371_v20  ;;  %v3118_v18 = vpop.f32.mrb[191].mxu0  ;;  %v3258_v1 = vadd.f32 %v3257_v24, %v17371_v20  ;;  %v3259_v47 = vpop.f32.mrb[191].mxu1  ;;  %v4078_v55 = vmax.f32 %v3113_v37, 0.0  ;;  %v4080_v59 = vmax.f32 %v3254_v33, 0.0 }
 0x2cb   : > { %v3119_v21 = vadd.f32 %v3118_v18, %v17371_v20  ;;  %v3260_v0 = vadd.f32 %v3259_v47, %v17371_v20  ;;  %v4079_v30 = vmax.f32 %v3115_v46, 0.0  ;;  %v4081_v4 = vmax.f32 %v3256_v62, 0.0 }
 0x2cc   : > { %v4106_v31 = vmax.f32 %v3117_v34, 0.0  ;;  %3725 = vmatmul.mubr.bf16.gmra.mrb[40].mxu0 %v13862_v27  ;;  %v4108_v56 = vmax.f32 %v3258_v1, 0.0  ;;  %3866 = vmatmul.mubr.bf16.gmra.mrb[40].mxu1 %v13862_v27 }
 0x2cd   : > { %v4107_v28 = vmax.f32 %v3119_v21, 0.0  ;;  %10339 = vmatprep.mubr.msk.bf16.mxu0 %vm1886_vm0, %v13869_v42  ;;  %v4109_v24 = vmax.f32 %v3260_v0, 0.0  ;;  %10350 = vmatprep.mubr.msk.bf16.mxu1 %vm1886_vm0, %v13869_v42 }
 0x2ce   : > { %v14167_v49 = vpack.c.bf16 %v4106_v31, %v4078_v55  ;;  %v14171_v37 = vpack.c.bf16 %v4108_v56, %v4080_v59 }
 0x2cf   : > { %v3122_v34 = vpop.f32.mrb[192].mxu0  ;;  %v14173_v18 = vpack.c.bf16 %v4107_v28, %v4079_v30  ;;  %v3263_v46 = vpop.f32.mrb[192].mxu1  ;;  %v14176_v27 = vpack.c.bf16 %v4109_v24, %v4081_v4 }
 0x2d0   : > { %17499 = vst [vmem:[#allocation38_spill] sm:$0xff] %v14167_v49  ;;  %17500 = vst [vmem:[#allocation39_spill] sm:$0xff] %v14171_v37  ;;  %v3123_v33 = vadd.f32 %v3122_v34, %v12640_v63  ;;  %v3124_v1 = vpop.f32.mrb[193].mxu0  ;;  %v3264_v21 = vadd.f32 %v3263_v46, %v12640_v63  ;;  %v3265_v47 = vpop.f32.mrb[193].mxu1 }
 0x2d1   : > { %17501 = vst [vmem:[#allocation36_spill] sm:$0xff] %v14173_v18  ;;  %17502 = vst [vmem:[#allocation37_spill] sm:$0xff] %v14176_v27  ;;  %v3125_v62 = vadd.f32 %v3124_v1, %v12640_v63  ;;  %v3126_v55 = vpop.f32.mrb[194].mxu0  ;;  %v3266_v31 = vadd.f32 %v3265_v47, %v12640_v63  ;;  %v3267_v56 = vpop.f32.mrb[194].mxu1  ;;  %v17513_v27 = vld [vmem:[#allocation57_spill] sm:$0xff] }
 0x2d2   : > { %v3127_v42 = vadd.f32 %v3126_v55, %v12650_v38  ;;  %v3128_v0 = vpop.f32.mrb[195].mxu0  ;;  %v3268_v28 = vadd.f32 %v3267_v56, %v12650_v38  ;;  %v3269_v30 = vpop.f32.mrb[195].mxu1  ;;  %v4134_v34 = vmax.f32 %v3123_v33, 0.0  ;;  %v4136_v46 = vmax.f32 %v3264_v21, 0.0 }
 0x2d3   : > { %v3129_v59 = vadd.f32 %v3128_v0, %v12650_v38  ;;  %v3270_v24 = vadd.f32 %v3269_v30, %v12650_v38  ;;  %v4135_v1 = vmax.f32 %v3125_v62, 0.0  ;;  %v4137_v47 = vmax.f32 %v3266_v31, 0.0 }
 0x2d4   : > { %v4162_v4 = vmax.f32 %v3127_v42, 0.0  ;;  %3735 = vmatmul.mubr.bf16.gmra.mrb[44].mxu0 %v13894_v8  ;;  %v4164_v37 = vmax.f32 %v3268_v28, 0.0  ;;  %3876 = vmatmul.mubr.bf16.gmra.mrb[44].mxu1 %v13894_v8 }
 0x2d5   : > { %v4163_v49 = vmax.f32 %v3129_v59, 0.0  ;;  %10340 = vmatprep.mubr.msk.bf16.mxu0 %vm1886_vm0, %v17378_v13  ;;  %v4165_v56 = vmax.f32 %v3270_v24, 0.0  ;;  %10351 = vmatprep.mubr.msk.bf16.mxu1 %vm1886_vm0, %v17378_v13  ;;  %v14205_v13 = vld [vmem:[%s17175_s3 + $0x4] ss:$8 sps:$4 sm:$0xff]  }
 0x2d6   : > { %v14189_v55 = vpack.c.bf16 %v4162_v4, %v4134_v34  ;;  %v14193_v33 = vpack.c.bf16 %v4164_v37, %v4136_v46 }
 0x2d7   : > { %v3132_v42 = vpop.f32.mrb[196].mxu0  ;;  %v14195_v0 = vpack.c.bf16 %v4163_v49, %v4135_v1  ;;  %v3273_v62 = vpop.f32.mrb[196].mxu1  ;;  %v14198_v8 = vpack.c.bf16 %v4165_v56, %v4137_v47 }
 0x2d8   : > { %17503 = vst [vmem:[#allocation42_spill] sm:$0xff] %v14189_v55  ;;  %17504 = vst [vmem:[#allocation50_spill] sm:$0xff] %v14193_v33  ;;  %v3133_v21 = vadd.f32 %v3132_v42, %v12678_v5  ;;  %v3134_v28 = vpop.f32.mrb[197].mxu0  ;;  %v3274_v59 = vadd.f32 %v3273_v62, %v12678_v5  ;;  %v3275_v30 = vpop.f32.mrb[197].mxu1 }
 0x2d9   : > { %17505 = vst [vmem:[#allocation43_spill] sm:$0xff] %v14195_v0  ;;  %17506 = vst [vmem:[#allocation52_spill] sm:$0xff] %v14198_v8  ;;  %v3135_v31 = vadd.f32 %v3134_v28, %v12678_v5  ;;  %v3136_v34 = vpop.f32.mrb[198].mxu0  ;;  %v3276_v49 = vadd.f32 %v3275_v30, %v12678_v5  ;;  %v3277_v4 = vpop.f32.mrb[198].mxu1 }
 0x2da   : > { %v3137_v37 = vadd.f32 %v3136_v34, %v12688_v45  ;;  %v3138_v24 = vpop.f32.mrb[199].mxu0  ;;  %v3278_v46 = vadd.f32 %v3277_v4, %v12688_v45  ;;  %v3279_v47 = vpop.f32.mrb[199].mxu1  ;;  %v4190_v56 = vmax.f32 %v3133_v21, 0.0  ;;  %v4192_v28 = vmax.f32 %v3274_v59, 0.0 }
 0x2db   : > { %v3139_v1 = vadd.f32 %v3138_v24, %v12688_v45  ;;  %v3280_v62 = vadd.f32 %v3279_v47, %v12688_v45  ;;  %v4191_v33 = vmax.f32 %v3135_v31, 0.0  ;;  %v4193_v34 = vmax.f32 %v3276_v49, 0.0 }
 0x2dc   : > { %v4218_v42 = vmax.f32 %v3137_v37, 0.0  ;;  %3745 = vmatmul.mubr.bf16.gmra.mrb[48].mxu0 %v12231_v10  ;;  %v4220_v55 = vmax.f32 %v3278_v46, 0.0  ;;  %3886 = vmatmul.mubr.bf16.gmra.mrb[48].mxu1 %v12231_v10  ;;  %v14228_v10 = vld [vmem:[%s17175_s3] ss:$8 sps:$4 sm:$0xff]  }
 0x2dd   : > { %v4219_v30 = vmax.f32 %v3139_v1, 0.0  ;;  %10365 = vmatprep.mubr.msk.bf16.mxu0 %vm4856_vm2, %v14205_v13  ;;  %v4221_v24 = vmax.f32 %v3280_v62, 0.0  ;;  %10372 = vmatprep.mubr.msk.bf16.mxu1 %vm4856_vm2, %v14205_v13 }
 0x2de   : > { %v14216_v4 = vpack.c.bf16 %v4218_v42, %v4190_v56  ;;  %v14220_v21 = vpack.c.bf16 %v4220_v55, %v4192_v28 }
 0x2df   : > { %v3142_v37 = vpop.f32.mrb[200].mxu0  ;;  %v14222_v47 = vpack.c.bf16 %v4219_v30, %v4191_v33  ;;  %v3283_v31 = vpop.f32.mrb[200].mxu1  ;;  %v14230_v49 = vpack.c.bf16 %v4221_v24, %v4193_v34  ;;  %v14241_v34 = vld [vmem:[%s17175_s3 + $0x14] ss:$8 sps:$4 sm:$0xff]  }
 0x2e0   : > { %17507 = vst [vmem:[#allocation53_spill] sm:$0xff] %v14216_v4  ;;  %17508 = vst [vmem:[#allocation54_spill] sm:$0xff] %v14220_v21  ;;  %v3143_v59 = vadd.f32 %v3142_v37, %v12716_v57  ;;  %v3144_v46 = vpop.f32.mrb[201].mxu0  ;;  %v3284_v1 = vadd.f32 %v3283_v31, %v12716_v57  ;;  %v3285_v55 = vpop.f32.mrb[201].mxu1 }
 0x2e1   : > { %17509 = vst [vmem:[#allocation40_spill] sm:$0xff] %v14222_v47  ;;  %17510 = vst [vmem:[#allocation41_spill] sm:$0xff] %v14230_v49  ;;  %v3145_v56 = vadd.f32 %v3144_v46, %v12716_v57  ;;  %v3146_v42 = vpop.f32.mrb[202].mxu0  ;;  %v3286_v33 = vadd.f32 %v3285_v55, %v12716_v57  ;;  %v3287_v28 = vpop.f32.mrb[202].mxu1 }
 0x2e2   : > { %v3147_v62 = vadd.f32 %v3146_v42, %v12726_v6  ;;  %v3148_v30 = vpop.f32.mrb[203].mxu0  ;;  %v3288_v37 = vadd.f32 %v3287_v28, %v12726_v6  ;;  %v3289_v4 = vpop.f32.mrb[203].mxu1  ;;  %v4246_v24 = vmax.f32 %v3143_v59, 0.0  ;;  %v4248_v55 = vmax.f32 %v3284_v1, 0.0  ;;  %v17511_v28 = vld [vmem:[#allocation56_spill] sm:$0xff]  ;;  %v17514_v59 = vld [vmem:[#allocation63_spill] sm:$0xff] }
 0x2e3   : > { %v3149_v21 = vadd.f32 %v3148_v30, %v12726_v6  ;;  %v3290_v46 = vadd.f32 %v3289_v4, %v12726_v6  ;;  %v4247_v42 = vmax.f32 %v3145_v56, 0.0  ;;  %v4249_v30 = vmax.f32 %v3286_v33, 0.0  ;;  %v17516_v4 = vld [vmem:[#allocation64_spill] sm:$0xff] }
 0x2e4   : > { %v4274_v31 = vmax.f32 %v3147_v62, 0.0  ;;  %4993 = vmatmul.mubr.bf16.vlgmr.msra.gmra.mrb[52].mxu0 %v14228_v10  ;;  %v4276_v49 = vmax.f32 %v3288_v37, 0.0  ;;  %5086 = vmatmul.mubr.bf16.vlgmr.msra.gmra.mrb[52].mxu1 %v14228_v10 }
 0x2e5   : > { %v4275_v47 = vmax.f32 %v3149_v21, 0.0  ;;  %5147 = vmatpush1.bf16.msra.mxu0 %v17511_v28  ;;  %v4277_v0 = vmax.f32 %v3290_v46, 0.0  ;;  %5240 = vmatpush1.bf16.msra.mxu1 %v17513_v27  ;;  %v14264_v27 = vld [vmem:[%s17175_s3 + $0x10] ss:$8 sps:$4 sm:$0xff]   ;;  %v17520_v28 = vld [vmem:[#allocation62_spill] sm:$0xff] }
 0x2e6   : > { %v14247_v8 = vpack.c.bf16 %v4274_v31, %v4246_v24  ;;  %5148 = vmatprep.subr.bf16.mxu0 %v17514_v59  ;;  %v14251_v62 = vpack.c.bf16 %v4276_v49, %v4248_v55  ;;  %5241 = vmatprep.subr.bf16.mxu1 %v17516_v4  ;;  %v17519_v46 = vld [vmem:[#allocation61_spill] sm:$0xff] }
 0x2e7   : > { %v3152_v1 = vpop.f32.mrb[204].mxu0  ;;  %10366 = vmatprep.mubr.msk.bf16.mxu0 %vm4856_vm2, %v14241_v34  ;;  %v14256_v21 = vpack.c.bf16 %v4275_v47, %v4247_v42  ;;  %v3293_v33 = vpop.f32.mrb[204].mxu1  ;;  %10373 = vmatprep.mubr.msk.bf16.mxu1 %vm4856_vm2, %v14241_v34  ;;  %v14266_v49 = vpack.c.bf16 %v4277_v0, %v4249_v30  ;;  %v17522_v30 = vld [vmem:[#allocation69_spill] sm:$0xff] }
 0x2e8   : > { %17512 = vst [vmem:[#allocation46_spill] sm:$0xff] %v14247_v8  ;;  %17515 = vst [vmem:[#allocation47_spill] sm:$0xff] %v14251_v62  ;;  %v3153_v56 = vadd.f32 %v3152_v1, %v12755_v50  ;;  %v3154_v37 = vpop.f32.mrb[205].mxu0  ;;  %v3294_v24 = vadd.f32 %v3293_v33, %v12755_v50  ;;  %v3295_v47 = vpop.f32.mrb[205].mxu1  ;;  %v17521_v1 = vld [vmem:[#allocation68_spill] sm:$0xff] }
 0x2e9   : > { %17517 = vst [vmem:[#allocation44_spill] sm:$0xff] %v14256_v21  ;;  %17518 = vst [vmem:[#allocation45_spill] sm:$0xff] %v14266_v49  ;;  %v3155_v31 = vadd.f32 %v3154_v37, %v12755_v50  ;;  %5149 = vmatpush1.bf16.msra.mxu0 %v17519_v46  ;;  %v3156_v55 = vpop.f32.mrb[206].mxu0  ;;  %v3296_v42 = vadd.f32 %v3295_v47, %v12755_v50  ;;  %5242 = vmatpush1.bf16.msra.mxu1 %v17520_v28  ;;  %v3297_v4 = vpop.f32.mrb[206].mxu1  ;;  %v14281_v46 = vld [vmem:[%s17175_s3 + $0x24] ss:$8 sps:$4 sm:$0xff]  }
 0x2ea   : > { %v3157_v59 = vadd.f32 %v3156_v55, %v12777_v53  ;;  %5150 = vmatprep.subr.bf16.mxu0 %v17521_v1  ;;  %v3158_v62 = vpop.f32.mrb[207].mxu0  ;;  %v3298_v0 = vadd.f32 %v3297_v4, %v12777_v53  ;;  %5243 = vmatprep.subr.bf16.mxu1 %v17522_v30  ;;  %v3299_v37 = vpop.f32.mrb[207].mxu1  ;;  %v4302_v47 = vmax.f32 %v3153_v56, 0.0  ;;  %v4304_v1 = vmax.f32 %v3294_v24, 0.0  ;;  %v17523_v30 = vld [vmem:[#allocation66_spill] sm:$0xff]  ;;  %v17526_v56 = vld [vmem:[#allocation73_spill] sm:$0xff] }
 0x2eb   : > { %v3159_v33 = vadd.f32 %v3158_v62, %v12777_v53  ;;  %v3300_v55 = vadd.f32 %v3299_v37, %v12777_v53  ;;  %v4303_v8 = vmax.f32 %v3155_v31, 0.0  ;;  %v4305_v62 = vmax.f32 %v3296_v42, 0.0  ;;  %v17528_v37 = vld [vmem:[#allocation74_spill] sm:$0xff] }
 0x2ec   : > { %v4330_v28 = vmax.f32 %v3157_v59, 0.0  ;;  %5003 = vmatmul.mubr.bf16.gmra.mrb[56].mxu0 %v14264_v27  ;;  %v4332_v49 = vmax.f32 %v3298_v0, 0.0  ;;  %5096 = vmatmul.mubr.bf16.gmra.mrb[56].mxu1 %v14264_v27 }
 0x2ed   : > { %v4331_v4 = vmax.f32 %v3159_v33, 0.0  ;;  %5151 = vmatpush1.bf16.msra.mxu0 %v17523_v30  ;;  %v4333_v18 = vmax.f32 %v3300_v55, 0.0  ;;  %5244 = vmatpush1.bf16.msra.mxu1 %v17525_v16  ;;  %v14304_v16 = vld [vmem:[%s17175_s3 + $0x20] ss:$8 sps:$4 sm:$0xff]   ;;  %v17532_v30 = vld [vmem:[#allocation72_spill] sm:$0xff] }
 0x2ee   : > { %v14287_v21 = vpack.c.bf16 %v4330_v28, %v4302_v47  ;;  %5152 = vmatprep.subr.bf16.mxu0 %v17526_v56  ;;  %v14291_v59 = vpack.c.bf16 %v4332_v49, %v4304_v1  ;;  %5245 = vmatprep.subr.bf16.mxu1 %v17528_v37  ;;  %v17531_v55 = vld [vmem:[#allocation71_spill] sm:$0xff] }
 0x2ef   : > { %v3162_v24 = vpop.f32.mrb[208].mxu0  ;;  %10367 = vmatprep.mubr.msk.bf16.mxu0 %vm4856_vm2, %v14281_v46  ;;  %v14296_v31 = vpack.c.bf16 %v4331_v4, %v4303_v8  ;;  %v3303_v42 = vpop.f32.mrb[208].mxu1  ;;  %10374 = vmatprep.mubr.msk.bf16.mxu1 %vm4856_vm2, %v14281_v46  ;;  %v14306_v49 = vpack.c.bf16 %v4333_v18, %v4305_v62  ;;  %v17534_v62 = vld [vmem:[#allocation79_spill] sm:$0xff] }
 0x2f0   : > { %17524 = vst [vmem:[#allocation51_spill] sm:$0xff] %v14287_v21  ;;  %17527 = vst [vmem:[#allocation55_spill] sm:$0xff] %v14291_v59  ;;  %v3163_v0 = vadd.f32 %v3162_v24, %v12814_v43  ;;  %v3164_v33 = vpop.f32.mrb[209].mxu0  ;;  %v3304_v47 = vadd.f32 %v3303_v42, %v12814_v43  ;;  %v3305_v8 = vpop.f32.mrb[209].mxu1  ;;  %v17533_v24 = vld [vmem:[#allocation78_spill] sm:$0xff] }
 0x2f1   : > { %17529 = vst [vmem:[#allocation48_spill] sm:$0xff] %v14296_v31  ;;  %17530 = vst [vmem:[#allocation49_spill] sm:$0xff] %v14306_v49  ;;  %v3165_v28 = vadd.f32 %v3164_v33, %v12814_v43  ;;  %5153 = vmatpush1.bf16.msra.mxu0 %v17531_v55  ;;  %v3166_v1 = vpop.f32.mrb[210].mxu0  ;;  %v3306_v4 = vadd.f32 %v3305_v8, %v12814_v43  ;;  %5246 = vmatpush1.bf16.msra.mxu1 %v17532_v30  ;;  %v3307_v37 = vpop.f32.mrb[210].mxu1  ;;  %v14321_v55 = vld [vmem:[%s17175_s3 + $0x34] ss:$8 sps:$4 sm:$0xff]  }
 0x2f2   : > { %v3167_v56 = vadd.f32 %v3166_v1, %v12837_v54  ;;  %5154 = vmatprep.subr.bf16.mxu0 %v17533_v24  ;;  %v3168_v59 = vpop.f32.mrb[211].mxu0  ;;  %v3308_v18 = vadd.f32 %v3307_v37, %v12837_v54  ;;  %5247 = vmatprep.subr.bf16.mxu1 %v17534_v62  ;;  %v3309_v33 = vpop.f32.mrb[211].mxu1  ;;  %v4358_v8 = vmax.f32 %v3163_v0, 0.0  ;;  %v4360_v24 = vmax.f32 %v3304_v47, 0.0  ;;  %v17535_v62 = vld [vmem:[#allocation76_spill] sm:$0xff]  ;;  %v17538_v0 = vld [vmem:[#allocation82_spill] sm:$0xff] }
 0x2f3   : > { %v3169_v42 = vadd.f32 %v3168_v59, %v12837_v54  ;;  %v3310_v1 = vadd.f32 %v3309_v33, %v12837_v54  ;;  %v4359_v21 = vmax.f32 %v3165_v28, 0.0  ;;  %v4361_v59 = vmax.f32 %v3306_v4, 0.0  ;;  %v17540_v33 = vld [vmem:[#allocation83_spill] sm:$0xff] }
 0x2f4   : > { %v4386_v30 = vmax.f32 %v3167_v56, 0.0  ;;  %5013 = vmatmul.mubr.bf16.gmra.mrb[60].mxu0 %v14304_v16  ;;  %v4388_v49 = vmax.f32 %v3308_v18, 0.0  ;;  %5106 = vmatmul.mubr.bf16.gmra.mrb[60].mxu1 %v14304_v16 }
 0x2f5   : > { %v4387_v37 = vmax.f32 %v3169_v42, 0.0  ;;  %5155 = vmatpush1.bf16.msra.mxu0 %v17535_v62  ;;  %v4389_v12 = vmax.f32 %v3310_v1, 0.0  ;;  %5248 = vmatpush1.bf16.msra.mxu1 %v17537_v40  ;;  %v14344_v40 = vld [vmem:[%s17175_s3 + $0x30] ss:$8 sps:$4 sm:$0xff]  }
 0x2f6   : > { %v14327_v31 = vpack.c.bf16 %v4386_v30, %v4358_v8  ;;  %5156 = vmatprep.subr.bf16.mxu0 %v17538_v0  ;;  %v14331_v56 = vpack.c.bf16 %v4388_v49, %v4360_v24  ;;  %5249 = vmatprep.subr.bf16.mxu1 %v17540_v33  ;;  %v17543_v1 = vld [vmem:[#allocation80_spill] sm:$0xff]  ;;  %v17544_v62 = vld [vmem:[#allocation81_spill] sm:$0xff] }
 0x2f7   : > { %v3172_v47 = vpop.f32.mrb[212].mxu0  ;;  %10368 = vmatprep.mubr.msk.bf16.mxu0 %vm4856_vm2, %v14321_v55  ;;  %v14336_v28 = vpack.c.bf16 %v4387_v37, %v4359_v21  ;;  %v3313_v4 = vpop.f32.mrb[212].mxu1  ;;  %10375 = vmatprep.mubr.msk.bf16.mxu1 %vm4856_vm2, %v14321_v55  ;;  %v14346_v49 = vpack.c.bf16 %v4389_v12, %v4361_v59  ;;  %v17545_v59 = vld [vmem:[#allocation86_spill] sm:$0xff] }
 0x2f8   : > { %17536 = vst [vmem:[#allocation58_spill] sm:$0xff] %v14327_v31  ;;  %17539 = vst [vmem:[#allocation59_spill] sm:$0xff] %v14331_v56  ;;  %v3173_v18 = vadd.f32 %v3172_v47, %v12876_v25  ;;  %v3174_v42 = vpop.f32.mrb[213].mxu0  ;;  %v3314_v8 = vadd.f32 %v3313_v4, %v12876_v25  ;;  %v3315_v21 = vpop.f32.mrb[213].mxu1 }
 0x2f9   : > { %17541 = vst [vmem:[#allocation56_spill] sm:$0xff] %v14336_v28  ;;  %17542 = vst [vmem:[#allocation57_spill] sm:$0xff] %v14346_v49  ;;  %v3175_v30 = vadd.f32 %v3174_v42, %v12876_v25  ;;  %5157 = vmatpush1.bf16.msra.mxu0 %v17543_v1  ;;  %v3176_v24 = vpop.f32.mrb[214].mxu0  ;;  %v3316_v37 = vadd.f32 %v3315_v21, %v12876_v25  ;;  %5250 = vmatpush1.bf16.msra.mxu1 %v17544_v62  ;;  %v3317_v33 = vpop.f32.mrb[214].mxu1  ;;  %v14361_v1 = vld [vmem:[%s17175_s3 + $0x44] ss:$8 sps:$4 sm:$0xff]  }
 0x2fa   : > { %v3177_v0 = vadd.f32 %v3176_v24, %v12899_v58  ;;  %5158 = vmatprep.subr.bf16.mxu0 %v13240_v15  ;;  %v3178_v47 = vpop.f32.mrb[215].mxu0  ;;  %v3318_v12 = vadd.f32 %v3317_v33, %v12899_v58  ;;  %5251 = vmatprep.subr.bf16.mxu1 %v17545_v59  ;;  %v3319_v42 = vpop.f32.mrb[215].mxu1  ;;  %v4414_v21 = vmax.f32 %v3173_v18, 0.0  ;;  %v4416_v15 = vmax.f32 %v3314_v8, 0.0  ;;  %v17546_v59 = vld [vmem:[#allocation84_spill] sm:$0xff]  ;;  %v17550_v8 = vld [vmem:[#allocation89_spill] sm:$0xff] }
 0x2fb   : > { %v3179_v4 = vadd.f32 %v3178_v47, %v12899_v58  ;;  %v3320_v24 = vadd.f32 %v3319_v42, %v12899_v58  ;;  %v4415_v56 = vmax.f32 %v3175_v30, 0.0  ;;  %v4417_v47 = vmax.f32 %v3316_v37, 0.0 }
 0x2fc   : > { %v4442_v62 = vmax.f32 %v3177_v0, 0.0  ;;  %5023 = vmatmul.mubr.bf16.gmra.mrb[64].mxu0 %v14344_v40  ;;  %v4444_v31 = vmax.f32 %v3318_v12, 0.0  ;;  %5116 = vmatmul.mubr.bf16.gmra.mrb[64].mxu1 %v14344_v40  ;;  %v2337_v18 = vadd.f32 %v13362_v17, %v14030_v44  ;;  %v17553_v12 = vld [vmem:[#allocation97_spill] sm:$0xff] }
 0x2fd   : > { %v4443_v33 = vmax.f32 %v3179_v4, 0.0  ;;  %5159 = vmatpush1.bf16.msra.mxu0 %v17546_v59  ;;  %v4445_v28 = vmax.f32 %v3320_v24, 0.0  ;;  %5252 = vmatpush1.bf16.msra.mxu1 %v17548_v22  ;;  %v2339_v4 = vadd.f32 %v17553_v12, %v14030_v44  ;;  %v17554_v22 = vld [vmem:[#allocation98_spill] sm:$0xff]  ;;  %v17561_v59 = vld [vmem:[#allocation88_spill] sm:$0xff] }
 0x2fe   : > { %v14367_v49 = vpack.c.bf16 %v4442_v62, %v4414_v21  ;;  %5160 = vmatprep.subr.bf16.mxu0 %v13282_v52  ;;  %v14373_v0 = vpack.c.bf16 %v4444_v31, %v4416_v15  ;;  %5253 = vmatprep.subr.bf16.mxu1 %v17550_v8  ;;  %v2478_v52 = vadd.f32 %v17554_v22, %v14030_v44  ;;  %v14395_v31 = vld [vmem:[%s17175_s3 + $0x40] ss:$8 sps:$4 sm:$0xff]   ;;  %v17558_v21 = vld [vmem:[#allocation100_spill] sm:$0xff] }
 0x2ff   : > { %v14376_v30 = vpop.f32.mrb[216].mxu0  ;;  %10369 = vmatprep.mubr.msk.bf16.mxu0 %vm4856_vm2, %v14361_v1  ;;  %v14380_v37 = vpack.c.bf16 %v4443_v33, %v4415_v56  ;;  %v14386_v42 = vpop.f32.mrb[216].mxu1  ;;  %10376 = vmatprep.mubr.msk.bf16.mxu1 %vm4856_vm2, %v14361_v1  ;;  %v14397_v56 = vpack.c.bf16 %v4445_v28, %v4417_v47  ;;  %v2480_v62 = vadd.f32 %v17558_v21, %v14030_v44  ;;  %v17560_v15 = vld [vmem:[#allocation87_spill] sm:$0xff]  ;;  %v17562_v8 = vld [vmem:[#allocation92_spill] sm:$0xff]  ;;  %v4459_v47 = vmax.f32 %v2339_v4, 0.0 }
 0x300   : > { %17547 = vst [vmem:[#allocation63_spill] sm:$0xff] %v14367_v49  ;;  %17549 = vst [vmem:[#allocation64_spill] sm:$0xff] %v14373_v0  ;;  %v14388_v17 = vpop.f32.mrb[217].mxu0  ;;  %v14401_v24 = vpop.f32.mrb[217].mxu1  ;;  %v4458_v0 = vmax.f32 %v2337_v18, 0.0  ;;  %v17563_v49 = vld [vmem:[#allocation93_spill] sm:$0xff] }
 0x301   : > { %17551 = vst [vmem:[#allocation61_spill] sm:$0xff] %v14376_v30  ;;  %17552 = vst [vmem:[#allocation62_spill] sm:$0xff] %v14380_v37  ;;  %5161 = vmatpush1.bf16.msra.mxu0 %v17560_v15  ;;  %v3186_v33 = vpop.f32.mrb[218].mxu0  ;;  %5254 = vmatpush1.bf16.msra.mxu1 %v17561_v59  ;;  %v3327_v22 = vpop.f32.mrb[218].mxu1  ;;  %v14410_v28 = vld [vmem:[%s17175_s3 + $0x54] ss:$8 sps:$4 sm:$0xff]   ;;  %v4779_v4 = vpack.c.bf16 %v4459_v47, %v4459_v47 }
 0x302   : > { %17555 = vst [vmem:[#allocation68_spill] sm:$0xff] %v14386_v42  ;;  %17556 = vst [vmem:[#allocation69_spill] sm:$0xff] %v14388_v17  ;;  %5162 = vmatprep.subr.bf16.mxu0 %v17562_v8  ;;  %v3187_v12 = vpop.f32.mrb[219].mxu0  ;;  %5255 = vmatprep.subr.bf16.mxu1 %v17563_v49  ;;  %v3328_v37 = vpop.f32.mrb[219].mxu1  ;;  %v4460_v21 = vmax.f32 %v2478_v52, 0.0  ;;  %v4461_v15 = vmax.f32 %v2480_v62, 0.0  ;;  %v4778_v49 = vpack.c.bf16 %v4458_v0, %v4458_v0 }
 0x303   : > { %17557 = vst [vmem:[#allocation66_spill] sm:$0xff] %v14397_v56  ;;  %17559 = vst [vmem:[#allocation67_spill] sm:$0xff] %v14401_v24  ;;  %v17564_v33 = vld [vmem:[#allocation90_spill] sm:$0xff]  ;;  %v17565_v59 = vld [vmem:[#allocation91_spill] sm:$0xff] }
 0x304   : > { %5033 = vmatmul.mubr.bf16.gmra.mrb[68].mxu0 %v14395_v31  ;;  %5126 = vmatmul.mubr.bf16.gmra.mrb[68].mxu1 %v14395_v31  ;;  %v17566_v18 = vld [vmem:[#allocation96_spill] sm:$0xff]  ;;  %v17567_v37 = vld [vmem:[#allocation99_spill] sm:$0xff]  ;;  %v4780_v52 = vpack.c.bf16 %v4460_v21, %v4460_v21  ;;  %v4781_v0 = vpack.c.bf16 %v4461_v15, %v4461_v15  ;;  %v17568_v47 = vld [vmem:[#allocation94_spill] sm:$0xff] }
 0x305   : > { %5163 = vmatpush1.bf16.msra.mxu0 %v17564_v33  ;;  %5256 = vmatpush1.bf16.msra.mxu1 %v17565_v59  ;;  %v14426_v33 = vld [vmem:[%s17175_s3 + $0x50] ss:$8 sps:$4 sm:$0xff]   ;;  %v17569_v56 = vld [vmem:[#allocation95_spill] sm:$0xff] }
 0x306   : > { %5164 = vmatprep.subr.bf16.mxu0 %v17566_v18  ;;  %5257 = vmatprep.subr.bf16.mxu1 %v17567_v37 }
 0x307   : > { %v3364_v8 = vpop.f32.mrb[220].mxu0  ;;  %10370 = vmatprep.mubr.msk.bf16.mxu0 %vm4856_vm2, %v14410_v28  ;;  %v3505_v62 = vpop.f32.mrb[220].mxu1  ;;  %10377 = vmatprep.mubr.msk.bf16.mxu1 %vm4856_vm2, %v14410_v28 }
 0x308   : > { %v3365_v12 = vadd.f32 %v3364_v8, %v12475_v32  ;;  %v3366_v22 = vpop.f32.mrb[221].mxu0  ;;  %v3506_v59 = vadd.f32 %v3505_v62, %v12475_v32  ;;  %v3507_v37 = vpop.f32.mrb[221].mxu1 }
 0x309   : > { %v3367_v18 = vadd.f32 %v3366_v22, %v12475_v32  ;;  %5165 = vmatpush1.bf16.msra.mxu0 %v17568_v47  ;;  %v3368_v21 = vpop.f32.mrb[222].mxu0  ;;  %v3508_v8 = vadd.f32 %v3507_v37, %v12475_v32  ;;  %5258 = vmatpush1.bf16.msra.mxu1 %v17569_v56  ;;  %v3509_v17 = vpop.f32.mrb[222].mxu1  ;;  %v4889_v47 = vsel %vm4875_vm1, %v4778_v49, 0  ;;  %v4895_v56 = vsel %vm4875_vm1, %v4780_v52, 0 }
 0x30a   : > { %v3369_v24 = vadd.f32 %v3368_v21, %v12501_v48  ;;  %10378 = vmatprep.subr.msk.bf16.mxu0 %vm4875_vm1, %v4779_v4  ;;  %v3370_v42 = vpop.f32.mrb[223].mxu0  ;;  %v3510_v15 = vadd.f32 %v3509_v17, %v12501_v48  ;;  %10385 = vmatprep.subr.msk.bf16.mxu1 %vm4875_vm1, %v4781_v0  ;;  %v3511_v22 = vpop.f32.mrb[223].mxu1  ;;  %v3914_v30 = vmax.f32 %v3365_v12, 0.0  ;;  %v3916_v21 = vmax.f32 %v3506_v59, 0.0 }
 0x30b   : > { %v3371_v62 = vadd.f32 %v3370_v42, %v12501_v48  ;;  %v3512_v37 = vadd.f32 %v3511_v22, %v12501_v48  ;;  %v3915_v17 = vmax.f32 %v3367_v18, 0.0  ;;  %v17570_v42 = vld [vmem:[#allocation103_spill] sm:$0xff]  ;;  %v3917_v61 = vmax.f32 %v3508_v8, 0.0 }
 0x30c   : > { %v3942_v36 = vmax.f32 %v3369_v24, 0.0  ;;  %5043 = vmatmul.mubr.bf16.gmra.mrb[72].mxu0 %v14426_v33  ;;  %v3944_v4 = vmax.f32 %v3510_v15, 0.0  ;;  %5136 = vmatmul.mubr.bf16.gmra.mrb[72].mxu1 %v14426_v33  ;;  %v17572_v24 = vld [vmem:[#allocation104_spill] sm:$0xff] }
 0x30d   : > { %5167 = vmatpush1.bf16.msra.mxu0 %v4889_v47  ;;  %v3943_v0 = vmax.f32 %v3371_v62, 0.0  ;;  %5260 = vmatpush1.bf16.msra.mxu1 %v4895_v56  ;;  %v3945_v49 = vmax.f32 %v3512_v37, 0.0 }
 0x30e   : > { %5332 = vmatprep.subr.bf16.mxu0 %v17570_v42  ;;  %v14444_v12 = vpack.c.bf16 %v3942_v36, %v3914_v30  ;;  %5425 = vmatprep.subr.bf16.mxu1 %v17572_v24  ;;  %v14451_v59 = vpack.c.bf16 %v3944_v4, %v3916_v21 }
 0x30f   : > { %v3374_v22 = vpop.f32.mrb[224].mxu0  ;;  %10379 = vmatprep.mubr.msk.bf16.mxu0 %vm4856_vm2, %v14205_v13  ;;  %v14449_v52 = vpack.c.bf16 %v3943_v0, %v3915_v17  ;;  %v3515_v15 = vpop.f32.mrb[224].mxu1  ;;  %10386 = vmatprep.mubr.msk.bf16.mxu1 %vm4856_vm2, %v14205_v13  ;;  %v14456_v8 = vpack.c.bf16 %v3945_v49, %v3917_v61 }
 0x310   : > { %17571 = vst [vmem:[#allocation73_spill] sm:$0xff] %v14444_v12  ;;  %17574 = vst [vmem:[#allocation71_spill] sm:$0xff] %v14451_v59  ;;  %v3375_v18 = vadd.f32 %v3374_v22, %v12495_v39  ;;  %v3376_v62 = vpop.f32.mrb[225].mxu0  ;;  %v3516_v36 = vadd.f32 %v3515_v15, %v12495_v39  ;;  %v3517_v47 = vpop.f32.mrb[225].mxu1  ;;  %v17577_v59 = vld [vmem:[#allocation102_spill] sm:$0xff] }
 0x311   : > { %17573 = vst [vmem:[#allocation74_spill] sm:$0xff] %v14449_v52  ;;  %17575 = vst [vmem:[#allocation72_spill] sm:$0xff] %v14456_v8  ;;  %v3377_v30 = vadd.f32 %v3376_v62, %v12495_v39  ;;  %v3378_v37 = vpop.f32.mrb[226].mxu0  ;;  %v3518_v56 = vadd.f32 %v3517_v47, %v12495_v39  ;;  %v3519_v4 = vpop.f32.mrb[226].mxu1  ;;  %v17576_v62 = vld [vmem:[#allocation101_spill] sm:$0xff]  ;;  %v17615_v8 = vld [vmem:[#allocation119_spill] sm:$0xff] }
 0x312   : > { %v3379_v21 = vadd.f32 %v3378_v37, %v17360_v60  ;;  %v3380_v17 = vpop.f32.mrb[227].mxu0  ;;  %v3520_v0 = vadd.f32 %v3519_v4, %v17360_v60  ;;  %v3521_v24 = vpop.f32.mrb[227].mxu1  ;;  %v3970_v13 = vmax.f32 %v3375_v18, 0.0  ;;  %v3972_v22 = vmax.f32 %v3516_v36, 0.0  ;;  %v17578_v4 = vld [vmem:[#allocation105_spill] sm:$0xff] }
 0x313   : > { %v3381_v42 = vadd.f32 %v3380_v17, %v17360_v60  ;;  %v3522_v49 = vadd.f32 %v3521_v24, %v17360_v60  ;;  %v3971_v47 = vmax.f32 %v3377_v30, 0.0  ;;  %v3973_v17 = vmax.f32 %v3518_v56, 0.0  ;;  %v17619_v52 = vld [vmem:[#allocation125_spill] sm:$0xff] }
 0x314   : > { %v3998_v61 = vmax.f32 %v3379_v21, 0.0  ;;  %5179 = vmatmul.mubr.bf16.vlgmr.msra.gmra.mrb[76].mxu0 %v14228_v10  ;;  %v4000_v15 = vmax.f32 %v3520_v0, 0.0  ;;  %5272 = vmatmul.mubr.bf16.vlgmr.msra.gmra.mrb[76].mxu1 %v14228_v10  ;;  %v17580_v21 = vld [vmem:[#allocation106_spill] sm:$0xff] }
 0x315   : > { %5333 = vmatpush1.bf16.msra.mxu0 %v17576_v62  ;;  %v3999_v37 = vmax.f32 %v3381_v42, 0.0  ;;  %5426 = vmatpush1.bf16.msra.mxu1 %v17577_v59  ;;  %v4001_v12 = vmax.f32 %v3522_v49, 0.0  ;;  %v17584_v62 = vld [vmem:[#allocation9_spill] sm:$0xff] }
 0x316   : > { %5334 = vmatprep.subr.bf16.mxu0 %v17578_v4  ;;  %v14470_v18 = vpack.c.bf16 %v3998_v61, %v3970_v13  ;;  %5427 = vmatprep.subr.bf16.mxu1 %v17580_v21  ;;  %v14477_v0 = vpack.c.bf16 %v4000_v15, %v3972_v22  ;;  %v17585_v15 = vld [vmem:[#allocation60_spill] sm:$0xff] }
 0x317   : > { %v3384_v24 = vpop.f32.mrb[228].mxu0  ;;  %10380 = vmatprep.mubr.msk.bf16.mxu0 %vm4856_vm2, %v14241_v34  ;;  %v14475_v36 = vpack.c.bf16 %v3999_v37, %v3971_v47  ;;  %v3525_v42 = vpop.f32.mrb[228].mxu1  ;;  %10387 = vmatprep.mubr.msk.bf16.mxu1 %vm4856_vm2, %v14241_v34  ;;  %v14482_v56 = vpack.c.bf16 %v4001_v12, %v3973_v17  ;;  %v17586_v21 = vld [vmem:[#allocation108_spill] sm:$0xff]  ;;  %v17587_v17 = vld [vmem:[#allocation109_spill] sm:$0xff] }
 0x318   : > { %17579 = vst [vmem:[#allocation78_spill] sm:$0xff] %v14470_v18  ;;  %17582 = vst [vmem:[#allocation76_spill] sm:$0xff] %v14477_v0  ;;  %v3385_v30 = vadd.f32 %v3384_v24, %v12564_v11  ;;  %v3386_v59 = vpop.f32.mrb[229].mxu0  ;;  %v3526_v13 = vadd.f32 %v3525_v42, %v12564_v11  ;;  %v3527_v49 = vpop.f32.mrb[229].mxu1 }
 0x319   : > { %17581 = vst [vmem:[#allocation79_spill] sm:$0xff] %v14475_v36  ;;  %17583 = vst [vmem:[#allocation77_spill] sm:$0xff] %v14482_v56  ;;  %v3387_v61 = vadd.f32 %v3386_v59, %v12564_v11  ;;  %5335 = vmatpush1.bf16.msra.mxu0 %v17584_v62  ;;  %v3388_v47 = vpop.f32.mrb[230].mxu0  ;;  %v3528_v22 = vadd.f32 %v3527_v49, %v12564_v11  ;;  %5428 = vmatpush1.bf16.msra.mxu1 %v17585_v15  ;;  %v3529_v4 = vpop.f32.mrb[230].mxu1 }
 0x31a   : > { %v3389_v37 = vadd.f32 %v3388_v47, %v12574_v14  ;;  %5336 = vmatprep.subr.bf16.mxu0 %v17586_v21  ;;  %v3390_v24 = vpop.f32.mrb[231].mxu0  ;;  %v3530_v12 = vadd.f32 %v3529_v4, %v12574_v14  ;;  %5429 = vmatprep.subr.bf16.mxu1 %v17587_v17  ;;  %v3531_v59 = vpop.f32.mrb[231].mxu1  ;;  %v4026_v0 = vmax.f32 %v3385_v30, 0.0  ;;  %v4028_v49 = vmax.f32 %v3526_v13, 0.0  ;;  %v17588_v47 = vld [vmem:[#allocation65_spill] sm:$0xff]  ;;  %v17589_v4 = vld [vmem:[#allocation107_spill] sm:$0xff] }
 0x31b   : > { %v3391_v42 = vadd.f32 %v3390_v24, %v12574_v14  ;;  %v3532_v18 = vadd.f32 %v3531_v59, %v12574_v14  ;;  %v4027_v21 = vmax.f32 %v3387_v61, 0.0  ;;  %v17590_v17 = vld [vmem:[#allocation110_spill] sm:$0xff]  ;;  %v4029_v24 = vmax.f32 %v3528_v22, 0.0 }
 0x31c   : > { %v4054_v62 = vmax.f32 %v3389_v37, 0.0  ;;  %5189 = vmatmul.mubr.bf16.gmra.mrb[80].mxu0 %v14264_v27  ;;  %v4056_v15 = vmax.f32 %v3530_v12, 0.0  ;;  %5282 = vmatmul.mubr.bf16.gmra.mrb[80].mxu1 %v14264_v27  ;;  %v17592_v37 = vld [vmem:[#allocation111_spill] sm:$0xff] }
 0x31d   : > { %5337 = vmatpush1.bf16.msra.mxu0 %v17588_v47  ;;  %v4055_v56 = vmax.f32 %v3391_v42, 0.0  ;;  %5430 = vmatpush1.bf16.msra.mxu1 %v17589_v4  ;;  %v4057_v36 = vmax.f32 %v3532_v18, 0.0  ;;  %v17596_v4 = vld [vmem:[#allocation18_spill] sm:$0xff] }
 0x31e   : > { %5338 = vmatprep.subr.bf16.mxu0 %v17590_v17  ;;  %v14500_v30 = vpack.c.bf16 %v4054_v62, %v4026_v0  ;;  %5431 = vmatprep.subr.bf16.mxu1 %v17592_v37  ;;  %v14507_v12 = vpack.c.bf16 %v4056_v15, %v4028_v49  ;;  %v17597_v15 = vld [vmem:[#allocation70_spill] sm:$0xff]  ;;  %v17598_v37 = vld [vmem:[#allocation112_spill] sm:$0xff] }
 0x31f   : > { %v3394_v59 = vpop.f32.mrb[232].mxu0  ;;  %10381 = vmatprep.mubr.msk.bf16.mxu0 %vm4856_vm2, %v14281_v46  ;;  %v14505_v13 = vpack.c.bf16 %v4055_v56, %v4027_v21  ;;  %v3535_v42 = vpop.f32.mrb[232].mxu1  ;;  %10388 = vmatprep.mubr.msk.bf16.mxu1 %vm4856_vm2, %v14281_v46  ;;  %v14512_v18 = vpack.c.bf16 %v4057_v36, %v4029_v24  ;;  %v17599_v24 = vld [vmem:[#allocation113_spill] sm:$0xff] }
 0x320   : > { %17591 = vst [vmem:[#allocation82_spill] sm:$0xff] %v14500_v30  ;;  %17594 = vst [vmem:[#allocation80_spill] sm:$0xff] %v14507_v12  ;;  %v3395_v61 = vadd.f32 %v3394_v59, %v12602_v7  ;;  %v3396_v47 = vpop.f32.mrb[233].mxu0  ;;  %v3536_v0 = vadd.f32 %v3535_v42, %v12602_v7  ;;  %v3537_v62 = vpop.f32.mrb[233].mxu1 }
 0x321   : > { %17593 = vst [vmem:[#allocation83_spill] sm:$0xff] %v14505_v13  ;;  %17595 = vst [vmem:[#allocation81_spill] sm:$0xff] %v14512_v18  ;;  %v3397_v22 = vadd.f32 %v3396_v47, %v12602_v7  ;;  %5339 = vmatpush1.bf16.msra.mxu0 %v17596_v4  ;;  %v3398_v56 = vpop.f32.mrb[234].mxu0  ;;  %v3538_v49 = vadd.f32 %v3537_v62, %v12602_v7  ;;  %5432 = vmatpush1.bf16.msra.mxu1 %v17597_v15  ;;  %v3539_v17 = vpop.f32.mrb[234].mxu1 }
 0x322   : > { %v3399_v21 = vadd.f32 %v3398_v56, %v17371_v20  ;;  %5340 = vmatprep.subr.bf16.mxu0 %v17598_v37  ;;  %v3400_v59 = vpop.f32.mrb[235].mxu0  ;;  %v3540_v36 = vadd.f32 %v3539_v17, %v17371_v20  ;;  %5433 = vmatprep.subr.bf16.mxu1 %v17599_v24  ;;  %v3541_v47 = vpop.f32.mrb[235].mxu1  ;;  %v4082_v12 = vmax.f32 %v3395_v61, 0.0  ;;  %v4084_v62 = vmax.f32 %v3536_v0, 0.0  ;;  %v17600_v56 = vld [vmem:[#allocation75_spill] sm:$0xff]  ;;  %v17601_v17 = vld [vmem:[#allocation6_spill] sm:$0xff] }
 0x323   : > { %v3401_v42 = vadd.f32 %v3400_v59, %v17371_v20  ;;  %v3542_v30 = vadd.f32 %v3541_v47, %v17371_v20  ;;  %v4083_v37 = vmax.f32 %v3397_v22, 0.0  ;;  %v17602_v24 = vld [vmem:[#allocation116_spill] sm:$0xff]  ;;  %v4085_v59 = vmax.f32 %v3538_v49, 0.0 }
 0x324   : > { %v4110_v4 = vmax.f32 %v3399_v21, 0.0  ;;  %5199 = vmatmul.mubr.bf16.gmra.mrb[84].mxu0 %v14304_v16  ;;  %v4112_v15 = vmax.f32 %v3540_v36, 0.0  ;;  %5292 = vmatmul.mubr.bf16.gmra.mrb[84].mxu1 %v14304_v16  ;;  %v17604_v21 = vld [vmem:[#allocation117_spill] sm:$0xff] }
 0x325   : > { %5341 = vmatpush1.bf16.msra.mxu0 %v17600_v56  ;;  %v4111_v18 = vmax.f32 %v3401_v42, 0.0  ;;  %5434 = vmatpush1.bf16.msra.mxu1 %v17601_v17  ;;  %v4113_v13 = vmax.f32 %v3542_v30, 0.0  ;;  %v17608_v17 = vld [vmem:[#allocation114_spill] sm:$0xff] }
 0x326   : > { %5342 = vmatprep.subr.bf16.mxu0 %v17602_v24  ;;  %v14530_v61 = vpack.c.bf16 %v4110_v4, %v4082_v12  ;;  %5435 = vmatprep.subr.bf16.mxu1 %v17604_v21  ;;  %v14537_v36 = vpack.c.bf16 %v4112_v15, %v4084_v62  ;;  %v17609_v15 = vld [vmem:[#allocation115_spill] sm:$0xff]  ;;  %v17610_v21 = vld [vmem:[#allocation120_spill] sm:$0xff] }
 0x327   : > { %v3404_v47 = vpop.f32.mrb[236].mxu0  ;;  %10382 = vmatprep.mubr.msk.bf16.mxu0 %vm4856_vm2, %v14321_v55  ;;  %v14535_v0 = vpack.c.bf16 %v4111_v18, %v4083_v37  ;;  %v3545_v42 = vpop.f32.mrb[236].mxu1  ;;  %10389 = vmatprep.mubr.msk.bf16.mxu1 %vm4856_vm2, %v14321_v55  ;;  %v14542_v30 = vpack.c.bf16 %v4113_v13, %v4085_v59  ;;  %v17611_v59 = vld [vmem:[#allocation121_spill] sm:$0xff] }
 0x328   : > { %17603 = vst [vmem:[#allocation86_spill] sm:$0xff] %v14530_v61  ;;  %17606 = vst [vmem:[#allocation85_spill] sm:$0xff] %v14537_v36  ;;  %v3405_v22 = vadd.f32 %v3404_v47, %v12640_v63  ;;  %v3406_v56 = vpop.f32.mrb[237].mxu0  ;;  %v3546_v12 = vadd.f32 %v3545_v42, %v12640_v63  ;;  %v3547_v4 = vpop.f32.mrb[237].mxu1 }
 0x329   : > { %17605 = vst [vmem:[#allocation84_spill] sm:$0xff] %v14535_v0  ;;  %17607 = vst [vmem:[#allocation89_spill] sm:$0xff] %v14542_v30  ;;  %v3407_v49 = vadd.f32 %v3406_v56, %v12640_v63  ;;  %5343 = vmatpush1.bf16.msra.mxu0 %v17608_v17  ;;  %v3408_v18 = vpop.f32.mrb[238].mxu0  ;;  %v3548_v62 = vadd.f32 %v3547_v4, %v12640_v63  ;;  %5436 = vmatpush1.bf16.msra.mxu1 %v17609_v15  ;;  %v3549_v24 = vpop.f32.mrb[238].mxu1  ;;  %v17612_v17 = vld [vmem:[#allocation132_spill] sm:$0xff] }
 0x32a   : > { %v3409_v37 = vadd.f32 %v3408_v18, %v12650_v38  ;;  %5344 = vmatprep.subr.bf16.mxu0 %v17610_v21  ;;  %v3410_v47 = vpop.f32.mrb[239].mxu0  ;;  %v3550_v13 = vadd.f32 %v3549_v24, %v12650_v38  ;;  %5437 = vmatprep.subr.bf16.mxu1 %v17611_v59  ;;  %v3551_v56 = vpop.f32.mrb[239].mxu1  ;;  %v14556_v36 = vadd.f32 %v17612_v17, %v14030_v44  ;;  %v4138_v4 = vmax.f32 %v3405_v22, 0.0  ;;  %v17613_v24 = vld [vmem:[#allocation118_spill] sm:$0xff]  ;;  %v17616_v17 = vld [vmem:[#allocation124_spill] sm:$0xff] }
 0x32b   : > { %v3411_v42 = vadd.f32 %v3410_v47, %v12650_v38  ;;  %v3552_v15 = vadd.f32 %v3551_v56, %v12650_v38  ;;  %v4140_v18 = vmax.f32 %v3546_v12, 0.0  ;;  %v4139_v59 = vmax.f32 %v3407_v49, 0.0  ;;  %v17614_v47 = vld [vmem:[#allocation134_spill] sm:$0xff]  ;;  %v17618_v12 = vld [vmem:[#allocation135_spill] sm:$0xff] }
 0x32c   : > { %v4166_v61 = vmax.f32 %v3409_v37, 0.0  ;;  %5209 = vmatmul.mubr.bf16.gmra.mrb[88].mxu0 %v14344_v40  ;;  %v4168_v21 = vmax.f32 %v3550_v13, 0.0  ;;  %5302 = vmatmul.mubr.bf16.gmra.mrb[88].mxu1 %v14344_v40  ;;  %v2621_v0 = vadd.f32 %v17614_v47, %v14030_v44  ;;  %v4141_v22 = vmax.f32 %v3548_v62, 0.0 }
 0x32d   : > { %5345 = vmatpush1.bf16.msra.mxu0 %v17613_v24  ;;  %v4167_v30 = vmax.f32 %v3411_v42, 0.0  ;;  %5438 = vmatpush1.bf16.msra.mxu1 %v17615_v8  ;;  %v4169_v37 = vmax.f32 %v3552_v15, 0.0  ;;  %v2760_v13 = vadd.f32 %v17618_v12, %v14030_v44  ;;  %v17622_v8 = vld [vmem:[#allocation137_spill] sm:$0xff] }
 0x32e   : > { %5346 = vmatprep.subr.bf16.mxu0 %v17616_v17  ;;  %v14566_v56 = vpack.c.bf16 %v4166_v61, %v4138_v4  ;;  %5439 = vmatprep.subr.bf16.mxu1 %v17619_v52  ;;  %v14575_v42 = vpack.c.bf16 %v4168_v21, %v4140_v18  ;;  %v2762_v24 = vadd.f32 %v17622_v8, %v14030_v44  ;;  %v4462_v21 = vmax.f32 %v14556_v36, 0.0 }
 0x32f   : > { %v3414_v38 = vpop.f32.mrb[240].mxu0  ;;  %10383 = vmatprep.mubr.msk.bf16.mxu0 %vm4856_vm2, %v14361_v1  ;;  %v14573_v49 = vpack.c.bf16 %v4167_v30, %v4139_v59  ;;  %v3555_v61 = vpop.f32.mrb[240].mxu1  ;;  %10390 = vmatprep.mubr.msk.bf16.mxu1 %vm4856_vm2, %v14361_v1  ;;  %v14582_v15 = vpack.c.bf16 %v4169_v37, %v4141_v22  ;;  %v17624_v59 = vld [vmem:[#allocation122_spill] sm:$0xff]  ;;  %v4463_v37 = vmax.f32 %v2621_v0, 0.0 }
 0x330   : > { %17617 = vst [vmem:[#allocation97_spill] sm:$0xff] %v14566_v56  ;;  %17621 = vst [vmem:[#allocation100_spill] sm:$0xff] %v14575_v42  ;;  %v3415_v62 = vadd.f32 %v3414_v38, %v12678_v5  ;;  %v3416_v4 = vpop.f32.mrb[241].mxu0  ;;  %v3556_v52 = vadd.f32 %v3555_v61, %v12678_v5  ;;  %v3557_v30 = vpop.f32.mrb[241].mxu1  ;;  %v17625_v38 = vld [vmem:[#allocation123_spill] sm:$0xff]  ;;  %v17626_v42 = vld [vmem:[#allocation128_spill] sm:$0xff] }
 0x331   : > { %17620 = vst [vmem:[#allocation98_spill] sm:$0xff] %v14573_v49  ;;  %17623 = vst [vmem:[#allocation87_spill] sm:$0xff] %v14582_v15  ;;  %v3417_v47 = vadd.f32 %v3416_v4, %v12678_v5  ;;  %5347 = vmatpush1.bf16.msra.mxu0 %v17624_v59  ;;  %v3418_v18 = vpop.f32.mrb[242].mxu0  ;;  %v3558_v17 = vadd.f32 %v3557_v30, %v12678_v5  ;;  %5440 = vmatpush1.bf16.msra.mxu1 %v17625_v38  ;;  %v3559_v8 = vpop.f32.mrb[242].mxu1  ;;  %v4464_v61 = vmax.f32 %v2760_v13, 0.0  ;;  %v17627_v56 = vld [vmem:[#allocation129_spill] sm:$0xff] }
 0x332   : > { %v3419_v12 = vadd.f32 %v3418_v18, %v12688_v45  ;;  %5348 = vmatprep.subr.bf16.mxu0 %v17626_v42  ;;  %v3420_v22 = vpop.f32.mrb[243].mxu0  ;;  %v3560_v4 = vadd.f32 %v3559_v8, %v12688_v45  ;;  %5441 = vmatprep.subr.bf16.mxu1 %v17627_v56  ;;  %v3561_v15 = vpop.f32.mrb[243].mxu1  ;;  %v4465_v36 = vmax.f32 %v2762_v24, 0.0  ;;  %v4194_v49 = vmax.f32 %v3415_v62, 0.0  ;;  %v17628_v0 = vld [vmem:[#allocation126_spill] sm:$0xff]  ;;  %v17629_v8 = vld [vmem:[#allocation127_spill] sm:$0xff] }
 0x333   : > { %v3421_v59 = vadd.f32 %v3420_v22, %v12688_v45  ;;  %v3562_v38 = vadd.f32 %v3561_v15, %v12688_v45  ;;  %v4196_v18 = vmax.f32 %v3556_v52, 0.0  ;;  %v4195_v13 = vmax.f32 %v3417_v47, 0.0  ;;  %v17630_v56 = vld [vmem:[#allocation133_spill] sm:$0xff]  ;;  %v17631_v15 = vld [vmem:[#allocation136_spill] sm:$0xff] }
 0x334   : > { %v4222_v30 = vmax.f32 %v3419_v12, 0.0  ;;  %5219 = vmatmul.mubr.bf16.gmra.mrb[92].mxu0 %v14395_v31  ;;  %v4224_v5 = vmax.f32 %v3560_v4, 0.0  ;;  %5312 = vmatmul.mubr.bf16.gmra.mrb[92].mxu1 %v14395_v31  ;;  %v4197_v22 = vmax.f32 %v3558_v17, 0.0  ;;  %v4782_v12 = vpack.c.bf16 %v4462_v21, %v4462_v21 }
 0x335   : > { %5349 = vmatpush1.bf16.msra.mxu0 %v17628_v0  ;;  %v4223_v42 = vmax.f32 %v3421_v59, 0.0  ;;  %5442 = vmatpush1.bf16.msra.mxu1 %v17629_v8  ;;  %v4225_v24 = vmax.f32 %v3562_v38, 0.0  ;;  %v4783_v47 = vpack.c.bf16 %v4463_v37, %v4463_v37  ;;  %v4784_v59 = vpack.c.bf16 %v4464_v61, %v4464_v61  ;;  %v17633_v61 = vld [vmem:[#allocation131_spill] sm:$0xff] }
 0x336   : > { %5350 = vmatprep.subr.bf16.mxu0 %v17630_v56  ;;  %v14601_v62 = vpack.c.bf16 %v4222_v30, %v4194_v49  ;;  %5443 = vmatprep.subr.bf16.mxu1 %v17631_v15  ;;  %v14608_v4 = vpack.c.bf16 %v4224_v5, %v4196_v18  ;;  %v4785_v21 = vpack.c.bf16 %v4465_v36, %v4465_v36  ;;  %v4901_v15 = vsel %vm4875_vm1, %v4782_v12, 0 }
 0x337   : > { %v3424_v45 = vpop.f32.mrb[244].mxu0  ;;  %10384 = vmatprep.mubr.msk.bf16.mxu0 %vm4856_vm2, %v14410_v28  ;;  %v14606_v52 = vpack.c.bf16 %v4223_v42, %v4195_v13  ;;  %v3565_v8 = vpop.f32.mrb[244].mxu1  ;;  %10391 = vmatprep.mubr.msk.bf16.mxu1 %vm4856_vm2, %v14410_v28  ;;  %v14613_v49 = vpack.c.bf16 %v4225_v24, %v4197_v22  ;;  %v17632_v42 = vld [vmem:[#allocation130_spill] sm:$0xff] }
 0x338   : > { %v3425_v0 = vadd.f32 %v3424_v45, %v12716_v57  ;;  %v3426_v17 = vpop.f32.mrb[245].mxu0  ;;  %v3566_v30 = vadd.f32 %v3565_v8, %v12716_v57  ;;  %v3567_v13 = vpop.f32.mrb[245].mxu1 }
 0x339   : > { %v3427_v38 = vadd.f32 %v3426_v17, %v12716_v57  ;;  %5351 = vmatpush1.bf16.msra.mxu0 %v17632_v42  ;;  %v3428_v5 = vpop.f32.mrb[246].mxu0  ;;  %v3568_v37 = vadd.f32 %v3567_v13, %v12716_v57  ;;  %5444 = vmatpush1.bf16.msra.mxu1 %v17633_v61  ;;  %v3569_v18 = vpop.f32.mrb[246].mxu1  ;;  %v4907_v42 = vsel %vm4875_vm1, %v4784_v59, 0  ;;  %v14637_v59 = vld [vmem:[%s17175_s3 + $0x4] ss:$8 sps:$4 sm:$0xff]  }
 0x33a   : > { %v3429_v45 = vadd.f32 %v3428_v5, %v12726_v6  ;;  %10392 = vmatprep.subr.msk.bf16.mxu0 %vm4875_vm1, %v4783_v47  ;;  %v3430_v56 = vpop.f32.mrb[247].mxu0  ;;  %v3570_v36 = vadd.f32 %v3569_v18, %v12726_v6  ;;  %10399 = vmatprep.subr.msk.bf16.mxu1 %vm4875_vm1, %v4785_v21  ;;  %v3571_v24 = vpop.f32.mrb[247].mxu1  ;;  %v4250_v8 = vmax.f32 %v3425_v0, 0.0  ;;  %v4252_v5 = vmax.f32 %v3566_v30, 0.0  ;;  %v17634_v18 = vld [vmem:[#allocation138_spill] sm:$0xff] }
 0x33b   : > { %v3431_v22 = vadd.f32 %v3430_v56, %v12726_v6  ;;  %v3572_v13 = vadd.f32 %v3571_v24, %v12726_v6  ;;  %v4251_v61 = vmax.f32 %v3427_v38, 0.0  ;;  %v4253_v56 = vmax.f32 %v3568_v37, 0.0 }
 0x33c   : > { %v4278_v17 = vmax.f32 %v3429_v45, 0.0  ;;  %5229 = vmatmul.mubr.bf16.gmra.mrb[96].mxu0 %v14426_v33  ;;  %v4280_v47 = vmax.f32 %v3570_v36, 0.0  ;;  %5322 = vmatmul.mubr.bf16.gmra.mrb[96].mxu1 %v14426_v33  ;;  %v17636_v45 = vld [vmem:[#allocation139_spill] sm:$0xff] }
 0x33d   : > { %5353 = vmatpush1.bf16.msra.mxu0 %v4901_v15  ;;  %v4279_v21 = vmax.f32 %v3431_v22, 0.0  ;;  %5446 = vmatpush1.bf16.msra.mxu1 %v4907_v42  ;;  %v4281_v12 = vmax.f32 %v3572_v13, 0.0 }
 0x33e   : > { %5518 = vmatprep.subr.bf16.mxu0 %v17634_v18  ;;  %v14631_v0 = vpack.c.bf16 %v4278_v17, %v4250_v8  ;;  %5611 = vmatprep.subr.bf16.mxu1 %v17636_v45  ;;  %v14643_v38 = vpack.c.bf16 %v4280_v47, %v4252_v5 }
 0x33f   : > { %v3434_v24 = vpop.f32.mrb[248].mxu0  ;;  %10393 = vmatprep.mubr.msk.bf16.mxu0 %vm4856_vm2, %v14637_v59  ;;  %v14641_v30 = vpack.c.bf16 %v4279_v21, %v4251_v61  ;;  %v3575_v36 = vpop.f32.mrb[248].mxu1  ;;  %10400 = vmatprep.mubr.msk.bf16.mxu1 %vm4856_vm2, %v14637_v59  ;;  %v14648_v15 = vpack.c.bf16 %v4281_v12, %v4253_v56 }
 0x340   : > { %17635 = vst [vmem:[#allocation88_spill] sm:$0xff] %v14631_v0  ;;  %17638 = vst [vmem:[#allocation93_spill] sm:$0xff] %v14643_v38  ;;  %v3435_v37 = vadd.f32 %v3434_v24, %v12755_v50  ;;  %v3436_v22 = vpop.f32.mrb[249].mxu0  ;;  %v3576_v8 = vadd.f32 %v3575_v36, %v12755_v50  ;;  %v3577_v13 = vpop.f32.mrb[249].mxu1 }
 0x341   : > { %17637 = vst [vmem:[#allocation92_spill] sm:$0xff] %v14641_v30  ;;  %17639 = vst [vmem:[#allocation90_spill] sm:$0xff] %v14648_v15  ;;  %v3437_v17 = vadd.f32 %v3436_v22, %v12755_v50  ;;  %v3438_v42 = vpop.f32.mrb[250].mxu0  ;;  %v3578_v61 = vadd.f32 %v3577_v13, %v12755_v50  ;;  %v3579_v47 = vpop.f32.mrb[250].mxu1  ;;  %v17640_v13 = vld [vmem:[#allocation10_spill] sm:$0xff]  ;;  %v17641_v15 = vld [vmem:[#allocation11_spill] sm:$0xff] }
 0x342   : > { %v3439_v5 = vadd.f32 %v3438_v42, %v12777_v53  ;;  %v3440_v21 = vpop.f32.mrb[251].mxu0  ;;  %v3580_v18 = vadd.f32 %v3579_v47, %v12777_v53  ;;  %v3581_v24 = vpop.f32.mrb[251].mxu1  ;;  %v4306_v38 = vmax.f32 %v3435_v37, 0.0  ;;  %v4308_v36 = vmax.f32 %v3576_v8, 0.0  ;;  %v17642_v47 = vld [vmem:[#allocation142_spill] sm:$0xff] }
 0x343   : > { %v3441_v45 = vadd.f32 %v3440_v21, %v12777_v53  ;;  %v3582_v12 = vadd.f32 %v3581_v24, %v12777_v53  ;;  %v4307_v42 = vmax.f32 %v3437_v17, 0.0  ;;  %v4309_v21 = vmax.f32 %v3578_v61, 0.0  ;;  %v14675_v61 = vld [vmem:[%s17175_s3 + $0x14] ss:$8 sps:$4 sm:$0xff]  }
 0x344   : > { %v4334_v56 = vmax.f32 %v3439_v5, 0.0  ;;  %5365 = vmatmul.mubr.bf16.vlgmr.msra.gmra.mrb[100].mxu0 %v14228_v10  ;;  %v4336_v22 = vmax.f32 %v3580_v18, 0.0  ;;  %5458 = vmatmul.mubr.bf16.vlgmr.msra.gmra.mrb[100].mxu1 %v14228_v10  ;;  %v17644_v5 = vld [vmem:[#allocation143_spill] sm:$0xff] }
 0x345   : > { %5519 = vmatpush1.bf16.msra.mxu0 %v17640_v13  ;;  %v4335_v0 = vmax.f32 %v3441_v45, 0.0  ;;  %5612 = vmatpush1.bf16.msra.mxu1 %v17641_v15  ;;  %v4337_v30 = vmax.f32 %v3582_v12, 0.0 }
 0x346   : > { %5520 = vmatprep.subr.bf16.mxu0 %v17642_v47  ;;  %v14662_v37 = vpack.c.bf16 %v4334_v56, %v4306_v38  ;;  %5613 = vmatprep.subr.bf16.mxu1 %v17644_v5  ;;  %v14669_v10 = vpack.c.bf16 %v4336_v22, %v4308_v36  ;;  %v17647_v56 = vld [vmem:[#allocation140_spill] sm:$0xff]  ;;  %v17648_v22 = vld [vmem:[#allocation141_spill] sm:$0xff]  ;;  %v17649_v47 = vld [vmem:[#allocation146_spill] sm:$0xff] }
 0x347   : > { %v3444_v24 = vpop.f32.mrb[252].mxu0  ;;  %10394 = vmatprep.mubr.msk.bf16.mxu0 %vm4856_vm2, %v14241_v34  ;;  %v14667_v8 = vpack.c.bf16 %v4335_v0, %v4307_v42  ;;  %v3585_v18 = vpop.f32.mrb[252].mxu1  ;;  %10401 = vmatprep.mubr.msk.bf16.mxu1 %vm4856_vm2, %v14675_v61  ;;  %v14679_v38 = vpack.c.bf16 %v4337_v30, %v4309_v21  ;;  %v17650_v21 = vld [vmem:[#allocation147_spill] sm:$0xff] }
 0x348   : > { %17643 = vst [vmem:[#allocation91_spill] sm:$0xff] %v14662_v37  ;;  %17645 = vst [vmem:[#allocation96_spill] sm:$0xff] %v14669_v10  ;;  %v3445_v17 = vadd.f32 %v3444_v24, %v12814_v43  ;;  %v3446_v15 = vpop.f32.mrb[253].mxu0  ;;  %v3586_v34 = vadd.f32 %v3585_v18, %v12814_v43  ;;  %v3587_v45 = vpop.f32.mrb[253].mxu1 }
 0x349   : > { %17646 = vst [vmem:[#allocation99_spill] sm:$0xff] %v14679_v38  ;;  %v3447_v0 = vadd.f32 %v3446_v15, %v12814_v43  ;;  %5521 = vmatpush1.bf16.msra.mxu0 %v17647_v56  ;;  %v3448_v12 = vpop.f32.mrb[254].mxu0  ;;  %v3588_v36 = vadd.f32 %v3587_v45, %v12814_v43  ;;  %5614 = vmatpush1.bf16.msra.mxu1 %v17648_v22  ;;  %v3589_v42 = vpop.f32.mrb[254].mxu1 }
 0x34a   : > { %v3449_v13 = vadd.f32 %v3448_v12, %v12837_v54  ;;  %5522 = vmatprep.subr.bf16.mxu0 %v17649_v47  ;;  %v3450_v5 = vpop.f32.mrb[255].mxu0  ;;  %v3590_v30 = vadd.f32 %v3589_v42, %v12837_v54  ;;  %5615 = vmatprep.subr.bf16.mxu1 %v17650_v21  ;;  %v3591_v18 = vpop.f32.mrb[255].mxu1  ;;  %v4362_v15 = vmax.f32 %v3445_v17, 0.0  ;;  %v4364_v45 = vmax.f32 %v3586_v34, 0.0  ;;  %v17651_v12 = vld [vmem:[#allocation144_spill] sm:$0xff]  ;;  %v17652_v42 = vld [vmem:[#allocation145_spill] sm:$0xff] }
 0x34b   : > { %v3451_v24 = vadd.f32 %v3450_v5, %v12837_v54  ;;  %v3592_v10 = vadd.f32 %v3591_v18, %v12837_v54  ;;  %v4363_v47 = vmax.f32 %v3447_v0, 0.0  ;;  %v17653_v21 = vld [vmem:[#allocation150_spill] sm:$0xff]  ;;  %v4365_v5 = vmax.f32 %v3588_v36, 0.0 }
 0x34c   : > { %v4390_v56 = vmax.f32 %v3449_v13, 0.0  ;;  %5375 = vmatmul.mubr.bf16.gmra.mrb[104].mxu0 %v14264_v27  ;;  %v4392_v22 = vmax.f32 %v3590_v30, 0.0  ;;  %5468 = vmatmul.mubr.bf16.gmra.mrb[104].mxu1 %v14264_v27  ;;  %v17655_v13 = vld [vmem:[#allocation151_spill] sm:$0xff] }
 0x34d   : > { %5523 = vmatpush1.bf16.msra.mxu0 %v17651_v12  ;;  %v4391_v37 = vmax.f32 %v3451_v24, 0.0  ;;  %5616 = vmatpush1.bf16.msra.mxu1 %v17652_v42  ;;  %v4393_v38 = vmax.f32 %v3592_v10, 0.0  ;;  %v17657_v12 = vld [vmem:[#allocation148_spill] sm:$0xff] }
 0x34e   : > { %5524 = vmatprep.subr.bf16.mxu0 %v17653_v21  ;;  %v14697_v17 = vpack.c.bf16 %v4390_v56, %v4362_v15  ;;  %5617 = vmatprep.subr.bf16.mxu1 %v17655_v13  ;;  %v14704_v27 = vpack.c.bf16 %v4392_v22, %v4364_v45  ;;  %v17658_v22 = vld [vmem:[#allocation149_spill] sm:$0xff]  ;;  %v17659_v21 = vld [vmem:[#allocation154_spill] sm:$0xff] }
 0x34f   : > { %v3454_v18 = vpop.f32.mrb[0].mxu0  ;;  %10395 = vmatprep.mubr.msk.bf16.mxu0 %vm4856_vm2, %v14281_v46  ;;  %v14702_v34 = vpack.c.bf16 %v4391_v37, %v4363_v47  ;;  %v3595_v30 = vpop.f32.mrb[0].mxu1  ;;  %10402 = vmatprep.mubr.msk.bf16.mxu1 %vm4856_vm2, %v14281_v46  ;;  %v14709_v10 = vpack.c.bf16 %v4393_v38, %v4365_v5  ;;  %v17660_v5 = vld [vmem:[#allocation155_spill] sm:$0xff] }
 0x350   : > { %17654 = vst [vmem:[#allocation94_spill] sm:$0xff] %v14697_v17  ;;  %17656 = vst [vmem:[#allocation95_spill] sm:$0xff] %v14704_v27  ;;  %v3455_v0 = vadd.f32 %v3454_v18, %v12876_v25  ;;  %v3456_v24 = vpop.f32.mrb[1].mxu0  ;;  %v3596_v36 = vadd.f32 %v3595_v30, %v12876_v25  ;;  %v3597_v56 = vpop.f32.mrb[1].mxu1 }
 0x351   : > { %v3457_v15 = vadd.f32 %v3456_v24, %v12876_v25  ;;  %5525 = vmatpush1.bf16.msra.mxu0 %v17657_v12  ;;  %v3458_v37 = vpop.f32.mrb[2].mxu0  ;;  %v3598_v45 = vadd.f32 %v3597_v56, %v12876_v25  ;;  %5618 = vmatpush1.bf16.msra.mxu1 %v17658_v22  ;;  %v3599_v42 = vpop.f32.mrb[2].mxu1 }
 0x352   : > { %v3459_v47 = vadd.f32 %v3458_v37, %v12899_v58  ;;  %5526 = vmatprep.subr.bf16.mxu0 %v17659_v21  ;;  %v3460_v46 = vpop.f32.mrb[3].mxu0  ;;  %v3600_v38 = vadd.f32 %v3599_v42, %v12899_v58  ;;  %5619 = vmatprep.subr.bf16.mxu1 %v17660_v5  ;;  %v3601_v18 = vpop.f32.mrb[3].mxu1  ;;  %v4418_v30 = vmax.f32 %v3455_v0, 0.0  ;;  %v4420_v56 = vmax.f32 %v3596_v36, 0.0  ;;  %v17661_v37 = vld [vmem:[#allocation152_spill] sm:$0xff]  ;;  %v17662_v42 = vld [vmem:[#allocation153_spill] sm:$0xff] }
 0x353   : > { %v3461_v13 = vadd.f32 %v3460_v46, %v12899_v58  ;;  %v3602_v12 = vadd.f32 %v3601_v18, %v12899_v58  ;;  %v4419_v21 = vmax.f32 %v3457_v15, 0.0  ;;  %v17663_v5 = vld [vmem:[#allocation158_spill] sm:$0xff]  ;;  %v4421_v46 = vmax.f32 %v3598_v45, 0.0 }
 0x354   : > { %v4446_v24 = vmax.f32 %v3459_v47, 0.0  ;;  %5385 = vmatmul.mubr.bf16.gmra.mrb[108].mxu0 %v14304_v16  ;;  %v4448_v22 = vmax.f32 %v3600_v38, 0.0  ;;  %5478 = vmatmul.mubr.bf16.gmra.mrb[108].mxu1 %v14304_v16  ;;  %v17664_v47 = vld [vmem:[#allocation159_spill] sm:$0xff] }
 0x355   : > { %5527 = vmatpush1.bf16.msra.mxu0 %v17661_v37  ;;  %v4447_v27 = vmax.f32 %v3461_v13, 0.0  ;;  %5620 = vmatpush1.bf16.msra.mxu1 %v17662_v42  ;;  %v4449_v17 = vmax.f32 %v3602_v12, 0.0  ;;  %v17666_v12 = vld [vmem:[#allocation157_spill] sm:$0xff]  ;;  %v17668_v37 = vld [vmem:[#allocation8_spill] sm:$0xff] }
 0x356   : > { %5528 = vmatprep.subr.bf16.mxu0 %v17663_v5  ;;  %v14727_v0 = vpack.c.bf16 %v4446_v24, %v4418_v30  ;;  %5621 = vmatprep.subr.bf16.mxu1 %v17664_v47  ;;  %v14736_v36 = vpack.c.bf16 %v4448_v22, %v4420_v56  ;;  %v17665_v30 = vld [vmem:[#allocation156_spill] sm:$0xff] }
 0x357   : > { %v14730_v18 = vpop.f32.mrb[4].mxu0  ;;  %10396 = vmatprep.mubr.msk.bf16.mxu0 %vm4856_vm2, %v14321_v55  ;;  %v14734_v16 = vpack.c.bf16 %v4447_v27, %v4419_v21  ;;  %v14738_v15 = vpop.f32.mrb[4].mxu1  ;;  %10403 = vmatprep.mubr.msk.bf16.mxu1 %vm4856_vm2, %v14321_v55  ;;  %v14744_v45 = vpack.c.bf16 %v4449_v17, %v4421_v46  ;;  %v17667_v55 = vld [vmem:[#allocation7_spill] sm:$0xff]  ;;  %v2901_v17 = vadd.f32 %v14045_v35, %v14030_v44 }
 0x358   : > { %v14740_v38 = vpop.f32.mrb[5].mxu0  ;;  %v14746_v13 = vpop.f32.mrb[5].mxu1 }
 0x359   : > { %5529 = vmatpush1.bf16.msra.mxu0 %v17665_v30  ;;  %v3468_v24 = vpop.f32.mrb[6].mxu0  ;;  %5622 = vmatpush1.bf16.msra.mxu1 %v17666_v12  ;;  %v3609_v56 = vpop.f32.mrb[6].mxu1  ;;  %v4466_v30 = vmax.f32 %v2901_v17, 0.0  ;;  %v17671_v12 = vld [vmem:[#allocation15_spill] sm:$0xff] }
 0x35a   : > { %5530 = vmatprep.subr.bf16.mxu0 %v13953_v41  ;;  %v3469_v27 = vpop.f32.mrb[7].mxu0  ;;  %5623 = vmatprep.subr.bf16.mxu1 %v13958_v9  ;;  %v3610_v22 = vpop.f32.mrb[7].mxu1  ;;  %v3042_v41 = vadd.f32 %v14055_v26, %v14030_v44  ;;  %v2903_v9 = vadd.f32 %v14057_v2, %v14030_v44 }
 0x35b   : > { %v17672_v22 = vld [vmem:[#allocation19_spill] sm:$0xff] }
 0x35c   : > { %5395 = vmatmul.mubr.bf16.gmra.mrb[112].mxu0 %v14344_v40  ;;  %5488 = vmatmul.mubr.bf16.gmra.mrb[112].mxu1 %v14344_v40  ;;  %v17669_v40 = vld [vmem:[#allocation21_spill] sm:$0xff] }
 0x35d   : > { %5531 = vmatpush1.bf16.msra.mxu0 %v17667_v55  ;;  %5624 = vmatpush1.bf16.msra.mxu1 %v17668_v37  ;;  %v3044_v42 = vadd.f32 %v17669_v40, %v14030_v44  ;;  %v4467_v37 = vmax.f32 %v2903_v9, 0.0  ;;  %v17673_v40 = vld [vmem:[#allocation20_spill] sm:$0xff] }
 0x35e   : > { %5532 = vmatprep.subr.bf16.mxu0 %v13983_v29  ;;  %5625 = vmatprep.subr.bf16.mxu1 %v13988_v19  ;;  %v17670_v19 = vld [vmem:[#allocation14_spill] sm:$0xff] }
 0x35f   : > { %v3646_v21 = vpop.f32.mrb[8].mxu0  ;;  %10397 = vmatprep.mubr.msk.bf16.mxu0 %vm4856_vm2, %v14361_v1  ;;  %v3787_v5 = vpop.f32.mrb[8].mxu1  ;;  %10404 = vmatprep.mubr.msk.bf16.mxu1 %vm4856_vm2, %v14361_v1  ;;  %v4468_v1 = vmax.f32 %v3042_v41, 0.0  ;;  %v4469_v17 = vmax.f32 %v3044_v42, 0.0  ;;  %v17674_v41 = vld [vmem:[#allocation12_spill] sm:$0xff] }
 0x360   : > { %v3647_v35 = vadd.f32 %v3646_v21, %v12475_v32  ;;  %v3648_v46 = vpop.f32.mrb[9].mxu0  ;;  %v3788_v29 = vadd.f32 %v3787_v5, %v12475_v32  ;;  %v3789_v2 = vpop.f32.mrb[9].mxu1 }
 0x361   : > { %v3649_v26 = vadd.f32 %v3648_v46, %v12475_v32  ;;  %5533 = vmatpush1.bf16.msra.mxu0 %v17670_v19  ;;  %v3650_v47 = vpop.f32.mrb[10].mxu0  ;;  %v3790_v24 = vadd.f32 %v3789_v2, %v12475_v32  ;;  %5626 = vmatpush1.bf16.msra.mxu1 %v17671_v12  ;;  %v3791_v56 = vpop.f32.mrb[10].mxu1 }
 0x362   : > { %v3651_v27 = vadd.f32 %v3650_v47, %v12501_v48  ;;  %5534 = vmatprep.subr.bf16.mxu0 %v17672_v22  ;;  %v3652_v55 = vpop.f32.mrb[11].mxu0  ;;  %v3792_v21 = vadd.f32 %v3791_v56, %v12501_v48  ;;  %5627 = vmatprep.subr.bf16.mxu1 %v17673_v40  ;;  %v3793_v46 = vpop.f32.mrb[11].mxu1  ;;  %v3918_v19 = vmax.f32 %v3647_v35, 0.0  ;;  %v3920_v47 = vmax.f32 %v3788_v29, 0.0  ;;  %v17675_v22 = vld [vmem:[#allocation13_spill] sm:$0xff]  ;;  %v17676_v40 = vld [vmem:[#allocation24_spill] sm:$0xff] }
 0x363   : > { %v3653_v5 = vadd.f32 %v3652_v55, %v12501_v48  ;;  %v3794_v2 = vadd.f32 %v3793_v46, %v12501_v48  ;;  %v3919_v9 = vmax.f32 %v3649_v26, 0.0  ;;  %v3921_v55 = vmax.f32 %v3790_v24, 0.0  ;;  %v17677_v48 = vld [vmem:[#allocation25_spill] sm:$0xff] }
 0x364   : > { %v3946_v32 = vmax.f32 %v3651_v27, 0.0  ;;  %5405 = vmatmul.mubr.bf16.gmra.mrb[116].mxu0 %v14395_v31  ;;  %v3948_v12 = vmax.f32 %v3792_v21, 0.0  ;;  %5498 = vmatmul.mubr.bf16.gmra.mrb[116].mxu1 %v14395_v31  ;;  %v4786_v27 = vpack.c.bf16 %v4466_v30, %v4466_v30  ;;  %v4788_v26 = vpack.c.bf16 %v4468_v1, %v4468_v1 }
 0x365   : > { %5535 = vmatpush1.bf16.msra.mxu0 %v17674_v41  ;;  %v3947_v56 = vmax.f32 %v3653_v5, 0.0  ;;  %5628 = vmatpush1.bf16.msra.mxu1 %v17675_v22  ;;  %v3949_v42 = vmax.f32 %v3794_v2, 0.0  ;;  %v4787_v21 = vpack.c.bf16 %v4467_v37, %v4467_v37  ;;  %v17679_v37 = vld [vmem:[#allocation17_spill] sm:$0xff] }
 0x366   : > { %5536 = vmatprep.subr.bf16.mxu0 %v17676_v40  ;;  %v14787_v35 = vpack.c.bf16 %v3946_v32, %v3918_v19  ;;  %5629 = vmatprep.subr.bf16.mxu1 %v17677_v48  ;;  %v14794_v29 = vpack.c.bf16 %v3948_v12, %v3920_v47  ;;  %v4789_v19 = vpack.c.bf16 %v4469_v17, %v4469_v17 }
 0x367   : > { %v3656_v46 = vpop.f32.mrb[12].mxu0  ;;  %10398 = vmatprep.mubr.msk.bf16.mxu0 %vm4856_vm2, %v14410_v28  ;;  %v14792_v31 = vpack.c.bf16 %v3947_v56, %v3919_v9  ;;  %v3797_v41 = vpop.f32.mrb[12].mxu1  ;;  %10405 = vmatprep.mubr.msk.bf16.mxu1 %vm4856_vm2, %v14410_v28  ;;  %v14799_v30 = vpack.c.bf16 %v3949_v42, %v3921_v55  ;;  %v17678_v56 = vld [vmem:[#allocation16_spill] sm:$0xff]  ;;  %v4913_v42 = vsel %vm4875_vm1, %v4786_v27, 0 }
 0x368   : > { %v3657_v5 = vadd.f32 %v3656_v46, %v12495_v39  ;;  %v3658_v24 = vpop.f32.mrb[13].mxu0  ;;  %v3798_v32 = vadd.f32 %v3797_v41, %v12495_v39  ;;  %v3799_v9 = vpop.f32.mrb[13].mxu1  ;;  %v4919_v41 = vsel %vm4875_vm1, %v4788_v26, 0 }
 0x369   : > { %v3659_v2 = vadd.f32 %v3658_v24, %v12495_v39  ;;  %5537 = vmatpush1.bf16.msra.mxu0 %v17678_v56  ;;  %v3660_v47 = vpop.f32.mrb[14].mxu0  ;;  %v3800_v1 = vadd.f32 %v3799_v9, %v12495_v39  ;;  %5630 = vmatpush1.bf16.msra.mxu1 %v17679_v37  ;;  %v3801_v22 = vpop.f32.mrb[14].mxu1 }
 0x36a   : > { %v3661_v12 = vadd.f32 %v3660_v47, %v17360_v60  ;;  %10406 = vmatprep.subr.msk.bf16.mxu0 %vm4875_vm1, %v4787_v21  ;;  %v3662_v28 = vpop.f32.mrb[15].mxu0  ;;  %v3802_v17 = vadd.f32 %v3801_v22, %v17360_v60  ;;  %10413 = vmatprep.subr.msk.bf16.mxu1 %vm4875_vm1, %v4789_v19  ;;  %v3803_v55 = vpop.f32.mrb[15].mxu1  ;;  %v3974_v48 = vmax.f32 %v3657_v5, 0.0  ;;  %v3976_v24 = vmax.f32 %v3798_v32, 0.0 }
 0x36b   : > { %v3663_v40 = vadd.f32 %v3662_v28, %v17360_v60  ;;  %v3804_v39 = vadd.f32 %v3803_v55, %v17360_v60  ;;  %v3975_v9 = vmax.f32 %v3659_v2, 0.0  ;;  %v3977_v56 = vmax.f32 %v3800_v1, 0.0 }
 0x36c   : > { %v4002_v46 = vmax.f32 %v3661_v12, 0.0  ;;  %5415 = vmatmul.mubr.bf16.gmra.mrb[120].mxu0 %v14426_v33  ;;  %v4004_v21 = vmax.f32 %v3802_v17, 0.0  ;;  %5508 = vmatmul.mubr.bf16.gmra.mrb[120].mxu1 %v14426_v33 }
 0x36d   : > { %5539 = vmatpush1.bf16.msra.mxu0 %v4913_v42  ;;  %v4003_v19 = vmax.f32 %v3663_v40, 0.0  ;;  %5632 = vmatpush1.bf16.msra.mxu1 %v4919_v41  ;;  %v4005_v27 = vmax.f32 %v3804_v39, 0.0 }
 0x36e   : > { %5704 = vmatprep.subr.bf16.mxu0 %v14105_v51  ;;  %v14817_v5 = vpack.c.bf16 %v4002_v46, %v3974_v48  ;;  %5797 = vmatprep.subr.bf16.mxu1 %v14110_v3  ;;  %v14824_v32 = vpack.c.bf16 %v4004_v21, %v3976_v24  ;;  %v14841_v24 = vld [vmem:[%s17175_s3] ss:$8 sps:$4 sm:$0xff]  }
 0x36f   : > { %v3666_v60 = vpop.f32.mrb[16].mxu0  ;;  %10407 = vmatprep.mubr.msk.bf16.mxu0 %vm4856_vm2, %v14637_v59  ;;  %v14822_v26 = vpack.c.bf16 %v4003_v19, %v3975_v9  ;;  %v3807_v2 = vpop.f32.mrb[16].mxu1  ;;  %10414 = vmatprep.mubr.msk.bf16.mxu1 %vm4856_vm2, %v14637_v59  ;;  %v14829_v51 = vpack.c.bf16 %v4005_v27, %v3977_v56  ;;  %v17681_v56 = vld [vmem:[#allocation22_spill] sm:$0xff]  ;;  %v17682_v27 = vld [vmem:[#allocation27_spill] sm:$0xff] }
 0x370   : > { %17680 = vst [vmem:[#allocation103_spill] sm:$0xff] %v14824_v32  ;;  %v3667_v33 = vadd.f32 %v3666_v60, %v12564_v11  ;;  %v3668_v47 = vpop.f32.mrb[17].mxu0  ;;  %v3808_v1 = vadd.f32 %v3807_v2, %v12564_v11  ;;  %v3809_v37 = vpop.f32.mrb[17].mxu1  ;;  %v17684_v2 = vld [vmem:[#allocation28_spill] sm:$0xff] }
 0x371   : > { %v3669_v3 = vadd.f32 %v3668_v47, %v12564_v11  ;;  %v3670_v12 = vpop.f32.mrb[18].mxu0  ;;  %v3810_v22 = vadd.f32 %v3809_v37, %v12564_v11  ;;  %v3811_v17 = vpop.f32.mrb[18].mxu1 }
 0x372   : > { %v3671_v28 = vadd.f32 %v3670_v12, %v12574_v14  ;;  %v3672_v40 = vpop.f32.mrb[19].mxu0  ;;  %v3812_v55 = vadd.f32 %v3811_v17, %v12574_v14  ;;  %v3813_v48 = vpop.f32.mrb[19].mxu1  ;;  %v4030_v46 = vmax.f32 %v3667_v33, 0.0  ;;  %v4032_v11 = vmax.f32 %v3808_v1, 0.0 }
 0x373   : > { %v3673_v42 = vadd.f32 %v3672_v40, %v12574_v14  ;;  %v3814_v41 = vadd.f32 %v3813_v48, %v12574_v14  ;;  %v4031_v9 = vmax.f32 %v3669_v3, 0.0  ;;  %v4033_v14 = vmax.f32 %v3810_v22, 0.0 }
 0x374   : > { %v4058_v39 = vmax.f32 %v3671_v28, 0.0  ;;  %5551 = vmatmul.mubr.bf16.vlgmr.msra.gmra.mrb[124].mxu0 %v14841_v24  ;;  %v4060_v21 = vmax.f32 %v3812_v55, 0.0  ;;  %5644 = vmatmul.mubr.bf16.vlgmr.msra.gmra.mrb[124].mxu1 %v14841_v24  ;;  %v17688_v55 = vld [vmem:[#allocation30_spill] sm:$0xff] }
 0x375   : > { %5705 = vmatpush1.bf16.msra.mxu0 %v14097_v23  ;;  %v4059_v19 = vmax.f32 %v3673_v42, 0.0  ;;  %5798 = vmatpush1.bf16.msra.mxu1 %v17681_v56  ;;  %v4061_v60 = vmax.f32 %v3814_v41, 0.0 }
 0x376   : > { %5706 = vmatprep.subr.bf16.mxu0 %v17682_v27  ;;  %v14848_v33 = vpack.c.bf16 %v4058_v39, %v4030_v46  ;;  %5799 = vmatprep.subr.bf16.mxu1 %v17684_v2  ;;  %v14855_v37 = vpack.c.bf16 %v4060_v21, %v4032_v11  ;;  %v17689_v46 = vld [vmem:[#allocation31_spill] sm:$0xff]  ;;  %v17690_v11 = vld [vmem:[#allocation32_spill] sm:$0xff] }
 0x377   : > { %v3676_v47 = vpop.f32.mrb[20].mxu0  ;;  %10408 = vmatprep.mubr.msk.bf16.mxu0 %vm4856_vm2, %v14675_v61  ;;  %v14853_v1 = vpack.c.bf16 %v4059_v19, %v4031_v9  ;;  %v3817_v3 = vpop.f32.mrb[20].mxu1  ;;  %10415 = vmatprep.mubr.msk.bf16.mxu1 %vm4856_vm2, %v14675_v61  ;;  %v14860_v22 = vpack.c.bf16 %v4061_v60, %v4033_v14  ;;  %v17691_v19 = vld [vmem:[#allocation33_spill] sm:$0xff] }
 0x378   : > { %17683 = vst [vmem:[#allocation104_spill] sm:$0xff] %v14848_v33  ;;  %17686 = vst [vmem:[#allocation102_spill] sm:$0xff] %v14855_v37  ;;  %v3677_v23 = vadd.f32 %v3676_v47, %v12602_v7  ;;  %v3678_v12 = vpop.f32.mrb[21].mxu0  ;;  %v3818_v28 = vadd.f32 %v3817_v3, %v12602_v7  ;;  %v3819_v40 = vpop.f32.mrb[21].mxu1  ;;  %v17726_v33 = vld [vmem:[#allocation49_spill] sm:$0xff] }
 0x379   : > { %17685 = vst [vmem:[#allocation101_spill] sm:$0xff] %v14853_v1  ;;  %17687 = vst [vmem:[#allocation105_spill] sm:$0xff] %v14860_v22  ;;  %v3679_v17 = vadd.f32 %v3678_v12, %v12602_v7  ;;  %5707 = vmatpush1.bf16.msra.mxu0 %v17688_v55  ;;  %v3680_v42 = vpop.f32.mrb[22].mxu0  ;;  %v3820_v48 = vadd.f32 %v3819_v40, %v12602_v7  ;;  %5800 = vmatpush1.bf16.msra.mxu1 %v17689_v46  ;;  %v3821_v41 = vpop.f32.mrb[22].mxu1  ;;  %v14876_v7 = vld [vmem:[%s17175_s3 + $0x10] ss:$8 sps:$4 sm:$0xff]  }
 0x37a   : > { %v3681_v39 = vadd.f32 %v3680_v42, %v17371_v20  ;;  %5708 = vmatprep.subr.bf16.mxu0 %v17690_v11  ;;  %v3682_v21 = vpop.f32.mrb[23].mxu0  ;;  %v3822_v9 = vadd.f32 %v3821_v41, %v17371_v20  ;;  %5801 = vmatprep.subr.bf16.mxu1 %v17691_v19  ;;  %v3823_v27 = vpop.f32.mrb[23].mxu1  ;;  %v4086_v14 = vmax.f32 %v3677_v23, 0.0  ;;  %v4088_v47 = vmax.f32 %v3818_v28, 0.0  ;;  %v17692_v12 = vld [vmem:[#allocation34_spill] sm:$0xff]  ;;  %v17693_v42 = vld [vmem:[#allocation35_spill] sm:$0xff] }
 0x37b   : > { %v3683_v56 = vadd.f32 %v3682_v21, %v17371_v20  ;;  %v3824_v2 = vadd.f32 %v3823_v27, %v17371_v20  ;;  %v4087_v40 = vmax.f32 %v3679_v17, 0.0  ;;  %v17694_v23 = vld [vmem:[#allocation36_spill] sm:$0xff]  ;;  %v4089_v20 = vmax.f32 %v3820_v48, 0.0  ;;  %v17696_v41 = vld [vmem:[#allocation37_spill] sm:$0xff]  ;;  %v14889_v28 = vld [vmem:[%s17175_s3 + $0x24] ss:$8 sps:$4 sm:$0xff]  }
 0x37c   : > { %v4114_v60 = vmax.f32 %v3681_v39, 0.0  ;;  %5561 = vmatmul.mubr.bf16.gmra.mrb[128].mxu0 %v14876_v7  ;;  %v4116_v3 = vmax.f32 %v3822_v9, 0.0  ;;  %5654 = vmatmul.mubr.bf16.gmra.mrb[128].mxu1 %v14876_v7 }
 0x37d   : > { %5709 = vmatpush1.bf16.msra.mxu0 %v17692_v12  ;;  %v4115_v55 = vmax.f32 %v3683_v56, 0.0  ;;  %5802 = vmatpush1.bf16.msra.mxu1 %v17693_v42  ;;  %v4117_v46 = vmax.f32 %v3824_v2, 0.0  ;;  %v17700_v2 = vld [vmem:[#allocation38_spill] sm:$0xff] }
 0x37e   : > { %5710 = vmatprep.subr.bf16.mxu0 %v17694_v23  ;;  %v14883_v39 = vpack.c.bf16 %v4114_v60, %v4086_v14  ;;  %5803 = vmatprep.subr.bf16.mxu1 %v17696_v41  ;;  %v14895_v21 = vpack.c.bf16 %v4116_v3, %v4088_v47  ;;  %v17701_v3 = vld [vmem:[#allocation39_spill] sm:$0xff] }
 0x37f   : > { %v3686_v11 = vpop.f32.mrb[24].mxu0  ;;  %10409 = vmatprep.mubr.msk.bf16.mxu0 %vm4856_vm2, %v14889_v28  ;;  %v14893_v17 = vpack.c.bf16 %v4115_v55, %v4087_v40  ;;  %v3827_v9 = vpop.f32.mrb[24].mxu1  ;;  %10416 = vmatprep.mubr.msk.bf16.mxu1 %vm4856_vm2, %v14889_v28  ;;  %v14900_v56 = vpack.c.bf16 %v4117_v46, %v4089_v20  ;;  %v17702_v40 = vld [vmem:[#allocation23_spill] sm:$0xff]  ;;  %v17704_v46 = vld [vmem:[#allocation52_spill] sm:$0xff] }
 0x380   : > { %17695 = vst [vmem:[#allocation106_spill] sm:$0xff] %v14883_v39  ;;  %17698 = vst [vmem:[#allocation60_spill] sm:$0xff] %v14895_v21  ;;  %v3687_v48 = vadd.f32 %v3686_v11, %v12640_v63  ;;  %v3688_v19 = vpop.f32.mrb[25].mxu0  ;;  %v3828_v27 = vadd.f32 %v3827_v9, %v12640_v63  ;;  %v3829_v60 = vpop.f32.mrb[25].mxu1  ;;  %v17703_v23 = vld [vmem:[#allocation43_spill] sm:$0xff] }
 0x381   : > { %17697 = vst [vmem:[#allocation9_spill] sm:$0xff] %v14893_v17  ;;  %17699 = vst [vmem:[#allocation108_spill] sm:$0xff] %v14900_v56  ;;  %v3689_v14 = vadd.f32 %v3688_v19, %v12640_v63  ;;  %5711 = vmatpush1.bf16.msra.mxu0 %v17700_v2  ;;  %v3690_v12 = vpop.f32.mrb[26].mxu0  ;;  %v3830_v47 = vadd.f32 %v3829_v60, %v12640_v63  ;;  %5804 = vmatpush1.bf16.msra.mxu1 %v17701_v3  ;;  %v3831_v42 = vpop.f32.mrb[26].mxu1  ;;  %v14916_v63 = vld [vmem:[%s17175_s3 + $0x20] ss:$8 sps:$4 sm:$0xff]  }
 0x382   : > { %v3691_v55 = vadd.f32 %v3690_v12, %v17702_v40  ;;  %5712 = vmatprep.subr.bf16.mxu0 %v17703_v23  ;;  %v3692_v41 = vpop.f32.mrb[27].mxu0  ;;  %v3832_v20 = vadd.f32 %v3831_v42, %v17702_v40  ;;  %5805 = vmatprep.subr.bf16.mxu1 %v17704_v46  ;;  %v3833_v9 = vpop.f32.mrb[27].mxu1  ;;  %v4142_v19 = vmax.f32 %v3687_v48, 0.0  ;;  %v4144_v60 = vmax.f32 %v3828_v27, 0.0  ;;  %v17705_v3 = vld [vmem:[#allocation42_spill] sm:$0xff]  ;;  %v17707_v48 = vld [vmem:[#allocation40_spill] sm:$0xff] }
 0x383   : > { %v3693_v11 = vadd.f32 %v3692_v41, %v17702_v40  ;;  %v3834_v21 = vadd.f32 %v3833_v9, %v17702_v40  ;;  %v4143_v42 = vmax.f32 %v3689_v14, 0.0  ;;  %v17706_v41 = vld [vmem:[#allocation50_spill] sm:$0xff]  ;;  %v4145_v40 = vmax.f32 %v3830_v47, 0.0  ;;  %v17709_v9 = vld [vmem:[#allocation41_spill] sm:$0xff]  ;;  %v17722_v56 = vld [vmem:[#allocation47_spill] sm:$0xff] }
 0x384   : > { %v4170_v2 = vmax.f32 %v3691_v55, 0.0  ;;  %5571 = vmatmul.mubr.bf16.gmra.mrb[132].mxu0 %v14916_v63  ;;  %v4172_v12 = vmax.f32 %v3832_v20, 0.0  ;;  %5664 = vmatmul.mubr.bf16.gmra.mrb[132].mxu1 %v14916_v63  ;;  %v14929_v27 = vld [vmem:[%s17175_s3 + $0x34] ss:$8 sps:$4 sm:$0xff]  }
 0x385   : > { %5713 = vmatpush1.bf16.msra.mxu0 %v17705_v3  ;;  %v4171_v23 = vmax.f32 %v3693_v11, 0.0  ;;  %5806 = vmatpush1.bf16.msra.mxu1 %v17706_v41  ;;  %v4173_v55 = vmax.f32 %v3834_v21, 0.0  ;;  %v17712_v11 = vld [vmem:[#allocation26_spill] sm:$0xff] }
 0x386   : > { %5714 = vmatprep.subr.bf16.mxu0 %v17707_v48  ;;  %v14923_v46 = vpack.c.bf16 %v4170_v2, %v4142_v19  ;;  %5807 = vmatprep.subr.bf16.mxu1 %v17709_v9  ;;  %v14935_v20 = vpack.c.bf16 %v4172_v12, %v4144_v60  ;;  %v17714_v9 = vld [vmem:[#allocation53_spill] sm:$0xff]  ;;  %v17715_v12 = vld [vmem:[#allocation54_spill] sm:$0xff] }
 0x387   : > { %v3696_v39 = vpop.f32.mrb[28].mxu0  ;;  %10410 = vmatprep.mubr.msk.bf16.mxu0 %vm4856_vm2, %v14929_v27  ;;  %v14933_v14 = vpack.c.bf16 %v4171_v23, %v4143_v42  ;;  %v3837_v21 = vpop.f32.mrb[28].mxu1  ;;  %10417 = vmatprep.mubr.msk.bf16.mxu1 %vm4856_vm2, %v14929_v27  ;;  %v14940_v2 = vpack.c.bf16 %v4173_v55, %v4145_v40  ;;  %v17718_v55 = vld [vmem:[#allocation45_spill] sm:$0xff] }
 0x388   : > { %17708 = vst [vmem:[#allocation109_spill] sm:$0xff] %v14923_v46  ;;  %17711 = vst [vmem:[#allocation107_spill] sm:$0xff] %v14935_v20  ;;  %v3697_v47 = vadd.f32 %v3696_v39, %v17712_v11  ;;  %v3698_v19 = vpop.f32.mrb[29].mxu0  ;;  %v3838_v3 = vadd.f32 %v3837_v21, %v17712_v11  ;;  %v3839_v48 = vpop.f32.mrb[29].mxu1  ;;  %v17716_v39 = vld [vmem:[#allocation29_spill] sm:$0xff]  ;;  %v17717_v46 = vld [vmem:[#allocation44_spill] sm:$0xff] }
 0x389   : > { %17710 = vst [vmem:[#allocation65_spill] sm:$0xff] %v14933_v14  ;;  %17713 = vst [vmem:[#allocation110_spill] sm:$0xff] %v14940_v2  ;;  %v3699_v41 = vadd.f32 %v3698_v19, %v17712_v11  ;;  %5715 = vmatpush1.bf16.msra.mxu0 %v17714_v9  ;;  %v3700_v42 = vpop.f32.mrb[30].mxu0  ;;  %v3840_v60 = vadd.f32 %v3839_v48, %v17712_v11  ;;  %5808 = vmatpush1.bf16.msra.mxu1 %v17715_v12  ;;  %v3841_v20 = vpop.f32.mrb[30].mxu1  ;;  %v17719_v9 = vld [vmem:[#allocation61_spill] sm:$0xff] }
 0x38a   : > { %v3701_v23 = vadd.f32 %v3700_v42, %v17716_v39  ;;  %5716 = vmatprep.subr.bf16.mxu0 %v17717_v46  ;;  %v3702_v14 = vpop.f32.mrb[31].mxu0  ;;  %v3842_v40 = vadd.f32 %v3841_v20, %v17716_v39  ;;  %5809 = vmatprep.subr.bf16.mxu1 %v17718_v55  ;;  %v3843_v19 = vpop.f32.mrb[31].mxu1  ;;  %v14954_v2 = vadd.f32 %v17719_v9, %v14030_v44  ;;  %v4198_v11 = vmax.f32 %v3697_v47, 0.0  ;;  %v14960_v46 = vld [vmem:[%s17175_s3 + $0x30] ss:$8 sps:$4 sm:$0xff]  }
 0x38b   : > { %v3703_v21 = vadd.f32 %v3702_v14, %v17716_v39  ;;  %v3844_v12 = vadd.f32 %v3843_v19, %v17716_v39  ;;  %v4200_v20 = vmax.f32 %v3838_v3, 0.0  ;;  %v17720_v14 = vld [vmem:[#allocation46_spill] sm:$0xff]  ;;  %v4199_v55 = vmax.f32 %v3699_v41, 0.0  ;;  %v17721_v47 = vld [vmem:[#allocation68_spill] sm:$0xff]  ;;  %v17725_v3 = vld [vmem:[#allocation69_spill] sm:$0xff] }
 0x38c   : > { %v4226_v48 = vmax.f32 %v3701_v23, 0.0  ;;  %5581 = vmatmul.mubr.bf16.gmra.mrb[136].mxu0 %v14960_v46  ;;  %v4228_v42 = vmax.f32 %v3842_v40, 0.0  ;;  %5674 = vmatmul.mubr.bf16.gmra.mrb[136].mxu1 %v14960_v46  ;;  %v3324_v23 = vadd.f32 %v17721_v47, %v14030_v44  ;;  %v17723_v39 = vld [vmem:[#allocation48_spill] sm:$0xff]  ;;  %v4201_v19 = vmax.f32 %v3840_v60, 0.0  ;;  %v14977_v41 = vld [vmem:[%s17175_s3 + $0x44] ss:$8 sps:$4 sm:$0xff]  }
 0x38d   : > { %5717 = vmatpush1.bf16.msra.mxu0 %v17720_v14  ;;  %v4227_v9 = vmax.f32 %v3703_v21, 0.0  ;;  %5810 = vmatpush1.bf16.msra.mxu1 %v17722_v56  ;;  %v4229_v17 = vmax.f32 %v3844_v12, 0.0  ;;  %v3185_v40 = vadd.f32 %v17725_v3, %v14030_v44  ;;  %v17729_v21 = vld [vmem:[#allocation67_spill] sm:$0xff] }
 0x38e   : > { %5718 = vmatprep.subr.bf16.mxu0 %v17723_v39  ;;  %v14969_v37 = vpack.c.bf16 %v4226_v48, %v4198_v11  ;;  %5811 = vmatprep.subr.bf16.mxu1 %v17726_v33  ;;  %v14983_v60 = vpack.c.bf16 %v4228_v42, %v4200_v20  ;;  %v3326_v11 = vadd.f32 %v17729_v21, %v14030_v44  ;;  %v4470_v42 = vmax.f32 %v14954_v2, 0.0 }
 0x38f   : > { %v3706_v22 = vpop.f32.mrb[32].mxu0  ;;  %10411 = vmatprep.mubr.msk.bf16.mxu0 %vm4856_vm2, %v14977_v41  ;;  %v14981_v56 = vpack.c.bf16 %v4227_v9, %v4199_v55  ;;  %v3847_v12 = vpop.f32.mrb[32].mxu1  ;;  %10418 = vmatprep.mubr.msk.bf16.mxu1 %vm4856_vm2, %v14977_v41  ;;  %v14990_v14 = vpack.c.bf16 %v4229_v17, %v4201_v19  ;;  %v17731_v9 = vld [vmem:[#allocation51_spill] sm:$0xff]  ;;  %v4472_v19 = vmax.f32 %v3324_v23, 0.0 }
 0x390   : > { %17724 = vst [vmem:[#allocation111_spill] sm:$0xff] %v14969_v37  ;;  %17728 = vst [vmem:[#allocation70_spill] sm:$0xff] %v14983_v60  ;;  %v3707_v48 = vadd.f32 %v3706_v22, %v12716_v57  ;;  %v3708_v33 = vpop.f32.mrb[33].mxu0  ;;  %v3848_v47 = vadd.f32 %v3847_v12, %v12716_v57  ;;  %v3849_v55 = vpop.f32.mrb[33].mxu1  ;;  %v17732_v22 = vld [vmem:[#allocation55_spill] sm:$0xff]  ;;  %v17733_v37 = vld [vmem:[#allocation56_spill] sm:$0xff] }
 0x391   : > { %17727 = vst [vmem:[#allocation18_spill] sm:$0xff] %v14981_v56  ;;  %17730 = vst [vmem:[#allocation112_spill] sm:$0xff] %v14990_v14  ;;  %v3709_v39 = vadd.f32 %v3708_v33, %v12716_v57  ;;  %5719 = vmatpush1.bf16.msra.mxu0 %v17731_v9  ;;  %v3710_v20 = vpop.f32.mrb[34].mxu0  ;;  %v3850_v3 = vadd.f32 %v3849_v55, %v12716_v57  ;;  %5812 = vmatpush1.bf16.msra.mxu1 %v17732_v22  ;;  %v3851_v60 = vpop.f32.mrb[34].mxu1  ;;  %v4471_v12 = vmax.f32 %v3185_v40, 0.0  ;;  %v17734_v14 = vld [vmem:[#allocation57_spill] sm:$0xff] }
 0x392   : > { %v3711_v21 = vadd.f32 %v3710_v20, %v12726_v6  ;;  %5720 = vmatprep.subr.bf16.mxu0 %v17733_v37  ;;  %v3712_v17 = vpop.f32.mrb[35].mxu0  ;;  %v3852_v33 = vadd.f32 %v3851_v60, %v12726_v6  ;;  %5813 = vmatprep.subr.bf16.mxu1 %v17734_v14  ;;  %v3853_v56 = vpop.f32.mrb[35].mxu1  ;;  %v4473_v2 = vmax.f32 %v3326_v11, 0.0  ;;  %v4254_v1 = vmax.f32 %v3707_v48, 0.0  ;;  %v15007_v20 = vld [vmem:[%s17175_s3 + $0x40] ss:$8 sps:$4 sm:$0xff]  }
 0x393   : > { %v3713_v9 = vadd.f32 %v3712_v17, %v12726_v6  ;;  %v3854_v55 = vadd.f32 %v3853_v56, %v12726_v6  ;;  %v4256_v37 = vmax.f32 %v3848_v47, 0.0  ;;  %v17735_v40 = vld [vmem:[#allocation58_spill] sm:$0xff]  ;;  %v4255_v60 = vmax.f32 %v3709_v39, 0.0  ;;  %v17736_v11 = vld [vmem:[#allocation59_spill] sm:$0xff]  ;;  %v15020_v47 = vld [vmem:[%s17175_s3 + $0x54] ss:$8 sps:$4 sm:$0xff]  }
 0x394   : > { %v4282_v57 = vmax.f32 %v3711_v21, 0.0  ;;  %5591 = vmatmul.mubr.bf16.gmra.mrb[140].mxu0 %v15007_v20  ;;  %v4284_v23 = vmax.f32 %v3852_v33, 0.0  ;;  %5684 = vmatmul.mubr.bf16.gmra.mrb[140].mxu1 %v15007_v20  ;;  %v17737_v48 = vld [vmem:[#allocation62_spill] sm:$0xff]  ;;  %v4257_v6 = vmax.f32 %v3850_v3, 0.0  ;;  %v4790_v21 = vpack.c.bf16 %v4470_v42, %v4470_v42 }
 0x395   : > { %5721 = vmatpush1.bf16.msra.mxu0 %v17735_v40  ;;  %v4283_v14 = vmax.f32 %v3713_v9, 0.0  ;;  %5814 = vmatpush1.bf16.msra.mxu1 %v17736_v11  ;;  %v4285_v56 = vmax.f32 %v3854_v55, 0.0  ;;  %v17738_v17 = vld [vmem:[#allocation66_spill] sm:$0xff]  ;;  %v4792_v3 = vpack.c.bf16 %v4472_v19, %v4472_v19  ;;  %v4791_v9 = vpack.c.bf16 %v4471_v12, %v4471_v12  ;;  %v17740_v12 = vld [vmem:[#allocation64_spill] sm:$0xff] }
 0x396   : > { %5722 = vmatprep.subr.bf16.mxu0 %v17737_v48  ;;  %v15014_v22 = vpack.c.bf16 %v4282_v57, %v4254_v1  ;;  %5815 = vmatprep.subr.bf16.mxu1 %v17738_v17  ;;  %v15026_v33 = vpack.c.bf16 %v4284_v23, %v4256_v37  ;;  %v4793_v40 = vpack.c.bf16 %v4473_v2, %v4473_v2 }
 0x397   : > { %v3716_v32 = vpop.f32.mrb[36].mxu0  ;;  %10412 = vmatprep.mubr.msk.bf16.mxu0 %vm4856_vm2, %v15020_v47  ;;  %v15024_v39 = vpack.c.bf16 %v4283_v14, %v4255_v60  ;;  %v3857_v42 = vpop.f32.mrb[36].mxu1  ;;  %10419 = vmatprep.mubr.msk.bf16.mxu1 %vm4856_vm2, %v15020_v47  ;;  %v15031_v55 = vpack.c.bf16 %v4285_v56, %v4257_v6  ;;  %v17739_v14 = vld [vmem:[#allocation63_spill] sm:$0xff] }
 0x398   : > { %v3717_v1 = vadd.f32 %v3716_v32, %v12755_v50  ;;  %v3718_v57 = vpop.f32.mrb[37].mxu0  ;;  %v3858_v11 = vadd.f32 %v3857_v42, %v12755_v50  ;;  %v3859_v60 = vpop.f32.mrb[37].mxu1  ;;  %v4925_v42 = vsel %vm4875_vm1, %v4790_v21, 0 }
 0x399   : > { %v3719_v48 = vadd.f32 %v3718_v57, %v12755_v50  ;;  %5723 = vmatpush1.bf16.msra.mxu0 %v17739_v14  ;;  %v3720_v37 = vpop.f32.mrb[38].mxu0  ;;  %v3860_v19 = vadd.f32 %v3859_v60, %v12755_v50  ;;  %5816 = vmatpush1.bf16.msra.mxu1 %v17740_v12  ;;  %v3861_v23 = vpop.f32.mrb[38].mxu1  ;;  %v15048_v60 = vld [vmem:[%s17175_s3 + $0x50] ss:$8 sps:$4 sm:$0xff]  }
 0x39a   : > { %v3721_v32 = vadd.f32 %v3720_v37, %v12777_v53  ;;  %10420 = vmatprep.subr.msk.bf16.mxu0 %vm4875_vm1, %v4791_v9  ;;  %v3722_v6 = vpop.f32.mrb[39].mxu0  ;;  %v3862_v2 = vadd.f32 %v3861_v23, %v12777_v53  ;;  %10427 = vmatprep.subr.msk.bf16.mxu1 %vm4875_vm1, %v4793_v40  ;;  %v3863_v17 = vpop.f32.mrb[39].mxu1  ;;  %v4310_v57 = vmax.f32 %v3717_v1, 0.0  ;;  %v4931_v9 = vsel %vm4875_vm1, %v4792_v3, 0  ;;  %v17741_v1 = vld [vmem:[#allocation74_spill] sm:$0xff] }
 0x39b   : > { %v3723_v56 = vadd.f32 %v3722_v6, %v12777_v53  ;;  %v3864_v50 = vadd.f32 %v3863_v17, %v12777_v53  ;;  %v4312_v37 = vmax.f32 %v3858_v11, 0.0  ;;  %v4311_v12 = vmax.f32 %v3719_v48, 0.0  ;;  %v17742_v6 = vld [vmem:[#allocation72_spill] sm:$0xff] }
 0x39c   : > { %v4338_v14 = vmax.f32 %v3721_v32, 0.0  ;;  %5601 = vmatmul.mubr.bf16.gmra.mrb[144].mxu0 %v15048_v60  ;;  %v4340_v40 = vmax.f32 %v3862_v2, 0.0  ;;  %5694 = vmatmul.mubr.bf16.gmra.mrb[144].mxu1 %v15048_v60  ;;  %v4313_v53 = vmax.f32 %v3860_v19, 0.0 }
 0x39d   : > { %5725 = vmatpush1.bf16.msra.mxu0 %v4925_v42  ;;  %v4339_v21 = vmax.f32 %v3723_v56, 0.0  ;;  %5818 = vmatpush1.bf16.msra.mxu1 %v4931_v9  ;;  %v4341_v32 = vmax.f32 %v3864_v50, 0.0 }
 0x39e   : > { %5890 = vmatprep.subr.bf16.mxu0 %v17741_v1  ;;  %v15054_v23 = vpack.c.bf16 %v4338_v14, %v4310_v57  ;;  %5983 = vmatprep.subr.bf16.mxu1 %v17742_v6  ;;  %v15061_v11 = vpack.c.bf16 %v4340_v40, %v4312_v37 }
 0x39f   : > { %v3726_v17 = vpop.f32.mrb[40].mxu0  ;;  %10421 = vmatprep.mubr.msk.bf16.mxu0 %vm4856_vm2, %v14637_v59  ;;  %v15059_v3 = vpack.c.bf16 %v4339_v21, %v4311_v12  ;;  %v3867_v2 = vpop.f32.mrb[40].mxu1  ;;  %10428 = vmatprep.mubr.msk.bf16.mxu1 %vm4856_vm2, %v14637_v59  ;;  %v15066_v19 = vpack.c.bf16 %v4341_v32, %v4313_v53 }
 0x3a0   : > { %17743 = vst [vmem:[#allocation113_spill] sm:$0xff] %v15061_v11  ;;  %v3727_v48 = vadd.f32 %v3726_v17, %v12814_v43  ;;  %v3728_v56 = vpop.f32.mrb[41].mxu0  ;;  %v3868_v42 = vadd.f32 %v3867_v2, %v12814_v43  ;;  %v3869_v14 = vpop.f32.mrb[41].mxu1 }
 0x3a1   : > { %v3729_v57 = vadd.f32 %v3728_v56, %v12814_v43  ;;  %v3730_v50 = vpop.f32.mrb[42].mxu0  ;;  %v3870_v9 = vadd.f32 %v3869_v14, %v12814_v43  ;;  %v3871_v40 = vpop.f32.mrb[42].mxu1  ;;  %v17744_v43 = vld [vmem:[#allocation73_spill] sm:$0xff] }
 0x3a2   : > { %v3731_v37 = vadd.f32 %v3730_v50, %v12837_v54  ;;  %v3732_v12 = vpop.f32.mrb[43].mxu0  ;;  %v3872_v21 = vadd.f32 %v3871_v40, %v12837_v54  ;;  %v3873_v6 = vpop.f32.mrb[43].mxu1  ;;  %v4366_v59 = vmax.f32 %v3727_v48, 0.0  ;;  %v4368_v17 = vmax.f32 %v3868_v42, 0.0  ;;  %v17745_v50 = vld [vmem:[#allocation71_spill] sm:$0xff] }
 0x3a3   : > { %v3733_v1 = vadd.f32 %v3732_v12, %v12837_v54  ;;  %v3874_v32 = vadd.f32 %v3873_v6, %v12837_v54  ;;  %v4367_v56 = vmax.f32 %v3729_v57, 0.0  ;;  %v17746_v40 = vld [vmem:[#allocation79_spill] sm:$0xff]  ;;  %v4369_v12 = vmax.f32 %v3870_v9, 0.0 }
 0x3a4   : > { %v4394_v53 = vmax.f32 %v3731_v37, 0.0  ;;  %5737 = vmatmul.mubr.bf16.vlgmr.msra.gmra.mrb[148].mxu0 %v14841_v24  ;;  %v4396_v2 = vmax.f32 %v3872_v21, 0.0  ;;  %5830 = vmatmul.mubr.bf16.vlgmr.msra.gmra.mrb[148].mxu1 %v14841_v24  ;;  %v17747_v37 = vld [vmem:[#allocation77_spill] sm:$0xff] }
 0x3a5   : > { %5891 = vmatpush1.bf16.msra.mxu0 %v17744_v43  ;;  %v4395_v14 = vmax.f32 %v3733_v1, 0.0  ;;  %5984 = vmatpush1.bf16.msra.mxu1 %v17745_v50  ;;  %v4397_v11 = vmax.f32 %v3874_v32, 0.0  ;;  %v17749_v43 = vld [vmem:[#allocation78_spill] sm:$0xff] }
 0x3a6   : > { %5892 = vmatprep.subr.bf16.mxu0 %v17746_v40  ;;  %v15080_v48 = vpack.c.bf16 %v4394_v53, %v4366_v59  ;;  %5985 = vmatprep.subr.bf16.mxu1 %v17747_v37  ;;  %v15087_v21 = vpack.c.bf16 %v4396_v2, %v4368_v17  ;;  %v17750_v2 = vld [vmem:[#allocation76_spill] sm:$0xff]  ;;  %v17751_v40 = vld [vmem:[#allocation83_spill] sm:$0xff] }
 0x3a7   : > { %v3736_v54 = vpop.f32.mrb[44].mxu0  ;;  %10422 = vmatprep.mubr.msk.bf16.mxu0 %vm4856_vm2, %v14675_v61  ;;  %v15085_v42 = vpack.c.bf16 %v4395_v14, %v4367_v56  ;;  %v3877_v1 = vpop.f32.mrb[44].mxu1  ;;  %10429 = vmatprep.mubr.msk.bf16.mxu1 %vm4856_vm2, %v14675_v61  ;;  %v15092_v9 = vpack.c.bf16 %v4397_v11, %v4369_v12  ;;  %v17752_v12 = vld [vmem:[#allocation81_spill] sm:$0xff] }
 0x3a8   : > { %17748 = vst [vmem:[#allocation75_spill] sm:$0xff] %v15087_v21  ;;  %v3737_v57 = vadd.f32 %v3736_v54, %v12876_v25  ;;  %v3738_v6 = vpop.f32.mrb[45].mxu0  ;;  %v3878_v59 = vadd.f32 %v3877_v1, %v12876_v25  ;;  %v3879_v32 = vpop.f32.mrb[45].mxu1 }
 0x3a9   : > { %v3739_v53 = vadd.f32 %v3738_v6, %v12876_v25  ;;  %5893 = vmatpush1.bf16.msra.mxu0 %v17749_v43  ;;  %v3740_v56 = vpop.f32.mrb[46].mxu0  ;;  %v3880_v17 = vadd.f32 %v3879_v32, %v12876_v25  ;;  %5986 = vmatpush1.bf16.msra.mxu1 %v17750_v2  ;;  %v3881_v50 = vpop.f32.mrb[46].mxu1 }
 0x3aa   : > { %v3741_v14 = vadd.f32 %v3740_v56, %v12899_v58  ;;  %5894 = vmatprep.subr.bf16.mxu0 %v17751_v40  ;;  %v3742_v61 = vpop.f32.mrb[47].mxu0  ;;  %v3882_v11 = vadd.f32 %v3881_v50, %v12899_v58  ;;  %5987 = vmatprep.subr.bf16.mxu1 %v17752_v12  ;;  %v3883_v54 = vpop.f32.mrb[47].mxu1  ;;  %v4422_v1 = vmax.f32 %v3737_v57, 0.0  ;;  %v4424_v25 = vmax.f32 %v3878_v59, 0.0  ;;  %v17753_v56 = vld [vmem:[#allocation82_spill] sm:$0xff]  ;;  %v17754_v12 = vld [vmem:[#allocation80_spill] sm:$0xff] }
 0x3ab   : > { %v3743_v37 = vadd.f32 %v3742_v61, %v12899_v58  ;;  %v3884_v43 = vadd.f32 %v3883_v54, %v12899_v58  ;;  %v4423_v2 = vmax.f32 %v3739_v53, 0.0  ;;  %v4425_v50 = vmax.f32 %v3880_v17, 0.0  ;;  %v17755_v61 = vld [vmem:[#allocation84_spill] sm:$0xff]  ;;  %v17756_v58 = vld [vmem:[#allocation89_spill] sm:$0xff] }
 0x3ac   : > { %v4450_v6 = vmax.f32 %v3741_v14, 0.0  ;;  %5747 = vmatmul.mubr.bf16.gmra.mrb[152].mxu0 %v14876_v7  ;;  %v4452_v32 = vmax.f32 %v3882_v11, 0.0  ;;  %5840 = vmatmul.mubr.bf16.gmra.mrb[152].mxu1 %v14876_v7 }
 0x3ad   : > { %5895 = vmatpush1.bf16.msra.mxu0 %v17753_v56  ;;  %v4451_v40 = vmax.f32 %v3743_v37, 0.0  ;;  %v4453_v21 = vmax.f32 %v3884_v43, 0.0  ;;  %5988 = vmatpush1.bf16.msra.mxu1 %v17754_v12  ;;  %v17758_v43 = vld [vmem:[#allocation85_spill] sm:$0xff] }
 0x3ae   : > { %5896 = vmatprep.subr.bf16.mxu0 %v17755_v61  ;;  %v15110_v57 = vpack.c.bf16 %v4450_v6, %v4422_v1  ;;  %v15112_v14 = vpack.c.bf16 %v4452_v32, %v4424_v25  ;;  %5989 = vmatprep.subr.bf16.mxu1 %v17756_v58  ;;  %v17757_v1 = vld [vmem:[#allocation86_spill] sm:$0xff] }
 0x3af   : > { %v15115_v59 = vpop.f32.mrb[48].mxu0  ;;  %10423 = vmatprep.mubr.msk.bf16.mxu0 %vm4856_vm2, %v14889_v28  ;;  %v15119_v11 = vpack.c.bf16 %v4451_v40, %v4423_v2  ;;  %v15121_v53 = vpop.f32.mrb[48].mxu1  ;;  %10430 = vmatprep.mubr.msk.bf16.mxu1 %vm4856_vm2, %v14889_v28  ;;  %v15127_v37 = vpack.c.bf16 %v4453_v21, %v4425_v50  ;;  %v17759_v25 = vld [vmem:[#allocation98_spill] sm:$0xff]  ;;  %v17760_v2 = vld [vmem:[#allocation87_spill] sm:$0xff]  ;;  %v17761_v21 = vld [vmem:[#allocation97_spill] sm:$0xff] }
 0x3b0   : > { %v15123_v17 = vpop.f32.mrb[49].mxu0  ;;  %v15129_v54 = vpop.f32.mrb[49].mxu1  ;;  %v17762_v50 = vld [vmem:[#allocation100_spill] sm:$0xff] }
 0x3b1   : > { %5897 = vmatpush1.bf16.msra.mxu0 %v17757_v1  ;;  %v3750_v6 = vpop.f32.mrb[50].mxu0  ;;  %5990 = vmatpush1.bf16.msra.mxu1 %v17758_v43  ;;  %v3891_v56 = vpop.f32.mrb[50].mxu1 }
 0x3b2   : > { %5898 = vmatprep.subr.bf16.mxu0 %v17759_v25  ;;  %v3751_v32 = vpop.f32.mrb[51].mxu0  ;;  %5991 = vmatprep.subr.bf16.mxu1 %v17760_v2  ;;  %v3892_v40 = vpop.f32.mrb[51].mxu1  ;;  %v17763_v25 = vld [vmem:[#allocation92_spill] sm:$0xff]  ;;  %v17764_v56 = vld [vmem:[#allocation90_spill] sm:$0xff] }
 0x3b4   : > { %5757 = vmatmul.mubr.bf16.gmra.mrb[156].mxu0 %v14916_v63  ;;  %5850 = vmatmul.mubr.bf16.gmra.mrb[156].mxu1 %v14916_v63 }
 0x3b5   : > { %5899 = vmatpush1.bf16.msra.mxu0 %v17761_v21  ;;  %5992 = vmatpush1.bf16.msra.mxu1 %v17762_v50  ;;  %v17766_v50 = vld [vmem:[#allocation93_spill] sm:$0xff] }
 0x3b6   : > { %5900 = vmatprep.subr.bf16.mxu0 %v14606_v52  ;;  %5993 = vmatprep.subr.bf16.mxu1 %v14613_v49 }
 0x3b7   : > { %v4994_v12 = vpop.f32.mrb[52].mxu0  ;;  %10424 = vmatprep.mubr.msk.bf16.mxu0 %vm4856_vm2, %v14929_v27  ;;  %v5087_v58 = vpop.f32.mrb[52].mxu1  ;;  %10431 = vmatprep.mubr.msk.bf16.mxu1 %vm4856_vm2, %v14929_v27 }
 0x3b8   : > { %v4996_v61 = vpop.f32.mrb[53].mxu0  ;;  %v5089_v43 = vpop.f32.mrb[53].mxu1 }
 0x3b9   : > { %v15145_v1 = vadd.f32 %v4996_v61, %v4994_v12  ;;  %5901 = vmatpush1.bf16.msra.mxu0 %v14601_v62  ;;  %v4998_v6 = vpop.f32.mrb[54].mxu0  ;;  %5994 = vmatpush1.bf16.msra.mxu1 %v14608_v4  ;;  %v6280_v52 = vadd.f32 %v5089_v43, %v5087_v58  ;;  %v5091_v32 = vpop.f32.mrb[54].mxu1  ;;  %v17765_v62 = vld [vmem:[#allocation88_spill] sm:$0xff]  ;;  %v17767_v61 = vld [vmem:[#allocation99_spill] sm:$0xff]  ;;  %v3467_v43 = vadd.f32 %v14740_v38, %v14030_v44 }
 0x3ba   : > { %5902 = vmatprep.subr.bf16.mxu0 %v17763_v25  ;;  %v5000_v49 = vpop.f32.mrb[55].mxu0  ;;  %5995 = vmatprep.subr.bf16.mxu1 %v17764_v56  ;;  %v5093_v40 = vpop.f32.mrb[55].mxu1  ;;  %v17768_v56 = vld [vmem:[#allocation91_spill] sm:$0xff] }
 0x3bb   : > { %v15151_v2 = vadd.f32 %v5000_v49, %v4998_v6  ;;  %v6281_v21 = vadd.f32 %v5093_v40, %v5091_v32  ;;  %v3465_v6 = vadd.f32 %v14730_v18, %v14030_v44  ;;  %v4475_v4 = vmax.f32 %v3467_v43, 0.0 }
 0x3bc   : > { %5767 = vmatmul.mubr.bf16.gmra.mrb[160].mxu0 %v14960_v46  ;;  %5860 = vmatmul.mubr.bf16.gmra.mrb[160].mxu1 %v14960_v46 }
 0x3bd   : > { %5903 = vmatpush1.bf16.msra.mxu0 %v17765_v62  ;;  %5996 = vmatpush1.bf16.msra.mxu1 %v17766_v50  ;;  %v15160_v12 = vpack.c.bf16 %v6281_v21, %v6280_v52  ;;  %v3608_v52 = vadd.f32 %v14746_v13, %v14030_v44  ;;  %v17769_v21 = vld [vmem:[#allocation96_spill] sm:$0xff] }
 0x3be   : > { %5904 = vmatprep.subr.bf16.mxu0 %v14667_v8  ;;  %5997 = vmatprep.subr.bf16.mxu1 %v17767_v61  ;;  %v3606_v8 = vadd.f32 %v14738_v15, %v14030_v44 }
 0x3bf   : > { %v5004_v58 = vpop.f32.mrb[56].mxu0  ;;  %10425 = vmatprep.mubr.msk.bf16.mxu0 %vm4856_vm2, %v14977_v41  ;;  %v5097_v49 = vpop.f32.mrb[56].mxu1  ;;  %10432 = vmatprep.mubr.msk.bf16.mxu1 %vm4856_vm2, %v14977_v41 }
 0x3c0   : > { %v5006_v25 = vpop.f32.mrb[57].mxu0  ;;  %v5099_v18 = vpop.f32.mrb[57].mxu1 }
 0x3c1   : > { %v15175_v32 = vadd.f32 %v5006_v25, %v5004_v58  ;;  %5905 = vmatpush1.bf16.msra.mxu0 %v17768_v56  ;;  %v5008_v40 = vpop.f32.mrb[58].mxu0  ;;  %5998 = vmatpush1.bf16.msra.mxu1 %v17769_v21  ;;  %v6282_v38 = vadd.f32 %v5099_v18, %v5097_v49  ;;  %v5101_v50 = vpop.f32.mrb[58].mxu1  ;;  %v4474_v58 = vmax.f32 %v3465_v6, 0.0  ;;  %v4477_v25 = vmax.f32 %v3608_v52, 0.0  ;;  %v17770_v56 = vld [vmem:[#allocation94_spill] sm:$0xff]  ;;  %v17771_v18 = vld [vmem:[#allocation95_spill] sm:$0xff] }
 0x3c2   : > { %5906 = vmatprep.subr.bf16.mxu0 %v14702_v34  ;;  %v5010_v62 = vpop.f32.mrb[59].mxu0  ;;  %5999 = vmatprep.subr.bf16.mxu1 %v14709_v10  ;;  %v5103_v15 = vpop.f32.mrb[59].mxu1  ;;  %v4476_v49 = vmax.f32 %v3606_v8, 0.0  ;;  %v4795_v6 = vpack.c.bf16 %v4475_v4, %v4475_v4 }
 0x3c3   : > { %v15181_v61 = vadd.f32 %v5010_v62, %v5008_v40  ;;  %v6283_v13 = vadd.f32 %v5103_v15, %v5101_v50  ;;  %v4794_v8 = vpack.c.bf16 %v4474_v58, %v4474_v58  ;;  %v4797_v21 = vpack.c.bf16 %v4477_v25, %v4477_v25 }
 0x3c4   : > { %5777 = vmatmul.mubr.bf16.gmra.mrb[164].mxu0 %v15007_v20  ;;  %5870 = vmatmul.mubr.bf16.gmra.mrb[164].mxu1 %v15007_v20  ;;  %v4796_v50 = vpack.c.bf16 %v4476_v49, %v4476_v49 }
 0x3c5   : > { %5907 = vmatpush1.bf16.msra.mxu0 %v17770_v56  ;;  %v6275_v34 = vpack.c.bf16 %v15181_v61, %v15175_v32  ;;  %6000 = vmatpush1.bf16.msra.mxu1 %v17771_v18  ;;  %v15190_v10 = vpack.c.bf16 %v6283_v13, %v6282_v38 }
 0x3c6   : > { %5908 = vmatprep.subr.bf16.mxu0 %v14734_v16  ;;  %6001 = vmatprep.subr.bf16.mxu1 %v14744_v45 }
 0x3c7   : > { %v5014_v43 = vpop.f32.mrb[60].mxu0  ;;  %10426 = vmatprep.mubr.msk.bf16.mxu0 %vm4856_vm2, %v15020_v47  ;;  %v5107_v40 = vpop.f32.mrb[60].mxu1  ;;  %10433 = vmatprep.mubr.msk.bf16.mxu1 %vm4856_vm2, %v15020_v47 }
 0x3c8   : > { %v5016_v52 = vpop.f32.mrb[61].mxu0  ;;  %v5109_v38 = vpop.f32.mrb[61].mxu1 }
 0x3c9   : > { %v15197_v62 = vadd.f32 %v5016_v52, %v5014_v43  ;;  %5909 = vmatpush1.bf16.msra.mxu0 %v14727_v0  ;;  %v5018_v16 = vpop.f32.mrb[62].mxu0  ;;  %6002 = vmatpush1.bf16.msra.mxu1 %v14736_v36  ;;  %v6284_v45 = vadd.f32 %v5109_v38, %v5107_v40  ;;  %v5111_v15 = vpop.f32.mrb[62].mxu1  ;;  %v4937_v0 = vsel %vm4875_vm1, %v4794_v8, 0  ;;  %v4943_v36 = vsel %vm4875_vm1, %v4796_v50, 0  ;;  %v15218_v43 = vld [vmem:[%s17175_s3 + $0x4] ss:$8 sps:$4 sm:$0xff]  }
 0x3ca   : > { %10434 = vmatprep.subr.msk.bf16.mxu0 %vm4875_vm1, %v4795_v6  ;;  %v5020_v4 = vpop.f32.mrb[63].mxu0  ;;  %10441 = vmatprep.subr.msk.bf16.mxu1 %vm4875_vm1, %v4797_v21  ;;  %v5113_v58 = vpop.f32.mrb[63].mxu1 }
 0x3cb   : > { %v15203_v13 = vadd.f32 %v5020_v4, %v5018_v16  ;;  %v6285_v25 = vadd.f32 %v5113_v58, %v5111_v15 }
 0x3cc   : > { %5787 = vmatmul.mubr.bf16.gmra.mrb[168].mxu0 %v15048_v60  ;;  %5880 = vmatmul.mubr.bf16.gmra.mrb[168].mxu1 %v15048_v60 }
 0x3cd   : > { %5911 = vmatpush1.bf16.msra.mxu0 %v4937_v0  ;;  %v6276_v56 = vpack.c.bf16 %v15203_v13, %v15197_v62  ;;  %6004 = vmatpush1.bf16.msra.mxu1 %v4943_v36  ;;  %v15212_v49 = vpack.c.bf16 %v6285_v25, %v6284_v45  ;;  %v15241_v25 = vld [vmem:[%s17175_s3 + $0x14] ss:$8 sps:$4 sm:$0xff]   ;;  %v17772_v0 = vld [vmem:[#allocation103_spill] sm:$0xff] }
 0x3ce   : > { %6076 = vmatprep.subr.bf16.mxu0 %v14792_v31  ;;  %6169 = vmatprep.subr.bf16.mxu1 %v14799_v30 }
 0x3cf   : > { %v5024_v18 = vpop.f32.mrb[64].mxu0  ;;  %10435 = vmatprep.mubr.msk.bf16.mxu0 %vm4856_vm2, %v15218_v43  ;;  %v5117_v52 = vpop.f32.mrb[64].mxu1  ;;  %10442 = vmatprep.mubr.msk.bf16.mxu1 %vm4856_vm2, %v15218_v43 }
 0x3d0   : > { %v5026_v6 = vpop.f32.mrb[65].mxu0  ;;  %v5119_v8 = vpop.f32.mrb[65].mxu1 }
 0x3d1   : > { %v15224_v40 = vadd.f32 %v5026_v6, %v5024_v18  ;;  %v5028_v31 = vpop.f32.mrb[66].mxu0  ;;  %v6286_v21 = vadd.f32 %v5119_v8, %v5117_v52  ;;  %v5121_v16 = vpop.f32.mrb[66].mxu1  ;;  %v17773_v18 = vld [vmem:[#allocation101_spill] sm:$0xff] }
 0x3d2   : > { %v5030_v30 = vpop.f32.mrb[67].mxu0  ;;  %v5123_v50 = vpop.f32.mrb[67].mxu1 }
 0x3d3   : > { %v15226_v38 = vadd.f32 %v5030_v30, %v5028_v31  ;;  %v6287_v45 = vadd.f32 %v5123_v50, %v5121_v16  ;;  %v17774_v31 = vld [vmem:[#allocation105_spill] sm:$0xff]  ;;  %v17776_v50 = vld [vmem:[#allocation102_spill] sm:$0xff] }
 0x3d4   : > { %5923 = vmatmul.mubr.bf16.vlgmr.msra.gmra.mrb[172].mxu0 %v14841_v24  ;;  %6016 = vmatmul.mubr.bf16.vlgmr.msra.gmra.mrb[172].mxu1 %v14841_v24 }
 0x3d5   : > { %6077 = vmatpush1.bf16.msra.mxu0 %v14787_v35  ;;  %v6277_v4 = vpack.c.bf16 %v15226_v38, %v15224_v40  ;;  %6170 = vmatpush1.bf16.msra.mxu1 %v14794_v29  ;;  %v15235_v15 = vpack.c.bf16 %v6287_v45, %v6286_v21  ;;  %v17777_v45 = vld [vmem:[#allocation9_spill] sm:$0xff] }
 0x3d6   : > { %6078 = vmatprep.subr.bf16.mxu0 %v14822_v26  ;;  %6171 = vmatprep.subr.bf16.mxu1 %v14829_v51 }
 0x3d7   : > { %v5034_v58 = vpop.f32.mrb[68].mxu0  ;;  %10436 = vmatprep.mubr.msk.bf16.mxu0 %vm4856_vm2, %v15241_v25  ;;  %v5127_v24 = vpop.f32.mrb[68].mxu1  ;;  %10443 = vmatprep.mubr.msk.bf16.mxu1 %vm4856_vm2, %v15241_v25 }
 0x3d8   : > { %v5036_v35 = vpop.f32.mrb[69].mxu0  ;;  %v5129_v51 = vpop.f32.mrb[69].mxu1 }
 0x3d9   : > { %v15247_v29 = vadd.f32 %v5036_v35, %v5034_v58  ;;  %6079 = vmatpush1.bf16.msra.mxu0 %v14817_v5  ;;  %v5038_v26 = vpop.f32.mrb[70].mxu0  ;;  %6172 = vmatpush1.bf16.msra.mxu1 %v17772_v0  ;;  %v6288_v36 = vadd.f32 %v5129_v51, %v5127_v24  ;;  %v5131_v52 = vpop.f32.mrb[70].mxu1  ;;  %v17775_v5 = vld [vmem:[#allocation104_spill] sm:$0xff]  ;;  %v17779_v0 = vld [vmem:[#allocation106_spill] sm:$0xff] }
 0x3da   : > { %6080 = vmatprep.subr.bf16.mxu0 %v17773_v18  ;;  %v5040_v6 = vpop.f32.mrb[71].mxu0  ;;  %6173 = vmatprep.subr.bf16.mxu1 %v17774_v31  ;;  %v5133_v21 = vpop.f32.mrb[71].mxu1  ;;  %v17778_v35 = vld [vmem:[#allocation108_spill] sm:$0xff]  ;;  %v17781_v31 = vld [vmem:[#allocation65_spill] sm:$0xff] }
 0x3db   : > { %v15253_v8 = vadd.f32 %v5040_v6, %v5038_v26  ;;  %v6289_v30 = vadd.f32 %v5133_v21, %v5131_v52  ;;  %v17780_v52 = vld [vmem:[#allocation60_spill] sm:$0xff] }
 0x3dc   : > { %5933 = vmatmul.mubr.bf16.gmra.mrb[176].mxu0 %v14876_v7  ;;  %6026 = vmatmul.mubr.bf16.gmra.mrb[176].mxu1 %v14876_v7 }
 0x3dd   : > { %6081 = vmatpush1.bf16.msra.mxu0 %v17775_v5  ;;  %v6278_v16 = vpack.c.bf16 %v15253_v8, %v15247_v29  ;;  %6174 = vmatpush1.bf16.msra.mxu1 %v17776_v50  ;;  %v15262_v58 = vpack.c.bf16 %v6289_v30, %v6288_v36  ;;  %v17782_v5 = vld [vmem:[#allocation110_spill] sm:$0xff] }
 0x3de   : > { %6082 = vmatprep.subr.bf16.mxu0 %v17777_v45  ;;  %6175 = vmatprep.subr.bf16.mxu1 %v17778_v35 }
 0x3df   : > { %v5044_v24 = vpop.f32.mrb[72].mxu0  ;;  %10437 = vmatprep.mubr.msk.bf16.mxu0 %vm4856_vm2, %v14889_v28  ;;  %v5137_v51 = vpop.f32.mrb[72].mxu1  ;;  %10444 = vmatprep.mubr.msk.bf16.mxu1 %vm4856_vm2, %v14889_v28  ;;  %v17783_v28 = vld [vmem:[#allocation109_spill] sm:$0xff] }
 0x3e0   : > { %v5046_v26 = vpop.f32.mrb[73].mxu0  ;;  %v5139_v6 = vpop.f32.mrb[73].mxu1 }
 0x3e1   : > { %v15269_v7 = vadd.f32 %v5046_v26, %v5044_v24  ;;  %6083 = vmatpush1.bf16.msra.mxu0 %v17779_v0  ;;  %v5048_v18 = vpop.f32.mrb[74].mxu0  ;;  %6176 = vmatpush1.bf16.msra.mxu1 %v17780_v52  ;;  %v6290_v36 = vadd.f32 %v5139_v6, %v5137_v51  ;;  %v5141_v30 = vpop.f32.mrb[74].mxu1  ;;  %v17784_v26 = vld [vmem:[#allocation107_spill] sm:$0xff]  ;;  %v17785_v51 = vld [vmem:[#allocation18_spill] sm:$0xff]  ;;  %v17786_v6 = vld [vmem:[#allocation112_spill] sm:$0xff] }
 0x3e2   : > { %6084 = vmatprep.subr.bf16.mxu0 %v17781_v31  ;;  %v5050_v21 = vpop.f32.mrb[75].mxu0  ;;  %6177 = vmatprep.subr.bf16.mxu1 %v17782_v5  ;;  %v5143_v45 = vpop.f32.mrb[75].mxu1 }
 0x3e3   : > { %v15275_v50 = vadd.f32 %v5050_v21, %v5048_v18  ;;  %v6291_v35 = vadd.f32 %v5143_v45, %v5141_v30  ;;  %v17787_v21 = vld [vmem:[#allocation111_spill] sm:$0xff]  ;;  %v17788_v45 = vld [vmem:[#allocation70_spill] sm:$0xff] }
 0x3e4   : > { %5943 = vmatmul.mubr.bf16.gmra.mrb[180].mxu0 %v14916_v63  ;;  %6036 = vmatmul.mubr.bf16.gmra.mrb[180].mxu1 %v14916_v63 }
 0x3e5   : > { %6085 = vmatpush1.bf16.msra.mxu0 %v17783_v28  ;;  %v6279_v24 = vpack.c.bf16 %v15275_v50, %v15269_v7  ;;  %6178 = vmatpush1.bf16.msra.mxu1 %v17784_v26  ;;  %v15284_v0 = vpack.c.bf16 %v6291_v35, %v6290_v36 }
 0x3e6   : > { %6086 = vmatprep.subr.bf16.mxu0 %v17785_v51  ;;  %6179 = vmatprep.subr.bf16.mxu1 %v17786_v6 }
 0x3e7   : > { %v5180_v18 = vpop.f32.mrb[76].mxu0  ;;  %10438 = vmatprep.mubr.msk.bf16.mxu0 %vm4856_vm2, %v14929_v27  ;;  %v5273_v31 = vpop.f32.mrb[76].mxu1  ;;  %10445 = vmatprep.mubr.msk.bf16.mxu1 %vm4856_vm2, %v14929_v27 }
 0x3e8   : > { %v5182_v52 = vpop.f32.mrb[77].mxu0  ;;  %v5275_v5 = vpop.f32.mrb[77].mxu1 }
 0x3e9   : > { %v6298_v63 = vadd.f32 %v5182_v52, %v5180_v18  ;;  %6087 = vmatpush1.bf16.msra.mxu0 %v17787_v21  ;;  %v5184_v30 = vpop.f32.mrb[78].mxu0  ;;  %6180 = vmatpush1.bf16.msra.mxu1 %v17788_v45  ;;  %v6316_v36 = vadd.f32 %v5275_v5, %v5273_v31  ;;  %v5277_v28 = vpop.f32.mrb[78].mxu1 }
 0x3ea   : > { %6088 = vmatprep.subr.bf16.mxu0 %v15024_v39  ;;  %v5186_v35 = vpop.f32.mrb[79].mxu0  ;;  %6181 = vmatprep.subr.bf16.mxu1 %v15031_v55  ;;  %v5279_v51 = vpop.f32.mrb[79].mxu1  ;;  %v3747_v55 = vadd.f32 %v15115_v59, %v14030_v44  ;;  %v17789_v59 = vld [vmem:[#allocation113_spill] sm:$0xff] }
 0x3eb   : > { %v6299_v26 = vadd.f32 %v5186_v35, %v5184_v30  ;;  %v6317_v6 = vadd.f32 %v5279_v51, %v5277_v28  ;;  %v17790_v35 = vld [vmem:[#allocation75_spill] sm:$0xff] }
 0x3ec   : > { %5953 = vmatmul.mubr.bf16.gmra.mrb[184].mxu0 %v14960_v46  ;;  %6046 = vmatmul.mubr.bf16.gmra.mrb[184].mxu1 %v14960_v46  ;;  %v3749_v46 = vadd.f32 %v15123_v17, %v14030_v44 }
 0x3ed   : > { %6089 = vmatpush1.bf16.msra.mxu0 %v15014_v22  ;;  %v15298_v27 = vpack.c.bf16 %v6299_v26, %v6298_v63  ;;  %v15300_v18 = vpack.c.bf16 %v6317_v6, %v6316_v36  ;;  %6182 = vmatpush1.bf16.msra.mxu1 %v15026_v33  ;;  %v3888_v33 = vadd.f32 %v15121_v53, %v14030_v44 }
 0x3ee   : > { %6090 = vmatprep.subr.bf16.mxu0 %v15059_v3  ;;  %6183 = vmatprep.subr.bf16.mxu1 %v15066_v19  ;;  %v3890_v3 = vadd.f32 %v15129_v54, %v14030_v44  ;;  %v4479_v53 = vmax.f32 %v3749_v46, 0.0  ;;  %v4478_v44 = vmax.f32 %v3747_v55, 0.0 }
 0x3ef   : > { %v5190_v39 = vpop.f32.mrb[80].mxu0  ;;  %10439 = vmatprep.mubr.msk.bf16.mxu0 %vm4856_vm2, %v14977_v41  ;;  %v5283_v52 = vpop.f32.mrb[80].mxu1  ;;  %10446 = vmatprep.mubr.msk.bf16.mxu1 %vm4856_vm2, %v14977_v41  ;;  %v4480_v54 = vmax.f32 %v3888_v33, 0.0 }
 0x3f0   : > { %v5192_v22 = vpop.f32.mrb[81].mxu0  ;;  %v5285_v63 = vpop.f32.mrb[81].mxu1  ;;  %v4799_v28 = vpack.c.bf16 %v4479_v53, %v4479_v53 }
 0x3f1   : > { %v6300_v19 = vadd.f32 %v5192_v22, %v5190_v39  ;;  %6091 = vmatpush1.bf16.msra.mxu0 %v15054_v23  ;;  %v5194_v31 = vpop.f32.mrb[82].mxu0  ;;  %6184 = vmatpush1.bf16.msra.mxu1 %v17789_v59  ;;  %v6318_v21 = vadd.f32 %v5285_v63, %v5283_v52  ;;  %v5287_v30 = vpop.f32.mrb[82].mxu1  ;;  %v4481_v23 = vmax.f32 %v3890_v3, 0.0 }
 0x3f2   : > { %6092 = vmatprep.subr.bf16.mxu0 %v15085_v42  ;;  %v5196_v17 = vpop.f32.mrb[83].mxu0  ;;  %6185 = vmatprep.subr.bf16.mxu1 %v15092_v9  ;;  %v5289_v5 = vpop.f32.mrb[83].mxu1 }
 0x3f3   : > { %v6301_v41 = vadd.f32 %v5196_v17, %v5194_v31  ;;  %v6319_v45 = vadd.f32 %v5289_v5, %v5287_v30  ;;  %v4801_v6 = vpack.c.bf16 %v4481_v23, %v4481_v23 }
 0x3f4   : > { %5963 = vmatmul.mubr.bf16.gmra.mrb[188].mxu0 %v15007_v20  ;;  %6056 = vmatmul.mubr.bf16.gmra.mrb[188].mxu1 %v15007_v20  ;;  %v4798_v20 = vpack.c.bf16 %v4478_v44, %v4478_v44 }
 0x3f5   : > { %6093 = vmatpush1.bf16.msra.mxu0 %v15080_v48  ;;  %v15324_v36 = vpack.c.bf16 %v6301_v41, %v6300_v19  ;;  %v15326_v42 = vpack.c.bf16 %v6319_v45, %v6318_v21  ;;  %6186 = vmatpush1.bf16.msra.mxu1 %v17790_v35  ;;  %v4800_v48 = vpack.c.bf16 %v4480_v54, %v4480_v54  ;;  %v11462_v35 = vld [vmem:[%s17175_s3] ss:$8 sps:$4 sm:$0xff]  }
 0x3f6   : > { %6094 = vmatprep.subr.bf16.mxu0 %v15119_v11  ;;  %6187 = vmatprep.subr.bf16.mxu1 %v15127_v37  ;;  %v4949_v19 = vsel %vm4875_vm1, %v4798_v20, 0 }
 0x3f7   : > { %v5200_v9 = vpop.f32.mrb[84].mxu0  ;;  %10440 = vmatprep.mubr.msk.bf16.mxu0 %vm4856_vm2, %v15020_v47  ;;  %v5293_v51 = vpop.f32.mrb[84].mxu1  ;;  %10447 = vmatprep.mubr.msk.bf16.mxu1 %vm4856_vm2, %v15020_v47 }
 0x3f8   : > { %v5202_v26 = vpop.f32.mrb[85].mxu0  ;;  %v5295_v11 = vpop.f32.mrb[85].mxu1 }
 0x3f9   : > { %v6302_v39 = vadd.f32 %v5202_v26, %v5200_v9  ;;  %6095 = vmatpush1.bf16.msra.mxu0 %v15110_v57  ;;  %v5204_v55 = vpop.f32.mrb[86].mxu0  ;;  %6188 = vmatpush1.bf16.msra.mxu1 %v15112_v14  ;;  %v6320_v37 = vadd.f32 %v5295_v11, %v5293_v51  ;;  %v5297_v22 = vpop.f32.mrb[86].mxu1  ;;  %v4955_v57 = vsel %vm4875_vm1, %v4800_v48, 0  ;;  %v17791_v9 = vpack.c.bf16 %v15151_v2, %v15145_v1 }
 0x3fa   : > { %10448 = vmatprep.subr.msk.bf16.mxu0 %vm4875_vm1, %v4799_v28  ;;  %v5206_v46 = vpop.f32.mrb[87].mxu0  ;;  %10455 = vmatprep.subr.msk.bf16.mxu1 %vm4875_vm1, %v4801_v6  ;;  %v5299_v33 = vpop.f32.mrb[87].mxu1 }
 0x3fb   : > { %v6303_v52 = vadd.f32 %v5206_v46, %v5204_v55  ;;  %v6321_v3 = vadd.f32 %v5299_v33, %v5297_v22  ;;  %v11463_v22 = vld [vmem:[%s17175_s3 + $0x10] ss:$8 sps:$4 sm:$0xff]  }
 0x3fc   : > { %5973 = vmatmul.mubr.bf16.gmra.mrb[192].mxu0 %v15048_v60  ;;  %6066 = vmatmul.mubr.bf16.gmra.mrb[192].mxu1 %v15048_v60 }
 0x3fd   : > { %6097 = vmatpush1.bf16.msra.mxu0 %v4949_v19  ;;  %v15343_v14 = vpack.c.bf16 %v6303_v52, %v6302_v39  ;;  %v15345_v31 = vpack.c.bf16 %v6321_v3, %v6320_v37  ;;  %6190 = vmatpush1.bf16.msra.mxu1 %v4955_v57 }
 0x3fe   : > { %6895 = vmatprep.subr.bf16.mxu0 %v15160_v12  ;;  %7161 = vmatprep.subr.bf16.mxu1 %v15300_v18 }
 0x3ff   : > { %v5210_v63 = vpop.f32.mrb[88].mxu0  ;;  %10449 = vmatprep.mubr.msk.bf16.mxu0 %vm4856_vm2, %v15218_v43  ;;  %v5303_v21 = vpop.f32.mrb[88].mxu1  ;;  %10456 = vmatprep.mubr.msk.bf16.mxu1 %vm4856_vm2, %v15218_v43 }
 0x400   : > { %v5212_v59 = vpop.f32.mrb[89].mxu0  ;;  %v5305_v41 = vpop.f32.mrb[89].mxu1 }
 0x401   : > { %v6304_v17 = vadd.f32 %v5212_v59, %v5210_v63  ;;  %v5214_v30 = vpop.f32.mrb[90].mxu0  ;;  %v6322_v5 = vadd.f32 %v5305_v41, %v5303_v21  ;;  %v5307_v45 = vpop.f32.mrb[90].mxu1 }
 0x402   : > { %v5216_v53 = vpop.f32.mrb[91].mxu0  ;;  %v5309_v54 = vpop.f32.mrb[91].mxu1 }
 0x403   : > { %v6305_v44 = vadd.f32 %v5216_v53, %v5214_v30  ;;  %v6323_v23 = vadd.f32 %v5309_v54, %v5307_v45  ;;  %v11465_v53 = vld [vmem:[%s17175_s3 + $0x20] ss:$8 sps:$4 sm:$0xff]   ;;  %v11466_v45 = vld [vmem:[%s17175_s3 + $0x34] ss:$8 sps:$4 sm:$0xff]  }
 0x404   : > { %6109 = vmatmul.mubr.bf16.vlgmr.msra.gmra.mrb[196].mxu0 %v11462_v35  ;;  %6202 = vmatmul.mubr.bf16.vlgmr.msra.gmra.mrb[196].mxu1 %v11462_v35 }
 0x405   : > { %6896 = vmatpush1.bf16.msra.mxu0 %v17791_v9  ;;  %v15359_v43 = vpack.c.bf16 %v6305_v44, %v6304_v17  ;;  %v15361_v28 = vpack.c.bf16 %v6323_v23, %v6322_v5  ;;  %7162 = vmatpush1.bf16.msra.mxu1 %v15298_v27 }
 0x406   : > { %6897 = vmatprep.subr.bf16.mxu0 %v15298_v27  ;;  %10450 = vmatprep.mubr.msk.bf16.mxu0 %vm4856_vm2, %v15241_v25 }
 0x407   : > { %v5220_v26 = vpop.f32.mrb[92].mxu0  ;;  %10457 = vmatprep.mubr.msk.bf16.mxu1 %vm4856_vm2, %v15241_v25  ;;  %v5313_v20 = vpop.f32.mrb[92].mxu1 }
 0x408   : > { %v5222_v51 = vpop.f32.mrb[93].mxu0  ;;  %v5315_v2 = vpop.f32.mrb[93].mxu1 }
 0x409   : > { %v6306_v48 = vadd.f32 %v5222_v51, %v5220_v26  ;;  %6898 = vmatpush1.bf16.msra.mxu0 %v15160_v12  ;;  %v5224_v1 = vpop.f32.mrb[94].mxu0  ;;  %v6324_v6 = vadd.f32 %v5315_v2, %v5313_v20  ;;  %v5317_v55 = vpop.f32.mrb[94].mxu1  ;;  %v11464_v12 = vld [vmem:[%s17175_s3 + $0x24] ss:$8 sps:$4 sm:$0xff]  }
 0x40a   : > { %6899 = vmatprep.subr.bf16.mxu0 %v15300_v18  ;;  %v5226_v39 = vpop.f32.mrb[95].mxu0  ;;  %v5319_v37 = vpop.f32.mrb[95].mxu1 }
 0x40b   : > { %v6307_v11 = vadd.f32 %v5226_v39, %v5224_v1  ;;  %v6325_v46 = vadd.f32 %v5319_v37, %v5317_v55 }
 0x40c   : > { %6119 = vmatmul.mubr.bf16.gmra.mrb[200].mxu0 %v11463_v22  ;;  %6212 = vmatmul.mubr.bf16.gmra.mrb[200].mxu1 %v11463_v22 }
 0x40d   : > { %6900 = vmatpush1.bf16.msra.mxu0 %v15298_v27  ;;  %10451 = vmatprep.mubr.msk.bf16.mxu0 %vm4856_vm2, %v11464_v12  ;;  %v15379_v25 = vpack.c.bf16 %v6307_v11, %v6306_v48  ;;  %v15381_v52 = vpack.c.bf16 %v6325_v46, %v6324_v6  ;;  %v11467_v11 = vld [vmem:[%s17175_s3 + $0x30] ss:$8 sps:$4 sm:$0xff]   ;;  %v11468_v46 = vld [vmem:[%s17175_s3 + $0x44] ss:$8 sps:$4 sm:$0xff]  }
 0x40e   : > { %10458 = vmatprep.mubr.msk.bf16.mxu1 %vm4856_vm2, %v11464_v12 }
 0x40f   : > { %v5230_v33 = vpop.f32.mrb[96].mxu0  ;;  %v5323_v19 = vpop.f32.mrb[96].mxu1 }
 0x410   : > { %v5232_v3 = vpop.f32.mrb[97].mxu0  ;;  %v5325_v59 = vpop.f32.mrb[97].mxu1 }
 0x411   : > { %v6308_v57 = vadd.f32 %v5232_v3, %v5230_v33  ;;  %v5234_v63 = vpop.f32.mrb[98].mxu0  ;;  %v6326_v27 = vadd.f32 %v5325_v59, %v5323_v19  ;;  %v5327_v17 = vpop.f32.mrb[98].mxu1 }
 0x412   : > { %v5236_v21 = vpop.f32.mrb[99].mxu0  ;;  %v5329_v41 = vpop.f32.mrb[99].mxu1 }
 0x413   : > { %v6309_v30 = vadd.f32 %v5236_v21, %v5234_v63  ;;  %v6327_v5 = vadd.f32 %v5329_v41, %v5327_v17 }
 0x414   : > { %6129 = vmatmul.mubr.bf16.gmra.mrb[204].mxu0 %v11465_v53  ;;  %6222 = vmatmul.mubr.bf16.gmra.mrb[204].mxu1 %v11465_v53 }
 0x415   : > { %10452 = vmatprep.mubr.msk.bf16.mxu0 %vm4856_vm2, %v11466_v45  ;;  %v15391_v44 = vpack.c.bf16 %v6309_v30, %v6308_v57  ;;  %v15393_v54 = vpack.c.bf16 %v6327_v5, %v6326_v27  ;;  %10459 = vmatprep.mubr.msk.bf16.mxu1 %vm4856_vm2, %v11466_v45  ;;  %v11469_v5 = vld [vmem:[%s17175_s3 + $0x40] ss:$8 sps:$4 sm:$0xff]  }
 0x417   : > { %v5366_v23 = vpop.f32.mrb[100].mxu0  ;;  %v5459_v9 = vpop.f32.mrb[100].mxu1 }
 0x418   : > { %v5368_v35 = vpop.f32.mrb[101].mxu0  ;;  %v5461_v20 = vpop.f32.mrb[101].mxu1 }
 0x419   : > { %v6334_v26 = vadd.f32 %v5368_v35, %v5366_v23  ;;  %v5370_v51 = vpop.f32.mrb[102].mxu0  ;;  %v6352_v48 = vadd.f32 %v5461_v20, %v5459_v9  ;;  %v5463_v2 = vpop.f32.mrb[102].mxu1 }
 0x41a   : > { %v5372_v1 = vpop.f32.mrb[103].mxu0  ;;  %v5465_v39 = vpop.f32.mrb[103].mxu1 }
 0x41b   : > { %v6335_v6 = vadd.f32 %v5372_v1, %v5370_v51  ;;  %v6353_v55 = vadd.f32 %v5465_v39, %v5463_v2  ;;  %v11275_v2 = vld [vmem:[%s17176_s4 + $0x4] ss:$16 sps:$4 sm:$0xff]  }
 0x41c   : > { %6139 = vmatmul.mubr.bf16.gmra.mrb[208].mxu0 %v11467_v11  ;;  %6232 = vmatmul.mubr.bf16.gmra.mrb[208].mxu1 %v11467_v11 }
 0x41d   : > { %v15399_v37 = vpack.c.bf16 %v6335_v6, %v6334_v26  ;;  %10453 = vmatprep.mubr.msk.bf16.mxu0 %vm4856_vm2, %v11468_v46  ;;  %v15405_v22 = vpack.c.bf16 %v6353_v55, %v6352_v48  ;;  %10460 = vmatprep.mubr.msk.bf16.mxu1 %vm4856_vm2, %v11468_v46 }
 0x41f   : > { %6901 = vmatprep.subr.bf16.mxu0 %v15399_v37  ;;  %7163 = vmatprep.subr.bf16.mxu1 %v15399_v37  ;;  %v5376_v12 = vpop.f32.mrb[104].mxu0  ;;  %v5469_v3 = vpop.f32.mrb[104].mxu1 }
 0x420   : > { %6902 = vmatpush1.bf16.msra.mxu0 %v15300_v18  ;;  %7164 = vmatpush1.bf16.msra.mxu1 %v15300_v18  ;;  %v5378_v33 = vpop.f32.mrb[105].mxu0  ;;  %v5471_v63 = vpop.f32.mrb[105].mxu1 }
 0x421   : > { %6903 = vmatprep.subr.bf16.mxu0 %v15405_v22  ;;  %7165 = vmatprep.subr.bf16.mxu1 %v15405_v22  ;;  %v6336_v19 = vadd.f32 %v5378_v33, %v5376_v12  ;;  %v5380_v57 = vpop.f32.mrb[106].mxu0  ;;  %v6354_v27 = vadd.f32 %v5471_v63, %v5469_v3  ;;  %v5473_v21 = vpop.f32.mrb[106].mxu1 }
 0x422   : > { %v5382_v59 = vpop.f32.mrb[107].mxu0  ;;  %v5475_v30 = vpop.f32.mrb[107].mxu1 }
 0x423   : > { %v6337_v17 = vadd.f32 %v5382_v59, %v5380_v57  ;;  %v6355_v18 = vadd.f32 %v5475_v30, %v5473_v21 }
 0x424   : > { %6904 = vmatpush1.bf16.msra.mxu0 %v15399_v37  ;;  %7166 = vmatpush1.bf16.msra.mxu1 %v15399_v37 }
 0x425   : > { %6905 = vmatprep.subr.bf16.mxu0 %v15190_v10  ;;  %v15417_v41 = vpack.c.bf16 %v6337_v17, %v6336_v19  ;;  %6149 = vmatmul.mubr.bf16.gmra.mrb[212].mxu0 %v11469_v5  ;;  %v15422_v53 = vpack.c.bf16 %v6355_v18, %v6354_v27 }
 0x426   : > { %10454 = vmatprep.mubr.msk.bf16.mxu0 %vm4856_vm2, %v15020_v47  ;;  %6242 = vmatmul.mubr.bf16.gmra.mrb[212].mxu1 %v11469_v5 }
 0x427   : > { %v5386_v45 = vpop.f32.mrb[108].mxu0  ;;  %10461 = vmatprep.mubr.msk.bf16.mxu1 %vm4856_vm2, %v15020_v47  ;;  %v5479_v35 = vpop.f32.mrb[108].mxu1 }
 0x428   : > { %6906 = vmatpush1.bf16.msra.mxu0 %v6275_v34  ;;  %v5388_v23 = vpop.f32.mrb[109].mxu0  ;;  %v5481_v51 = vpop.f32.mrb[109].mxu1 }
 0x429   : > { %6907 = vmatprep.subr.bf16.mxu0 %v15324_v36  ;;  %v6338_v9 = vadd.f32 %v5388_v23, %v5386_v45  ;;  %v5390_v26 = vpop.f32.mrb[110].mxu0  ;;  %v6356_v48 = vadd.f32 %v5481_v51, %v5479_v35  ;;  %v5483_v1 = vpop.f32.mrb[110].mxu1 }
 0x42a   : > { %v5392_v20 = vpop.f32.mrb[111].mxu0  ;;  %v5485_v47 = vpop.f32.mrb[111].mxu1 }
 0x42b   : > { %v6339_v6 = vadd.f32 %v5392_v20, %v5390_v26  ;;  %v6357_v32 = vadd.f32 %v5485_v47, %v5483_v1 }
 0x42c   : > { %6908 = vmatpush1.bf16.msra.mxu0 %v15190_v10 }
 0x42d   : > { %6909 = vmatprep.subr.bf16.mxu0 %v15326_v42  ;;  %v15437_v61 = vpack.c.bf16 %v6339_v6, %v6338_v9  ;;  %6159 = vmatmul.mubr.bf16.gmra.mrb[216].mxu0 %v15048_v60  ;;  %v15440_v34 = vpack.c.bf16 %v6357_v32, %v6356_v48 }
 0x42e   : > { %6927 = vmatprep.mubr.bf16.mxu0 %v11275_v2  ;;  %6252 = vmatmul.mubr.bf16.gmra.mrb[216].mxu1 %v15048_v60 }
 0x42f   : > { %v5396_v39 = vpop.f32.mrb[112].mxu0  ;;  %7193 = vmatprep.mubr.bf16.mxu1 %v11275_v2  ;;  %v5489_v11 = vpop.f32.mrb[112].mxu1 }
 0x430   : > { %6910 = vmatpush1.bf16.msra.mxu0 %v15324_v36  ;;  %v5398_v55 = vpop.f32.mrb[113].mxu0  ;;  %v5491_v12 = vpop.f32.mrb[113].mxu1 }
 0x431   : > { %6911 = vmatprep.subr.bf16.mxu0 %v15417_v41  ;;  %v6340_v10 = vadd.f32 %v5398_v55, %v5396_v39  ;;  %v5400_v46 = vpop.f32.mrb[114].mxu0  ;;  %v6358_v3 = vadd.f32 %v5491_v12, %v5489_v11  ;;  %v5493_v19 = vpop.f32.mrb[114].mxu1 }
 0x432   : > { %v5402_v33 = vpop.f32.mrb[115].mxu0  ;;  %v5495_v63 = vpop.f32.mrb[115].mxu1 }
 0x433   : > { %v6341_v57 = vadd.f32 %v5402_v33, %v5400_v46  ;;  %v6359_v59 = vadd.f32 %v5495_v63, %v5493_v19 }
 0x434   : > { %6912 = vmatpush1.bf16.msra.mxu0 %v15326_v42 }
 0x435   : > { %6913 = vmatprep.subr.bf16.mxu0 %v15422_v53  ;;  %v15447_v60 = vpack.c.bf16 %v6341_v57, %v6340_v10  ;;  %v15449_v27 = vpack.c.bf16 %v6359_v59, %v6358_v3 }
 0x437   : > { %v5406_v21 = vpop.f32.mrb[116].mxu0  ;;  %v5499_v30 = vpop.f32.mrb[116].mxu1 }
 0x438   : > { %6914 = vmatpush1.bf16.msra.mxu0 %v15417_v41  ;;  %v5408_v17 = vpop.f32.mrb[117].mxu0  ;;  %v5501_v45 = vpop.f32.mrb[117].mxu1 }
 0x439   : > { %6915 = vmatprep.subr.bf16.mxu0 %v15212_v49  ;;  %v6342_v18 = vadd.f32 %v5408_v17, %v5406_v21  ;;  %v5410_v5 = vpop.f32.mrb[118].mxu0  ;;  %v6360_v35 = vadd.f32 %v5501_v45, %v5499_v30  ;;  %v5503_v9 = vpop.f32.mrb[118].mxu1 }
 0x43a   : > { %v5412_v23 = vpop.f32.mrb[119].mxu0  ;;  %v5505_v51 = vpop.f32.mrb[119].mxu1 }
 0x43b   : > { %v6343_v26 = vadd.f32 %v5412_v23, %v5410_v5  ;;  %v6361_v20 = vadd.f32 %v5505_v51, %v5503_v9  ;;  %v15481_v9 = vld [vmem:[%s17176_s4] ss:$16 sps:$4 sm:$0xff]  }
 0x43c   : > { %6916 = vmatpush1.bf16.msra.mxu0 %v6276_v56 }
 0x43d   : > { %6917 = vmatprep.subr.bf16.mxu0 %v15343_v14  ;;  %v15457_v48 = vpack.c.bf16 %v6343_v26, %v6342_v18  ;;  %v15459_v1 = vpack.c.bf16 %v6361_v20, %v6360_v35 }
 0x43f   : > { %v5416_v2 = vpop.f32.mrb[120].mxu0  ;;  %v5509_v47 = vpop.f32.mrb[120].mxu1 }
 0x440   : > { %6918 = vmatpush1.bf16.msra.mxu0 %v15212_v49  ;;  %v5418_v6 = vpop.f32.mrb[121].mxu0  ;;  %v5511_v55 = vpop.f32.mrb[121].mxu1 }
 0x441   : > { %6919 = vmatprep.subr.bf16.mxu0 %v15345_v31  ;;  %v6344_v32 = vadd.f32 %v5418_v6, %v5416_v2  ;;  %v5420_v39 = vpop.f32.mrb[122].mxu0  ;;  %v6362_v62 = vadd.f32 %v5511_v55, %v5509_v47  ;;  %v5513_v13 = vpop.f32.mrb[122].mxu1 }
 0x442   : > { %v5422_v11 = vpop.f32.mrb[123].mxu0  ;;  %v5515_v10 = vpop.f32.mrb[123].mxu1 }
 0x443   : > { %v6345_v56 = vadd.f32 %v5422_v11, %v5420_v39  ;;  %v6363_v46 = vadd.f32 %v5515_v10, %v5513_v13 }
 0x444   : > { %6920 = vmatpush1.bf16.msra.mxu0 %v15343_v14 }
 0x445   : > { %6921 = vmatprep.subr.bf16.mxu0 %v15437_v61  ;;  %v15465_v12 = vpack.c.bf16 %v6345_v56, %v6344_v32  ;;  %v15467_v49 = vpack.c.bf16 %v6363_v46, %v6362_v62  ;;  %v15492_v32 = vld [vmem:[%s17176_s4 + $0x24] ss:$16 sps:$4 sm:$0xff]   ;;  %v15507_v56 = vld [vmem:[%s17176_s4 + $0x20] ss:$16 sps:$4 sm:$0xff]  }
 0x447   : > { %17792 = vst [vmem:[#allocation6_spill] sm:$0xff] %v15465_v12  ;;  %v5552_v33 = vpop.f32.mrb[124].mxu0  ;;  %v5645_v19 = vpop.f32.mrb[124].mxu1 }
 0x448   : > { %v5554_v3 = vpop.f32.mrb[125].mxu0  ;;  %6922 = vmatpush1.bf16.msra.mxu0 %v15345_v31  ;;  %v5647_v59 = vpop.f32.mrb[125].mxu1 }
 0x449   : > { %v6370_v57 = vadd.f32 %v5554_v3, %v5552_v33  ;;  %v5556_v63 = vpop.f32.mrb[126].mxu0  ;;  %6923 = vmatprep.subr.bf16.mxu0 %v15440_v34  ;;  %v6388_v17 = vadd.f32 %v5647_v59, %v5645_v19  ;;  %v5649_v30 = vpop.f32.mrb[126].mxu1 }
 0x44a   : > { %v5558_v21 = vpop.f32.mrb[127].mxu0  ;;  %v5651_v5 = vpop.f32.mrb[127].mxu1 }
 0x44b   : > { %v6371_v18 = vadd.f32 %v5558_v21, %v5556_v63  ;;  %v6389_v45 = vadd.f32 %v5651_v5, %v5649_v30 }
 0x44c   : > { %6924 = vmatpush1.bf16.msra.mxu0 %v15437_v61 }
 0x44d   : > { %v15472_v23 = vpack.c.bf16 %v6371_v18, %v6370_v57  ;;  %6925 = vmatprep.subr.bf16.mxu0 %v15235_v15  ;;  %v15475_v35 = vpack.c.bf16 %v6389_v45, %v6388_v17  ;;  %v15516_v57 = vld [vmem:[%s17176_s4 + $0x44] ss:$16 sps:$4 sm:$0xff]   ;;  %v15531_v45 = vld [vmem:[%s17176_s4 + $0x40] ss:$16 sps:$4 sm:$0xff]  }
 0x44f   : > { %7167 = vmatprep.subr.bf16.mxu1 %v15472_v23  ;;  %v5562_v26 = vpop.f32.mrb[128].mxu0  ;;  %v5655_v20 = vpop.f32.mrb[128].mxu1 }
 0x450   : > { %6926 = vmatpush1.bf16.msra.mxu0 %v6277_v4  ;;  %7168 = vmatpush1.bf16.msra.mxu1 %v15405_v22  ;;  %v5564_v51 = vpop.f32.mrb[129].mxu0  ;;  %v5657_v47 = vpop.f32.mrb[129].mxu1 }
 0x451   : > { %7028 = vmatprep.subr.bf16.mxu0 %v15359_v43  ;;  %7169 = vmatprep.subr.bf16.mxu1 %v15475_v35  ;;  %v6372_v2 = vadd.f32 %v5564_v51, %v5562_v26  ;;  %v5566_v6 = vpop.f32.mrb[130].mxu0  ;;  %v6390_v55 = vadd.f32 %v5657_v47, %v5655_v20  ;;  %v5659_v40 = vpop.f32.mrb[130].mxu1  ;;  %v15540_v47 = vld [vmem:[%s17176_s4 + $0x64] ss:$16 sps:$4 sm:$0xff]  }
 0x452   : > { %v5568_v39 = vpop.f32.mrb[131].mxu0  ;;  %v5661_v4 = vpop.f32.mrb[131].mxu1 }
 0x453   : > { %6928 = vmatmul.mubr.bf16.vlgmr.msra.gmra.mrb[220].mxu0 %v15481_v9  ;;  %v6373_v38 = vadd.f32 %v5568_v39, %v5566_v6  ;;  %v6391_v11 = vadd.f32 %v5661_v4, %v5659_v40 }
 0x454   : > { %7029 = vmatpush1.bf16.msra.mxu0 %v15235_v15  ;;  %7170 = vmatpush1.bf16.msra.mxu1 %v15472_v23 }
 0x455   : > { %7030 = vmatprep.subr.bf16.mxu0 %v15361_v28  ;;  %7171 = vmatprep.subr.bf16.mxu1 %v15326_v42  ;;  %v15499_v62 = vpack.c.bf16 %v6373_v38, %v6372_v2  ;;  %v15502_v13 = vpack.c.bf16 %v6391_v11, %v6390_v55 }
 0x456   : > { %6937 = vmatprep.mubr.bf16.mxu0 %v15492_v32 }
 0x457   : > { %v5572_v10 = vpop.f32.mrb[132].mxu0  ;;  %v5665_v46 = vpop.f32.mrb[132].mxu1 }
 0x458   : > { %7031 = vmatpush1.bf16.msra.mxu0 %v15359_v43  ;;  %7172 = vmatpush1.bf16.msra.mxu1 %v15324_v36  ;;  %v5574_v15 = vpop.f32.mrb[133].mxu0  ;;  %v5667_v19 = vpop.f32.mrb[133].mxu1 }
 0x459   : > { %7032 = vmatprep.subr.bf16.mxu0 %v15447_v60  ;;  %7173 = vmatprep.subr.bf16.mxu1 %v15417_v41  ;;  %v6374_v33 = vadd.f32 %v5574_v15, %v5572_v10  ;;  %v5576_v3 = vpop.f32.mrb[134].mxu0  ;;  %v6392_v59 = vadd.f32 %v5667_v19, %v5665_v46  ;;  %v5669_v21 = vpop.f32.mrb[134].mxu1  ;;  %v15557_v46 = vld [vmem:[%s17176_s4 + $0x60] ss:$16 sps:$4 sm:$0xff]  }
 0x45a   : > { %v5578_v63 = vpop.f32.mrb[135].mxu0  ;;  %v5671_v17 = vpop.f32.mrb[135].mxu1 }
 0x45b   : > { %6938 = vmatmul.mubr.bf16.gmra.mrb[224].mxu0 %v15507_v56  ;;  %v6375_v36 = vadd.f32 %v5578_v63, %v5576_v3  ;;  %v6393_v30 = vadd.f32 %v5671_v17, %v5669_v21  ;;  %v15566_v63 = vld [vmem:[%s17176_s4 + $0x84] ss:$16 sps:$4 sm:$0xff]  }
 0x45c   : > { %7033 = vmatpush1.bf16.msra.mxu0 %v15361_v28  ;;  %7174 = vmatpush1.bf16.msra.mxu1 %v15326_v42 }
 0x45d   : > { %7175 = vmatprep.subr.bf16.mxu1 %v15422_v53  ;;  %7034 = vmatprep.subr.bf16.mxu0 %v15449_v27  ;;  %v15523_v18 = vpack.c.bf16 %v6375_v36, %v6374_v33  ;;  %v15526_v5 = vpack.c.bf16 %v6393_v30, %v6392_v59 }
 0x45e   : > { %6947 = vmatprep.mubr.bf16.mxu0 %v15516_v57 }
 0x45f   : > { %v5582_v26 = vpop.f32.mrb[136].mxu0  ;;  %v5675_v51 = vpop.f32.mrb[136].mxu1 }
 0x460   : > { %7035 = vmatpush1.bf16.msra.mxu0 %v15447_v60  ;;  %7176 = vmatpush1.bf16.msra.mxu1 %v15417_v41  ;;  %v5584_v42 = vpop.f32.mrb[137].mxu0  ;;  %v5677_v6 = vpop.f32.mrb[137].mxu1 }
 0x461   : > { %7036 = vmatprep.subr.bf16.mxu0 %v15262_v58  ;;  %7177 = vmatprep.subr.bf16.mxu1 %v15499_v62  ;;  %v6376_v20 = vadd.f32 %v5584_v42, %v5582_v26  ;;  %v5586_v2 = vpop.f32.mrb[138].mxu0  ;;  %v6394_v55 = vadd.f32 %v5677_v6, %v5675_v51  ;;  %v5679_v40 = vpop.f32.mrb[138].mxu1  ;;  %v15581_v51 = vld [vmem:[%s17176_s4 + $0x80] ss:$16 sps:$4 sm:$0xff]  }
 0x462   : > { %v5588_v39 = vpop.f32.mrb[139].mxu0  ;;  %v5681_v4 = vpop.f32.mrb[139].mxu1 }
 0x463   : > { %6948 = vmatmul.mubr.bf16.gmra.mrb[228].mxu0 %v15531_v45  ;;  %v6377_v38 = vadd.f32 %v5588_v39, %v5586_v2  ;;  %v6395_v11 = vadd.f32 %v5681_v4, %v5679_v40  ;;  %v15590_v40 = vld [vmem:[%s17176_s4 + $0xa4] ss:$16 sps:$4 sm:$0xff]  }
 0x464   : > { %7037 = vmatpush1.bf16.msra.mxu0 %v6278_v16  ;;  %7178 = vmatpush1.bf16.msra.mxu1 %v15422_v53 }
 0x465   : > { %7038 = vmatprep.subr.bf16.mxu0 %v15379_v25  ;;  %7179 = vmatprep.subr.bf16.mxu1 %v15502_v13  ;;  %v15549_v10 = vpack.c.bf16 %v6377_v38, %v6376_v20  ;;  %v15552_v15 = vpack.c.bf16 %v6395_v11, %v6394_v55 }
 0x466   : > { %6957 = vmatprep.mubr.bf16.mxu0 %v15540_v47 }
 0x467   : > { %v5592_v29 = vpop.f32.mrb[140].mxu0  ;;  %v5685_v16 = vpop.f32.mrb[140].mxu1 }
 0x468   : > { %7039 = vmatpush1.bf16.msra.mxu0 %v15262_v58  ;;  %7180 = vmatpush1.bf16.msra.mxu1 %v15499_v62  ;;  %v5594_v8 = vpop.f32.mrb[141].mxu0  ;;  %v5687_v19 = vpop.f32.mrb[141].mxu1 }
 0x469   : > { %7040 = vmatprep.subr.bf16.mxu0 %v15381_v52  ;;  %7181 = vmatprep.subr.bf16.mxu1 %v15345_v31  ;;  %v6378_v33 = vadd.f32 %v5594_v8, %v5592_v29  ;;  %v5596_v3 = vpop.f32.mrb[142].mxu0  ;;  %v6396_v21 = vadd.f32 %v5687_v19, %v5685_v16  ;;  %v5689_v36 = vpop.f32.mrb[142].mxu1 }
 0x46a   : > { %v5598_v59 = vpop.f32.mrb[143].mxu0  ;;  %v5691_v17 = vpop.f32.mrb[143].mxu1 }
 0x46b   : > { %6958 = vmatmul.mubr.bf16.gmra.mrb[232].mxu0 %v15557_v46  ;;  %v6379_v58 = vadd.f32 %v5598_v59, %v5596_v3  ;;  %v6397_v30 = vadd.f32 %v5691_v17, %v5689_v36  ;;  %v15605_v3 = vld [vmem:[%s17176_s4 + $0xa0] ss:$16 sps:$4 sm:$0xff]  }
 0x46c   : > { %7041 = vmatpush1.bf16.msra.mxu0 %v15379_v25  ;;  %7182 = vmatpush1.bf16.msra.mxu1 %v15343_v14  ;;  %17795 = vst [vmem:[#allocation114_spill] sm:$0xff] %v15605_v3 }
 0x46d   : > { %7042 = vmatprep.subr.bf16.mxu0 %v15457_v48  ;;  %7183 = vmatprep.subr.bf16.mxu1 %v15437_v61  ;;  %v15573_v26 = vpack.c.bf16 %v6379_v58, %v6378_v33  ;;  %v15576_v42 = vpack.c.bf16 %v6397_v30, %v6396_v21  ;;  %v15616_v30 = vld [vmem:[%s17176_s4 + $0xc4] ss:$16 sps:$4 sm:$0xff]  }
 0x46e   : > { %6967 = vmatprep.mubr.bf16.mxu0 %v15566_v63  ;;  %17796 = vst [vmem:[#allocation115_spill] sm:$0xff] %v15616_v30 }
 0x46f   : > { %v5602_v20 = vpop.f32.mrb[144].mxu0  ;;  %v5695_v2 = vpop.f32.mrb[144].mxu1 }
 0x470   : > { %7043 = vmatpush1.bf16.msra.mxu0 %v15381_v52  ;;  %7184 = vmatpush1.bf16.msra.mxu1 %v15345_v31  ;;  %v5604_v14 = vpop.f32.mrb[145].mxu0  ;;  %v5697_v55 = vpop.f32.mrb[145].mxu1 }
 0x471   : > { %7185 = vmatprep.subr.bf16.mxu1 %v15440_v34  ;;  %7044 = vmatprep.subr.bf16.mxu0 %v15459_v1  ;;  %v6380_v6 = vadd.f32 %v5604_v14, %v5602_v20  ;;  %v5606_v39 = vpop.f32.mrb[146].mxu0  ;;  %v6398_v4 = vadd.f32 %v5697_v55, %v5695_v2  ;;  %v5699_v11 = vpop.f32.mrb[146].mxu1  ;;  %v15631_v55 = vld [vmem:[%s17176_s4 + $0xc0] ss:$16 sps:$4 sm:$0xff]  }
 0x472   : > { %v5608_v38 = vpop.f32.mrb[147].mxu0  ;;  %v5701_v29 = vpop.f32.mrb[147].mxu1  ;;  %17797 = vst [vmem:[#allocation120_spill] sm:$0xff] %v15631_v55 }
 0x473   : > { %6968 = vmatmul.mubr.bf16.gmra.mrb[236].mxu0 %v15581_v51  ;;  %v6381_v31 = vadd.f32 %v5608_v38, %v5606_v39  ;;  %v6399_v8 = vadd.f32 %v5701_v29, %v5699_v11 }
 0x474   : > { %7045 = vmatpush1.bf16.msra.mxu0 %v15457_v48  ;;  %7186 = vmatpush1.bf16.msra.mxu1 %v15437_v61 }
 0x475   : > { %7046 = vmatprep.subr.bf16.mxu0 %v15284_v0  ;;  %7187 = vmatprep.subr.bf16.mxu1 %v15523_v18  ;;  %v15597_v16 = vpack.c.bf16 %v6381_v31, %v6380_v6  ;;  %v15600_v33 = vpack.c.bf16 %v6399_v8, %v6398_v4  ;;  %v15640_v8 = vld [vmem:[%s17176_s4 + $0xe4] ss:$16 sps:$4 sm:$0xff]  }
 0x476   : > { %6977 = vmatprep.mubr.bf16.mxu0 %v15590_v40  ;;  %17798 = vst [vmem:[#allocation121_spill] sm:$0xff] %v15640_v8 }
 0x477   : > { %17793 = vst [vmem:[#allocation116_spill] sm:$0xff] %v15597_v16  ;;  %17794 = vst [vmem:[#allocation117_spill] sm:$0xff] %v15600_v33  ;;  %v5738_v19 = vpop.f32.mrb[148].mxu0  ;;  %v5831_v21 = vpop.f32.mrb[148].mxu1 }
 0x478   : > { %7047 = vmatpush1.bf16.msra.mxu0 %v6279_v24  ;;  %7188 = vmatpush1.bf16.msra.mxu1 %v15440_v34  ;;  %v5740_v59 = vpop.f32.mrb[149].mxu0  ;;  %v5833_v17 = vpop.f32.mrb[149].mxu1 }
 0x479   : > { %7048 = vmatprep.subr.bf16.mxu0 %v15391_v44  ;;  %7189 = vmatprep.subr.bf16.mxu1 %v15526_v5  ;;  %v6406_v36 = vadd.f32 %v5740_v59, %v5738_v19  ;;  %v5742_v58 = vpop.f32.mrb[150].mxu0  ;;  %v6424_v14 = vadd.f32 %v5833_v17, %v5831_v21  ;;  %v5835_v7 = vpop.f32.mrb[150].mxu1 }
 0x47a   : > { %v5744_v20 = vpop.f32.mrb[151].mxu0  ;;  %v5837_v24 = vpop.f32.mrb[151].mxu1 }
 0x47b   : > { %6978 = vmatmul.mubr.bf16.gmra.mrb[240].mxu0 %v15605_v3  ;;  %v6407_v50 = vadd.f32 %v5744_v20, %v5742_v58  ;;  %v6425_v2 = vadd.f32 %v5837_v24, %v5835_v7 }
 0x47c   : > { %7049 = vmatpush1.bf16.msra.mxu0 %v15284_v0  ;;  %7190 = vmatpush1.bf16.msra.mxu1 %v15523_v18 }
 0x47d   : > { %7050 = vmatprep.subr.bf16.mxu0 %v15393_v54  ;;  %7191 = vmatprep.subr.bf16.mxu1 %v15361_v28  ;;  %v15623_v6 = vpack.c.bf16 %v6407_v50, %v6406_v36  ;;  %v15626_v39 = vpack.c.bf16 %v6425_v2, %v6424_v14 }
 0x47e   : > { %6987 = vmatprep.mubr.bf16.mxu0 %v15616_v30 }
 0x47f   : > { %v5748_v38 = vpop.f32.mrb[152].mxu0  ;;  %v5841_v4 = vpop.f32.mrb[152].mxu1 }
 0x480   : > { %7051 = vmatpush1.bf16.msra.mxu0 %v15391_v44  ;;  %7192 = vmatpush1.bf16.msra.mxu1 %v15359_v43  ;;  %v5750_v0 = vpop.f32.mrb[153].mxu0  ;;  %v5843_v29 = vpop.f32.mrb[153].mxu1 }
 0x481   : > { %7052 = vmatprep.subr.bf16.mxu0 %v15465_v12  ;;  %7294 = vmatprep.subr.bf16.mxu1 %v15447_v60  ;;  %v6408_v11 = vadd.f32 %v5750_v0, %v5748_v38  ;;  %v5752_v31 = vpop.f32.mrb[154].mxu0  ;;  %v6426_v59 = vadd.f32 %v5843_v29, %v5841_v4  ;;  %v5845_v21 = vpop.f32.mrb[154].mxu1 }
 0x482   : > { %v5754_v19 = vpop.f32.mrb[155].mxu0  ;;  %v5847_v36 = vpop.f32.mrb[155].mxu1 }
 0x483   : > { %6988 = vmatmul.mubr.bf16.gmra.mrb[244].mxu0 %v15631_v55  ;;  %7194 = vmatmul.mubr.bf16.vlgmr.msra.gmra.mrb[220].mxu1 %v15481_v9  ;;  %v6409_v43 = vadd.f32 %v5754_v19, %v5752_v31  ;;  %v6427_v58 = vadd.f32 %v5847_v36, %v5845_v21  ;;  %v15657_v9 = vld [vmem:[%s17176_s4 + $0xe0] ss:$16 sps:$4 sm:$0xff]  }
 0x484   : > { %7053 = vmatpush1.bf16.msra.mxu0 %v15393_v54  ;;  %7295 = vmatpush1.bf16.msra.mxu1 %v15361_v28  ;;  %17799 = vst [vmem:[#allocation132_spill] sm:$0xff] %v15657_v9  ;;  %v15664_v28 = vld [vmem:[%s17176_s4 + $0x104] ss:$16 sps:$4 sm:$0xff]   ;;  %v15681_v21 = vld [vmem:[%s17176_s4 + $0x100] ss:$16 sps:$4 sm:$0xff]  }
 0x485   : > { %7054 = vmatprep.subr.bf16.mxu0 %v15467_v49  ;;  %7296 = vmatprep.subr.bf16.mxu1 %v15449_v27  ;;  %v15648_v17 = vpack.c.bf16 %v6409_v43, %v6408_v11  ;;  %v15652_v20 = vpack.c.bf16 %v6427_v58, %v6426_v59  ;;  %17800 = vst [vmem:[#allocation118_spill] sm:$0xff] %v15664_v28  ;;  %17801 = vst [vmem:[#allocation134_spill] sm:$0xff] %v15681_v21  ;;  %v15687_v43 = vld [vmem:[%s17176_s4 + $0x124] ss:$16 sps:$4 sm:$0xff]  }
 0x486   : > { %6997 = vmatprep.mubr.bf16.mxu0 %v15640_v8  ;;  %7203 = vmatprep.mubr.bf16.mxu1 %v15492_v32  ;;  %17802 = vst [vmem:[#allocation119_spill] sm:$0xff] %v15687_v43 }
 0x487   : > { %v5758_v14 = vpop.f32.mrb[156].mxu0  ;;  %v5851_v50 = vpop.f32.mrb[156].mxu1 }
 0x488   : > { %7055 = vmatpush1.bf16.msra.mxu0 %v15465_v12  ;;  %7297 = vmatpush1.bf16.msra.mxu1 %v15447_v60  ;;  %v5760_v7 = vpop.f32.mrb[157].mxu0  ;;  %v5853_v2 = vpop.f32.mrb[157].mxu1 }
 0x489   : > { %7298 = vmatprep.subr.bf16.mxu1 %v15549_v10  ;;  %7427 = vmatprep.subr.bf16.mxu0 %v15405_v22  ;;  %v6410_v32 = vadd.f32 %v5760_v7, %v5758_v14  ;;  %v5762_v24 = vpop.f32.mrb[158].mxu0  ;;  %v6428_v0 = vadd.f32 %v5853_v2, %v5851_v50  ;;  %v5855_v4 = vpop.f32.mrb[158].mxu1 }
 0x48a   : > { %v5764_v38 = vpop.f32.mrb[159].mxu0  ;;  %v5857_v31 = vpop.f32.mrb[159].mxu1 }
 0x48b   : > { %6998 = vmatmul.mubr.bf16.gmra.mrb[248].mxu0 %v15657_v9  ;;  %7204 = vmatmul.mubr.bf16.gmra.mrb[224].mxu1 %v15507_v56  ;;  %v6411_v11 = vadd.f32 %v5764_v38, %v5762_v24  ;;  %v6429_v29 = vadd.f32 %v5857_v31, %v5855_v4  ;;  %v15703_v31 = vld [vmem:[%s17176_s4 + $0x120] ss:$16 sps:$4 sm:$0xff]  }
 0x48c   : > { %7299 = vmatpush1.bf16.msra.mxu1 %v15449_v27  ;;  %7007 = vmatprep.mubr.bf16.mxu0 %v15664_v28 }
 0x48d   : > { %7300 = vmatprep.subr.bf16.mxu1 %v15552_v15  ;;  %7213 = vmatprep.mubr.bf16.mxu1 %v15516_v57  ;;  %v15674_v19 = vpack.c.bf16 %v6411_v11, %v6410_v32  ;;  %v15676_v59 = vpack.c.bf16 %v6429_v29, %v6428_v0 }
 0x48f   : > { %v5768_v56 = vpop.f32.mrb[160].mxu0  ;;  %v5861_v58 = vpop.f32.mrb[160].mxu1 }
 0x490   : > { %7301 = vmatpush1.bf16.msra.mxu1 %v15549_v10  ;;  %v5770_v36 = vpop.f32.mrb[161].mxu0  ;;  %v5863_v7 = vpop.f32.mrb[161].mxu1 }
 0x491   : > { %7302 = vmatprep.subr.bf16.mxu1 %v15381_v52  ;;  %v6412_v57 = vadd.f32 %v5770_v36, %v5768_v56  ;;  %v5772_v14 = vpop.f32.mrb[162].mxu0  ;;  %v6430_v32 = vadd.f32 %v5863_v7, %v5861_v58  ;;  %v5865_v24 = vpop.f32.mrb[162].mxu1 }
 0x492   : > { %v5774_v50 = vpop.f32.mrb[163].mxu0  ;;  %v5867_v38 = vpop.f32.mrb[163].mxu1 }
 0x493   : > { %7008 = vmatmul.mubr.bf16.gmra.mrb[252].mxu0 %v15681_v21  ;;  %7214 = vmatmul.mubr.bf16.gmra.mrb[228].mxu1 %v15531_v45  ;;  %v6413_v2 = vadd.f32 %v5774_v50, %v5772_v14  ;;  %v6431_v0 = vadd.f32 %v5867_v38, %v5865_v24 }
 0x494   : > { %7303 = vmatpush1.bf16.msra.mxu1 %v15379_v25  ;;  %7017 = vmatprep.mubr.bf16.mxu0 %v15687_v43  ;;  %v15709_v25 = vld [vmem:[%s17176_s4 + $0xc] ss:$16 sps:$4 sm:$0xff]  }
 0x495   : > { %7304 = vmatprep.subr.bf16.mxu1 %v15457_v48  ;;  %7223 = vmatprep.mubr.bf16.mxu1 %v15540_v47  ;;  %v15696_v4 = vpack.c.bf16 %v6413_v2, %v6412_v57  ;;  %v15698_v11 = vpack.c.bf16 %v6431_v0, %v6430_v32 }
 0x497   : > { %v5778_v29 = vpop.f32.mrb[164].mxu0  ;;  %v5871_v36 = vpop.f32.mrb[164].mxu1 }
 0x498   : > { %7305 = vmatpush1.bf16.msra.mxu1 %v15381_v52  ;;  %v5780_v56 = vpop.f32.mrb[165].mxu0  ;;  %v5873_v14 = vpop.f32.mrb[165].mxu1 }
 0x499   : > { %7306 = vmatprep.subr.bf16.mxu1 %v15459_v1  ;;  %v6414_v58 = vadd.f32 %v5780_v56, %v5778_v29  ;;  %v5782_v57 = vpop.f32.mrb[166].mxu0  ;;  %v6432_v50 = vadd.f32 %v5873_v14, %v5871_v36  ;;  %v5875_v32 = vpop.f32.mrb[166].mxu1  ;;  %v15726_v29 = vld [vmem:[%s17176_s4 + $0x8] ss:$16 sps:$4 sm:$0xff]  }
 0x49a   : > { %v5784_v7 = vpop.f32.mrb[167].mxu0  ;;  %v5877_v24 = vpop.f32.mrb[167].mxu1 }
 0x49b   : > { %7018 = vmatmul.mubr.bf16.gmra.mrb[0].mxu0 %v15703_v31  ;;  %7224 = vmatmul.mubr.bf16.gmra.mrb[232].mxu1 %v15557_v46  ;;  %v6415_v52 = vadd.f32 %v5784_v7, %v5782_v57  ;;  %v6433_v2 = vadd.f32 %v5877_v24, %v5875_v32 }
 0x49c   : > { %7307 = vmatpush1.bf16.msra.mxu1 %v15457_v48  ;;  %10502 = vmatprep.mubr.msk.bf16.mxu0 %vm6864_vm3, %v15709_v25 }
 0x49d   : > { %7308 = vmatprep.subr.bf16.mxu1 %v15573_v26  ;;  %7233 = vmatprep.mubr.bf16.mxu1 %v15566_v63  ;;  %v15719_v38 = vpack.c.bf16 %v6415_v52, %v6414_v58  ;;  %v15721_v0 = vpack.c.bf16 %v6433_v2, %v6432_v50  ;;  %v15733_v58 = vld [vmem:[%s17176_s4 + $0x2c] ss:$16 sps:$4 sm:$0xff]  }
 0x49f   : > { %17803 = vst [vmem:[#allocation124_spill] sm:$0xff] %v15721_v0  ;;  %v5788_v56 = vpop.f32.mrb[168].mxu0  ;;  %v5881_v57 = vpop.f32.mrb[168].mxu1 }
 0x4a0   : > { %7309 = vmatpush1.bf16.msra.mxu1 %v15459_v1  ;;  %v5790_v36 = vpop.f32.mrb[169].mxu0  ;;  %v5883_v32 = vpop.f32.mrb[169].mxu1 }
 0x4a1   : > { %7310 = vmatprep.subr.bf16.mxu1 %v15576_v42  ;;  %v6416_v14 = vadd.f32 %v5790_v36, %v5788_v56  ;;  %v5792_v7 = vpop.f32.mrb[170].mxu0  ;;  %v6434_v52 = vadd.f32 %v5883_v32, %v5881_v57  ;;  %v5885_v24 = vpop.f32.mrb[170].mxu1 }
 0x4a2   : > { %v5794_v50 = vpop.f32.mrb[171].mxu0  ;;  %v5887_v0 = vpop.f32.mrb[171].mxu1 }
 0x4a3   : > { %7061 = vmatmul.mubr.bf16.vlgmr.msra.gmra.mrb[220].mxu0 %v15726_v29  ;;  %7234 = vmatmul.mubr.bf16.gmra.mrb[236].mxu1 %v15581_v51  ;;  %v6417_v2 = vadd.f32 %v5794_v50, %v5792_v7  ;;  %v6435_v56 = vadd.f32 %v5887_v0, %v5885_v24  ;;  %v15760_v24 = vld [vmem:[%s17176_s4 + $0x4c] ss:$16 sps:$4 sm:$0xff]  }
 0x4a4   : > { %7428 = vmatpush1.bf16.msra.mxu0 %v15399_v37  ;;  %7311 = vmatpush1.bf16.msra.mxu1 %v15573_v26  ;;  %v15751_v37 = vld [vmem:[%s17176_s4 + $0x28] ss:$16 sps:$4 sm:$0xff]   ;;  %17806 = vst [vmem:[#allocation137_spill] sm:$0xff] %v15760_v24 }
 0x4a5   : > { %7429 = vmatprep.subr.bf16.mxu0 %v15472_v23  ;;  %7312 = vmatprep.subr.bf16.mxu1 %v15393_v54  ;;  %v15741_v36 = vpack.c.bf16 %v6417_v2, %v6416_v14  ;;  %v15746_v57 = vpack.c.bf16 %v6435_v56, %v6434_v52 }
 0x4a6   : > { %10503 = vmatprep.mubr.msk.bf16.mxu0 %vm6864_vm3, %v15733_v58  ;;  %7243 = vmatprep.mubr.bf16.mxu1 %v15590_v40 }
 0x4a7   : > { %17804 = vst [vmem:[#allocation135_spill] sm:$0xff] %v15741_v36  ;;  %17805 = vst [vmem:[#allocation125_spill] sm:$0xff] %v15746_v57  ;;  %v5924_v7 = vpop.f32.mrb[172].mxu0  ;;  %v6017_v14 = vpop.f32.mrb[172].mxu1 }
 0x4a8   : > { %7430 = vmatpush1.bf16.msra.mxu0 %v15405_v22  ;;  %7313 = vmatpush1.bf16.msra.mxu1 %v15391_v44  ;;  %v5926_v0 = vpop.f32.mrb[173].mxu0  ;;  %v6019_v52 = vpop.f32.mrb[173].mxu1 }
 0x4a9   : > { %7431 = vmatprep.subr.bf16.mxu0 %v15475_v35  ;;  %7314 = vmatprep.subr.bf16.mxu1 %v15465_v12  ;;  %v6442_v32 = vadd.f32 %v5926_v0, %v5924_v7  ;;  %v5928_v50 = vpop.f32.mrb[174].mxu0  ;;  %v6460_v56 = vadd.f32 %v6019_v52, %v6017_v14  ;;  %v6021_v57 = vpop.f32.mrb[174].mxu1 }
 0x4aa   : > { %v5930_v2 = vpop.f32.mrb[175].mxu0  ;;  %v6023_v22 = vpop.f32.mrb[175].mxu1 }
 0x4ab   : > { %7071 = vmatmul.mubr.bf16.gmra.mrb[224].mxu0 %v15751_v37  ;;  %7244 = vmatmul.mubr.bf16.gmra.mrb[240].mxu1 %v15605_v3  ;;  %v6443_v44 = vadd.f32 %v5930_v2, %v5928_v50  ;;  %v6461_v7 = vadd.f32 %v6023_v22, %v6021_v57  ;;  %v15778_v50 = vld [vmem:[%s17176_s4 + $0x48] ss:$16 sps:$4 sm:$0xff]  }
 0x4ac   : > { %7432 = vmatpush1.bf16.msra.mxu0 %v15472_v23  ;;  %7315 = vmatpush1.bf16.msra.mxu1 %v15393_v54  ;;  %17807 = vst [vmem:[#allocation122_spill] sm:$0xff] %v15778_v50 }
 0x4ad   : > { %7433 = vmatprep.subr.bf16.mxu0 %v15623_v6  ;;  %7316 = vmatprep.subr.bf16.mxu1 %v15467_v49  ;;  %v15768_v0 = vpack.c.bf16 %v6443_v44, %v6442_v32  ;;  %v15773_v14 = vpack.c.bf16 %v6461_v7, %v6460_v56  ;;  %v15787_v44 = vld [vmem:[%s17176_s4 + $0x6c] ss:$16 sps:$4 sm:$0xff]  }
 0x4ae   : > { %10504 = vmatprep.mubr.msk.bf16.mxu0 %vm6864_vm3, %v15760_v24  ;;  %7253 = vmatprep.mubr.bf16.mxu1 %v15616_v30  ;;  %17808 = vst [vmem:[#allocation123_spill] sm:$0xff] %v15787_v44 }
 0x4af   : > { %v5934_v54 = vpop.f32.mrb[176].mxu0  ;;  %v6027_v32 = vpop.f32.mrb[176].mxu1 }
 0x4b0   : > { %7434 = vmatpush1.bf16.msra.mxu0 %v15475_v35  ;;  %7317 = vmatpush1.bf16.msra.mxu1 %v15465_v12  ;;  %v5936_v57 = vpop.f32.mrb[177].mxu0  ;;  %v6029_v56 = vpop.f32.mrb[177].mxu1 }
 0x4b1   : > { %7318 = vmatprep.subr.bf16.mxu1 %v15597_v16  ;;  %7435 = vmatprep.subr.bf16.mxu0 %v15626_v39  ;;  %v6444_v52 = vadd.f32 %v5936_v57, %v5934_v54  ;;  %v5938_v2 = vpop.f32.mrb[178].mxu0  ;;  %v6462_v7 = vadd.f32 %v6029_v56, %v6027_v32  ;;  %v6031_v36 = vpop.f32.mrb[178].mxu1 }
 0x4b2   : > { %v5940_v22 = vpop.f32.mrb[179].mxu0  ;;  %v6033_v3 = vpop.f32.mrb[179].mxu1 }
 0x4b3   : > { %7081 = vmatmul.mubr.bf16.gmra.mrb[228].mxu0 %v15778_v50  ;;  %7254 = vmatmul.mubr.bf16.gmra.mrb[244].mxu1 %v15631_v55  ;;  %v6445_v30 = vadd.f32 %v5940_v22, %v5938_v2  ;;  %v6463_v54 = vadd.f32 %v6033_v3, %v6031_v36  ;;  %v15805_v2 = vld [vmem:[%s17176_s4 + $0x68] ss:$16 sps:$4 sm:$0xff]   ;;  %v15812_v3 = vld [vmem:[%s17176_s4 + $0x8c] ss:$16 sps:$4 sm:$0xff]  }
 0x4b4   : > { %7436 = vmatpush1.bf16.msra.mxu0 %v15623_v6  ;;  %7319 = vmatpush1.bf16.msra.mxu1 %v15467_v49 }
 0x4b5   : > { %7437 = vmatprep.subr.bf16.mxu0 %v15422_v53  ;;  %7320 = vmatprep.subr.bf16.mxu1 %v15600_v33  ;;  %v15795_v57 = vpack.c.bf16 %v6445_v30, %v6444_v52  ;;  %v15800_v32 = vpack.c.bf16 %v6463_v54, %v6462_v7 }
 0x4b6   : > { %10505 = vmatprep.mubr.msk.bf16.mxu0 %vm6864_vm3, %v15787_v44  ;;  %7263 = vmatprep.mubr.bf16.mxu1 %v15640_v8 }
 0x4b7   : > { %v5944_v56 = vpop.f32.mrb[180].mxu0  ;;  %v6037_v36 = vpop.f32.mrb[180].mxu1 }
 0x4b8   : > { %7438 = vmatpush1.bf16.msra.mxu0 %v15417_v41  ;;  %7321 = vmatpush1.bf16.msra.mxu1 %v15597_v16  ;;  %v5946_v30 = vpop.f32.mrb[181].mxu0  ;;  %v6039_v7 = vpop.f32.mrb[181].mxu1 }
 0x4b9   : > { %7439 = vmatprep.subr.bf16.mxu0 %v15499_v62  ;;  %7693 = vmatprep.subr.bf16.mxu1 %v15475_v35  ;;  %v6446_v52 = vadd.f32 %v5946_v30, %v5944_v56  ;;  %v5948_v22 = vpop.f32.mrb[182].mxu0  ;;  %v6464_v8 = vadd.f32 %v6039_v7, %v6037_v36  ;;  %v6041_v55 = vpop.f32.mrb[182].mxu1  ;;  %v15830_v36 = vld [vmem:[%s17176_s4 + $0x88] ss:$16 sps:$4 sm:$0xff]  }
 0x4ba   : > { %v5950_v54 = vpop.f32.mrb[183].mxu0  ;;  %v6043_v33 = vpop.f32.mrb[183].mxu1 }
 0x4bb   : > { %7091 = vmatmul.mubr.bf16.gmra.mrb[232].mxu0 %v15805_v2  ;;  %7264 = vmatmul.mubr.bf16.gmra.mrb[248].mxu1 %v15657_v9  ;;  %v6447_v41 = vadd.f32 %v5950_v54, %v5948_v22  ;;  %v6465_v16 = vadd.f32 %v6043_v33, %v6041_v55 }
 0x4bc   : > { %7440 = vmatpush1.bf16.msra.mxu0 %v15422_v53  ;;  %10506 = vmatprep.mubr.msk.bf16.mxu0 %vm6864_vm3, %v15812_v3  ;;  %v15836_v53 = vld [vmem:[%s17176_s4 + $0xac] ss:$16 sps:$4 sm:$0xff]  }
 0x4bd   : > { %7441 = vmatprep.subr.bf16.mxu0 %v15502_v13  ;;  %7273 = vmatprep.mubr.bf16.mxu1 %v15664_v28  ;;  %v15823_v56 = vpack.c.bf16 %v6447_v41, %v6446_v52  ;;  %v15825_v30 = vpack.c.bf16 %v6465_v16, %v6464_v8 }
 0x4bf   : > { %v5954_v22 = vpop.f32.mrb[184].mxu0  ;;  %v6047_v55 = vpop.f32.mrb[184].mxu1 }
 0x4c0   : > { %7442 = vmatpush1.bf16.msra.mxu0 %v15499_v62  ;;  %v5956_v33 = vpop.f32.mrb[185].mxu0  ;;  %v6049_v8 = vpop.f32.mrb[185].mxu1 }
 0x4c1   : > { %7443 = vmatprep.subr.bf16.mxu0 %v15648_v17  ;;  %v6448_v52 = vadd.f32 %v5956_v33, %v5954_v22  ;;  %v5958_v16 = vpop.f32.mrb[186].mxu0  ;;  %v6466_v54 = vadd.f32 %v6049_v8, %v6047_v55  ;;  %v6051_v41 = vpop.f32.mrb[186].mxu1  ;;  %v15853_v55 = vld [vmem:[%s17176_s4 + $0xa8] ss:$16 sps:$4 sm:$0xff]  }
 0x4c2   : > { %v5960_v7 = vpop.f32.mrb[187].mxu0  ;;  %v6053_v9 = vpop.f32.mrb[187].mxu1 }
 0x4c3   : > { %7101 = vmatmul.mubr.bf16.gmra.mrb[236].mxu0 %v15830_v36  ;;  %7274 = vmatmul.mubr.bf16.gmra.mrb[252].mxu1 %v15681_v21  ;;  %v6449_v28 = vadd.f32 %v5960_v7, %v5958_v16  ;;  %v6467_v12 = vadd.f32 %v6053_v9, %v6051_v41  ;;  %v15859_v9 = vld [vmem:[%s17176_s4 + $0xcc] ss:$16 sps:$4 sm:$0xff]  }
 0x4c4   : > { %7444 = vmatpush1.bf16.msra.mxu0 %v15502_v13  ;;  %10507 = vmatprep.mubr.msk.bf16.mxu0 %vm6864_vm3, %v15836_v53 }
 0x4c5   : > { %7445 = vmatprep.subr.bf16.mxu0 %v15652_v20  ;;  %7283 = vmatprep.mubr.bf16.mxu1 %v15687_v43  ;;  %v15846_v22 = vpack.c.bf16 %v6449_v28, %v6448_v52  ;;  %v15848_v33 = vpack.c.bf16 %v6467_v12, %v6466_v54 }
 0x4c7   : > { %17809 = vst [vmem:[#allocation128_spill] sm:$0xff] %v15846_v22  ;;  %17810 = vst [vmem:[#allocation129_spill] sm:$0xff] %v15848_v33  ;;  %v5964_v16 = vpop.f32.mrb[188].mxu0  ;;  %v6057_v7 = vpop.f32.mrb[188].mxu1 }
 0x4c8   : > { %7446 = vmatpush1.bf16.msra.mxu0 %v15648_v17  ;;  %v5966_v8 = vpop.f32.mrb[189].mxu0  ;;  %v6059_v52 = vpop.f32.mrb[189].mxu1 }
 0x4c9   : > { %7447 = vmatprep.subr.bf16.mxu0 %v15440_v34  ;;  %v6450_v28 = vadd.f32 %v5966_v8, %v5964_v16  ;;  %v5968_v12 = vpop.f32.mrb[190].mxu0  ;;  %v6468_v41 = vadd.f32 %v6059_v52, %v6057_v7  ;;  %v6061_v43 = vpop.f32.mrb[190].mxu1  ;;  %v15877_v7 = vld [vmem:[%s17176_s4 + $0xc8] ss:$16 sps:$4 sm:$0xff]  }
 0x4ca   : > { %v5970_v54 = vpop.f32.mrb[191].mxu0  ;;  %v6063_v33 = vpop.f32.mrb[191].mxu1 }
 0x4cb   : > { %7111 = vmatmul.mubr.bf16.gmra.mrb[240].mxu0 %v15853_v55  ;;  %7284 = vmatmul.mubr.bf16.gmra.mrb[0].mxu1 %v15703_v31  ;;  %v6451_v21 = vadd.f32 %v5970_v54, %v5968_v12  ;;  %v6469_v22 = vadd.f32 %v6063_v33, %v6061_v43 }
 0x4cc   : > { %7448 = vmatpush1.bf16.msra.mxu0 %v15437_v61  ;;  %10508 = vmatprep.mubr.msk.bf16.mxu0 %vm6864_vm3, %v15859_v9 }
 0x4cd   : > { %7449 = vmatprep.subr.bf16.mxu0 %v15523_v18  ;;  %10512 = vmatprep.mubr.msk.bf16.mxu1 %vm6864_vm3, %v15709_v25  ;;  %v15870_v16 = vpack.c.bf16 %v6451_v21, %v6450_v28  ;;  %v15872_v8 = vpack.c.bf16 %v6469_v22, %v6468_v41  ;;  %v15884_v21 = vld [vmem:[%s17176_s4 + $0xec] ss:$16 sps:$4 sm:$0xff]  }
 0x4cf   : > { %17811 = vst [vmem:[#allocation126_spill] sm:$0xff] %v15872_v8  ;;  %v5974_v12 = vpop.f32.mrb[192].mxu0  ;;  %v6067_v52 = vpop.f32.mrb[192].mxu1 }
 0x4d0   : > { %7450 = vmatpush1.bf16.msra.mxu0 %v15440_v34  ;;  %v5976_v61 = vpop.f32.mrb[193].mxu0  ;;  %v6069_v54 = vpop.f32.mrb[193].mxu1 }
 0x4d1   : > { %7451 = vmatprep.subr.bf16.mxu0 %v15526_v5  ;;  %v6452_v43 = vadd.f32 %v5976_v61, %v5974_v12  ;;  %v5978_v33 = vpop.f32.mrb[194].mxu0  ;;  %v6470_v28 = vadd.f32 %v6069_v54, %v6067_v52  ;;  %v6071_v41 = vpop.f32.mrb[194].mxu1 }
 0x4d2   : > { %v5980_v22 = vpop.f32.mrb[195].mxu0  ;;  %v6073_v8 = vpop.f32.mrb[195].mxu1 }
 0x4d3   : > { %7121 = vmatmul.mubr.bf16.gmra.mrb[244].mxu0 %v15877_v7  ;;  %7327 = vmatmul.mubr.bf16.vlgmr.msra.gmra.mrb[220].mxu1 %v15726_v29  ;;  %v6453_v34 = vadd.f32 %v5980_v22, %v5978_v33  ;;  %v6471_v12 = vadd.f32 %v6073_v8, %v6071_v41  ;;  %v15903_v33 = vld [vmem:[%s17176_s4 + $0xe8] ss:$16 sps:$4 sm:$0xff]   ;;  %v15912_v41 = vld [vmem:[%s17176_s4 + $0x10c] ss:$16 sps:$4 sm:$0xff]  }
 0x4d4   : > { %7452 = vmatpush1.bf16.msra.mxu0 %v15523_v18  ;;  %7694 = vmatpush1.bf16.msra.mxu1 %v15472_v23 }
 0x4d5   : > { %7453 = vmatprep.subr.bf16.mxu0 %v15674_v19  ;;  %7695 = vmatprep.subr.bf16.mxu1 %v15623_v6  ;;  %v15892_v61 = vpack.c.bf16 %v6453_v34, %v6452_v43  ;;  %v15898_v52 = vpack.c.bf16 %v6471_v12, %v6470_v28 }
 0x4d6   : > { %10509 = vmatprep.mubr.msk.bf16.mxu0 %vm6864_vm3, %v15884_v21  ;;  %10513 = vmatprep.mubr.msk.bf16.mxu1 %vm6864_vm3, %v15733_v58 }
 0x4d7   : > { %17812 = vst [vmem:[#allocation127_spill] sm:$0xff] %v15892_v61  ;;  %17813 = vst [vmem:[#allocation133_spill] sm:$0xff] %v15898_v52  ;;  %v6110_v23 = vpop.f32.mrb[196].mxu0  ;;  %v6203_v43 = vpop.f32.mrb[196].mxu1 }
 0x4d8   : > { %7454 = vmatpush1.bf16.msra.mxu0 %v15526_v5  ;;  %7696 = vmatpush1.bf16.msra.mxu1 %v15475_v35  ;;  %v6112_v8 = vpop.f32.mrb[197].mxu0  ;;  %v6205_v28 = vpop.f32.mrb[197].mxu1 }
 0x4d9   : > { %7697 = vmatprep.subr.bf16.mxu1 %v15626_v39  ;;  %7455 = vmatprep.subr.bf16.mxu0 %v15676_v59  ;;  %v6478_v54 = vadd.f32 %v6112_v8, %v6110_v23  ;;  %v6114_v22 = vpop.f32.mrb[198].mxu0  ;;  %v15914_v12 = vadd.f32 %v6205_v28, %v6203_v43  ;;  %v6207_v52 = vpop.f32.mrb[198].mxu1 }
 0x4da   : > { %v6116_v34 = vpop.f32.mrb[199].mxu0  ;;  %v6209_v61 = vpop.f32.mrb[199].mxu1 }
 0x4db   : > { %17814 = vst [vmem:[#allocation136_spill] sm:$0xff] %v15914_v12  ;;  %7131 = vmatmul.mubr.bf16.gmra.mrb[248].mxu0 %v15903_v33  ;;  %7337 = vmatmul.mubr.bf16.gmra.mrb[224].mxu1 %v15751_v37  ;;  %v6479_v35 = vadd.f32 %v6116_v34, %v6114_v22  ;;  %v15920_v23 = vadd.f32 %v6209_v61, %v6207_v52  ;;  %v15935_v61 = vld [vmem:[%s17176_s4 + $0x108] ss:$16 sps:$4 sm:$0xff]  }
 0x4dc   : > { %7456 = vmatpush1.bf16.msra.mxu0 %v15674_v19  ;;  %7698 = vmatpush1.bf16.msra.mxu1 %v15623_v6 }
 0x4dd   : > { %17815 = vst [vmem:[#allocation130_spill] sm:$0xff] %v15920_v23  ;;  %7457 = vmatprep.subr.bf16.mxu0 %v15449_v27  ;;  %7699 = vmatprep.subr.bf16.mxu1 %v15768_v0  ;;  %v15924_v8 = vpack.c.bf16 %v6479_v35, %v6478_v54  ;;  %v15942_v54 = vld [vmem:[%s17176_s4 + $0x12c] ss:$16 sps:$4 sm:$0xff]  }
 0x4de   : > { %10510 = vmatprep.mubr.msk.bf16.mxu0 %vm6864_vm3, %v15912_v41  ;;  %10514 = vmatprep.mubr.msk.bf16.mxu1 %vm6864_vm3, %v15760_v24 }
 0x4df   : > { %17816 = vst [vmem:[#allocation131_spill] sm:$0xff] %v15924_v8  ;;  %v6120_v52 = vpop.f32.mrb[200].mxu0  ;;  %v6213_v35 = vpop.f32.mrb[200].mxu1 }
 0x4e0   : > { %7458 = vmatpush1.bf16.msra.mxu0 %v15447_v60  ;;  %7700 = vmatpush1.bf16.msra.mxu1 %v15626_v39  ;;  %v6122_v22 = vpop.f32.mrb[201].mxu0  ;;  %v6215_v12 = vpop.f32.mrb[201].mxu1 }
 0x4e1   : > { %7560 = vmatprep.subr.bf16.mxu0 %v15549_v10  ;;  %7701 = vmatprep.subr.bf16.mxu1 %v15773_v14  ;;  %v6480_v28 = vadd.f32 %v6122_v22, %v6120_v52  ;;  %v6124_v34 = vpop.f32.mrb[202].mxu0  ;;  %v15948_v23 = vadd.f32 %v6215_v12, %v6213_v35  ;;  %v6217_v24 = vpop.f32.mrb[202].mxu1  ;;  %v15963_v12 = vld [vmem:[%s17176_s4 + $0x128] ss:$16 sps:$4 sm:$0xff]  }
 0x4e2   : > { %v6126_v43 = vpop.f32.mrb[203].mxu0  ;;  %v6219_v8 = vpop.f32.mrb[203].mxu1 }
 0x4e3   : > { %7141 = vmatmul.mubr.bf16.gmra.mrb[252].mxu0 %v15935_v61  ;;  %7347 = vmatmul.mubr.bf16.gmra.mrb[228].mxu1 %v15778_v50  ;;  %v6481_v60 = vadd.f32 %v6126_v43, %v6124_v34  ;;  %17817 = vst [vmem:[#allocation138_spill] sm:$0xff] %v15948_v23  ;;  %v15958_v22 = vadd.f32 %v6219_v8, %v6217_v24  ;;  %v15989_v23 = vld [vmem:[%s17176_s4] ss:$16 sps:$4 sm:$0xff]  }
 0x4e4   : > { %7702 = vmatpush1.bf16.msra.mxu1 %v15768_v0  ;;  %10511 = vmatprep.mubr.msk.bf16.mxu0 %vm6864_vm3, %v15942_v54 }
 0x4e5   : > { %7703 = vmatprep.subr.bf16.mxu1 %v15502_v13  ;;  %10515 = vmatprep.mubr.msk.bf16.mxu1 %vm6864_vm3, %v15787_v44  ;;  %v15956_v52 = vpack.c.bf16 %v6481_v60, %v6480_v28 }
 0x4e7   : > { %v6130_v43 = vpop.f32.mrb[204].mxu0 }
 0x4e8   : > { %7704 = vmatpush1.bf16.msra.mxu1 %v15499_v62  ;;  %v6132_v35 = vpop.f32.mrb[205].mxu0  ;;  %v15978_v62 = vld [vmem:[%s17176_s4 + $0x4] ss:$16 sps:$4 sm:$0xff]  }
 0x4e9   : > { %7705 = vmatprep.subr.bf16.mxu1 %v15648_v17  ;;  %v6482_v50 = vadd.f32 %v6132_v35, %v6130_v43  ;;  %v6134_v44 = vpop.f32.mrb[206].mxu0  ;;  %v6223_v35 = vpop.f32.mrb[204].mxu1 }
 0x4ea   : > { %v6136_v28 = vpop.f32.mrb[207].mxu0  ;;  %v6225_v34 = vpop.f32.mrb[205].mxu1 }
 0x4eb   : > { %7151 = vmatmul.mubr.bf16.gmra.mrb[0].mxu0 %v15963_v12  ;;  %7357 = vmatmul.mubr.bf16.gmra.mrb[232].mxu1 %v15805_v2  ;;  %v6483_v24 = vadd.f32 %v6136_v28, %v6134_v44 }
 0x4ec   : > { %7706 = vmatpush1.bf16.msra.mxu1 %v15502_v13  ;;  %10516 = vmatprep.mubr.msk.bf16.mxu1 %vm6864_vm3, %v15812_v3 }
 0x4ed   : > { %7707 = vmatprep.subr.bf16.mxu1 %v15652_v20  ;;  %7459 = vmatprep.mubr.bf16.mxu0 %v15978_v62  ;;  %v15981_v8 = vpack.c.bf16 %v6483_v24, %v6482_v50  ;;  %v15992_v24 = vadd.f32 %v6225_v34, %v6223_v35  ;;  %v16005_v34 = vld [vmem:[%s17176_s4 + $0x24] ss:$16 sps:$4 sm:$0xff]  }
 0x4ef   : > { %17818 = vst [vmem:[#allocation139_spill] sm:$0xff] %v15981_v8  ;;  %v6140_v60 = vpop.f32.mrb[208].mxu0  ;;  %17819 = vst [vmem:[#allocation10_spill] sm:$0xff] %v15992_v24 }
 0x4f0   : > { %7708 = vmatpush1.bf16.msra.mxu1 %v15648_v17  ;;  %v6142_v44 = vpop.f32.mrb[209].mxu0 }
 0x4f1   : > { %7709 = vmatprep.subr.bf16.mxu1 %v15795_v57  ;;  %v6484_v13 = vadd.f32 %v6142_v44, %v6140_v60  ;;  %v6144_v43 = vpop.f32.mrb[210].mxu0  ;;  %v6227_v60 = vpop.f32.mrb[206].mxu1 }
 0x4f2   : > { %v6146_v28 = vpop.f32.mrb[211].mxu0  ;;  %v6229_v8 = vpop.f32.mrb[207].mxu1 }
 0x4f3   : > { %7367 = vmatmul.mubr.bf16.gmra.mrb[236].mxu1 %v15830_v36  ;;  %7460 = vmatmul.mubr.bf16.vlgmr.msra.gmra.mrb[4].mxu0 %v15989_v23  ;;  %v6485_v50 = vadd.f32 %v6146_v28, %v6144_v43 }
 0x4f4   : > { %7561 = vmatpush1.bf16.msra.mxu0 %v15449_v27  ;;  %7710 = vmatpush1.bf16.msra.mxu1 %v15652_v20  ;;  %v16008_v27 = vadd.f32 %v6229_v8, %v6227_v60  ;;  %v16020_v8 = vld [vmem:[%s17176_s4 + $0x20] ss:$16 sps:$4 sm:$0xff]  }
 0x4f5   : > { %7562 = vmatprep.subr.bf16.mxu0 %v15552_v15  ;;  %7711 = vmatprep.subr.bf16.mxu1 %v15800_v32  ;;  %v15998_v44 = vpack.c.bf16 %v6485_v50, %v6484_v13 }
 0x4f6   : > { %10517 = vmatprep.mubr.msk.bf16.mxu1 %vm6864_vm3, %v15836_v53  ;;  %7469 = vmatprep.mubr.bf16.mxu0 %v16005_v34 }
 0x4f7   : > { %17820 = vst [vmem:[#allocation11_spill] sm:$0xff] %v15998_v44 }
 0x4f8   : > { %7563 = vmatpush1.bf16.msra.mxu0 %v15549_v10  ;;  %7712 = vmatpush1.bf16.msra.mxu1 %v15795_v57  ;;  %v6150_v43 = vpop.f32.mrb[212].mxu0 }
 0x4f9   : > { %7564 = vmatprep.subr.bf16.mxu0 %v15696_v4  ;;  %7713 = vmatprep.subr.bf16.mxu1 %v15526_v5  ;;  %v6152_v35 = vpop.f32.mrb[213].mxu0 }
 0x4fa   : > { %v6486_v28 = vadd.f32 %v6152_v35, %v6150_v43  ;;  %v6154_v50 = vpop.f32.mrb[214].mxu0  ;;  %v16032_v43 = vld [vmem:[%s17176_s4 + $0x44] ss:$16 sps:$4 sm:$0xff]  }
 0x4fb   : > { %7377 = vmatmul.mubr.bf16.gmra.mrb[240].mxu1 %v15853_v55  ;;  %7470 = vmatmul.mubr.bf16.gmra.mrb[8].mxu0 %v16020_v8  ;;  %v6156_v60 = vpop.f32.mrb[215].mxu0 }
 0x4fc   : > { %7565 = vmatpush1.bf16.msra.mxu0 %v15552_v15  ;;  %7714 = vmatpush1.bf16.msra.mxu1 %v15523_v18  ;;  %v6487_v13 = vadd.f32 %v6156_v60, %v6154_v50 }
 0x4fd   : > { %7715 = vmatprep.subr.bf16.mxu1 %v15674_v19  ;;  %7566 = vmatprep.subr.bf16.mxu0 %v15698_v11 }
 0x4fe   : > { %10518 = vmatprep.mubr.msk.bf16.mxu1 %vm6864_vm3, %v15859_v9  ;;  %7479 = vmatprep.mubr.bf16.mxu0 %v16032_v43  ;;  %v16035_v35 = vpack.c.bf16 %v6487_v13, %v6486_v28 }
 0x500   : > { %7567 = vmatpush1.bf16.msra.mxu0 %v15696_v4  ;;  %7716 = vmatpush1.bf16.msra.mxu1 %v15526_v5  ;;  %v6160_v18 = vpop.f32.mrb[216].mxu0 }
 0x501   : > { %7568 = vmatprep.subr.bf16.mxu0 %v15459_v1  ;;  %7717 = vmatprep.subr.bf16.mxu1 %v15676_v59  ;;  %v6162_v50 = vpop.f32.mrb[217].mxu0 }
 0x502   : > { %v6488_v60 = vadd.f32 %v6162_v50, %v6160_v18  ;;  %v6164_v44 = vpop.f32.mrb[218].mxu0  ;;  %v16165_v18 = vld [vmem:[%s17176_s4 + $0x80] ss:$16 sps:$4 sm:$0xff]  }
 0x503   : > { %7387 = vmatmul.mubr.bf16.gmra.mrb[244].mxu1 %v15877_v7  ;;  %7480 = vmatmul.mubr.bf16.gmra.mrb[12].mxu0 %v15531_v45  ;;  %v6166_v24 = vpop.f32.mrb[219].mxu0  ;;  %v17823_v45 = vld [vmem:[#allocation6_spill] sm:$0xff]  ;;  %17842 = vst [vmem:[#allocation146_spill] sm:$0xff] %v16165_v18 }
 0x504   : > { %7569 = vmatpush1.bf16.msra.mxu0 %v15457_v48  ;;  %7718 = vmatpush1.bf16.msra.mxu1 %v15674_v19  ;;  %v6489_v13 = vadd.f32 %v6166_v24, %v6164_v44  ;;  %v17822_v48 = vld [vmem:[#allocation124_spill] sm:$0xff]  ;;  %v17826_v44 = vld [vmem:[#allocation115_spill] sm:$0xff] }
 0x505   : > { %7570 = vmatprep.subr.bf16.mxu0 %v15573_v26  ;;  %7719 = vmatprep.subr.bf16.mxu1 %v15823_v56 }
 0x506   : > { %10519 = vmatprep.mubr.msk.bf16.mxu1 %vm6864_vm3, %v15884_v21  ;;  %7489 = vmatprep.mubr.bf16.mxu0 %v15540_v47  ;;  %v16050_v5 = vpack.c.bf16 %v6489_v13, %v6488_v60  ;;  %v17824_v47 = vld [vmem:[#allocation116_spill] sm:$0xff]  ;;  %v17828_v60 = vld [vmem:[#allocation135_spill] sm:$0xff] }
 0x508   : > { %17821 = vst [vmem:[#allocation142_spill] sm:$0xff] %v16050_v5  ;;  %7571 = vmatpush1.bf16.msra.mxu0 %v15459_v1  ;;  %7720 = vmatpush1.bf16.msra.mxu1 %v15676_v59  ;;  %v6233_v1 = vpop.f32.mrb[208].mxu1 }
 0x509   : > { %7572 = vmatprep.subr.bf16.mxu0 %v15576_v42  ;;  %7721 = vmatprep.subr.bf16.mxu1 %v15825_v30 }
 0x50b   : > { %7397 = vmatmul.mubr.bf16.gmra.mrb[248].mxu1 %v15903_v33  ;;  %7490 = vmatmul.mubr.bf16.gmra.mrb[16].mxu0 %v15557_v46 }
 0x50c   : > { %7573 = vmatpush1.bf16.msra.mxu0 %v15573_v26  ;;  %7722 = vmatpush1.bf16.msra.mxu1 %v15823_v56 }
 0x50d   : > { %7574 = vmatprep.subr.bf16.mxu0 %v15719_v38  ;;  %7723 = vmatprep.subr.bf16.mxu1 %v15552_v15 }
 0x50e   : > { %10520 = vmatprep.mubr.msk.bf16.mxu1 %vm6864_vm3, %v15912_v41  ;;  %7499 = vmatprep.mubr.bf16.mxu0 %v15566_v63 }
 0x510   : > { %7575 = vmatpush1.bf16.msra.mxu0 %v15576_v42  ;;  %7724 = vmatpush1.bf16.msra.mxu1 %v15549_v10  ;;  %v6235_v10 = vpop.f32.mrb[209].mxu1 }
 0x511   : > { %7826 = vmatprep.subr.bf16.mxu1 %v15696_v4  ;;  %7576 = vmatprep.subr.bf16.mxu0 %v17822_v48  ;;  %v16078_v46 = vadd.f32 %v6235_v10, %v6233_v1  ;;  %v6237_v63 = vpop.f32.mrb[210].mxu1 }
 0x512   : > { %v6239_v24 = vpop.f32.mrb[211].mxu1 }
 0x513   : > { %7407 = vmatmul.mubr.bf16.gmra.mrb[252].mxu1 %v15935_v61  ;;  %7500 = vmatmul.mubr.bf16.gmra.mrb[20].mxu0 %v15581_v51  ;;  %v17825_v51 = vld [vmem:[#allocation114_spill] sm:$0xff]  ;;  %v16084_v28 = vadd.f32 %v6239_v24, %v6237_v63  ;;  %v6243_v50 = vpop.f32.mrb[212].mxu1 }
 0x514   : > { %7577 = vmatpush1.bf16.msra.mxu0 %v15719_v38  ;;  %10521 = vmatprep.mubr.msk.bf16.mxu1 %vm6864_vm3, %v15942_v54  ;;  %v6245_v13 = vpop.f32.mrb[213].mxu1 }
 0x515   : > { %7578 = vmatprep.subr.bf16.mxu0 %v15467_v49  ;;  %7509 = vmatprep.mubr.bf16.mxu0 %v15590_v40  ;;  %v17827_v40 = vld [vmem:[#allocation117_spill] sm:$0xff]  ;;  %v16092_v1 = vadd.f32 %v6245_v13, %v6243_v50 }
 0x516   : > { %v17832_v50 = vld [vmem:[#allocation121_spill] sm:$0xff] }
 0x517   : > { %17829 = vst [vmem:[#allocation143_spill] sm:$0xff] %v16092_v1  ;;  %v16213_v1 = vld [vmem:[%s17176_s4 + $0xc0] ss:$16 sps:$4 sm:$0xff]  }
 0x518   : > { %7579 = vmatpush1.bf16.msra.mxu0 %v17823_v45  ;;  %v17830_v45 = vld [vmem:[#allocation120_spill] sm:$0xff] }
 0x519   : > { %7580 = vmatprep.subr.bf16.mxu0 %v17824_v47 }
 0x51b   : > { %7417 = vmatmul.mubr.bf16.gmra.mrb[0].mxu1 %v15963_v12  ;;  %7510 = vmatmul.mubr.bf16.gmra.mrb[24].mxu0 %v17825_v51  ;;  %v17831_v51 = vld [vmem:[#allocation125_spill] sm:$0xff] }
 0x51c   : > { %7581 = vmatpush1.bf16.msra.mxu0 %v15467_v49  ;;  %7519 = vmatprep.mubr.bf16.mxu0 %v17826_v44  ;;  %v6247_v49 = vpop.f32.mrb[214].mxu1 }
 0x51d   : > { %7582 = vmatprep.subr.bf16.mxu0 %v17827_v40  ;;  %7725 = vmatprep.mubr.bf16.mxu1 %v15978_v62  ;;  %v6249_v10 = vpop.f32.mrb[215].mxu1 }
 0x51e   : > { %v6253_v63 = vpop.f32.mrb[216].mxu1  ;;  %v16100_v24 = vadd.f32 %v6249_v10, %v6247_v49  ;;  %v17835_v49 = vld [vmem:[#allocation128_spill] sm:$0xff]  ;;  %v17841_v10 = vld [vmem:[#allocation126_spill] sm:$0xff] }
 0x51f   : > { %v6255_v44 = vpop.f32.mrb[217].mxu1 }
 0x520   : > { %7583 = vmatpush1.bf16.msra.mxu0 %v17824_v47  ;;  %v16104_v13 = vadd.f32 %v6255_v44, %v6253_v63  ;;  %v17836_v63 = vld [vmem:[#allocation132_spill] sm:$0xff]  ;;  %v17837_v44 = vld [vmem:[#allocation118_spill] sm:$0xff] }
 0x521   : > { %7584 = vmatprep.subr.bf16.mxu0 %v17828_v60 }
 0x522   : > { %17833 = vst [vmem:[#allocation140_spill] sm:$0xff] %v16104_v13  ;;  %v16177_v13 = vld [vmem:[%s17176_s4 + $0xa4] ss:$16 sps:$4 sm:$0xff]  }
 0x523   : > { %7520 = vmatmul.mubr.bf16.gmra.mrb[28].mxu0 %v17830_v45  ;;  %7726 = vmatmul.mubr.bf16.vlgmr.msra.gmra.mrb[4].mxu1 %v15989_v23  ;;  %v6257_v45 = vpop.f32.mrb[218].mxu1  ;;  %17843 = vst [vmem:[#allocation147_spill] sm:$0xff] %v16177_v13 }
 0x524   : > { %7585 = vmatpush1.bf16.msra.mxu0 %v17827_v40  ;;  %7827 = vmatpush1.bf16.msra.mxu1 %v15552_v15  ;;  %v6259_v5 = vpop.f32.mrb[219].mxu1 }
 0x525   : > { %7586 = vmatprep.subr.bf16.mxu0 %v17831_v51  ;;  %7828 = vmatprep.subr.bf16.mxu1 %v15698_v11  ;;  %v16110_v15 = vadd.f32 %v6259_v5, %v6257_v45  ;;  %v17839_v5 = vld [vmem:[#allocation134_spill] sm:$0xff] }
 0x526   : > { %7529 = vmatprep.mubr.bf16.mxu0 %v17832_v50  ;;  %7735 = vmatprep.mubr.bf16.mxu1 %v16005_v34  ;;  %v17838_v50 = vld [vmem:[#allocation129_spill] sm:$0xff]  ;;  %v16128_v45 = vld [vmem:[%s17176_s4 + $0x40] ss:$16 sps:$4 sm:$0xff]  }
 0x527   : > { %17834 = vst [vmem:[#allocation141_spill] sm:$0xff] %v16110_v15  ;;  %v16200_v15 = vld [vmem:[%s17176_s4 + $0xc4] ss:$16 sps:$4 sm:$0xff]  }
 0x528   : > { %7587 = vmatpush1.bf16.msra.mxu0 %v17828_v60  ;;  %7829 = vmatpush1.bf16.msra.mxu1 %v15696_v4  ;;  %17847 = vst [vmem:[#allocation145_spill] sm:$0xff] %v16200_v15 }
 0x529   : > { %7830 = vmatprep.subr.bf16.mxu1 %v17835_v49  ;;  %7959 = vmatprep.subr.bf16.mxu0 %v15626_v39 }
 0x52b   : > { %7530 = vmatmul.mubr.bf16.gmra.mrb[32].mxu0 %v17836_v63  ;;  %7736 = vmatmul.mubr.bf16.gmra.mrb[8].mxu1 %v16020_v8  ;;  %v17840_v63 = vld [vmem:[#allocation119_spill] sm:$0xff] }
 0x52c   : > { %7831 = vmatpush1.bf16.msra.mxu1 %v15698_v11  ;;  %7539 = vmatprep.mubr.bf16.mxu0 %v17837_v44  ;;  %v16137_v44 = vld [vmem:[%s17176_s4 + $0x64] ss:$16 sps:$4 sm:$0xff]  }
 0x52d   : > { %7832 = vmatprep.subr.bf16.mxu1 %v17838_v50  ;;  %7745 = vmatprep.mubr.bf16.mxu1 %v16032_v43 }
 0x530   : > { %7833 = vmatpush1.bf16.msra.mxu1 %v17835_v49 }
 0x531   : > { %7834 = vmatprep.subr.bf16.mxu1 %v15576_v42 }
 0x533   : > { %7540 = vmatmul.mubr.bf16.gmra.mrb[36].mxu0 %v17839_v5  ;;  %7746 = vmatmul.mubr.bf16.gmra.mrb[12].mxu1 %v16128_v45 }
 0x534   : > { %7835 = vmatpush1.bf16.msra.mxu1 %v15573_v26  ;;  %7549 = vmatprep.mubr.bf16.mxu0 %v17840_v63  ;;  %v16146_v26 = vld [vmem:[%s17176_s4 + $0x60] ss:$16 sps:$4 sm:$0xff]  }
 0x535   : > { %7836 = vmatprep.subr.bf16.mxu1 %v15719_v38  ;;  %7755 = vmatprep.mubr.bf16.mxu1 %v16137_v44 }
 0x538   : > { %7837 = vmatpush1.bf16.msra.mxu1 %v15576_v42  ;;  %v16156_v42 = vld [vmem:[%s17176_s4 + $0x84] ss:$16 sps:$4 sm:$0xff]  }
 0x539   : > { %7838 = vmatprep.subr.bf16.mxu1 %v17822_v48 }
 0x53b   : > { %7550 = vmatmul.mubr.bf16.gmra.mrb[40].mxu0 %v15703_v31  ;;  %7756 = vmatmul.mubr.bf16.gmra.mrb[16].mxu1 %v16146_v26 }
 0x53c   : > { %7839 = vmatpush1.bf16.msra.mxu1 %v15719_v38  ;;  %10522 = vmatprep.mubr.msk.bf16.mxu0 %vm6864_vm3, %v15709_v25 }
 0x53d   : > { %7840 = vmatprep.subr.bf16.mxu1 %v15870_v16  ;;  %7765 = vmatprep.mubr.bf16.mxu1 %v16156_v42 }
 0x540   : > { %7841 = vmatpush1.bf16.msra.mxu1 %v17822_v48 }
 0x541   : > { %7842 = vmatprep.subr.bf16.mxu1 %v17841_v10 }
 0x543   : > { %7593 = vmatmul.mubr.bf16.vlgmr.msra.gmra.mrb[4].mxu0 %v15726_v29  ;;  %7766 = vmatmul.mubr.bf16.gmra.mrb[20].mxu1 %v16165_v18  ;;  %v17852_v18 = vld [vmem:[#allocation122_spill] sm:$0xff] }
 0x544   : > { %7843 = vmatpush1.bf16.msra.mxu1 %v15870_v16  ;;  %7960 = vmatpush1.bf16.msra.mxu0 %v15623_v6  ;;  %v16188_v6 = vld [vmem:[%s17176_s4 + $0xa0] ss:$16 sps:$4 sm:$0xff]  }
 0x545   : > { %7844 = vmatprep.subr.bf16.mxu1 %v17827_v40  ;;  %7961 = vmatprep.subr.bf16.mxu0 %v15768_v0  ;;  %17844 = vst [vmem:[#allocation144_spill] sm:$0xff] %v16188_v6 }
 0x546   : > { %10523 = vmatprep.mubr.msk.bf16.mxu0 %vm6864_vm3, %v15733_v58  ;;  %7775 = vmatprep.mubr.bf16.mxu1 %v16177_v13 }
 0x548   : > { %7845 = vmatpush1.bf16.msra.mxu1 %v17824_v47  ;;  %7962 = vmatpush1.bf16.msra.mxu0 %v15626_v39  ;;  %v17845_v39 = vld [vmem:[#allocation131_spill] sm:$0xff]  ;;  %v17846_v47 = vld [vmem:[#allocation137_spill] sm:$0xff] }
 0x549   : > { %7846 = vmatprep.subr.bf16.mxu1 %v17828_v60  ;;  %7963 = vmatprep.subr.bf16.mxu0 %v15773_v14 }
 0x54b   : > { %7603 = vmatmul.mubr.bf16.gmra.mrb[8].mxu0 %v15751_v37  ;;  %7776 = vmatmul.mubr.bf16.gmra.mrb[24].mxu1 %v16188_v6  ;;  %v17850_v6 = vld [vmem:[#allocation136_spill] sm:$0xff] }
 0x54c   : > { %7847 = vmatpush1.bf16.msra.mxu1 %v17827_v40  ;;  %7964 = vmatpush1.bf16.msra.mxu0 %v15768_v0  ;;  %v17848_v40 = vld [vmem:[#allocation127_spill] sm:$0xff]  ;;  %v17849_v0 = vld [vmem:[#allocation130_spill] sm:$0xff] }
 0x54d   : > { %7848 = vmatprep.subr.bf16.mxu1 %v17831_v51  ;;  %7965 = vmatprep.subr.bf16.mxu0 %v17845_v39  ;;  %v17851_v13 = vpack.c.bf16 %v17849_v0, %v17850_v6  ;;  %v16235_v6 = vld [vmem:[%s17176_s4 + $0xe0] ss:$16 sps:$4 sm:$0xff]  }
 0x54e   : > { %10524 = vmatprep.mubr.msk.bf16.mxu0 %vm6864_vm3, %v17846_v47  ;;  %7785 = vmatprep.mubr.bf16.mxu1 %v16200_v15  ;;  %v17854_v15 = vld [vmem:[#allocation123_spill] sm:$0xff] }
 0x550   : > { %7849 = vmatpush1.bf16.msra.mxu1 %v17828_v60  ;;  %7966 = vmatpush1.bf16.msra.mxu0 %v15773_v14  ;;  %v17853_v14 = vld [vmem:[#allocation133_spill] sm:$0xff] }
 0x551   : > { %7850 = vmatprep.subr.bf16.mxu1 %v17848_v40  ;;  %7967 = vmatprep.subr.bf16.mxu0 %v17851_v13  ;;  %v16225_v13 = vld [vmem:[%s17176_s4 + $0xe4] ss:$16 sps:$4 sm:$0xff]  }
 0x553   : > { %7613 = vmatmul.mubr.bf16.gmra.mrb[12].mxu0 %v17852_v18  ;;  %7786 = vmatmul.mubr.bf16.gmra.mrb[28].mxu1 %v16213_v1 }
 0x554   : > { %7851 = vmatpush1.bf16.msra.mxu1 %v17831_v51  ;;  %7968 = vmatpush1.bf16.msra.mxu0 %v17845_v39 }
 0x555   : > { %7852 = vmatprep.subr.bf16.mxu1 %v17853_v14  ;;  %7969 = vmatprep.subr.bf16.mxu0 %v15652_v20 }
 0x556   : > { %10525 = vmatprep.mubr.msk.bf16.mxu0 %vm6864_vm3, %v17854_v15  ;;  %7795 = vmatprep.mubr.bf16.mxu1 %v16225_v13 }
 0x558   : > { %7853 = vmatpush1.bf16.msra.mxu1 %v17848_v40  ;;  %7970 = vmatpush1.bf16.msra.mxu0 %v15648_v17  ;;  %v16245_v17 = vld [vmem:[%s17176_s4 + $0x104] ss:$16 sps:$4 sm:$0xff]  }
 0x559   : > { %7971 = vmatprep.subr.bf16.mxu0 %v15795_v57 }
 0x55b   : > { %7623 = vmatmul.mubr.bf16.gmra.mrb[16].mxu0 %v15805_v2  ;;  %7796 = vmatmul.mubr.bf16.gmra.mrb[32].mxu1 %v16235_v6 }
 0x55c   : > { %7972 = vmatpush1.bf16.msra.mxu0 %v15652_v20  ;;  %10526 = vmatprep.mubr.msk.bf16.mxu0 %vm6864_vm3, %v15812_v3  ;;  %v17855_v20 = vld [vmem:[#allocation138_spill] sm:$0xff] }
 0x55d   : > { %7973 = vmatprep.subr.bf16.mxu0 %v15800_v32  ;;  %7805 = vmatprep.mubr.bf16.mxu1 %v16245_v17  ;;  %v17856_v39 = vpack.c.bf16 %v15958_v22, %v17855_v20 }
 0x560   : > { %7974 = vmatpush1.bf16.msra.mxu0 %v15795_v57 }
 0x561   : > { %7975 = vmatprep.subr.bf16.mxu0 %v15956_v52 }
 0x563   : > { %7633 = vmatmul.mubr.bf16.gmra.mrb[20].mxu0 %v15830_v36  ;;  %7806 = vmatmul.mubr.bf16.gmra.mrb[36].mxu1 %v17839_v5  ;;  %v17858_v5 = vld [vmem:[#allocation10_spill] sm:$0xff] }
 0x564   : > { %7976 = vmatpush1.bf16.msra.mxu0 %v15800_v32  ;;  %10527 = vmatprep.mubr.msk.bf16.mxu0 %vm6864_vm3, %v15836_v53  ;;  %v16282_v32 = vpop.permute.xlu0 %6581 }
 0x565   : > { %7977 = vmatprep.subr.bf16.mxu0 %v17856_v39  ;;  %7815 = vmatprep.mubr.bf16.mxu1 %v17840_v63  ;;  %v17859_v63 = vpack.c.bf16 %v16008_v27, %v17858_v5 }
 0x568   : > { %7978 = vmatpush1.bf16.msra.mxu0 %v15956_v52 }
 0x569   : > { %7979 = vmatprep.subr.bf16.mxu0 %v15676_v59 }
 0x56b   : > { %7643 = vmatmul.mubr.bf16.gmra.mrb[24].mxu0 %v15853_v55  ;;  %7816 = vmatmul.mubr.bf16.gmra.mrb[40].mxu1 %v15703_v31  ;;  %v16279_v31 = vpop.permute.xlu1 %6576 }
 0x56c   : > { %7980 = vmatpush1.bf16.msra.mxu0 %v15674_v19  ;;  %10528 = vmatprep.mubr.msk.bf16.mxu0 %vm6864_vm3, %v15859_v9  ;;  %v17857_v19 = vld [vmem:[#allocation139_spill] sm:$0xff] }
 0x56d   : > { %7981 = vmatprep.subr.bf16.mxu0 %v15823_v56  ;;  %10532 = vmatprep.mubr.msk.bf16.mxu1 %vm6864_vm3, %v15709_v25 }
 0x56f   : > { %v16299_v27 = vpop.permute.xlu1 %6586 }
 0x570   : > { %7982 = vmatpush1.bf16.msra.mxu0 %v15676_v59 }
 0x571   : > { %7983 = vmatprep.subr.bf16.mxu0 %v15825_v30 }
 0x573   : > { %7653 = vmatmul.mubr.bf16.gmra.mrb[28].mxu0 %v15877_v7  ;;  %7859 = vmatmul.mubr.bf16.vlgmr.msra.gmra.mrb[4].mxu1 %v15726_v29 }
 0x574   : > { %7984 = vmatpush1.bf16.msra.mxu0 %v15823_v56  ;;  %10529 = vmatprep.mubr.msk.bf16.mxu0 %vm6864_vm3, %v15884_v21 }
 0x575   : > { %7985 = vmatprep.subr.bf16.mxu0 %v17857_v19  ;;  %10533 = vmatprep.mubr.msk.bf16.mxu1 %vm6864_vm3, %v15733_v58 }
 0x576   : > { %v7062_v25 = vpop.f32.mrb[220].mxu0 }
 0x577   : > { %v10775_v59 = vadd.f32 %v7062_v25, %v16279_v31  ;;  %v7064_v57 = vpop.f32.mrb[221].mxu0 }
 0x578   : > { %v10776_v29 = vadd.f32 %v7064_v57, %v16279_v31  ;;  %7986 = vmatpush1.bf16.msra.mxu0 %v15825_v30  ;;  %v7066_v56 = vpop.f32.mrb[222].mxu0 }
 0x579   : > { %v10777_v52 = vadd.f32 %v7066_v56, %v16282_v32  ;;  %v7068_v22 = vpop.f32.mrb[223].mxu0  ;;  %7987 = vmatprep.subr.bf16.mxu0 %v17859_v63  ;;  %v8225_v0 = vmax.f32 %v10775_v59, 0.0 }
 0x57a   : > { %v10778_v58 = vadd.f32 %v7068_v22, %v16282_v32  ;;  %v8226_v39 = vmax.f32 %v10776_v29, 0.0  ;;  %v16302_v29 = vpop.permute.xlu0 %6591 }
 0x57b   : > { %v8235_v20 = vmax.f32 %v10777_v52, 0.0  ;;  %7663 = vmatmul.mubr.bf16.gmra.mrb[32].mxu0 %v15903_v33  ;;  %7869 = vmatmul.mubr.bf16.gmra.mrb[8].mxu1 %v15751_v37 }
 0x57c   : > { %v8236_v25 = vmax.f32 %v10778_v58, 0.0  ;;  %7988 = vmatpush1.bf16.msra.mxu0 %v17857_v19  ;;  %10530 = vmatprep.mubr.msk.bf16.mxu0 %vm6864_vm3, %v15912_v41 }
 0x57d   : > { %v8435_v30 = vpack.c.bf16 %v8235_v20, %v8225_v0  ;;  %7989 = vmatprep.subr.bf16.mxu0 %v15698_v11  ;;  %10534 = vmatprep.mubr.msk.bf16.mxu1 %vm6864_vm3, %v17846_v47 }
 0x57e   : > { %v8436_v59 = vpack.c.bf16 %v8236_v25, %v8226_v39  ;;  %v7072_v57 = vpop.f32.mrb[224].mxu0  ;;  %v16315_v39 = vpop.permute.xlu1 %6596 }
 0x57f   : > { %v10779_v56 = vadd.f32 %v7072_v57, %v16299_v27  ;;  %v7074_v37 = vpop.f32.mrb[225].mxu0 }
 0x580   : > { %v10780_v19 = vadd.f32 %v7074_v37, %v16299_v27  ;;  %7990 = vmatpush1.bf16.msra.mxu0 %v15696_v4  ;;  %v7076_v52 = vpop.f32.mrb[226].mxu0  ;;  %8595 = vmatprep.subr.bf16.mxu1 %v8436_v59 }
 0x581   : > { %v10781_v22 = vadd.f32 %v7076_v52, %v16302_v29  ;;  %8092 = vmatprep.subr.bf16.mxu0 %v17835_v49  ;;  %v7078_v47 = vpop.f32.mrb[227].mxu0  ;;  %8596 = vmatpush1.bf16.msra.mxu1 %v8435_v30  ;;  %v8245_v63 = vmax.f32 %v10779_v56, 0.0  ;;  %v16318_v56 = vpop.permute.xlu0 %6601 }
 0x582   : > { %v10782_v5 = vadd.f32 %v7078_v47, %v16302_v29  ;;  %v8246_v0 = vmax.f32 %v10780_v19, 0.0 }
 0x583   : > { %v8255_v58 = vmax.f32 %v10781_v22, 0.0  ;;  %7673 = vmatmul.mubr.bf16.gmra.mrb[36].mxu0 %v15935_v61  ;;  %7879 = vmatmul.mubr.bf16.gmra.mrb[12].mxu1 %v17852_v18 }
 0x584   : > { %v8256_v20 = vmax.f32 %v10782_v5, 0.0  ;;  %10531 = vmatprep.mubr.msk.bf16.mxu0 %vm6864_vm3, %v15942_v54  ;;  %10535 = vmatprep.mubr.msk.bf16.mxu1 %vm6864_vm3, %v17854_v15 }
 0x585   : > { %v8445_v4 = vpack.c.bf16 %v8255_v58, %v8245_v63 }
 0x586   : > { %v8446_v25 = vpack.c.bf16 %v8256_v20, %v8246_v0  ;;  %v7082_v30 = vpop.f32.mrb[228].mxu0  ;;  %v16328_v0 = vpop.permute.xlu1 %6606 }
 0x587   : > { %v10783_v59 = vadd.f32 %v7082_v30, %v16315_v39  ;;  %v7084_v57 = vpop.f32.mrb[229].mxu0 }
 0x588   : > { %v10784_v18 = vadd.f32 %v7084_v57, %v16315_v39  ;;  %v7086_v37 = vpop.f32.mrb[230].mxu0  ;;  %8597 = vmatprep.subr.bf16.mxu1 %v8446_v25 }
 0x589   : > { %v10785_v19 = vadd.f32 %v7086_v37, %v16318_v56  ;;  %v7088_v52 = vpop.f32.mrb[231].mxu0  ;;  %8598 = vmatpush1.bf16.msra.mxu1 %v8445_v4  ;;  %v8265_v22 = vmax.f32 %v10783_v59, 0.0  ;;  %v16331_v59 = vpop.permute.xlu0 %6611 }
 0x58a   : > { %v10786_v15 = vadd.f32 %v7088_v52, %v16318_v56  ;;  %v8266_v5 = vmax.f32 %v10784_v18, 0.0 }
 0x58b   : > { %v8275_v47 = vmax.f32 %v10785_v19, 0.0  ;;  %7683 = vmatmul.mubr.bf16.gmra.mrb[40].mxu0 %v15963_v12  ;;  %7889 = vmatmul.mubr.bf16.gmra.mrb[16].mxu1 %v15805_v2 }
 0x58c   : > { %v8276_v63 = vmax.f32 %v10786_v15, 0.0  ;;  %10536 = vmatprep.mubr.msk.bf16.mxu1 %vm6864_vm3, %v15812_v3  ;;  %7991 = vmatprep.mubr.bf16.mxu0 %v15978_v62 }
 0x58d   : > { %v8455_v58 = vpack.c.bf16 %v8275_v47, %v8265_v22  ;;  %v16343_v47 = vpop.permute.xlu1 %6616 }
 0x58e   : > { %v8456_v20 = vpack.c.bf16 %v8276_v63, %v8266_v5  ;;  %v7092_v4 = vpop.f32.mrb[232].mxu0 }
 0x58f   : > { %v10787_v25 = vadd.f32 %v7092_v4, %v16328_v0  ;;  %v7094_v30 = vpop.f32.mrb[233].mxu0  ;;  %v17860_v4 = vld [vmem:[#allocation11_spill] sm:$0xff] }
 0x590   : > { %v10788_v57 = vadd.f32 %v7094_v30, %v16328_v0  ;;  %v7096_v2 = vpop.f32.mrb[234].mxu0  ;;  %8599 = vmatprep.subr.bf16.mxu1 %v8456_v20 }
 0x591   : > { %v10789_v18 = vadd.f32 %v7096_v2, %v16331_v59  ;;  %v7098_v37 = vpop.f32.mrb[235].mxu0  ;;  %8600 = vmatpush1.bf16.msra.mxu1 %v8455_v58  ;;  %v8285_v62 = vmax.f32 %v10787_v25, 0.0 }
 0x592   : > { %v10790_v3 = vadd.f32 %v7098_v37, %v16331_v59  ;;  %v8286_v52 = vmax.f32 %v10788_v57, 0.0  ;;  %v17861_v37 = vpack.c.bf16 %v16084_v28, %v16078_v46 }
 0x593   : > { %v8295_v19 = vmax.f32 %v10789_v18, 0.0  ;;  %7899 = vmatmul.mubr.bf16.gmra.mrb[20].mxu1 %v15830_v36  ;;  %7992 = vmatmul.mubr.bf16.vlgmr.msra.gmra.mrb[44].mxu0 %v15989_v23  ;;  %v16346_v23 = vpop.permute.xlu0 %6621 }
 0x594   : > { %v8296_v15 = vmax.f32 %v10790_v3, 0.0  ;;  %8093 = vmatpush1.bf16.msra.mxu0 %v15698_v11  ;;  %10537 = vmatprep.mubr.msk.bf16.mxu1 %vm6864_vm3, %v15836_v53  ;;  %v16362_v3 = vpop.permute.xlu1 %6626 }
 0x595   : > { %v8465_v22 = vpack.c.bf16 %v8295_v19, %v8285_v62  ;;  %8094 = vmatprep.subr.bf16.mxu0 %v17838_v50  ;;  %8001 = vmatprep.mubr.bf16.mxu0 %v16005_v34 }
 0x596   : > { %v8466_v5 = vpack.c.bf16 %v8296_v15, %v8286_v52  ;;  %v7102_v63 = vpop.f32.mrb[236].mxu0 }
 0x597   : > { %v10791_v36 = vadd.f32 %v7102_v63, %v16343_v47  ;;  %v7104_v58 = vpop.f32.mrb[237].mxu0  ;;  %v16364_v19 = vpop.permute.xlu0 %6631 }
 0x598   : > { %v10792_v20 = vadd.f32 %v7104_v58, %v16343_v47  ;;  %8095 = vmatpush1.bf16.msra.mxu0 %v17835_v49  ;;  %v7106_v11 = vpop.f32.mrb[238].mxu0  ;;  %8601 = vmatprep.subr.bf16.mxu1 %v8466_v5  ;;  %v16379_v58 = vpop.permute.xlu1 %6636 }
 0x599   : > { %v10793_v53 = vadd.f32 %v7106_v11, %v16346_v23  ;;  %8096 = vmatprep.subr.bf16.mxu0 %v17860_v4  ;;  %v7108_v34 = vpop.f32.mrb[239].mxu0  ;;  %8602 = vmatpush1.bf16.msra.mxu1 %v8465_v22  ;;  %v8305_v30 = vmax.f32 %v10791_v36, 0.0 }
 0x59a   : > { %v10794_v25 = vadd.f32 %v7108_v34, %v16346_v23  ;;  %v8306_v2 = vmax.f32 %v10792_v20, 0.0 }
 0x59b   : > { %v8315_v57 = vmax.f32 %v10793_v53, 0.0  ;;  %7909 = vmatmul.mubr.bf16.gmra.mrb[24].mxu1 %v15853_v55  ;;  %8002 = vmatmul.mubr.bf16.gmra.mrb[48].mxu0 %v16020_v8  ;;  %v16377_v36 = vpop.permute.xlu0 %6641 }
 0x59c   : > { %v8316_v18 = vmax.f32 %v10794_v25, 0.0  ;;  %8097 = vmatpush1.bf16.msra.mxu0 %v17838_v50  ;;  %10538 = vmatprep.mubr.msk.bf16.mxu1 %vm6864_vm3, %v15859_v9 }
 0x59d   : > { %v8475_v49 = vpack.c.bf16 %v8315_v57, %v8305_v30  ;;  %8098 = vmatprep.subr.bf16.mxu0 %v17861_v37  ;;  %8011 = vmatprep.mubr.bf16.mxu0 %v16032_v43 }
 0x59e   : > { %v8476_v62 = vpack.c.bf16 %v8316_v18, %v8306_v2  ;;  %v7112_v55 = vpop.f32.mrb[240].mxu0 }
 0x59f   : > { %v10795_v8 = vadd.f32 %v7112_v55, %v16362_v3  ;;  %v7114_v52 = vpop.f32.mrb[241].mxu0 }
 0x5a0   : > { %v10796_v50 = vadd.f32 %v7114_v52, %v16362_v3  ;;  %8099 = vmatpush1.bf16.msra.mxu0 %v17860_v4  ;;  %v7116_v9 = vpop.f32.mrb[242].mxu0  ;;  %8603 = vmatprep.subr.bf16.mxu1 %v8476_v62 }
 0x5a1   : > { %v10797_v46 = vadd.f32 %v7116_v9, %v16364_v19  ;;  %8100 = vmatprep.subr.bf16.mxu0 %v17822_v48  ;;  %v7118_v43 = vpop.f32.mrb[243].mxu0  ;;  %8604 = vmatpush1.bf16.msra.mxu1 %v8475_v49  ;;  %v8325_v15 = vmax.f32 %v10795_v8, 0.0 }
 0x5a2   : > { %v10798_v28 = vadd.f32 %v7118_v43, %v16364_v19  ;;  %v8326_v5 = vmax.f32 %v10796_v50, 0.0 }
 0x5a3   : > { %v8335_v22 = vmax.f32 %v10797_v46, 0.0  ;;  %7919 = vmatmul.mubr.bf16.gmra.mrb[28].mxu1 %v15877_v7  ;;  %8012 = vmatmul.mubr.bf16.gmra.mrb[52].mxu0 %v16128_v45 }
 0x5a4   : > { %v8336_v63 = vmax.f32 %v10798_v28, 0.0  ;;  %8101 = vmatpush1.bf16.msra.mxu0 %v15719_v38  ;;  %10539 = vmatprep.mubr.msk.bf16.mxu1 %vm6864_vm3, %v15884_v21  ;;  %v16398_v28 = vpop.permute.xlu0 %6651 }
 0x5a5   : > { %v8485_v20 = vpack.c.bf16 %v8335_v22, %v8325_v15  ;;  %8102 = vmatprep.subr.bf16.mxu0 %v15870_v16  ;;  %8021 = vmatprep.mubr.bf16.mxu0 %v16137_v44  ;;  %v16400_v15 = vpop.permute.xlu1 %6646 }
 0x5a6   : > { %v8486_v11 = vpack.c.bf16 %v8336_v63, %v8326_v5  ;;  %v7122_v7 = vpop.f32.mrb[244].mxu0  ;;  %v7328_v53 = vpop.f32.mrb[220].mxu1 }
 0x5a7   : > { %v10799_v45 = vadd.f32 %v7122_v7, %v16379_v58  ;;  %v10815_v4 = vadd.f32 %v7328_v53, %v16279_v31  ;;  %v7124_v38 = vpop.f32.mrb[245].mxu0  ;;  %v7330_v34 = vpop.f32.mrb[221].mxu1 }
 0x5a8   : > { %v10800_v21 = vadd.f32 %v7124_v38, %v16379_v58  ;;  %v10816_v25 = vadd.f32 %v7330_v34, %v16279_v31  ;;  %8103 = vmatpush1.bf16.msra.mxu0 %v17822_v48  ;;  %v7126_v30 = vpop.f32.mrb[246].mxu0  ;;  %v7332_v57 = vpop.f32.mrb[222].mxu1  ;;  %8605 = vmatprep.subr.bf16.mxu1 %v8486_v11 }
 0x5a9   : > { %v10801_v44 = vadd.f32 %v7126_v30, %v16377_v36  ;;  %v10817_v2 = vadd.f32 %v7332_v57, %v16282_v32  ;;  %8104 = vmatprep.subr.bf16.mxu0 %v17841_v10  ;;  %v7128_v18 = vpop.f32.mrb[247].mxu0  ;;  %v7334_v49 = vpop.f32.mrb[223].mxu1  ;;  %8606 = vmatpush1.bf16.msra.mxu1 %v8485_v20  ;;  %v8345_v55 = vmax.f32 %v10799_v45, 0.0  ;;  %v8227_v8 = vmax.f32 %v10815_v4, 0.0 }
 0x5aa   : > { %v10802_v37 = vadd.f32 %v7128_v18, %v16377_v36  ;;  %v10818_v62 = vadd.f32 %v7334_v49, %v16282_v32  ;;  %v8346_v50 = vmax.f32 %v10800_v21, 0.0  ;;  %v8228_v9 = vmax.f32 %v10816_v25, 0.0  ;;  %v17862_v21 = vld [vmem:[#allocation143_spill] sm:$0xff] }
 0x5ab   : > { %v8355_v52 = vmax.f32 %v10801_v44, 0.0  ;;  %v8237_v48 = vmax.f32 %v10817_v2, 0.0  ;;  %7929 = vmatmul.mubr.bf16.gmra.mrb[32].mxu1 %v15903_v33  ;;  %8022 = vmatmul.mubr.bf16.gmra.mrb[56].mxu0 %v16146_v26  ;;  %v17863_v25 = vpack.c.bf16 %v16100_v24, %v17862_v21 }
 0x5ac   : > { %v8356_v46 = vmax.f32 %v10802_v37, 0.0  ;;  %v8238_v43 = vmax.f32 %v10818_v62, 0.0  ;;  %8105 = vmatpush1.bf16.msra.mxu0 %v15870_v16  ;;  %10540 = vmatprep.mubr.msk.bf16.mxu1 %vm6864_vm3, %v15912_v41  ;;  %v17864_v62 = vld [vmem:[#allocation146_spill] sm:$0xff] }
 0x5ad   : > { %v8495_v22 = vpack.c.bf16 %v8355_v52, %v8345_v55  ;;  %v16402_v5 = vpack.c.bf16 %v8237_v48, %v8227_v8  ;;  %8106 = vmatprep.subr.bf16.mxu0 %v16035_v35  ;;  %8031 = vmatprep.mubr.bf16.mxu0 %v16156_v42  ;;  %v16425_v48 = vpop.permute.xlu0 %6661 }
 0x5ae   : > { %v8496_v33 = vpack.c.bf16 %v8356_v46, %v8346_v50  ;;  %v16406_v26 = vpack.c.bf16 %v8238_v43, %v8228_v9  ;;  %v7132_v63 = vpop.f32.mrb[248].mxu0  ;;  %v7338_v20 = vpop.f32.mrb[224].mxu1 }
 0x5af   : > { %v10803_v16 = vadd.f32 %v7132_v63, %v16400_v15  ;;  %v10819_v41 = vadd.f32 %v7338_v20, %v16299_v27  ;;  %v7134_v11 = vpop.f32.mrb[249].mxu0  ;;  %v7340_v7 = vpop.f32.mrb[225].mxu1 }
 0x5b0   : > { %v10804_v53 = vadd.f32 %v7134_v11, %v16400_v15  ;;  %v10820_v45 = vadd.f32 %v7340_v7, %v16299_v27  ;;  %8107 = vmatpush1.bf16.msra.mxu0 %v17841_v10  ;;  %v7136_v4 = vpop.f32.mrb[250].mxu0  ;;  %v7342_v38 = vpop.f32.mrb[226].mxu1  ;;  %8607 = vmatprep.subr.bf16.mxu1 %v8496_v33 }
 0x5b1   : > { %v10805_v42 = vadd.f32 %v7136_v4, %v16398_v28  ;;  %v10821_v34 = vadd.f32 %v7342_v38, %v16302_v29  ;;  %8108 = vmatprep.subr.bf16.mxu0 %v17863_v25  ;;  %v7138_v30 = vpop.f32.mrb[251].mxu0  ;;  %v7344_v57 = vpop.f32.mrb[227].mxu1  ;;  %8608 = vmatpush1.bf16.msra.mxu1 %v8495_v22  ;;  %v8365_v18 = vmax.f32 %v10803_v16, 0.0  ;;  %v8247_v10 = vmax.f32 %v10819_v41, 0.0 }
 0x5b2   : > { %v10806_v44 = vadd.f32 %v7138_v30, %v16398_v28  ;;  %v10822_v2 = vadd.f32 %v7344_v57, %v16302_v29  ;;  %v8366_v55 = vmax.f32 %v10804_v53, 0.0  ;;  %v8248_v8 = vmax.f32 %v10820_v45, 0.0  ;;  %v16427_v50 = vpop.permute.xlu1 %6656 }
 0x5b3   : > { %v8375_v49 = vmax.f32 %v10805_v42, 0.0  ;;  %v8257_v37 = vmax.f32 %v10821_v34, 0.0  ;;  %7939 = vmatmul.mubr.bf16.gmra.mrb[36].mxu1 %v15935_v61  ;;  %8032 = vmatmul.mubr.bf16.gmra.mrb[60].mxu0 %v17864_v62  ;;  %v17865_v61 = vld [vmem:[#allocation147_spill] sm:$0xff]  ;;  %v17867_v62 = vld [vmem:[#allocation145_spill] sm:$0xff] }
 0x5b4   : > { %v8376_v52 = vmax.f32 %v10806_v44, 0.0  ;;  %v8258_v24 = vmax.f32 %v10822_v2, 0.0  ;;  %8109 = vmatpush1.bf16.msra.mxu0 %v16035_v35  ;;  %10541 = vmatprep.mubr.msk.bf16.mxu1 %vm6864_vm3, %v15942_v54  ;;  %v16446_v34 = vld [vmem:[%s17178_s6 + $0x4] ss:$8 sps:$4 sm:$0xff]   ;;  %v17866_v2 = vld [vmem:[#allocation144_spill] sm:$0xff] }
 0x5b5   : > { %v8505_v9 = vpack.c.bf16 %v8375_v49, %v8365_v18  ;;  %v16429_v46 = vpack.c.bf16 %v8257_v37, %v8247_v10  ;;  %8110 = vmatprep.subr.bf16.mxu0 %v17831_v51  ;;  %8041 = vmatprep.mubr.bf16.mxu0 %v17865_v61 }
 0x5b6   : > { %v8506_v43 = vpack.c.bf16 %v8376_v52, %v8366_v55  ;;  %v16433_v22 = vpack.c.bf16 %v8258_v24, %v8248_v8  ;;  %v7142_v33 = vpop.f32.mrb[252].mxu0  ;;  %v7348_v63 = vpop.f32.mrb[228].mxu1 }
 0x5b7   : > { %v10807_v35 = vadd.f32 %v7142_v33, %v16427_v50  ;;  %v10823_v54 = vadd.f32 %v7348_v63, %v16315_v39  ;;  %v7144_v20 = vpop.f32.mrb[253].mxu0  ;;  %v7350_v16 = vpop.f32.mrb[229].mxu1 }
 0x5b8   : > { %v10808_v41 = vadd.f32 %v7144_v20, %v16427_v50  ;;  %v10824_v11 = vadd.f32 %v7350_v16, %v16315_v39  ;;  %8111 = vmatpush1.bf16.msra.mxu0 %v17828_v60  ;;  %v7146_v7 = vpop.f32.mrb[254].mxu0  ;;  %v7352_v53 = vpop.f32.mrb[230].mxu1  ;;  %8609 = vmatprep.subr.bf16.mxu1 %v8506_v43 }
 0x5b9   : > { %v10809_v45 = vadd.f32 %v7146_v7, %v16425_v48  ;;  %v10825_v4 = vadd.f32 %v7352_v53, %v16318_v56  ;;  %8112 = vmatprep.subr.bf16.mxu0 %v17848_v40  ;;  %v7148_v38 = vpop.f32.mrb[255].mxu0  ;;  %v7354_v42 = vpop.f32.mrb[231].mxu1  ;;  %8610 = vmatpush1.bf16.msra.mxu1 %v8505_v9  ;;  %v8385_v25 = vmax.f32 %v10807_v35, 0.0  ;;  %v8267_v30 = vmax.f32 %v10823_v54, 0.0  ;;  %v17868_v53 = vld [vmem:[#allocation142_spill] sm:$0xff] }
 0x5ba   : > { %v10810_v21 = vadd.f32 %v7148_v38, %v16425_v48  ;;  %v10826_v60 = vadd.f32 %v7354_v42, %v16318_v56  ;;  %v8386_v18 = vmax.f32 %v10808_v41, 0.0  ;;  %v8268_v10 = vmax.f32 %v10824_v11, 0.0  ;;  %v16454_v55 = vpop.permute.xlu0 %6671  ;;  %v16456_v8 = vpop.permute.xlu1 %6666 }
 0x5bb   : > { %v8395_v57 = vmax.f32 %v10809_v45, 0.0  ;;  %v8277_v44 = vmax.f32 %v10825_v4, 0.0  ;;  %7949 = vmatmul.mubr.bf16.gmra.mrb[40].mxu1 %v15963_v12  ;;  %8042 = vmatmul.mubr.bf16.gmra.mrb[64].mxu0 %v17866_v2 }
 0x5bc   : > { %v8396_v49 = vmax.f32 %v10810_v21, 0.0  ;;  %v8278_v37 = vmax.f32 %v10826_v60, 0.0  ;;  %8113 = vmatpush1.bf16.msra.mxu0 %v17831_v51  ;;  %8051 = vmatprep.mubr.bf16.mxu0 %v17867_v62 }
 0x5bd   : > { %v8515_v52 = vpack.c.bf16 %v8395_v57, %v8385_v25  ;;  %v16458_v24 = vpack.c.bf16 %v8277_v44, %v8267_v30  ;;  %8114 = vmatprep.subr.bf16.mxu0 %v17853_v14  ;;  %10562 = vmatprep.mubr.msk.bf16.mxu1 %vm1886_vm0, %v16446_v34 }
 0x5be   : > { %v8516_v12 = vpack.c.bf16 %v8396_v49, %v8386_v18  ;;  %v16463_v9 = vpack.c.bf16 %v8278_v37, %v8268_v10  ;;  %v7152_v61 = vpop.f32.mrb[0].mxu0  ;;  %v7358_v43 = vpop.f32.mrb[232].mxu1  ;;  %v17869_v49 = vld [vmem:[#allocation141_spill] sm:$0xff]  ;;  %v17870_v37 = vld [vmem:[#allocation140_spill] sm:$0xff] }
 0x5bf   : > { %v10811_v51 = vadd.f32 %v7152_v61, %v16456_v8  ;;  %v10827_v33 = vadd.f32 %v7358_v43, %v16328_v0  ;;  %v7154_v63 = vpop.f32.mrb[1].mxu0  ;;  %v7360_v35 = vpop.f32.mrb[233].mxu1  ;;  %v17871_v62 = vpack.c.bf16 %v17869_v49, %v17870_v37 }
 0x5c0   : > { %v10812_v54 = vadd.f32 %v7154_v63, %v16456_v8  ;;  %v10828_v20 = vadd.f32 %v7360_v35, %v16328_v0  ;;  %8115 = vmatpush1.bf16.msra.mxu0 %v17848_v40  ;;  %v7156_v16 = vpop.f32.mrb[2].mxu0  ;;  %v7362_v41 = vpop.f32.mrb[234].mxu1  ;;  %8611 = vmatprep.subr.bf16.mxu1 %v8516_v12  ;;  %v16495_v35 = vld [vmem:[%s17178_s6 + $0x14] ss:$8 sps:$4 sm:$0xff]  }
 0x5c1   : > { %v10813_v11 = vadd.f32 %v7156_v16, %v16454_v55  ;;  %v10829_v7 = vadd.f32 %v7362_v41, %v16331_v59  ;;  %8116 = vmatprep.subr.bf16.mxu0 %v17868_v53  ;;  %v7158_v45 = vpop.f32.mrb[3].mxu0  ;;  %v7364_v4 = vpop.f32.mrb[235].mxu1  ;;  %8612 = vmatpush1.bf16.msra.mxu1 %v8515_v52  ;;  %v8405_v21 = vmax.f32 %v10811_v51, 0.0  ;;  %v8287_v60 = vmax.f32 %v10827_v33, 0.0 }
 0x5c2   : > { %v10814_v38 = vadd.f32 %v7158_v45, %v16454_v55  ;;  %v10830_v42 = vadd.f32 %v7364_v4, %v16331_v59  ;;  %v8406_v30 = vmax.f32 %v10812_v54, 0.0  ;;  %v8288_v57 = vmax.f32 %v10828_v20, 0.0 }
 0x5c3   : > { %v8415_v25 = vmax.f32 %v10813_v11, 0.0  ;;  %v8297_v40 = vmax.f32 %v10829_v7, 0.0  ;;  %8052 = vmatmul.mubr.bf16.gmra.mrb[68].mxu0 %v16213_v1 }
 0x5c4   : > { %v8416_v44 = vmax.f32 %v10814_v38, 0.0  ;;  %v8298_v2 = vmax.f32 %v10830_v42, 0.0  ;;  %8117 = vmatpush1.bf16.msra.mxu0 %v17853_v14  ;;  %8061 = vmatprep.mubr.bf16.mxu0 %v16225_v13  ;;  %v16489_v13 = vld [vmem:[%s17178_s6] ss:$8 sps:$4 sm:$0xff]  }
 0x5c5   : > { %v8525_v18 = vpack.c.bf16 %v8415_v25, %v8405_v21  ;;  %v16478_v10 = vpack.c.bf16 %v8297_v40, %v8287_v60  ;;  %8118 = vmatprep.subr.bf16.mxu0 %v17871_v62  ;;  %v11487_v40 = vld [vmem:[%s17176_s4 + $0x100] ss:$16 sps:$4 sm:$0xff]  }
 0x5c6   : > { %v8526_v52 = vpack.c.bf16 %v8416_v44, %v8406_v30  ;;  %v8468_v12 = vpack.c.bf16 %v8298_v2, %v8288_v57  ;;  %v7368_v61 = vpop.f32.mrb[236].mxu1 }
 0x5c7   : > { %v10831_v1 = vadd.f32 %v7368_v61, %v16343_v47  ;;  %v7370_v43 = vpop.f32.mrb[237].mxu1 }
 0x5c8   : > { %v10832_v51 = vadd.f32 %v7370_v43, %v16343_v47  ;;  %8119 = vmatpush1.bf16.msra.mxu0 %v17868_v53  ;;  %v7372_v14 = vpop.f32.mrb[238].mxu1  ;;  %8613 = vmatprep.subr.bf16.mxu1 %v8526_v52  ;;  %v16537_v52 = vld [vmem:[%s17178_s6 + $0x20] ss:$8 sps:$4 sm:$0xff]  }
 0x5c9   : > { %v10833_v33 = vadd.f32 %v7372_v14, %v16346_v23  ;;  %v7374_v63 = vpop.f32.mrb[239].mxu1  ;;  %8614 = vmatpush1.bf16.msra.mxu1 %v8525_v18  ;;  %v8307_v20 = vmax.f32 %v10831_v1, 0.0  ;;  %v11489_v14 = vld [vmem:[%s17176_s4 + $0x120] ss:$16 sps:$4 sm:$0xff]  }
 0x5ca   : > { %v10834_v54 = vadd.f32 %v7374_v63, %v16346_v23  ;;  %8678 = vmatprep.subr.bf16.mxu1 %v16406_v26  ;;  %v8308_v41 = vmax.f32 %v10832_v51, 0.0 }
 0x5cb   : > { %v8317_v16 = vmax.f32 %v10833_v33, 0.0  ;;  %8062 = vmatmul.mubr.bf16.gmra.mrb[72].mxu0 %v16235_v6 }
 0x5cc   : > { %v8318_v11 = vmax.f32 %v10834_v54, 0.0  ;;  %8628 = vmatmul.mubr.bf16.vlgmr.msra.gmra.mrb[44].mxu1 %v16489_v13  ;;  %8071 = vmatprep.mubr.bf16.mxu0 %v16245_v17  ;;  %v16511_v17 = vld [vmem:[%s17178_s6 + $0x10] ss:$8 sps:$4 sm:$0xff]  }
 0x5cd   : > { %v8477_v7 = vpack.c.bf16 %v8317_v16, %v8307_v20  ;;  %8679 = vmatpush1.bf16.msra.mxu1 %v16402_v5  ;;  %10563 = vmatprep.mubr.msk.bf16.mxu1 %vm1886_vm0, %v16495_v35 }
 0x5ce   : > { %v8478_v53 = vpack.c.bf16 %v8318_v11, %v8308_v41  ;;  %v7378_v45 = vpop.f32.mrb[240].mxu1  ;;  %8680 = vmatprep.subr.bf16.mxu1 %v16433_v22  ;;  %v16518_v22 = vld [vmem:[%s17178_s6 + $0x24] ss:$8 sps:$4 sm:$0xff]  }
 0x5cf   : > { %v10835_v26 = vadd.f32 %v7378_v45, %v16362_v3  ;;  %v7380_v4 = vpop.f32.mrb[241].mxu1 }
 0x5d0   : > { %v10836_v6 = vadd.f32 %v7380_v4, %v16362_v3  ;;  %v7382_v38 = vpop.f32.mrb[242].mxu1 }
 0x5d1   : > { %v10837_v5 = vadd.f32 %v7382_v38, %v16364_v19  ;;  %v7384_v42 = vpop.f32.mrb[243].mxu1  ;;  %8681 = vmatpush1.bf16.msra.mxu1 %v16429_v46  ;;  %v8327_v60 = vmax.f32 %v10835_v26, 0.0  ;;  %v11488_v46 = vld [vmem:[%s17176_s4 + $0x124] ss:$16 sps:$4 sm:$0xff]   ;;  %v16562_v26 = vld [vmem:[%s17178_s6 + $0x30] ss:$8 sps:$4 sm:$0xff]  }
 0x5d2   : > { %v10838_v21 = vadd.f32 %v7384_v42, %v16364_v19  ;;  %8682 = vmatprep.subr.bf16.mxu1 %v16463_v9  ;;  %v8328_v30 = vmax.f32 %v10836_v6, 0.0  ;;  %v16568_v6 = vld [vmem:[%s17178_s6 + $0x44] ss:$8 sps:$4 sm:$0xff]  }
 0x5d3   : > { %v8337_v25 = vmax.f32 %v10837_v5, 0.0  ;;  %8072 = vmatmul.mubr.bf16.gmra.mrb[76].mxu0 %v11487_v40  ;;  %v11492_v40 = vld [vmem:[%s17176_s4 + $0x2c] ss:$16 sps:$4 sm:$0xff]  }
 0x5d4   : > { %v8338_v57 = vmax.f32 %v10838_v21, 0.0  ;;  %8081 = vmatprep.mubr.bf16.mxu0 %v11488_v46  ;;  %8638 = vmatmul.mubr.bf16.gmra.mrb[48].mxu1 %v16511_v17  ;;  %v11491_v21 = vld [vmem:[%s17176_s4 + $0x8] ss:$16 sps:$4 sm:$0xff]  }
 0x5d5   : > { %v8487_v44 = vpack.c.bf16 %v8337_v25, %v8327_v60  ;;  %8683 = vmatpush1.bf16.msra.mxu1 %v16458_v24  ;;  %10564 = vmatprep.mubr.msk.bf16.mxu1 %vm1886_vm0, %v16518_v22 }
 0x5d6   : > { %v8488_v9 = vpack.c.bf16 %v8338_v57, %v8328_v30  ;;  %v7388_v2 = vpop.f32.mrb[244].mxu1  ;;  %8684 = vmatprep.subr.bf16.mxu1 %v8468_v12  ;;  %v16544_v12 = vld [vmem:[%s17178_s6 + $0x34] ss:$8 sps:$4 sm:$0xff]  }
 0x5d7   : > { %v10839_v18 = vadd.f32 %v7388_v2, %v16379_v58  ;;  %v7390_v49 = vpop.f32.mrb[245].mxu1 }
 0x5d8   : > { %v10840_v37 = vadd.f32 %v7390_v49, %v16379_v58  ;;  %v7392_v62 = vpop.f32.mrb[246].mxu1  ;;  %v16586_v49 = vld [vmem:[%s17178_s6 + $0x40] ss:$8 sps:$4 sm:$0xff]  }
 0x5d9   : > { %v10841_v61 = vadd.f32 %v7392_v62, %v16377_v36  ;;  %v7394_v24 = vpop.f32.mrb[247].mxu1  ;;  %8685 = vmatpush1.bf16.msra.mxu1 %v16478_v10  ;;  %v8347_v43 = vmax.f32 %v10839_v18, 0.0  ;;  %v11490_v10 = vld [vmem:[%s17176_s4 + $0xc] ss:$16 sps:$4 sm:$0xff]  }
 0x5da   : > { %v10842_v1 = vadd.f32 %v7394_v24, %v16377_v36  ;;  %8686 = vmatprep.subr.bf16.mxu1 %v8478_v53  ;;  %v8348_v33 = vmax.f32 %v10840_v37, 0.0 }
 0x5db   : > { %v8357_v51 = vmax.f32 %v10841_v61, 0.0  ;;  %8082 = vmatmul.mubr.bf16.gmra.mrb[80].mxu0 %v11489_v14 }
 0x5dc   : > { %v8358_v63 = vmax.f32 %v10842_v1, 0.0  ;;  %10542 = vmatprep.mubr.msk.bf16.mxu0 %vm6864_vm3, %v11490_v10  ;;  %8648 = vmatmul.mubr.bf16.gmra.mrb[52].mxu1 %v16537_v52 }
 0x5dd   : > { %v8497_v54 = vpack.c.bf16 %v8357_v51, %v8347_v43  ;;  %8687 = vmatpush1.bf16.msra.mxu1 %v8477_v7  ;;  %10565 = vmatprep.mubr.msk.bf16.mxu1 %vm1886_vm0, %v16544_v12  ;;  %v11493_v43 = vld [vmem:[%s17176_s4 + $0x28] ss:$16 sps:$4 sm:$0xff]  }
 0x5de   : > { %v8498_v20 = vpack.c.bf16 %v8358_v63, %v8348_v33  ;;  %v7398_v16 = vpop.f32.mrb[248].mxu1  ;;  %8688 = vmatprep.subr.bf16.mxu1 %v8488_v9  ;;  %v11494_v33 = vld [vmem:[%s17176_s4 + $0x4c] ss:$16 sps:$4 sm:$0xff]  }
 0x5df   : > { %v10843_v41 = vadd.f32 %v7398_v16, %v16400_v15  ;;  %v7400_v11 = vpop.f32.mrb[249].mxu1 }
 0x5e0   : > { %v10844_v53 = vadd.f32 %v7400_v11, %v16400_v15  ;;  %v7402_v45 = vpop.f32.mrb[250].mxu1 }
 0x5e1   : > { %v10845_v4 = vadd.f32 %v7402_v45, %v16398_v28  ;;  %v7404_v7 = vpop.f32.mrb[251].mxu1  ;;  %8689 = vmatpush1.bf16.msra.mxu1 %v8487_v44  ;;  %v8367_v5 = vmax.f32 %v10843_v41, 0.0 }
 0x5e2   : > { %v10846_v38 = vadd.f32 %v7404_v7, %v16398_v28  ;;  %8690 = vmatprep.subr.bf16.mxu1 %v8498_v20  ;;  %v8368_v60 = vmax.f32 %v10844_v53, 0.0 }
 0x5e3   : > { %v8377_v42 = vmax.f32 %v10845_v4, 0.0  ;;  %8125 = vmatmul.mubr.bf16.vlgmr.msra.gmra.mrb[44].mxu0 %v11491_v21 }
 0x5e4   : > { %v8378_v25 = vmax.f32 %v10846_v38, 0.0  ;;  %10543 = vmatprep.mubr.msk.bf16.mxu0 %vm6864_vm3, %v11492_v40  ;;  %8658 = vmatmul.mubr.bf16.gmra.mrb[56].mxu1 %v16562_v26 }
 0x5e5   : > { %v8507_v30 = vpack.c.bf16 %v8377_v42, %v8367_v5  ;;  %8691 = vmatpush1.bf16.msra.mxu1 %v8497_v54  ;;  %10566 = vmatprep.mubr.msk.bf16.mxu1 %vm1886_vm0, %v16568_v6  ;;  %v11495_v5 = vld [vmem:[%s17176_s4 + $0x48] ss:$16 sps:$4 sm:$0xff]  }
 0x5e6   : > { %v8508_v57 = vpack.c.bf16 %v8378_v25, %v8368_v60  ;;  %v7408_v46 = vpop.f32.mrb[252].mxu1  ;;  %v11496_v60 = vld [vmem:[%s17176_s4 + $0x6c] ss:$16 sps:$4 sm:$0xff]  }
 0x5e7   : > { %v10847_v44 = vadd.f32 %v7408_v46, %v16427_v50  ;;  %v7410_v9 = vpop.f32.mrb[253].mxu1  ;;  %v11499_v46 = vld [vmem:[%s17176_s4 + $0x88] ss:$16 sps:$4 sm:$0xff]  }
 0x5e8   : > { %v10848_v2 = vadd.f32 %v7410_v9, %v16427_v50  ;;  %v7412_v18 = vpop.f32.mrb[254].mxu1  ;;  %8692 = vmatprep.subr.bf16.mxu1 %v8508_v57  ;;  %v11498_v57 = vld [vmem:[%s17176_s4 + $0x8c] ss:$16 sps:$4 sm:$0xff]   ;;  %v11501_v9 = vld [vmem:[%s17176_s4 + $0xa8] ss:$16 sps:$4 sm:$0xff]  }
 0x5e9   : > { %v10849_v37 = vadd.f32 %v7412_v18, %v16425_v48  ;;  %v7414_v62 = vpop.f32.mrb[255].mxu1  ;;  %8693 = vmatpush1.bf16.msra.mxu1 %v8507_v30  ;;  %v8387_v24 = vmax.f32 %v10847_v44, 0.0  ;;  %v11497_v30 = vld [vmem:[%s17176_s4 + $0x68] ss:$16 sps:$4 sm:$0xff]   ;;  %v11500_v44 = vld [vmem:[%s17176_s4 + $0xac] ss:$16 sps:$4 sm:$0xff]  }
 0x5ea   : > { %v10850_v61 = vadd.f32 %v7414_v62, %v16425_v48  ;;  %v8388_v51 = vmax.f32 %v10848_v2, 0.0  ;;  %v11502_v2 = vld [vmem:[%s17176_s4 + $0xcc] ss:$16 sps:$4 sm:$0xff]   ;;  %v11503_v18 = vld [vmem:[%s17176_s4 + $0xc8] ss:$16 sps:$4 sm:$0xff]  }
 0x5eb   : > { %v8397_v1 = vmax.f32 %v10849_v37, 0.0  ;;  %8135 = vmatmul.mubr.bf16.gmra.mrb[48].mxu0 %v11493_v43  ;;  %v11504_v37 = vld [vmem:[%s17176_s4 + $0xec] ss:$16 sps:$4 sm:$0xff]  }
 0x5ec   : > { %v8398_v14 = vmax.f32 %v10850_v61, 0.0  ;;  %10544 = vmatprep.mubr.msk.bf16.mxu0 %vm6864_vm3, %v11494_v33  ;;  %8668 = vmatmul.mubr.bf16.gmra.mrb[60].mxu1 %v16586_v49 }
 0x5ed   : > { %v8517_v63 = vpack.c.bf16 %v8397_v1, %v8387_v24  ;;  %10567 = vmatprep.mubr.msk.bf16.mxu1 %vm1886_vm0, %v16446_v34 }
 0x5ee   : > { %v8518_v10 = vpack.c.bf16 %v8398_v14, %v8388_v51  ;;  %v7418_v54 = vpop.f32.mrb[0].mxu1 }
 0x5ef   : > { %v10851_v20 = vadd.f32 %v7418_v54, %v16456_v8  ;;  %v7420_v16 = vpop.f32.mrb[1].mxu1  ;;  %v11505_v54 = vld [vmem:[%s17176_s4 + $0xe8] ss:$16 sps:$4 sm:$0xff]  }
 0x5f0   : > { %v10852_v41 = vadd.f32 %v7420_v16, %v16456_v8  ;;  %v7422_v11 = vpop.f32.mrb[2].mxu1  ;;  %8694 = vmatprep.subr.bf16.mxu1 %v8518_v10 }
 0x5f1   : > { %v10853_v53 = vadd.f32 %v7422_v11, %v16454_v55  ;;  %v7424_v45 = vpop.f32.mrb[3].mxu1  ;;  %8695 = vmatpush1.bf16.msra.mxu1 %v8517_v63  ;;  %v8407_v7 = vmax.f32 %v10851_v20, 0.0 }
 0x5f2   : > { %v10854_v4 = vadd.f32 %v7424_v45, %v16454_v55  ;;  %v8408_v42 = vmax.f32 %v10852_v41, 0.0  ;;  %v11506_v41 = vld [vmem:[%s17176_s4 + $0x10c] ss:$16 sps:$4 sm:$0xff]  }
 0x5f3   : > { %v8417_v38 = vmax.f32 %v10853_v53, 0.0  ;;  %8145 = vmatmul.mubr.bf16.gmra.mrb[52].mxu0 %v11495_v5 }
 0x5f4   : > { %v8418_v21 = vmax.f32 %v10854_v4, 0.0  ;;  %10545 = vmatprep.mubr.msk.bf16.mxu0 %vm6864_vm3, %v11496_v60 }
 0x5f5   : > { %v8527_v25 = vpack.c.bf16 %v8417_v38, %v8407_v7 }
 0x5f6   : > { %v8528_v40 = vpack.c.bf16 %v8418_v21, %v8408_v42 }
 0x5f8   : > { %8696 = vmatprep.subr.bf16.mxu1 %v8528_v40 }
 0x5f9   : > { %8697 = vmatpush1.bf16.msra.mxu1 %v8527_v25 }
 0x5fb   : > { %8155 = vmatmul.mubr.bf16.gmra.mrb[56].mxu0 %v11497_v30  ;;  %v11507_v30 = vld [vmem:[%s17176_s4 + $0x108] ss:$16 sps:$4 sm:$0xff]  }
 0x5fc   : > { %10546 = vmatprep.mubr.msk.bf16.mxu0 %vm6864_vm3, %v11498_v57  ;;  %8711 = vmatmul.mubr.bf16.vlgmr.msra.gmra.mrb[64].mxu1 %v16489_v13 }
 0x5fd   : > { %10568 = vmatprep.mubr.msk.bf16.mxu1 %vm1886_vm0, %v16495_v35 }
 0x603   : > { %8165 = vmatmul.mubr.bf16.gmra.mrb[60].mxu0 %v11499_v46 }
 0x604   : > { %10547 = vmatprep.mubr.msk.bf16.mxu0 %vm6864_vm3, %v11500_v44  ;;  %8721 = vmatmul.mubr.bf16.gmra.mrb[68].mxu1 %v16511_v17  ;;  %v11508_v44 = vld [vmem:[%s17176_s4 + $0x12c] ss:$16 sps:$4 sm:$0xff]  }
 0x605   : > { %10569 = vmatprep.mubr.msk.bf16.mxu1 %vm1886_vm0, %v16518_v22 }
 0x60b   : > { %8175 = vmatmul.mubr.bf16.gmra.mrb[64].mxu0 %v11501_v9 }
 0x60c   : > { %10548 = vmatprep.mubr.msk.bf16.mxu0 %vm6864_vm3, %v11502_v2  ;;  %8731 = vmatmul.mubr.bf16.gmra.mrb[72].mxu1 %v16537_v52 }
 0x60d   : > { %10570 = vmatprep.mubr.msk.bf16.mxu1 %vm1886_vm0, %v16544_v12 }
 0x613   : > { %8185 = vmatmul.mubr.bf16.gmra.mrb[68].mxu0 %v11503_v18 }
 0x614   : > { %10549 = vmatprep.mubr.msk.bf16.mxu0 %vm6864_vm3, %v11504_v37  ;;  %8741 = vmatmul.mubr.bf16.gmra.mrb[76].mxu1 %v16562_v26 }
 0x615   : > { %10571 = vmatprep.mubr.msk.bf16.mxu1 %vm1886_vm0, %v16568_v6 }
 0x616   : > { %v7594_v62 = vpop.f32.mrb[4].mxu0 }
 0x617   : > { %v10855_v61 = vadd.f32 %v7594_v62, %v16279_v31  ;;  %v7596_v24 = vpop.f32.mrb[5].mxu0 }
 0x618   : > { %v10856_v1 = vadd.f32 %v7596_v24, %v16279_v31  ;;  %v7598_v43 = vpop.f32.mrb[6].mxu0 }
 0x619   : > { %v10857_v51 = vadd.f32 %v7598_v43, %v16282_v32  ;;  %v7600_v14 = vpop.f32.mrb[7].mxu0  ;;  %v8229_v63 = vmax.f32 %v10855_v61, 0.0 }
 0x61a   : > { %v10858_v33 = vadd.f32 %v7600_v14, %v16282_v32  ;;  %v8230_v20 = vmax.f32 %v10856_v1, 0.0 }
 0x61b   : > { %v8239_v10 = vmax.f32 %v10857_v51, 0.0  ;;  %8195 = vmatmul.mubr.bf16.gmra.mrb[72].mxu0 %v11505_v54 }
 0x61c   : > { %v8240_v16 = vmax.f32 %v10858_v33, 0.0  ;;  %10550 = vmatprep.mubr.msk.bf16.mxu0 %vm6864_vm3, %v11506_v41  ;;  %8751 = vmatmul.mubr.bf16.gmra.mrb[80].mxu1 %v16586_v49 }
 0x61d   : > { %v8439_v11 = vpack.c.bf16 %v8239_v10, %v8229_v63  ;;  %10572 = vmatprep.mubr.msk.bf16.mxu1 %vm1886_vm0, %v16446_v34  ;;  %v11509_v63 = vld [vmem:[%s17176_s4 + $0x128] ss:$16 sps:$4 sm:$0xff]  }
 0x61e   : > { %v8440_v53 = vpack.c.bf16 %v8240_v16, %v8230_v20  ;;  %v7604_v45 = vpop.f32.mrb[8].mxu0 }
 0x61f   : > { %v10859_v4 = vadd.f32 %v7604_v45, %v16299_v27  ;;  %v7606_v7 = vpop.f32.mrb[9].mxu0 }
 0x620   : > { %v10860_v38 = vadd.f32 %v7606_v7, %v16299_v27  ;;  %v7608_v5 = vpop.f32.mrb[10].mxu0  ;;  %8761 = vmatprep.subr.bf16.mxu1 %v8440_v53 }
 0x621   : > { %v10861_v42 = vadd.f32 %v7608_v5, %v16302_v29  ;;  %v7610_v21 = vpop.f32.mrb[11].mxu0  ;;  %8762 = vmatpush1.bf16.msra.mxu1 %v8439_v11  ;;  %v8249_v25 = vmax.f32 %v10859_v4, 0.0 }
 0x622   : > { %v10862_v60 = vadd.f32 %v7610_v21, %v16302_v29  ;;  %v8250_v57 = vmax.f32 %v10860_v38, 0.0 }
 0x623   : > { %v8259_v40 = vmax.f32 %v10861_v42, 0.0  ;;  %8205 = vmatmul.mubr.bf16.gmra.mrb[76].mxu0 %v11507_v30 }
 0x624   : > { %v8260_v46 = vmax.f32 %v10862_v60, 0.0  ;;  %10551 = vmatprep.mubr.msk.bf16.mxu0 %vm6864_vm3, %v11508_v44 }
 0x625   : > { %v8449_v9 = vpack.c.bf16 %v8259_v40, %v8249_v25 }
 0x626   : > { %v8450_v2 = vpack.c.bf16 %v8260_v46, %v8250_v57  ;;  %v7614_v18 = vpop.f32.mrb[12].mxu0 }
 0x627   : > { %v10863_v37 = vadd.f32 %v7614_v18, %v16315_v39  ;;  %v7616_v62 = vpop.f32.mrb[13].mxu0 }
 0x628   : > { %v10864_v61 = vadd.f32 %v7616_v62, %v16315_v39  ;;  %v7618_v24 = vpop.f32.mrb[14].mxu0  ;;  %8763 = vmatprep.subr.bf16.mxu1 %v8450_v2 }
 0x629   : > { %v10865_v1 = vadd.f32 %v7618_v24, %v16318_v56  ;;  %v7620_v43 = vpop.f32.mrb[15].mxu0  ;;  %8764 = vmatpush1.bf16.msra.mxu1 %v8449_v9  ;;  %v8269_v14 = vmax.f32 %v10863_v37, 0.0 }
 0x62a   : > { %v10866_v51 = vadd.f32 %v7620_v43, %v16318_v56  ;;  %v8270_v10 = vmax.f32 %v10864_v61, 0.0 }
 0x62b   : > { %v8279_v33 = vmax.f32 %v10865_v1, 0.0  ;;  %8215 = vmatmul.mubr.bf16.gmra.mrb[80].mxu0 %v11509_v63 }
 0x62c   : > { %v8280_v54 = vmax.f32 %v10866_v51, 0.0  ;;  %10582 = vmatprep.mubr.msk.bf16.mxu0 %vm1886_vm0, %v16446_v34 }
 0x62d   : > { %v8459_v20 = vpack.c.bf16 %v8279_v33, %v8269_v14 }
 0x62e   : > { %v8460_v16 = vpack.c.bf16 %v8280_v54, %v8270_v10  ;;  %v7624_v41 = vpop.f32.mrb[16].mxu0 }
 0x62f   : > { %v10867_v11 = vadd.f32 %v7624_v41, %v16328_v0  ;;  %v7626_v53 = vpop.f32.mrb[17].mxu0 }
 0x630   : > { %v10868_v45 = vadd.f32 %v7626_v53, %v16328_v0  ;;  %v7628_v4 = vpop.f32.mrb[18].mxu0  ;;  %8765 = vmatprep.subr.bf16.mxu1 %v8460_v16 }
 0x631   : > { %v10869_v7 = vadd.f32 %v7628_v4, %v16331_v59  ;;  %v7630_v38 = vpop.f32.mrb[19].mxu0  ;;  %8766 = vmatpush1.bf16.msra.mxu1 %v8459_v20  ;;  %v8289_v42 = vmax.f32 %v10867_v11, 0.0 }
 0x632   : > { %v10870_v5 = vadd.f32 %v7630_v38, %v16331_v59  ;;  %v8290_v60 = vmax.f32 %v10868_v45, 0.0 }
 0x633   : > { %v8299_v21 = vmax.f32 %v10869_v7, 0.0 }
 0x634   : > { %v8300_v34 = vmax.f32 %v10870_v5, 0.0 }
 0x635   : > { %v8469_v25 = vpack.c.bf16 %v8299_v21, %v8289_v42 }
 0x636   : > { %v8470_v40 = vpack.c.bf16 %v8300_v34, %v8290_v60  ;;  %v7634_v30 = vpop.f32.mrb[20].mxu0 }
 0x637   : > { %v10871_v57 = vadd.f32 %v7634_v30, %v16343_v47  ;;  %v7636_v46 = vpop.f32.mrb[21].mxu0 }
 0x638   : > { %v10872_v44 = vadd.f32 %v7636_v46, %v16343_v47  ;;  %v7638_v9 = vpop.f32.mrb[22].mxu0  ;;  %8767 = vmatprep.subr.bf16.mxu1 %v8470_v40 }
 0x639   : > { %v10873_v2 = vadd.f32 %v7638_v9, %v16346_v23  ;;  %v7640_v18 = vpop.f32.mrb[23].mxu0  ;;  %8768 = vmatpush1.bf16.msra.mxu1 %v8469_v25  ;;  %v8309_v62 = vmax.f32 %v10871_v57, 0.0 }
 0x63a   : > { %v10874_v37 = vadd.f32 %v7640_v18, %v16346_v23  ;;  %v8310_v24 = vmax.f32 %v10872_v44, 0.0 }
 0x63b   : > { %v8319_v61 = vmax.f32 %v10873_v2, 0.0 }
 0x63c   : > { %v8320_v1 = vmax.f32 %v10874_v37, 0.0 }
 0x63d   : > { %v8479_v43 = vpack.c.bf16 %v8319_v61, %v8309_v62 }
 0x63e   : > { %v8480_v51 = vpack.c.bf16 %v8320_v1, %v8310_v24  ;;  %v7644_v14 = vpop.f32.mrb[24].mxu0 }
 0x63f   : > { %v10875_v33 = vadd.f32 %v7644_v14, %v16362_v3  ;;  %v7646_v63 = vpop.f32.mrb[25].mxu0 }
 0x640   : > { %v10876_v10 = vadd.f32 %v7646_v63, %v16362_v3  ;;  %v7648_v54 = vpop.f32.mrb[26].mxu0  ;;  %8769 = vmatprep.subr.bf16.mxu1 %v8480_v51 }
 0x641   : > { %v10877_v20 = vadd.f32 %v7648_v54, %v16364_v19  ;;  %v7650_v16 = vpop.f32.mrb[27].mxu0  ;;  %8770 = vmatpush1.bf16.msra.mxu1 %v8479_v43  ;;  %v8329_v11 = vmax.f32 %v10875_v33, 0.0 }
 0x642   : > { %v10878_v41 = vadd.f32 %v7650_v16, %v16364_v19  ;;  %v8330_v45 = vmax.f32 %v10876_v10, 0.0 }
 0x643   : > { %v8339_v53 = vmax.f32 %v10877_v20, 0.0 }
 0x644   : > { %v8340_v4 = vmax.f32 %v10878_v41, 0.0 }
 0x645   : > { %v8489_v7 = vpack.c.bf16 %v8339_v53, %v8329_v11 }
 0x646   : > { %v8490_v38 = vpack.c.bf16 %v8340_v4, %v8330_v45  ;;  %v7654_v5 = vpop.f32.mrb[28].mxu0  ;;  %v7860_v42 = vpop.f32.mrb[4].mxu1 }
 0x647   : > { %v10879_v21 = vadd.f32 %v7654_v5, %v16379_v58  ;;  %v10895_v60 = vadd.f32 %v7860_v42, %v16279_v31  ;;  %v7656_v34 = vpop.f32.mrb[29].mxu0  ;;  %v7862_v25 = vpop.f32.mrb[5].mxu1 }
 0x648   : > { %v10880_v40 = vadd.f32 %v7656_v34, %v16379_v58  ;;  %v10896_v30 = vadd.f32 %v7862_v25, %v16279_v31  ;;  %v7658_v57 = vpop.f32.mrb[30].mxu0  ;;  %v7864_v46 = vpop.f32.mrb[6].mxu1  ;;  %8771 = vmatprep.subr.bf16.mxu1 %v8490_v38 }
 0x649   : > { %v10881_v44 = vadd.f32 %v7658_v57, %v16377_v36  ;;  %v10897_v9 = vadd.f32 %v7864_v46, %v16282_v32  ;;  %v7660_v2 = vpop.f32.mrb[31].mxu0  ;;  %v7866_v18 = vpop.f32.mrb[7].mxu1  ;;  %8772 = vmatpush1.bf16.msra.mxu1 %v8489_v7  ;;  %v8349_v61 = vmax.f32 %v10879_v21, 0.0  ;;  %v8231_v24 = vmax.f32 %v10895_v60, 0.0 }
 0x64a   : > { %v10882_v37 = vadd.f32 %v7660_v2, %v16377_v36  ;;  %v10898_v62 = vadd.f32 %v7866_v18, %v16282_v32  ;;  %v8350_v51 = vmax.f32 %v10880_v40, 0.0  ;;  %v8232_v14 = vmax.f32 %v10896_v30, 0.0 }
 0x64b   : > { %v8359_v1 = vmax.f32 %v10881_v44, 0.0  ;;  %v8241_v43 = vmax.f32 %v10897_v9, 0.0 }
 0x64c   : > { %v8360_v33 = vmax.f32 %v10882_v37, 0.0  ;;  %v8242_v63 = vmax.f32 %v10898_v62, 0.0 }
 0x64d   : > { %v8499_v10 = vpack.c.bf16 %v8359_v1, %v8349_v61  ;;  %v16705_v54 = vpack.c.bf16 %v8241_v43, %v8231_v24 }
 0x64e   : > { %v8500_v20 = vpack.c.bf16 %v8360_v33, %v8350_v51  ;;  %v16707_v16 = vpack.c.bf16 %v8242_v63, %v8232_v14  ;;  %v7664_v41 = vpop.f32.mrb[32].mxu0  ;;  %v7870_v11 = vpop.f32.mrb[8].mxu1 }
 0x64f   : > { %v10883_v53 = vadd.f32 %v7664_v41, %v16400_v15  ;;  %v10899_v45 = vadd.f32 %v7870_v11, %v16299_v27  ;;  %v7666_v4 = vpop.f32.mrb[33].mxu0  ;;  %v7872_v7 = vpop.f32.mrb[9].mxu1 }
 0x650   : > { %v10884_v38 = vadd.f32 %v7666_v4, %v16400_v15  ;;  %v10900_v5 = vadd.f32 %v7872_v7, %v16299_v27  ;;  %v7668_v42 = vpop.f32.mrb[34].mxu0  ;;  %v7874_v21 = vpop.f32.mrb[10].mxu1  ;;  %8773 = vmatprep.subr.bf16.mxu1 %v8500_v20 }
 0x651   : > { %v10885_v60 = vadd.f32 %v7668_v42, %v16398_v28  ;;  %v10901_v34 = vadd.f32 %v7874_v21, %v16302_v29  ;;  %v7670_v25 = vpop.f32.mrb[35].mxu0  ;;  %v7876_v40 = vpop.f32.mrb[11].mxu1  ;;  %8774 = vmatpush1.bf16.msra.mxu1 %v8499_v10  ;;  %v8369_v46 = vmax.f32 %v10883_v53, 0.0  ;;  %v8251_v44 = vmax.f32 %v10899_v45, 0.0 }
 0x652   : > { %v10886_v30 = vadd.f32 %v7670_v25, %v16398_v28  ;;  %v10902_v57 = vadd.f32 %v7876_v40, %v16302_v29  ;;  %v8370_v18 = vmax.f32 %v10884_v38, 0.0  ;;  %v8252_v37 = vmax.f32 %v10900_v5, 0.0 }
 0x653   : > { %v8379_v9 = vmax.f32 %v10885_v60, 0.0  ;;  %v8261_v2 = vmax.f32 %v10901_v34, 0.0 }
 0x654   : > { %v8380_v62 = vmax.f32 %v10886_v30, 0.0  ;;  %v8262_v61 = vmax.f32 %v10902_v57, 0.0 }
 0x655   : > { %v8509_v24 = vpack.c.bf16 %v8379_v9, %v8369_v46  ;;  %v16717_v1 = vpack.c.bf16 %v8261_v2, %v8251_v44 }
 0x656   : > { %v8510_v43 = vpack.c.bf16 %v8380_v62, %v8370_v18  ;;  %v16719_v51 = vpack.c.bf16 %v8262_v61, %v8252_v37  ;;  %v7674_v14 = vpop.f32.mrb[36].mxu0  ;;  %v7880_v33 = vpop.f32.mrb[12].mxu1 }
 0x657   : > { %v10887_v63 = vadd.f32 %v7674_v14, %v16427_v50  ;;  %v10903_v10 = vadd.f32 %v7880_v33, %v16315_v39  ;;  %v7676_v20 = vpop.f32.mrb[37].mxu0  ;;  %v7882_v41 = vpop.f32.mrb[13].mxu1 }
 0x658   : > { %v10888_v11 = vadd.f32 %v7676_v20, %v16427_v50  ;;  %v10904_v53 = vadd.f32 %v7882_v41, %v16315_v39  ;;  %v7678_v45 = vpop.f32.mrb[38].mxu0  ;;  %v7884_v4 = vpop.f32.mrb[14].mxu1  ;;  %8775 = vmatprep.subr.bf16.mxu1 %v8510_v43 }
 0x659   : > { %v10889_v7 = vadd.f32 %v7678_v45, %v16425_v48  ;;  %v10905_v38 = vadd.f32 %v7884_v4, %v16318_v56  ;;  %v7680_v5 = vpop.f32.mrb[39].mxu0  ;;  %v7886_v42 = vpop.f32.mrb[15].mxu1  ;;  %8776 = vmatpush1.bf16.msra.mxu1 %v8509_v24  ;;  %v8389_v34 = vmax.f32 %v10887_v63, 0.0  ;;  %v8271_v25 = vmax.f32 %v10903_v10, 0.0 }
 0x65a   : > { %v10890_v21 = vadd.f32 %v7680_v5, %v16425_v48  ;;  %v10906_v60 = vadd.f32 %v7886_v42, %v16318_v56  ;;  %v8390_v57 = vmax.f32 %v10888_v11, 0.0  ;;  %v8272_v46 = vmax.f32 %v10904_v53, 0.0 }
 0x65b   : > { %v8399_v40 = vmax.f32 %v10889_v7, 0.0  ;;  %v8281_v30 = vmax.f32 %v10905_v38, 0.0 }
 0x65c   : > { %v8400_v44 = vmax.f32 %v10890_v21, 0.0  ;;  %v8282_v9 = vmax.f32 %v10906_v60, 0.0 }
 0x65d   : > { %v8519_v2 = vpack.c.bf16 %v8399_v40, %v8389_v34  ;;  %v16729_v18 = vpack.c.bf16 %v8281_v30, %v8271_v25 }
 0x65e   : > { %v8520_v37 = vpack.c.bf16 %v8400_v44, %v8390_v57  ;;  %v8462_v62 = vpack.c.bf16 %v8282_v9, %v8272_v46  ;;  %v7684_v61 = vpop.f32.mrb[40].mxu0  ;;  %v7890_v43 = vpop.f32.mrb[16].mxu1 }
 0x65f   : > { %v10891_v24 = vadd.f32 %v7684_v61, %v16456_v8  ;;  %v10907_v14 = vadd.f32 %v7890_v43, %v16328_v0  ;;  %v7686_v33 = vpop.f32.mrb[41].mxu0  ;;  %v7892_v63 = vpop.f32.mrb[17].mxu1 }
 0x660   : > { %v10892_v10 = vadd.f32 %v7686_v33, %v16456_v8  ;;  %v10908_v20 = vadd.f32 %v7892_v63, %v16328_v0  ;;  %v7688_v41 = vpop.f32.mrb[42].mxu0  ;;  %v7894_v11 = vpop.f32.mrb[18].mxu1  ;;  %8777 = vmatprep.subr.bf16.mxu1 %v8520_v37 }
 0x661   : > { %v10893_v53 = vadd.f32 %v7688_v41, %v16454_v55  ;;  %v10909_v45 = vadd.f32 %v7894_v11, %v16331_v59  ;;  %v7690_v4 = vpop.f32.mrb[43].mxu0  ;;  %v7896_v7 = vpop.f32.mrb[19].mxu1  ;;  %8778 = vmatpush1.bf16.msra.mxu1 %v8519_v2  ;;  %v8409_v42 = vmax.f32 %v10891_v24, 0.0  ;;  %v8291_v21 = vmax.f32 %v10907_v14, 0.0 }
 0x662   : > { %v10894_v38 = vadd.f32 %v7690_v4, %v16454_v55  ;;  %v10910_v5 = vadd.f32 %v7896_v7, %v16331_v59  ;;  %v8410_v25 = vmax.f32 %v10892_v10, 0.0  ;;  %v8292_v40 = vmax.f32 %v10908_v20, 0.0 }
 0x663   : > { %v8419_v60 = vmax.f32 %v10893_v53, 0.0  ;;  %v8301_v34 = vmax.f32 %v10909_v45, 0.0 }
 0x664   : > { %v8420_v30 = vmax.f32 %v10894_v38, 0.0  ;;  %v8302_v57 = vmax.f32 %v10910_v5, 0.0 }
 0x665   : > { %v8529_v46 = vpack.c.bf16 %v8419_v60, %v8409_v42  ;;  %v8471_v44 = vpack.c.bf16 %v8301_v34, %v8291_v21 }
 0x666   : > { %v8530_v9 = vpack.c.bf16 %v8420_v30, %v8410_v25  ;;  %v8472_v37 = vpack.c.bf16 %v8302_v57, %v8292_v40  ;;  %v7900_v61 = vpop.f32.mrb[20].mxu1 }
 0x667   : > { %v10911_v43 = vadd.f32 %v7900_v61, %v16343_v47  ;;  %v7902_v2 = vpop.f32.mrb[21].mxu1 }
 0x668   : > { %v10912_v33 = vadd.f32 %v7902_v2, %v16343_v47  ;;  %v7904_v63 = vpop.f32.mrb[22].mxu1  ;;  %8779 = vmatprep.subr.bf16.mxu1 %v8530_v9 }
 0x669   : > { %v10913_v24 = vadd.f32 %v7904_v63, %v16346_v23  ;;  %v7906_v14 = vpop.f32.mrb[23].mxu1  ;;  %8780 = vmatpush1.bf16.msra.mxu1 %v8529_v46  ;;  %v8311_v20 = vmax.f32 %v10911_v43, 0.0 }
 0x66a   : > { %v10914_v10 = vadd.f32 %v7906_v14, %v16346_v23  ;;  %8844 = vmatprep.subr.bf16.mxu1 %v16707_v16  ;;  %v8312_v11 = vmax.f32 %v10912_v33, 0.0 }
 0x66b   : > { %v8321_v41 = vmax.f32 %v10913_v24, 0.0 }
 0x66c   : > { %v8322_v53 = vmax.f32 %v10914_v10, 0.0  ;;  %8794 = vmatmul.mubr.bf16.vlgmr.msra.gmra.mrb[84].mxu1 %v16489_v13 }
 0x66d   : > { %v8481_v45 = vpack.c.bf16 %v8321_v41, %v8311_v20  ;;  %8845 = vmatpush1.bf16.msra.mxu1 %v16705_v54  ;;  %10573 = vmatprep.mubr.msk.bf16.mxu1 %vm1886_vm0, %v16495_v35 }
 0x66e   : > { %v8482_v4 = vpack.c.bf16 %v8322_v53, %v8312_v11  ;;  %v7910_v7 = vpop.f32.mrb[24].mxu1  ;;  %8846 = vmatprep.subr.bf16.mxu1 %v16719_v51 }
 0x66f   : > { %v10915_v38 = vadd.f32 %v7910_v7, %v16362_v3  ;;  %v7912_v5 = vpop.f32.mrb[25].mxu1 }
 0x670   : > { %v10916_v16 = vadd.f32 %v7912_v5, %v16362_v3  ;;  %v7914_v42 = vpop.f32.mrb[26].mxu1 }
 0x671   : > { %v10917_v21 = vadd.f32 %v7914_v42, %v16364_v19  ;;  %v7916_v60 = vpop.f32.mrb[27].mxu1  ;;  %8847 = vmatpush1.bf16.msra.mxu1 %v16717_v1  ;;  %v8331_v34 = vmax.f32 %v10915_v38, 0.0 }
 0x672   : > { %v10918_v54 = vadd.f32 %v7916_v60, %v16364_v19  ;;  %8848 = vmatprep.subr.bf16.mxu1 %v8462_v62  ;;  %v8332_v40 = vmax.f32 %v10916_v16, 0.0 }
 0x673   : > { %v8341_v25 = vmax.f32 %v10917_v21, 0.0 }
 0x674   : > { %v8342_v30 = vmax.f32 %v10918_v54, 0.0  ;;  %8804 = vmatmul.mubr.bf16.gmra.mrb[88].mxu1 %v16511_v17 }
 0x675   : > { %v8491_v51 = vpack.c.bf16 %v8341_v25, %v8331_v34  ;;  %8849 = vmatpush1.bf16.msra.mxu1 %v16729_v18  ;;  %10574 = vmatprep.mubr.msk.bf16.mxu1 %vm1886_vm0, %v16518_v22 }
 0x676   : > { %v8492_v57 = vpack.c.bf16 %v8342_v30, %v8332_v40  ;;  %v7920_v46 = vpop.f32.mrb[28].mxu1  ;;  %8850 = vmatprep.subr.bf16.mxu1 %v8472_v37 }
 0x677   : > { %v10919_v1 = vadd.f32 %v7920_v46, %v16379_v58  ;;  %v7922_v9 = vpop.f32.mrb[29].mxu1 }
 0x678   : > { %v10920_v62 = vadd.f32 %v7922_v9, %v16379_v58  ;;  %v7924_v61 = vpop.f32.mrb[30].mxu1 }
 0x679   : > { %v10921_v43 = vadd.f32 %v7924_v61, %v16377_v36  ;;  %v7926_v2 = vpop.f32.mrb[31].mxu1  ;;  %8851 = vmatpush1.bf16.msra.mxu1 %v8471_v44  ;;  %v8351_v18 = vmax.f32 %v10919_v1, 0.0 }
 0x67a   : > { %v10922_v33 = vadd.f32 %v7926_v2, %v16377_v36  ;;  %8852 = vmatprep.subr.bf16.mxu1 %v8482_v4  ;;  %v8352_v24 = vmax.f32 %v10920_v62, 0.0  ;;  %v11510_v2 = vld [vmem:[%s17178_s6 + $0x4] ss:$8 sps:$4 sm:$0xff]  }
 0x67b   : > { %v8361_v63 = vmax.f32 %v10921_v43, 0.0 }
 0x67c   : > { %v8362_v14 = vmax.f32 %v10922_v33, 0.0  ;;  %8814 = vmatmul.mubr.bf16.gmra.mrb[92].mxu1 %v16537_v52 }
 0x67d   : > { %v8501_v37 = vpack.c.bf16 %v8361_v63, %v8351_v18  ;;  %8853 = vmatpush1.bf16.msra.mxu1 %v8481_v45  ;;  %10575 = vmatprep.mubr.msk.bf16.mxu1 %vm1886_vm0, %v16544_v12 }
 0x67e   : > { %v8502_v10 = vpack.c.bf16 %v8362_v14, %v8352_v24  ;;  %v7930_v20 = vpop.f32.mrb[32].mxu1  ;;  %8854 = vmatprep.subr.bf16.mxu1 %v8492_v57 }
 0x67f   : > { %v10923_v41 = vadd.f32 %v7930_v20, %v16400_v15  ;;  %v7932_v44 = vpop.f32.mrb[33].mxu1 }
 0x680   : > { %v10924_v11 = vadd.f32 %v7932_v44, %v16400_v15  ;;  %v7934_v53 = vpop.f32.mrb[34].mxu1 }
 0x681   : > { %v10925_v4 = vadd.f32 %v7934_v53, %v16398_v28  ;;  %v7936_v7 = vpop.f32.mrb[35].mxu1  ;;  %8855 = vmatpush1.bf16.msra.mxu1 %v8491_v51  ;;  %v8371_v45 = vmax.f32 %v10923_v41, 0.0 }
 0x682   : > { %v10926_v38 = vadd.f32 %v7936_v7, %v16398_v28  ;;  %8856 = vmatprep.subr.bf16.mxu1 %v8502_v10  ;;  %v8372_v16 = vmax.f32 %v10924_v11, 0.0 }
 0x683   : > { %v8381_v5 = vmax.f32 %v10925_v4, 0.0 }
 0x684   : > { %v8382_v42 = vmax.f32 %v10926_v38, 0.0  ;;  %8824 = vmatmul.mubr.bf16.gmra.mrb[96].mxu1 %v16562_v26 }
 0x685   : > { %v8511_v21 = vpack.c.bf16 %v8381_v5, %v8371_v45  ;;  %8857 = vmatpush1.bf16.msra.mxu1 %v8501_v37  ;;  %10576 = vmatprep.mubr.msk.bf16.mxu1 %vm1886_vm0, %v16568_v6 }
 0x686   : > { %v8512_v60 = vpack.c.bf16 %v8382_v42, %v8372_v16  ;;  %v7940_v54 = vpop.f32.mrb[36].mxu1 }
 0x687   : > { %v10927_v34 = vadd.f32 %v7940_v54, %v16427_v50  ;;  %v7942_v25 = vpop.f32.mrb[37].mxu1 }
 0x688   : > { %v10928_v40 = vadd.f32 %v7942_v25, %v16427_v50  ;;  %v7944_v30 = vpop.f32.mrb[38].mxu1  ;;  %8858 = vmatprep.subr.bf16.mxu1 %v8512_v60 }
 0x689   : > { %v10929_v51 = vadd.f32 %v7944_v30, %v16425_v48  ;;  %v7946_v57 = vpop.f32.mrb[39].mxu1  ;;  %8859 = vmatpush1.bf16.msra.mxu1 %v8511_v21  ;;  %v8391_v1 = vmax.f32 %v10927_v34, 0.0 }
 0x68a   : > { %v10930_v46 = vadd.f32 %v7946_v57, %v16425_v48  ;;  %v8392_v62 = vmax.f32 %v10928_v40, 0.0 }
 0x68b   : > { %v8401_v9 = vmax.f32 %v10929_v51, 0.0 }
 0x68c   : > { %v8402_v61 = vmax.f32 %v10930_v46, 0.0  ;;  %8834 = vmatmul.mubr.bf16.gmra.mrb[100].mxu1 %v16586_v49 }
 0x68d   : > { %v8521_v43 = vpack.c.bf16 %v8401_v9, %v8391_v1  ;;  %10577 = vmatprep.mubr.msk.bf16.mxu1 %vm1886_vm0, %v11510_v2 }
 0x68e   : > { %v8522_v33 = vpack.c.bf16 %v8402_v61, %v8392_v62  ;;  %v7950_v18 = vpop.f32.mrb[40].mxu1 }
 0x68f   : > { %v10931_v63 = vadd.f32 %v7950_v18, %v16456_v8  ;;  %v7952_v24 = vpop.f32.mrb[41].mxu1 }
 0x690   : > { %v10932_v14 = vadd.f32 %v7952_v24, %v16456_v8  ;;  %v7954_v37 = vpop.f32.mrb[42].mxu1  ;;  %8860 = vmatprep.subr.bf16.mxu1 %v8522_v33 }
 0x691   : > { %v10933_v10 = vadd.f32 %v7954_v37, %v16454_v55  ;;  %v7956_v20 = vpop.f32.mrb[43].mxu1  ;;  %8861 = vmatpush1.bf16.msra.mxu1 %v8521_v43  ;;  %v8411_v44 = vmax.f32 %v10931_v63, 0.0 }
 0x692   : > { %v10934_v41 = vadd.f32 %v7956_v20, %v16454_v55  ;;  %v8412_v53 = vmax.f32 %v10932_v14, 0.0 }
 0x693   : > { %v8421_v11 = vmax.f32 %v10933_v10, 0.0 }
 0x694   : > { %v8422_v4 = vmax.f32 %v10934_v41, 0.0 }
 0x695   : > { %v8531_v7 = vpack.c.bf16 %v8421_v11, %v8411_v44 }
 0x696   : > { %v8532_v38 = vpack.c.bf16 %v8422_v4, %v8412_v53 }
 0x698   : > { %8862 = vmatprep.subr.bf16.mxu1 %v8532_v38 }
 0x699   : > { %8863 = vmatpush1.bf16.msra.mxu1 %v8531_v7 }
 0x69c   : > { %8877 = vmatmul.mubr.bf16.vlgmr.msra.gmra.mrb[104].mxu1 %v16489_v13 }
 0x69d   : > { %10578 = vmatprep.mubr.msk.bf16.mxu1 %vm1886_vm0, %v16495_v35 }
 0x69f   : > { %v8629_v45 = vpop.f32.mrb[44].mxu1 }
 0x6a0   : > { %v8631_v5 = vpop.f32.mrb[45].mxu1 }
 0x6a1   : > { %v16794_v16 = vadd.f32 %v8631_v5, %v8629_v45  ;;  %v8633_v42 = vpop.f32.mrb[46].mxu1 }
 0x6a2   : > { %v8635_v21 = vpop.f32.mrb[47].mxu1 }
 0x6a3   : > { %v16796_v13 = vadd.f32 %v8635_v21, %v8633_v42 }
 0x6a4   : > { %8887 = vmatmul.mubr.bf16.gmra.mrb[108].mxu1 %v16511_v17 }
 0x6a5   : > { %10579 = vmatprep.mubr.msk.bf16.mxu1 %vm1886_vm0, %v16518_v22  ;;  %v9020_v17 = vpack.c.bf16 %v16796_v13, %v16794_v16 }
 0x6a7   : > { %v8639_v60 = vpop.f32.mrb[48].mxu1 }
 0x6a8   : > { %v8641_v35 = vpop.f32.mrb[49].mxu1 }
 0x6a9   : > { %v16800_v54 = vadd.f32 %v8641_v35, %v8639_v60  ;;  %v8643_v22 = vpop.f32.mrb[50].mxu1 }
 0x6ac   : > { %8897 = vmatmul.mubr.bf16.gmra.mrb[112].mxu1 %v16537_v52  ;;  %v8645_v52 = vpop.f32.mrb[51].mxu1 }
 0x6ad   : > { %10580 = vmatprep.mubr.msk.bf16.mxu1 %vm1886_vm0, %v16544_v12  ;;  %v16803_v34 = vadd.f32 %v8645_v52, %v8643_v22 }
 0x6af   : > { %v8649_v12 = vpop.f32.mrb[52].mxu1  ;;  %v9021_v30 = vpack.c.bf16 %v16803_v34, %v16800_v54 }
 0x6b0   : > { %v8651_v25 = vpop.f32.mrb[53].mxu1 }
 0x6b1   : > { %v16809_v51 = vadd.f32 %v8651_v25, %v8649_v12  ;;  %v8653_v57 = vpop.f32.mrb[54].mxu1 }
 0x6b2   : > { %v8655_v9 = vpop.f32.mrb[55].mxu1 }
 0x6b3   : > { %v16813_v61 = vadd.f32 %v8655_v9, %v8653_v57 }
 0x6b4   : > { %8907 = vmatmul.mubr.bf16.gmra.mrb[116].mxu1 %v16562_v26 }
 0x6b5   : > { %10581 = vmatprep.mubr.msk.bf16.mxu1 %vm1886_vm0, %v16568_v6  ;;  %v9022_v63 = vpack.c.bf16 %v16813_v61, %v16809_v51 }
 0x6b6   : > { %v8126_v40 = vpop.f32.mrb[44].mxu0 }
 0x6b7   : > { %v10935_v46 = vadd.f32 %v8126_v40, %v16279_v31  ;;  %v8128_v1 = vpop.f32.mrb[45].mxu0  ;;  %v8659_v43 = vpop.f32.mrb[56].mxu1 }
 0x6b8   : > { %v10936_v26 = vadd.f32 %v8128_v1, %v16279_v31  ;;  %v8130_v62 = vpop.f32.mrb[46].mxu0  ;;  %v8661_v33 = vpop.f32.mrb[57].mxu1 }
 0x6b9   : > { %v10937_v6 = vadd.f32 %v8130_v62, %v16282_v32  ;;  %v8132_v2 = vpop.f32.mrb[47].mxu0  ;;  %v16819_v24 = vadd.f32 %v8661_v33, %v8659_v43  ;;  %v8663_v14 = vpop.f32.mrb[58].mxu1  ;;  %v8233_v37 = vmax.f32 %v10935_v46, 0.0 }
 0x6ba   : > { %v10938_v18 = vadd.f32 %v8132_v2, %v16282_v32  ;;  %v8665_v20 = vpop.f32.mrb[59].mxu1  ;;  %v8234_v31 = vmax.f32 %v10936_v26, 0.0 }
 0x6bb   : > { %v8243_v10 = vmax.f32 %v10937_v6, 0.0  ;;  %v16822_v44 = vadd.f32 %v8665_v20, %v8663_v14 }
 0x6bc   : > { %v8244_v41 = vmax.f32 %v10938_v18, 0.0  ;;  %8917 = vmatmul.mubr.bf16.gmra.mrb[120].mxu1 %v16586_v49 }
 0x6bd   : > { %v8443_v11 = vpack.c.bf16 %v8243_v10, %v8233_v37  ;;  %v9023_v32 = vpack.c.bf16 %v16822_v44, %v16819_v24 }
 0x6be   : > { %v8444_v53 = vpack.c.bf16 %v8244_v41, %v8234_v31  ;;  %v8136_v4 = vpop.f32.mrb[48].mxu0 }
 0x6bf   : > { %v10939_v7 = vadd.f32 %v8136_v4, %v16299_v27  ;;  %v8138_v38 = vpop.f32.mrb[49].mxu0  ;;  %v8669_v45 = vpop.f32.mrb[60].mxu1 }
 0x6c0   : > { %v10940_v5 = vadd.f32 %v8138_v38, %v16299_v27  ;;  %v8140_v42 = vpop.f32.mrb[50].mxu0  ;;  %8927 = vmatprep.subr.bf16.mxu0 %v8444_v53  ;;  %v8671_v21 = vpop.f32.mrb[61].mxu1 }
 0x6c1   : > { %v10941_v60 = vadd.f32 %v8140_v42, %v16302_v29  ;;  %v8142_v49 = vpop.f32.mrb[51].mxu0  ;;  %8928 = vmatpush1.bf16.msra.mxu0 %v8443_v11  ;;  %v16829_v35 = vadd.f32 %v8671_v21, %v8669_v45  ;;  %v8673_v22 = vpop.f32.mrb[62].mxu1  ;;  %v8253_v25 = vmax.f32 %v10939_v7, 0.0 }
 0x6c2   : > { %v10942_v52 = vadd.f32 %v8142_v49, %v16302_v29  ;;  %v8675_v12 = vpop.f32.mrb[63].mxu1  ;;  %v8254_v46 = vmax.f32 %v10940_v5, 0.0 }
 0x6c3   : > { %v8263_v40 = vmax.f32 %v10941_v60, 0.0  ;;  %v16832_v57 = vadd.f32 %v8675_v12, %v8673_v22 }
 0x6c4   : > { %v8264_v1 = vmax.f32 %v10942_v52, 0.0 }
 0x6c5   : > { %v8453_v27 = vpack.c.bf16 %v8263_v40, %v8253_v25  ;;  %v9024_v9 = vpack.c.bf16 %v16832_v57, %v16829_v35 }
 0x6c6   : > { %v8454_v26 = vpack.c.bf16 %v8264_v1, %v8254_v46  ;;  %v8146_v62 = vpop.f32.mrb[52].mxu0 }
 0x6c7   : > { %v10943_v43 = vadd.f32 %v8146_v62, %v16315_v39  ;;  %v8148_v6 = vpop.f32.mrb[53].mxu0 }
 0x6c8   : > { %v10944_v2 = vadd.f32 %v8148_v6, %v16315_v39  ;;  %v8150_v33 = vpop.f32.mrb[54].mxu0  ;;  %8929 = vmatprep.subr.bf16.mxu0 %v8454_v26 }
 0x6c9   : > { %v10945_v29 = vadd.f32 %v8150_v33, %v16318_v56  ;;  %v8152_v18 = vpop.f32.mrb[55].mxu0  ;;  %8930 = vmatpush1.bf16.msra.mxu0 %v8453_v27  ;;  %v8273_v37 = vmax.f32 %v10943_v43, 0.0 }
 0x6ca   : > { %v10946_v14 = vadd.f32 %v8152_v18, %v16318_v56  ;;  %v8274_v20 = vmax.f32 %v10944_v2, 0.0 }
 0x6cb   : > { %v8283_v10 = vmax.f32 %v10945_v29, 0.0 }
 0x6cc   : > { %v8284_v31 = vmax.f32 %v10946_v14, 0.0 }
 0x6cd   : > { %v8463_v41 = vpack.c.bf16 %v8283_v10, %v8273_v37 }
 0x6ce   : > { %v8464_v11 = vpack.c.bf16 %v8284_v31, %v8274_v20  ;;  %v8156_v53 = vpop.f32.mrb[56].mxu0 }
 0x6cf   : > { %v10947_v4 = vadd.f32 %v8156_v53, %v16328_v0  ;;  %v8158_v7 = vpop.f32.mrb[57].mxu0  ;;  %v8712_v38 = vpop.f32.mrb[64].mxu1 }
 0x6d0   : > { %v10948_v39 = vadd.f32 %v8158_v7, %v16328_v0  ;;  %v8160_v45 = vpop.f32.mrb[58].mxu0  ;;  %8931 = vmatprep.subr.bf16.mxu0 %v8464_v11  ;;  %v8714_v5 = vpop.f32.mrb[65].mxu1 }
 0x6d1   : > { %v10949_v42 = vadd.f32 %v8160_v45, %v16331_v59  ;;  %v8162_v21 = vpop.f32.mrb[59].mxu0  ;;  %8932 = vmatpush1.bf16.msra.mxu0 %v8463_v41  ;;  %v16843_v56 = vadd.f32 %v8714_v5, %v8712_v38  ;;  %v8716_v60 = vpop.f32.mrb[66].mxu1  ;;  %v8293_v52 = vmax.f32 %v10947_v4, 0.0 }
 0x6d2   : > { %v10950_v49 = vadd.f32 %v8162_v21, %v16331_v59  ;;  %v8718_v22 = vpop.f32.mrb[67].mxu1  ;;  %v8294_v40 = vmax.f32 %v10948_v39, 0.0 }
 0x6d3   : > { %v8303_v12 = vmax.f32 %v10949_v42, 0.0  ;;  %v16846_v25 = vadd.f32 %v8718_v22, %v8716_v60 }
 0x6d4   : > { %v8304_v46 = vmax.f32 %v10950_v49, 0.0 }
 0x6d5   : > { %v8473_v0 = vpack.c.bf16 %v8303_v12, %v8293_v52  ;;  %v9035_v1 = vpack.c.bf16 %v16846_v25, %v16843_v56  ;;  %v11348_v56 = vld [vmem:[%s17179_s7] ss:$16 sps:$4 sm:$0xff]  }
 0x6d6   : > { %v8474_v27 = vpack.c.bf16 %v8304_v46, %v8294_v40  ;;  %v8166_v26 = vpop.f32.mrb[60].mxu0 }
 0x6d7   : > { %v10951_v62 = vadd.f32 %v8166_v26, %v16343_v47  ;;  %v8168_v43 = vpop.f32.mrb[61].mxu0  ;;  %v8722_v6 = vpop.f32.mrb[68].mxu1 }
 0x6d8   : > { %v10952_v2 = vadd.f32 %v8168_v43, %v16343_v47  ;;  %v8170_v59 = vpop.f32.mrb[62].mxu0  ;;  %8933 = vmatprep.subr.bf16.mxu0 %v8474_v27  ;;  %v8724_v33 = vpop.f32.mrb[69].mxu1 }
 0x6d9   : > { %v10953_v29 = vadd.f32 %v8170_v59, %v16346_v23  ;;  %v8172_v18 = vpop.f32.mrb[63].mxu0  ;;  %8934 = vmatpush1.bf16.msra.mxu0 %v8473_v0  ;;  %v16853_v14 = vadd.f32 %v8724_v33, %v8722_v6  ;;  %v8726_v37 = vpop.f32.mrb[70].mxu1  ;;  %v8313_v31 = vmax.f32 %v10951_v62, 0.0 }
 0x6da   : > { %v10954_v10 = vadd.f32 %v8172_v18, %v16346_v23  ;;  %v8728_v20 = vpop.f32.mrb[71].mxu1  ;;  %v8314_v53 = vmax.f32 %v10952_v2, 0.0 }
 0x6db   : > { %v8323_v41 = vmax.f32 %v10953_v29, 0.0  ;;  %v16856_v11 = vadd.f32 %v8728_v20, %v8726_v37 }
 0x6dc   : > { %v8324_v4 = vmax.f32 %v10954_v10, 0.0 }
 0x6dd   : > { %v8483_v47 = vpack.c.bf16 %v8323_v41, %v8313_v31  ;;  %v9036_v7 = vpack.c.bf16 %v16856_v11, %v16853_v14 }
 0x6de   : > { %v8484_v38 = vpack.c.bf16 %v8324_v4, %v8314_v53  ;;  %v8176_v39 = vpop.f32.mrb[64].mxu0 }
 0x6df   : > { %v10955_v45 = vadd.f32 %v8176_v39, %v16362_v3  ;;  %v8178_v5 = vpop.f32.mrb[65].mxu0  ;;  %v8732_v42 = vpop.f32.mrb[72].mxu1 }
 0x6e0   : > { %v10956_v21 = vadd.f32 %v8178_v5, %v16362_v3  ;;  %v8180_v23 = vpop.f32.mrb[66].mxu0  ;;  %8935 = vmatprep.subr.bf16.mxu0 %v8484_v38  ;;  %v8734_v60 = vpop.f32.mrb[73].mxu1 }
 0x6e1   : > { %v10957_v49 = vadd.f32 %v8180_v23, %v16364_v19  ;;  %v8182_v22 = vpop.f32.mrb[67].mxu0  ;;  %8936 = vmatpush1.bf16.msra.mxu0 %v8483_v47  ;;  %v16863_v52 = vadd.f32 %v8734_v60, %v8732_v42  ;;  %v8736_v12 = vpop.f32.mrb[74].mxu1  ;;  %v8333_v0 = vmax.f32 %v10955_v45, 0.0 }
 0x6e2   : > { %v10958_v40 = vadd.f32 %v8182_v22, %v16364_v19  ;;  %v8738_v46 = vpop.f32.mrb[75].mxu1  ;;  %v8334_v62 = vmax.f32 %v10956_v21, 0.0 }
 0x6e3   : > { %v8343_v27 = vmax.f32 %v10957_v49, 0.0  ;;  %v16866_v26 = vadd.f32 %v8738_v46, %v8736_v12 }
 0x6e4   : > { %v8344_v43 = vmax.f32 %v10958_v40, 0.0 }
 0x6e5   : > { %v8493_v3 = vpack.c.bf16 %v8343_v27, %v8333_v0  ;;  %v9037_v6 = vpack.c.bf16 %v16866_v26, %v16863_v52  ;;  %v11356_v52 = vld [vmem:[%s17179_s7 + $0x44] ss:$16 sps:$4 sm:$0xff]  }
 0x6e6   : > { %v8494_v2 = vpack.c.bf16 %v8344_v43, %v8334_v62  ;;  %v8186_v59 = vpop.f32.mrb[68].mxu0 }
 0x6e7   : > { %v10959_v33 = vadd.f32 %v8186_v59, %v16379_v58  ;;  %v8188_v29 = vpop.f32.mrb[69].mxu0  ;;  %v8742_v18 = vpop.f32.mrb[76].mxu1 }
 0x6e8   : > { %v10960_v37 = vadd.f32 %v8188_v29, %v16379_v58  ;;  %v8190_v19 = vpop.f32.mrb[70].mxu0  ;;  %8937 = vmatprep.subr.bf16.mxu0 %v8494_v2  ;;  %v8744_v10 = vpop.f32.mrb[77].mxu1 }
 0x6e9   : > { %v10961_v20 = vadd.f32 %v8190_v19, %v16377_v36  ;;  %v8192_v31 = vpop.f32.mrb[71].mxu0  ;;  %8938 = vmatpush1.bf16.msra.mxu0 %v8493_v3  ;;  %v9031_v41 = vadd.f32 %v8744_v10, %v8742_v18  ;;  %v8746_v53 = vpop.f32.mrb[78].mxu1  ;;  %v8353_v38 = vmax.f32 %v10959_v33, 0.0 }
 0x6ea   : > { %v10962_v4 = vadd.f32 %v8192_v31, %v16377_v36  ;;  %v8748_v47 = vpop.f32.mrb[79].mxu1  ;;  %v8354_v5 = vmax.f32 %v10960_v37, 0.0 }
 0x6eb   : > { %v8363_v39 = vmax.f32 %v10961_v20, 0.0  ;;  %v9032_v45 = vadd.f32 %v8748_v47, %v8746_v53 }
 0x6ec   : > { %v8364_v42 = vmax.f32 %v10962_v4, 0.0 }
 0x6ed   : > { %v8503_v21 = vpack.c.bf16 %v8363_v39, %v8353_v38  ;;  %v9038_v23 = vpack.c.bf16 %v9032_v45, %v9031_v41 }
 0x6ee   : > { %v8504_v58 = vpack.c.bf16 %v8364_v42, %v8354_v5  ;;  %v8196_v60 = vpop.f32.mrb[72].mxu0 }
 0x6ef   : > { %v10963_v49 = vadd.f32 %v8196_v60, %v16400_v15  ;;  %v8198_v22 = vpop.f32.mrb[73].mxu0  ;;  %v8752_v12 = vpop.f32.mrb[80].mxu1  ;;  %10646 = vmatprep.subr.bf16.mxu1 %v9038_v23 }
 0x6f0   : > { %v10964_v40 = vadd.f32 %v8198_v22, %v16400_v15  ;;  %v8200_v46 = vpop.f32.mrb[74].mxu0  ;;  %8939 = vmatprep.subr.bf16.mxu0 %v8504_v58  ;;  %v8754_v36 = vpop.f32.mrb[81].mxu1  ;;  %10647 = vmatpush3.bf16.msra.mxu1 %v9020_v17 }
 0x6f1   : > { %v10965_v0 = vadd.f32 %v8200_v46, %v16398_v28  ;;  %v8202_v27 = vpop.f32.mrb[75].mxu0  ;;  %8940 = vmatpush1.bf16.msra.mxu0 %v8503_v21  ;;  %v9033_v62 = vadd.f32 %v8754_v36, %v8752_v12  ;;  %v8756_v43 = vpop.f32.mrb[82].mxu1  ;;  %v8373_v59 = vmax.f32 %v10963_v49, 0.0  ;;  %v17872_v36 = vmov 0  }
 0x6f2   : > { %v10966_v3 = vadd.f32 %v8202_v27, %v16398_v28  ;;  %v8758_v2 = vpop.f32.mrb[83].mxu1  ;;  %v8374_v15 = vmax.f32 %v10964_v40, 0.0  ;;  %v11350_v28 = vld [vmem:[%s17179_s7 + $0x4] ss:$16 sps:$4 sm:$0xff]  }
 0x6f3   : > { %v8383_v33 = vmax.f32 %v10965_v0, 0.0  ;;  %v9034_v29 = vadd.f32 %v8758_v2, %v8756_v43  ;;  %9408 = vmatprep.mubr.bf16.mxu1 %v11350_v28  ;;  %v11512_v0 = vld [vmem:[%s17178_s6 + $0x14] ss:$8 sps:$4 sm:$0xff]   ;;  %v11514_v27 = vld [vmem:[%s17178_s6 + $0x24] ss:$8 sps:$4 sm:$0xff]  }
 0x6f4   : > { %v8384_v18 = vmax.f32 %v10966_v3, 0.0  ;;  %v11516_v43 = vld [vmem:[%s17178_s6 + $0x34] ss:$8 sps:$4 sm:$0xff]   ;;  %v11517_v3 = vld [vmem:[%s17178_s6 + $0x30] ss:$8 sps:$4 sm:$0xff]  }
 0x6f5   : > { %v8513_v37 = vpack.c.bf16 %v8383_v33, %v8373_v59  ;;  %v9039_v19 = vpack.c.bf16 %v9034_v29, %v9033_v62  ;;  %v11515_v62 = vld [vmem:[%s17178_s6 + $0x20] ss:$8 sps:$4 sm:$0xff]   ;;  %v11518_v2 = vld [vmem:[%s17178_s6 + $0x44] ss:$8 sps:$4 sm:$0xff]  }
 0x6f6   : > { %v8514_v10 = vpack.c.bf16 %v8384_v18, %v8374_v15  ;;  %v8206_v20 = vpop.f32.mrb[76].mxu0  ;;  %v11519_v59 = vld [vmem:[%s17178_s6 + $0x40] ss:$8 sps:$4 sm:$0xff]  }
 0x6f7   : > { %v10967_v16 = vadd.f32 %v8206_v20, %v16427_v50  ;;  %v8208_v13 = vpop.f32.mrb[77].mxu0  ;;  %10648 = vmatprep.subr.bf16.mxu1 %v9039_v19 }
 0x6f8   : > { %v10968_v17 = vadd.f32 %v8208_v13, %v16427_v50  ;;  %v8210_v31 = vpop.f32.mrb[78].mxu0  ;;  %8941 = vmatprep.subr.bf16.mxu0 %v8514_v10  ;;  %10649 = vmatpush3.bf16.msra.mxu1 %v9021_v30 }
 0x6f9   : > { %v10969_v41 = vadd.f32 %v8210_v31, %v16425_v48  ;;  %v8212_v53 = vpop.f32.mrb[79].mxu0  ;;  %8942 = vmatpush1.bf16.msra.mxu0 %v8513_v37  ;;  %v8393_v47 = vmax.f32 %v10967_v16, 0.0 }
 0x6fa   : > { %v10970_v4 = vadd.f32 %v8212_v53, %v16425_v48  ;;  %v8394_v50 = vmax.f32 %v10968_v17, 0.0 }
 0x6fb   : > { %v8403_v38 = vmax.f32 %v10969_v41, 0.0 }
 0x6fc   : > { %v8404_v39 = vmax.f32 %v10970_v4, 0.0 }
 0x6fd   : > { %v8523_v45 = vpack.c.bf16 %v8403_v38, %v8393_v47 }
 0x6fe   : > { %v8524_v5 = vpack.c.bf16 %v8404_v39, %v8394_v50  ;;  %v8216_v42 = vpop.f32.mrb[80].mxu0 }
 0x6ff   : > { %v10971_v54 = vadd.f32 %v8216_v42, %v16456_v8  ;;  %v8218_v34 = vpop.f32.mrb[81].mxu0 }
 0x700   : > { %v10972_v30 = vadd.f32 %v8218_v34, %v16456_v8  ;;  %v8220_v21 = vpop.f32.mrb[82].mxu0  ;;  %8943 = vmatprep.subr.bf16.mxu0 %v8524_v5  ;;  %v11511_v8 = vld [vmem:[%s17178_s6] ss:$8 sps:$4 sm:$0xff]  }
 0x701   : > { %v10973_v23 = vadd.f32 %v8220_v21, %v16454_v55  ;;  %v8222_v58 = vpop.f32.mrb[83].mxu0  ;;  %8944 = vmatpush1.bf16.msra.mxu0 %v8523_v45  ;;  %v8413_v60 = vmax.f32 %v10971_v54, 0.0 }
 0x702   : > { %v10974_v48 = vadd.f32 %v8222_v58, %v16454_v55  ;;  %v8414_v22 = vmax.f32 %v10972_v30, 0.0  ;;  %v11513_v55 = vld [vmem:[%s17178_s6 + $0x10] ss:$8 sps:$4 sm:$0xff]  }
 0x703   : > { %v8423_v49 = vmax.f32 %v10973_v23, 0.0 }
 0x704   : > { %v8424_v12 = vmax.f32 %v10974_v48, 0.0 }
 0x705   : > { %v8533_v40 = vpack.c.bf16 %v8423_v49, %v8413_v60 }
 0x706   : > { %v8534_v46 = vpack.c.bf16 %v8424_v12, %v8414_v22 }
 0x708   : > { %8945 = vmatprep.subr.bf16.mxu0 %v8534_v46 }
 0x709   : > { %8946 = vmatpush1.bf16.msra.mxu0 %v8533_v40 }
 0x70a   : > { %9472 = vmatprep.subr.bf16.mxu0 %v17872_v36 }
 0x70c   : > { %8960 = vmatmul.mubr.bf16.vlgmr.msra.gmra.mrb[84].mxu0 %v11511_v8  ;;  %v11351_v8 = vld [vmem:[%s17179_s7 + $0x20] ss:$16 sps:$4 sm:$0xff]  }
 0x70d   : > { %10583 = vmatprep.mubr.msk.bf16.mxu0 %vm1886_vm0, %v11512_v0 }
 0x714   : > { %8970 = vmatmul.mubr.bf16.gmra.mrb[88].mxu0 %v11513_v55 }
 0x715   : > { %10584 = vmatprep.mubr.msk.bf16.mxu0 %vm1886_vm0, %v11514_v27 }
 0x71c   : > { %8980 = vmatmul.mubr.bf16.gmra.mrb[92].mxu0 %v11515_v62 }
 0x71d   : > { %10585 = vmatprep.mubr.msk.bf16.mxu0 %vm1886_vm0, %v11516_v43 }
 0x724   : > { %8990 = vmatmul.mubr.bf16.gmra.mrb[96].mxu0 %v11517_v3  ;;  %v11354_v3 = vld [vmem:[%s17179_s7 + $0x40] ss:$16 sps:$4 sm:$0xff]  }
 0x725   : > { %10586 = vmatprep.mubr.msk.bf16.mxu0 %vm1886_vm0, %v11518_v2 }
 0x72c   : > { %9000 = vmatmul.mubr.bf16.gmra.mrb[100].mxu0 %v11519_v59  ;;  %v11373_v59 = vld [vmem:[%s17179_s7 + $0xc] ss:$16 sps:$4 sm:$0xff]  }
 0x72d   : > { %10619 = vmatprep.mubr.msk.bf16.mxu0 %vm9351_vm4, %v11373_v59  ;;  %v11377_v59 = vld [vmem:[%s17179_s7 + $0x48] ss:$16 sps:$4 sm:$0xff]  }
 0x73f   : > { %v8795_v33 = vpop.f32.mrb[84].mxu1 }
 0x740   : > { %v8797_v29 = vpop.f32.mrb[85].mxu1 }
 0x741   : > { %v9040_v15 = vadd.f32 %v8797_v29, %v8795_v33  ;;  %v8799_v18 = vpop.f32.mrb[86].mxu1  ;;  %v11359_v33 = vld [vmem:[%s17179_s7 + $0x64] ss:$16 sps:$4 sm:$0xff]  }
 0x742   : > { %v8801_v37 = vpop.f32.mrb[87].mxu1 }
 0x743   : > { %v9041_v19 = vadd.f32 %v8801_v37, %v8799_v18 }
 0x745   : > { %v9050_v10 = vpack.c.bf16 %v9041_v19, %v9040_v15 }
 0x747   : > { %v8805_v20 = vpop.f32.mrb[88].mxu1  ;;  %10650 = vmatprep.subr.bf16.mxu1 %v9050_v10 }
 0x748   : > { %v8807_v16 = vpop.f32.mrb[89].mxu1  ;;  %10651 = vmatpush3.bf16.msra.mxu1 %v9022_v63 }
 0x749   : > { %v9042_v13 = vadd.f32 %v8807_v16, %v8805_v20  ;;  %v8809_v17 = vpop.f32.mrb[90].mxu1  ;;  %v11357_v20 = vld [vmem:[%s17179_s7 + $0x60] ss:$16 sps:$4 sm:$0xff]  }
 0x74a   : > { %v8811_v31 = vpop.f32.mrb[91].mxu1 }
 0x74b   : > { %v9043_v28 = vadd.f32 %v8811_v31, %v8809_v17 }
 0x74d   : > { %v9051_v41 = vpack.c.bf16 %v9043_v28, %v9042_v13  ;;  %v11362_v13 = vld [vmem:[%s17179_s7 + $0x84] ss:$16 sps:$4 sm:$0xff]  }
 0x74f   : > { %v8815_v53 = vpop.f32.mrb[92].mxu1  ;;  %10652 = vmatprep.subr.bf16.mxu1 %v9051_v41 }
 0x750   : > { %v8817_v4 = vpop.f32.mrb[93].mxu1  ;;  %10653 = vmatpush3.bf16.msra.mxu1 %v9023_v32 }
 0x751   : > { %v9044_v47 = vadd.f32 %v8817_v4, %v8815_v53  ;;  %v8819_v38 = vpop.f32.mrb[94].mxu1 }
 0x752   : > { %v8821_v50 = vpop.f32.mrb[95].mxu1 }
 0x753   : > { %v9045_v39 = vadd.f32 %v8821_v50, %v8819_v38  ;;  %v11365_v38 = vld [vmem:[%s17179_s7 + $0xa4] ss:$16 sps:$4 sm:$0xff]   ;;  %v11363_v50 = vld [vmem:[%s17179_s7 + $0xa0] ss:$16 sps:$4 sm:$0xff]  }
 0x755   : > { %v9052_v45 = vpack.c.bf16 %v9045_v39, %v9044_v47  ;;  %v11360_v47 = vld [vmem:[%s17179_s7 + $0x80] ss:$16 sps:$4 sm:$0xff]   ;;  %v11368_v39 = vld [vmem:[%s17179_s7 + $0xc4] ss:$16 sps:$4 sm:$0xff]  }
 0x757   : > { %v8825_v5 = vpop.f32.mrb[96].mxu1  ;;  %10654 = vmatprep.subr.bf16.mxu1 %v9052_v45  ;;  %v9113_v45 = vld [vmem:[%s17179_s7 + $0xe0] sm:$0xff] }
 0x758   : > { %v8827_v51 = vpop.f32.mrb[97].mxu1  ;;  %10655 = vmatpush3.bf16.msra.mxu1 %v9024_v9 }
 0x759   : > { %v9046_v61 = vadd.f32 %v8827_v51, %v8825_v5  ;;  %v8829_v63 = vpop.f32.mrb[98].mxu1  ;;  %v11366_v5 = vld [vmem:[%s17179_s7 + $0xc0] ss:$16 sps:$4 sm:$0xff]   ;;  %v10616_v51 = vcombine.high %v9113_v45, %v9113_v45 }
 0x75a   : > { %v8831_v42 = vpop.f32.mrb[99].mxu1 }
 0x75b   : > { %v9047_v54 = vadd.f32 %v8831_v42, %v8829_v63 }
 0x75d   : > { %v9053_v34 = vpack.c.bf16 %v9047_v54, %v9046_v61  ;;  %v10615_v61 = vcombine.low %v9113_v45, %v9113_v45 }
 0x75f   : > { %v8835_v30 = vpop.f32.mrb[100].mxu1  ;;  %10656 = vmatprep.subr.bf16.mxu1 %v9053_v34 }
 0x760   : > { %v8837_v24 = vpop.f32.mrb[101].mxu1  ;;  %10657 = vmatpush3.bf16.msra.mxu1 %v9035_v1  ;;  %v11353_v1 = vld [vmem:[%s17179_s7 + $0x24] ss:$16 sps:$4 sm:$0xff]  }
 0x761   : > { %v9048_v44 = vadd.f32 %v8837_v24, %v8835_v30  ;;  %v8839_v32 = vpop.f32.mrb[102].mxu1 }
 0x762   : > { %v8841_v21 = vpop.f32.mrb[103].mxu1 }
 0x763   : > { %v9049_v23 = vadd.f32 %v8841_v21, %v8839_v32 }
 0x765   : > { %v9054_v58 = vpack.c.bf16 %v9049_v23, %v9048_v44 }
 0x767   : > { %10658 = vmatprep.subr.bf16.mxu1 %v9054_v58 }
 0x768   : > { %10659 = vmatpush3.bf16.msra.mxu1 %v9036_v7 }
 0x76f   : > { %v8878_v35 = vpop.f32.mrb[104].mxu1 }
 0x770   : > { %v8880_v57 = vpop.f32.mrb[105].mxu1 }
 0x771   : > { %v9055_v9 = vadd.f32 %v8880_v57, %v8878_v35  ;;  %v8882_v48 = vpop.f32.mrb[106].mxu1 }
 0x772   : > { %v8884_v60 = vpop.f32.mrb[107].mxu1 }
 0x773   : > { %v9056_v49 = vadd.f32 %v8884_v60, %v8882_v48 }
 0x775   : > { %v9065_v22 = vpack.c.bf16 %v9056_v49, %v9055_v9 }
 0x777   : > { %10660 = vmatprep.subr.bf16.mxu1 %v9065_v22  ;;  %v8888_v25 = vpop.f32.mrb[108].mxu1 }
 0x778   : > { %10661 = vmatpush3.bf16.msra.mxu1 %v9037_v6  ;;  %v8890_v14 = vpop.f32.mrb[109].mxu1 }
 0x779   : > { %v9057_v11 = vadd.f32 %v8890_v14, %v8888_v25  ;;  %v8892_v7 = vpop.f32.mrb[110].mxu1 }
 0x77a   : > { %v8894_v12 = vpop.f32.mrb[111].mxu1 }
 0x77b   : > { %9409 = vmatmul.mubr.bf16.vlgmr.msra.gmra.mrb[124].mxu1 %v11348_v56  ;;  %v9058_v40 = vadd.f32 %v8894_v12, %v8892_v7 }
 0x77c   : > { %9416 = vmatprep.mubr.bf16.mxu1 %v11353_v1 }
 0x77d   : > { %v9066_v46 = vpack.c.bf16 %v9058_v40, %v9057_v11 }
 0x77f   : > { %v8898_v0 = vpop.f32.mrb[112].mxu1  ;;  %9473 = vmatpush1.bf16.msra.mxu0 %v9066_v46 }
 0x780   : > { %v8900_v26 = vpop.f32.mrb[113].mxu1  ;;  %9474 = vmatprep.subr.bf16.mxu0 %v17872_v36 }
 0x781   : > { %v9059_v6 = vadd.f32 %v8900_v26, %v8898_v0  ;;  %v8902_v55 = vpop.f32.mrb[114].mxu1 }
 0x782   : > { %v8904_v27 = vpop.f32.mrb[115].mxu1 }
 0x783   : > { %9417 = vmatmul.mubr.bf16.gmra.mrb[128].mxu1 %v11351_v8  ;;  %v9060_v62 = vadd.f32 %v8904_v27, %v8902_v55 }
 0x784   : > { %9424 = vmatprep.mubr.bf16.mxu1 %v11356_v52 }
 0x785   : > { %v9067_v43 = vpack.c.bf16 %v9060_v62, %v9059_v6 }
 0x787   : > { %v8908_v2 = vpop.f32.mrb[116].mxu1  ;;  %9475 = vmatpush1.bf16.msra.mxu0 %v9067_v43  ;;  %v11371_v43 = vld [vmem:[%s17179_s7 + $0x8] ss:$16 sps:$4 sm:$0xff]  }
 0x788   : > { %v8910_v29 = vpop.f32.mrb[117].mxu1  ;;  %9476 = vmatprep.subr.bf16.mxu0 %v17872_v36 }
 0x789   : > { %v9061_v15 = vadd.f32 %v8910_v29, %v8908_v2  ;;  %v8912_v18 = vpop.f32.mrb[118].mxu1  ;;  %v11379_v2 = vld [vmem:[%s17179_s7 + $0x4c] ss:$16 sps:$4 sm:$0xff]   ;;  %v11380_v29 = vld [vmem:[%s17179_s7 + $0x68] ss:$16 sps:$4 sm:$0xff]  }
 0x78a   : > { %v8914_v37 = vpop.f32.mrb[119].mxu1 }
 0x78b   : > { %9425 = vmatmul.mubr.bf16.gmra.mrb[132].mxu1 %v11354_v3  ;;  %v9062_v19 = vadd.f32 %v8914_v37, %v8912_v18  ;;  %v11376_v3 = vld [vmem:[%s17179_s7 + $0x2c] ss:$16 sps:$4 sm:$0xff]   ;;  %v11383_v18 = vld [vmem:[%s17179_s7 + $0x88] ss:$16 sps:$4 sm:$0xff]  }
 0x78c   : > { %9432 = vmatprep.mubr.bf16.mxu1 %v11359_v33  ;;  %v11382_v33 = vld [vmem:[%s17179_s7 + $0x6c] ss:$16 sps:$4 sm:$0xff]  }
 0x78d   : > { %v9068_v10 = vpack.c.bf16 %v9062_v19, %v9061_v15  ;;  %v11385_v15 = vld [vmem:[%s17179_s7 + $0x8c] ss:$16 sps:$4 sm:$0xff]   ;;  %v11386_v19 = vld [vmem:[%s17179_s7 + $0xa8] ss:$16 sps:$4 sm:$0xff]  }
 0x78e   : > { %v11388_v37 = vld [vmem:[%s17179_s7 + $0xac] ss:$16 sps:$4 sm:$0xff]  }
 0x78f   : > { %v8918_v16 = vpop.f32.mrb[120].mxu1  ;;  %9477 = vmatpush1.bf16.msra.mxu0 %v9068_v10  ;;  %v11391_v10 = vld [vmem:[%s17179_s7 + $0xcc] ss:$16 sps:$4 sm:$0xff]  }
 0x790   : > { %v8920_v17 = vpop.f32.mrb[121].mxu1  ;;  %9478 = vmatprep.subr.bf16.mxu0 %v17872_v36 }
 0x791   : > { %v9063_v31 = vadd.f32 %v8920_v17, %v8918_v16  ;;  %v8922_v28 = vpop.f32.mrb[122].mxu1  ;;  %v11389_v16 = vld [vmem:[%s17179_s7 + $0xc8] ss:$16 sps:$4 sm:$0xff]  }
 0x792   : > { %v8924_v41 = vpop.f32.mrb[123].mxu1 }
 0x793   : > { %9433 = vmatmul.mubr.bf16.gmra.mrb[136].mxu1 %v11357_v20  ;;  %v9064_v53 = vadd.f32 %v8924_v41, %v8922_v28  ;;  %v9114_v20 = vld [vmem:[%s17179_s7 + $0xe8] sm:$0xff] }
 0x794   : > { %9440 = vmatprep.mubr.bf16.mxu1 %v11362_v13  ;;  %v10618_v13 = vcombine.high %v9114_v20, %v9114_v20  ;;  %v10617_v17 = vcombine.low %v9114_v20, %v9114_v20 }
 0x795   : > { %v9069_v4 = vpack.c.bf16 %v9064_v53, %v9063_v31 }
 0x797   : > { %9479 = vmatpush1.bf16.msra.mxu0 %v9069_v4 }
 0x798   : > { %9480 = vmatprep.subr.bf16.mxu0 %v17872_v36 }
 0x79b   : > { %9441 = vmatmul.mubr.bf16.gmra.mrb[140].mxu1 %v11360_v47 }
 0x79c   : > { %9448 = vmatprep.mubr.bf16.mxu1 %v11365_v38 }
 0x7a3   : > { %9449 = vmatmul.mubr.bf16.gmra.mrb[144].mxu1 %v11363_v50 }
 0x7a4   : > { %9456 = vmatprep.mubr.bf16.mxu1 %v11368_v39 }
 0x7ab   : > { %9457 = vmatmul.mubr.bf16.gmra.mrb[148].mxu1 %v11366_v5 }
 0x7ac   : > { %9464 = vmatprep.mubr.bf16.mxu1 %v10616_v51 }
 0x7b3   : > { %9465 = vmatmul.mubr.bf16.gmra.mrb[152].mxu1 %v10615_v61 }
 0x7df   : > { %v8961_v63 = vpop.f32.mrb[84].mxu0 }
 0x7e0   : > { %v8963_v42 = vpop.f32.mrb[85].mxu0 }
 0x7e1   : > { %v9070_v54 = vadd.f32 %v8963_v42, %v8961_v63  ;;  %v8965_v34 = vpop.f32.mrb[86].mxu0 }
 0x7e2   : > { %v8967_v30 = vpop.f32.mrb[87].mxu0 }
 0x7e3   : > { %v9071_v24 = vadd.f32 %v8967_v30, %v8965_v34 }
 0x7e5   : > { %v9080_v44 = vpack.c.bf16 %v9071_v24, %v9070_v54 }
 0x7e7   : > { %v8971_v32 = vpop.f32.mrb[88].mxu0  ;;  %9481 = vmatpush1.bf16.msra.mxu0 %v9080_v44 }
 0x7e8   : > { %v8973_v21 = vpop.f32.mrb[89].mxu0  ;;  %9482 = vmatprep.subr.bf16.mxu0 %v17872_v36 }
 0x7e9   : > { %v9072_v23 = vadd.f32 %v8973_v21, %v8971_v32  ;;  %v8975_v58 = vpop.f32.mrb[90].mxu0 }
 0x7ea   : > { %v8977_v35 = vpop.f32.mrb[91].mxu0 }
 0x7eb   : > { %v9073_v57 = vadd.f32 %v8977_v35, %v8975_v58 }
 0x7ed   : > { %v9081_v9 = vpack.c.bf16 %v9073_v57, %v9072_v23 }
 0x7ef   : > { %v8981_v48 = vpop.f32.mrb[92].mxu0  ;;  %9483 = vmatpush1.bf16.msra.mxu0 %v9081_v9 }
 0x7f0   : > { %v8983_v60 = vpop.f32.mrb[93].mxu0  ;;  %9484 = vmatprep.subr.bf16.mxu0 %v17872_v36 }
 0x7f1   : > { %v9074_v49 = vadd.f32 %v8983_v60, %v8981_v48  ;;  %v8985_v22 = vpop.f32.mrb[94].mxu0 }
 0x7f2   : > { %v8987_v56 = vpop.f32.mrb[95].mxu0 }
 0x7f3   : > { %v9075_v25 = vadd.f32 %v8987_v56, %v8985_v22 }
 0x7f5   : > { %v9082_v1 = vpack.c.bf16 %v9075_v25, %v9074_v49 }
 0x7f7   : > { %v8991_v14 = vpop.f32.mrb[96].mxu0  ;;  %9485 = vmatpush1.bf16.msra.mxu0 %v9082_v1 }
 0x7f8   : > { %v8993_v11 = vpop.f32.mrb[97].mxu0  ;;  %9486 = vmatprep.subr.bf16.mxu0 %v17872_v36 }
 0x7f9   : > { %v9076_v7 = vadd.f32 %v8993_v11, %v8991_v14  ;;  %v8995_v12 = vpop.f32.mrb[98].mxu0 }
 0x7fa   : > { %v8997_v40 = vpop.f32.mrb[99].mxu0 }
 0x7fb   : > { %v9077_v46 = vadd.f32 %v8997_v40, %v8995_v12 }
 0x7fd   : > { %v9083_v8 = vpack.c.bf16 %v9077_v46, %v9076_v7 }
 0x7ff   : > { %v9001_v0 = vpop.f32.mrb[100].mxu0  ;;  %9487 = vmatpush1.bf16.msra.mxu0 %v9083_v8 }
 0x800   : > { %v9003_v52 = vpop.f32.mrb[101].mxu0  ;;  %9488 = vmatprep.subr.bf16.mxu0 %v17872_v36  ;;  %v11374_v36 = vld [vmem:[%s17179_s7 + $0x28] ss:$16 sps:$4 sm:$0xff]  }
 0x801   : > { %v9078_v26 = vadd.f32 %v9003_v52, %v9001_v0  ;;  %v9005_v6 = vpop.f32.mrb[102].mxu0 }
 0x802   : > { %v9007_v55 = vpop.f32.mrb[103].mxu0 }
 0x803   : > { %v9079_v27 = vadd.f32 %v9007_v55, %v9005_v6 }
 0x805   : > { %v9084_v62 = vpack.c.bf16 %v9079_v27, %v9078_v26 }
 0x807   : > { %9489 = vmatpush1.bf16.msra.mxu0 %v9084_v62  ;;  %v11394_v62 = vld [vmem:[%s17181_s9] sm:$0xff]  }
 0x808   : > { %10747 = vmatprep.mubr.msk.bf16.mxu1 %vm9696_vm5, %v11394_v62 }
 0x80a   : > { %9505 = vmatmul.mubr.bf16.vlgmr.msra.gmra.mrb[104].mxu0 %v11371_v43  ;;  %v9133_v43 = vpop.permute.xlu1 %9132 }
 0x80b   : > { %10620 = vmatprep.mubr.msk.bf16.mxu0 %vm9351_vm4, %v11376_v3 }
 0x80e   : > { %v9143_v20 = vpop.permute.xlu1 %9142 }
 0x812   : > { %9513 = vmatmul.mubr.bf16.gmra.mrb[108].mxu0 %v11374_v36  ;;  %v9138_v36 = vpop.permute.xlu0 %9137 }
 0x813   : > { %10621 = vmatprep.mubr.msk.bf16.mxu0 %vm9351_vm4, %v11379_v2 }
 0x81a   : > { %9521 = vmatmul.mubr.bf16.gmra.mrb[112].mxu0 %v11377_v59 }
 0x81b   : > { %10622 = vmatprep.mubr.msk.bf16.mxu0 %vm9351_vm4, %v11382_v33 }
 0x822   : > { %9529 = vmatmul.mubr.bf16.gmra.mrb[116].mxu0 %v11380_v29 }
 0x823   : > { %10623 = vmatprep.mubr.msk.bf16.mxu0 %vm9351_vm4, %v11385_v15 }
 0x82a   : > { %9537 = vmatmul.mubr.bf16.gmra.mrb[120].mxu0 %v11383_v18 }
 0x82b   : > { %10624 = vmatprep.mubr.msk.bf16.mxu0 %vm9351_vm4, %v11388_v37 }
 0x832   : > { %9545 = vmatmul.mubr.bf16.gmra.mrb[124].mxu0 %v11386_v19 }
 0x833   : > { %10625 = vmatprep.mubr.msk.bf16.mxu0 %vm9351_vm4, %v11391_v10 }
 0x83a   : > { %9553 = vmatmul.mubr.bf16.gmra.mrb[128].mxu0 %v11389_v16 }
 0x83b   : > { %10626 = vmatprep.mubr.msk.bf16.mxu0 %vm9351_vm4, %v10618_v13 }
 0x842   : > { %9561 = vmatmul.mubr.bf16.gmra.mrb[132].mxu0 %v10617_v17  ;;  %v9148_v17 = vpop.permute.xlu0 %9147 }
 0x84e   : > { %v10662_v31 = vpop.f32.mrb[124].mxu1 }
 0x84f   : > { %v10663_v28 = vpop.f32.mrb[125].mxu1 }
 0x850   : > { %v10664_v41 = vadd.f32 %v10663_v28, %v10662_v31  ;;  %v10665_v53 = vpop.f32.mrb[126].mxu1 }
 0x851   : > { %v10666_v4 = vpop.f32.mrb[127].mxu1 }
 0x852   : > { %v10667_v47 = vadd.f32 %v10666_v4, %v10665_v53  ;;  %v9411_v3 = vadd.f32 %v10664_v41, %v9133_v43 }
 0x854   : > { %v9414_v29 = vadd.f32 %v10667_v47, %v9138_v36 }
 0x856   : > { %v10668_v38 = vpop.f32.mrb[128].mxu1 }
 0x857   : > { %v10669_v50 = vpop.f32.mrb[129].mxu1 }
 0x858   : > { %v10670_v39 = vadd.f32 %v10669_v50, %v10668_v38  ;;  %v10671_v45 = vpop.f32.mrb[130].mxu1 }
 0x859   : > { %v10672_v5 = vpop.f32.mrb[131].mxu1 }
 0x85a   : > { %v10673_v51 = vadd.f32 %v10672_v5, %v10671_v45  ;;  %v9419_v13 = vadd.f32 %v10670_v39, %v9143_v20  ;;  %v9153_v5 = vpop.permute.xlu1 %9152 }
 0x85c   : > { %v9422_v4 = vadd.f32 %v10673_v51, %v9148_v17 }
 0x85e   : > { %v10674_v61 = vpop.f32.mrb[132].mxu1 }
 0x85f   : > { %v10675_v63 = vpop.f32.mrb[133].mxu1 }
 0x860   : > { %v17048_v42 = vadd.f32 %v10675_v63, %v10674_v61  ;;  %v10677_v54 = vpop.f32.mrb[134].mxu1 }
 0x861   : > { %v10678_v34 = vpop.f32.mrb[135].mxu1 }
 0x862   : > { %v17050_v30 = vadd.f32 %v10678_v34, %v10677_v54  ;;  %v9427_v63 = vadd.f32 %v17048_v42, %v9153_v5  ;;  %v9158_v54 = vpop.permute.xlu0 %9157 }
 0x866   : > { %v10680_v24 = vpop.f32.mrb[136].mxu1 }
 0x867   : > { %v10681_v44 = vpop.f32.mrb[137].mxu1 }
 0x868   : > { %v17052_v32 = vadd.f32 %v10681_v44, %v10680_v24  ;;  %v10683_v21 = vpop.f32.mrb[138].mxu1  ;;  %v9430_v44 = vadd.f32 %v17050_v30, %v9158_v54 }
 0x869   : > { %v10684_v23 = vpop.f32.mrb[139].mxu1 }
 0x86a   : > { %v17054_v58 = vadd.f32 %v10684_v23, %v10683_v21 }
 0x86e   : > { %v10686_v35 = vpop.f32.mrb[140].mxu1 }
 0x86f   : > { %v10687_v57 = vpop.f32.mrb[141].mxu1 }
 0x870   : > { %v17056_v9 = vadd.f32 %v10687_v57, %v10686_v35  ;;  %v10689_v48 = vpop.f32.mrb[142].mxu1 }
 0x871   : > { %v10690_v60 = vpop.f32.mrb[143].mxu1 }
 0x872   : > { %v17058_v49 = vadd.f32 %v10690_v60, %v10689_v48  ;;  %v9163_v48 = vpop.permute.xlu1 %9162 }
 0x876   : > { %v10692_v22 = vpop.f32.mrb[144].mxu1 }
 0x877   : > { %v10693_v56 = vpop.f32.mrb[145].mxu1 }
 0x878   : > { %v17060_v25 = vadd.f32 %v10693_v56, %v10692_v22  ;;  %v10695_v1 = vpop.f32.mrb[146].mxu1  ;;  %v9435_v22 = vadd.f32 %v17052_v32, %v9163_v48  ;;  %v9168_v56 = vpop.permute.xlu0 %9167  ;;  %v11395_v48 = vld [vmem:[%s17181_s9 + $0x8] sm:$0xff]  }
 0x879   : > { %v10696_v14 = vpop.f32.mrb[147].mxu1 }
 0x87a   : > { %v17062_v11 = vadd.f32 %v10696_v14, %v10695_v1 }
 0x87c   : > { %v9178_v62 = vpop.permute.xlu0 %9177 }
 0x87d   : > { %v9446_v36 = vadd.f32 %v17058_v49, %v9178_v62 }
 0x87e   : > { %v10698_v7 = vpop.f32.mrb[148].mxu1 }
 0x87f   : > { %v10699_v12 = vpop.f32.mrb[149].mxu1 }
 0x880   : > { %v17064_v40 = vadd.f32 %v10699_v12, %v10698_v7  ;;  %v10701_v46 = vpop.f32.mrb[150].mxu1  ;;  %v9438_v7 = vadd.f32 %v17054_v58, %v9168_v56  ;;  %v11399_v56 = vld [vmem:[%s17181_s9 + $0x28] ss:$0 sps:$4 sm:$0x33]  }
 0x881   : > { %v10702_v8 = vpop.f32.mrb[151].mxu1 }
 0x882   : > { %v17066_v0 = vadd.f32 %v10702_v8, %v10701_v46 }
 0x886   : > { %v10704_v52 = vpop.f32.mrb[152].mxu1 }
 0x887   : > { %v10705_v26 = vpop.f32.mrb[153].mxu1 }
 0x888   : > { %v17068_v6 = vadd.f32 %v10705_v26, %v10704_v52  ;;  %v10707_v55 = vpop.f32.mrb[154].mxu1  ;;  %v9173_v26 = vpop.permute.xlu1 %9172 }
 0x889   : > { %v10708_v27 = vpop.f32.mrb[155].mxu1 }
 0x88a   : > { %v9443_v27 = vadd.f32 %v17056_v9, %v9173_v26 }
 0x8dd   : > { %v9506_v2 = vpop.f32.mrb[104].mxu0 }
 0x8de   : > { %v9507_v59 = vadd.f32 %v9506_v2, %v9411_v3  ;;  %v9508_v33 = vpop.f32.mrb[105].mxu0 }
 0x8df   : > { %v9509_v15 = vpop.f32.mrb[106].mxu0 }
 0x8e0   : > { %v9510_v18 = vadd.f32 %v9509_v15, %v9414_v29  ;;  %v9511_v37 = vpop.f32.mrb[107].mxu0  ;;  %v9568_v19 = vmax.f32 %v9507_v59, 0.0  ;;  %v9183_v15 = vpop.permute.xlu1 %9182 }
 0x8e1   : > { %v9451_v37 = vadd.f32 %v17060_v25, %v9183_v15 }
 0x8e2   : > { %v9569_v10 = vmax.f32 %v9510_v18, 0.0 }
 0x8e4   : > { %v9594_v16 = vpack.c.bf16 %v9569_v10, %v9568_v19  ;;  %v9188_v19 = vpop.permute.xlu0 %9187 }
 0x8e5   : > { %v9514_v31 = vpop.f32.mrb[108].mxu0 }
 0x8e6   : > { %v9515_v28 = vadd.f32 %v9514_v31, %v9419_v13  ;;  %v9516_v53 = vpop.f32.mrb[109].mxu0  ;;  %10731 = vmatprep.subr.bf16.mxu1 %v9594_v16 }
 0x8e7   : > { %v9517_v41 = vpop.f32.mrb[110].mxu0  ;;  %10732 = vmatpush3.bf16.msra.mxu1 %v9594_v16  ;;  %v9454_v16 = vadd.f32 %v17062_v11, %v9188_v19  ;;  %v9193_v53 = vpop.permute.xlu1 %9192 }
 0x8e8   : > { %v9518_v38 = vadd.f32 %v9517_v41, %v9422_v4  ;;  %v9519_v50 = vpop.f32.mrb[111].mxu0  ;;  %v9570_v45 = vmax.f32 %v9515_v28, 0.0  ;;  %v9459_v41 = vadd.f32 %v17064_v40, %v9193_v53 }
 0x8ea   : > { %v9571_v47 = vmax.f32 %v9518_v38, 0.0  ;;  %v9198_v38 = vpop.permute.xlu0 %9197 }
 0x8ec   : > { %v9595_v61 = vpack.c.bf16 %v9571_v47, %v9570_v45  ;;  %v9462_v47 = vadd.f32 %v17066_v0, %v9198_v38 }
 0x8ed   : > { %v9522_v34 = vpop.f32.mrb[112].mxu0 }
 0x8ee   : > { %v9523_v24 = vadd.f32 %v9522_v34, %v9427_v63  ;;  %v9524_v39 = vpop.f32.mrb[113].mxu0  ;;  %10733 = vmatprep.subr.bf16.mxu1 %v9595_v61  ;;  %v9203_v34 = vpop.permute.xlu1 %9202 }
 0x8ef   : > { %v9525_v21 = vpop.f32.mrb[114].mxu0  ;;  %10734 = vmatpush3.bf16.msra.mxu1 %v9595_v61  ;;  %v9467_v39 = vadd.f32 %v17068_v6, %v9203_v34  ;;  %v11396_v6 = vld [vmem:[%s17181_s9 + $0x10] sm:$0xff]  }
 0x8f0   : > { %v9526_v51 = vadd.f32 %v9525_v21, %v9430_v44  ;;  %v9527_v23 = vpop.f32.mrb[115].mxu0  ;;  %v9572_v35 = vmax.f32 %v9523_v24, 0.0 }
 0x8f2   : > { %v9573_v57 = vmax.f32 %v9526_v51, 0.0 }
 0x8f4   : > { %v9596_v60 = vpack.c.bf16 %v9573_v57, %v9572_v35 }
 0x8f5   : > { %v9530_v1 = vpop.f32.mrb[116].mxu0 }
 0x8f6   : > { %v9531_v42 = vadd.f32 %v9530_v1, %v9435_v22  ;;  %v9532_v14 = vpop.f32.mrb[117].mxu0  ;;  %10735 = vmatprep.subr.bf16.mxu1 %v9596_v60  ;;  %v11398_v22 = vld [vmem:[%s17181_s9 + $0x20] sm:$0xff]   ;;  %v11585_v1 = vmov 0.0  }
 0x8f7   : > { %v9533_v12 = vpop.f32.mrb[118].mxu0  ;;  %10736 = vmatpush3.bf16.msra.mxu1 %v9596_v60  ;;  %v11397_v60 = vld [vmem:[%s17181_s9 + $0x18] sm:$0xff]  }
 0x8f8   : > { %v9534_v30 = vadd.f32 %v9533_v12, %v9438_v7  ;;  %v9535_v46 = vpop.f32.mrb[119].mxu0  ;;  %v9574_v8 = vmax.f32 %v9531_v42, 0.0  ;;  %v9616_v42 = vpop.permute.xlu0 %9615 }
 0x8f9   : > { %v9621_v7 = vpop.permute.xlu1 %9620 }
 0x8fa   : > { %v9575_v52 = vmax.f32 %v9534_v30, 0.0 }
 0x8fc   : > { %v9597_v55 = vpack.c.bf16 %v9575_v52, %v9574_v8  ;;  %v9626_v14 = vpop.permute.xlu0 %9625 }
 0x8fd   : > { %v9538_v43 = vpop.f32.mrb[120].mxu0  ;;  %v9631_v30 = vpop.permute.xlu1 %9630 }
 0x8fe   : > { %v9539_v32 = vadd.f32 %v9538_v43, %v9443_v27  ;;  %v9540_v3 = vpop.f32.mrb[121].mxu0  ;;  %10737 = vmatprep.subr.bf16.mxu1 %v9597_v55 }
 0x8ff   : > { %v9541_v2 = vpop.f32.mrb[122].mxu0  ;;  %10738 = vmatpush3.bf16.msra.mxu1 %v9597_v55 }
 0x900   : > { %v9542_v58 = vadd.f32 %v9541_v2, %v9446_v36  ;;  %v9543_v59 = vpop.f32.mrb[123].mxu0  ;;  %v9576_v33 = vmax.f32 %v9539_v32, 0.0  ;;  %v9636_v12 = vpop.permute.xlu0 %9635 }
 0x901   : > { %v9641_v32 = vpop.permute.xlu1 %9640 }
 0x902   : > { %v9577_v29 = vmax.f32 %v9542_v58, 0.0 }
 0x904   : > { %v9598_v18 = vpack.c.bf16 %v9577_v29, %v9576_v33  ;;  %v9646_v27 = vpop.permute.xlu0 %9645 }
 0x905   : > { %v9546_v10 = vpop.f32.mrb[124].mxu0 }
 0x906   : > { %v9547_v9 = vadd.f32 %v9546_v10, %v9451_v37  ;;  %v9548_v20 = vpop.f32.mrb[125].mxu0  ;;  %10739 = vmatprep.subr.bf16.mxu1 %v9598_v18  ;;  %v9651_v10 = vpop.permute.xlu1 %9650 }
 0x907   : > { %v9549_v13 = vpop.f32.mrb[126].mxu0  ;;  %10740 = vmatpush3.bf16.msra.mxu1 %v9598_v18 }
 0x908   : > { %v9550_v49 = vadd.f32 %v9549_v13, %v9454_v16  ;;  %v9551_v17 = vpop.f32.mrb[127].mxu0  ;;  %v9578_v31 = vmax.f32 %v9547_v9, 0.0  ;;  %v9656_v18 = vpop.permute.xlu0 %9655 }
 0x90a   : > { %v9579_v28 = vmax.f32 %v9550_v49, 0.0 }
 0x90c   : > { %v9599_v4 = vpack.c.bf16 %v9579_v28, %v9578_v31 }
 0x90d   : > { %v9554_v50 = vpop.f32.mrb[128].mxu0 }
 0x90e   : > { %v9555_v25 = vadd.f32 %v9554_v50, %v9459_v41  ;;  %v9556_v45 = vpop.f32.mrb[129].mxu0  ;;  %10741 = vmatprep.subr.bf16.mxu1 %v9599_v4  ;;  %v9666_v41 = vpop.permute.xlu0 %9665 }
 0x90f   : > { %v9557_v5 = vpop.f32.mrb[130].mxu0  ;;  %10742 = vmatpush3.bf16.msra.mxu1 %v9599_v4 }
 0x910   : > { %v9558_v11 = vadd.f32 %v9557_v5, %v9462_v47  ;;  %v9559_v61 = vpop.f32.mrb[131].mxu0  ;;  %v9580_v63 = vmax.f32 %v9555_v25, 0.0 }
 0x912   : > { %v9581_v54 = vmax.f32 %v9558_v11, 0.0  ;;  %v9661_v11 = vpop.permute.xlu1 %9660 }
 0x914   : > { %v9600_v24 = vpack.c.bf16 %v9581_v54, %v9580_v63 }
 0x915   : > { %v9562_v44 = vpop.f32.mrb[132].mxu0 }
 0x916   : > { %v9563_v21 = vadd.f32 %v9562_v44, %v9467_v39  ;;  %v9564_v40 = vpop.f32.mrb[133].mxu0  ;;  %10743 = vmatprep.subr.bf16.mxu1 %v9600_v24 }
 0x917   : > { %v9565_v51 = vpop.f32.mrb[134].mxu0  ;;  %10744 = vmatpush3.bf16.msra.mxu1 %v9600_v24  ;;  %v11400_v40 = vld [vmem:[%s17183_s11] sm:$0x1f]  }
 0x918   : > { %v9582_v23 = vmax.f32 %v9563_v21, 0.0  ;;  %v9566_v35 = vpop.f32.mrb[135].mxu0 }
 0x919   : > { %v9827_v35 = vpop.permute.xlu1 %9826 }
 0x91a   : > { %v9601_v57 = vpack.c.bf16 %v9582_v23, %v9582_v23 }
 0x91c   : > { %11175 = vmatprep.subr.msk.bf16.mxu1 %vm4875_vm1, %v9601_v57  ;;  %v9716_v0 = vsel %vm4875_vm1, %v9601_v57, 0 }
 0x91d   : > { %10746 = vmatpush3.bf16.msra.mxu1 %v9716_v0  ;;  %v9822_v0 = vpop.permute.xlu0 %9821 }
 0x91e   : > { %10759 = vmatprep.subr.bf16.mxu1 %v11585_v1 }
 0x920   : > { %10748 = vmatmul.mubr.msk.bf16.vlgmr.msra.gmra.mrb[156].mxu1 %vm9696_vm5, %v11395_v48 }
 0x921   : > { %10751 = vmatprep.mubr.msk.bf16.mxu1 %vm9696_vm5, %v11396_v6 }
 0x928   : > { %10752 = vmatmul.mubr.msk.bf16.gmra.mrb[160].mxu1 %vm9696_vm5, %v11397_v60 }
 0x929   : > { %10755 = vmatprep.mubr.msk.bf16.mxu1 %vm9696_vm5, %v11398_v22 }
 0x930   : > { %10756 = vmatmul.mubr.msk.bf16.gmra.mrb[164].mxu1 %vm9696_vm5, %v11399_v56 }
 0x931   : > { %10771 = vmatprep.mubr.msk.bf16.mxu1 %vm11586_vm6, %v11585_v1 }
 0x9f3   : > { %v10749_v46 = vpop.f32.mrb[156].mxu1 }
 0x9f4   : > { %v9761_v8 = vadd.f32 %v10749_v46, %v9626_v14  ;;  %v9752_v52 = vpop.f32.mrb[157].mxu1 }
 0x9f5   : > { %v9753_v26 = vadd.f32 %v9752_v52, %v9616_v42  ;;  %v10750_v55 = vpop.f32.mrb[158].mxu1 }
 0x9f6   : > { %v9764_v62 = vadd.f32 %v10750_v55, %v9631_v30  ;;  %v9755_v43 = vpop.f32.mrb[159].mxu1  ;;  %v9800_v36 = vmax.f32 %v9761_v8, 0.0 }
 0x9f7   : > { %v9756_v3 = vadd.f32 %v9755_v43, %v9621_v7  ;;  %v9798_v58 = vmax.f32 %v9753_v26, 0.0 }
 0x9f8   : > { %v9801_v2 = vmax.f32 %v9764_v62, 0.0 }
 0x9f9   : > { %v9799_v59 = vmax.f32 %v9756_v3, 0.0 }
 0x9fa   : > { %v9812_v33 = vpack.c.bf16 %v9801_v2, %v9800_v36 }
 0x9fb   : > { %v9811_v29 = vpack.c.bf16 %v9799_v59, %v9798_v58  ;;  %v10753_v15 = vpop.f32.mrb[160].mxu1 }
 0x9fc   : > { %v9777_v37 = vadd.f32 %v10753_v15, %v9646_v27  ;;  %v9768_v19 = vpop.f32.mrb[161].mxu1 }
 0x9fd   : > { %v9769_v9 = vadd.f32 %v9768_v19, %v9636_v12  ;;  %v10754_v20 = vpop.f32.mrb[162].mxu1  ;;  %10760 = vmatpush3.bf16.msra.mxu1 %v9811_v29 }
 0x9fe   : > { %v9780_v16 = vadd.f32 %v10754_v20, %v9651_v10  ;;  %v9771_v13 = vpop.f32.mrb[163].mxu1  ;;  %10761 = vmatprep.subr.bf16.mxu1 %v11585_v1  ;;  %v9804_v17 = vmax.f32 %v9777_v37, 0.0 }
 0x9ff   : > { %v9772_v49 = vadd.f32 %v9771_v13, %v9641_v32  ;;  %v9802_v28 = vmax.f32 %v9769_v9, 0.0 }
 0xa00   : > { %v9805_v31 = vmax.f32 %v9780_v16, 0.0 }
 0xa01   : > { %v9803_v53 = vmax.f32 %v9772_v49, 0.0  ;;  %10762 = vmatpush3.bf16.msra.mxu1 %v9812_v33 }
 0xa02   : > { %v9814_v4 = vpack.c.bf16 %v9805_v31, %v9804_v17  ;;  %10763 = vmatprep.subr.bf16.mxu1 %v11585_v1 }
 0xa03   : > { %v9813_v38 = vpack.c.bf16 %v9803_v53, %v9802_v28  ;;  %v10757_v50 = vpop.f32.mrb[164].mxu1 }
 0xa04   : > { %v9793_v25 = vadd.f32 %v10757_v50, %v9666_v41  ;;  %v9784_v45 = vpop.f32.mrb[165].mxu1 }
 0xa05   : > { %v9785_v47 = vadd.f32 %v9784_v45, %v9656_v18  ;;  %v10758_v5 = vpop.f32.mrb[166].mxu1  ;;  %10764 = vmatpush3.bf16.msra.mxu1 %v9813_v38 }
 0xa06   : > { %v9787_v61 = vpop.f32.mrb[167].mxu1  ;;  %10765 = vmatprep.subr.bf16.mxu1 %v11585_v1  ;;  %v9808_v54 = vmax.f32 %v9793_v25, 0.0 }
 0xa07   : > { %v9788_v63 = vadd.f32 %v9787_v61, %v9661_v11  ;;  %v9806_v34 = vmax.f32 %v9785_v47, 0.0 }
 0xa08   : > { %v9816_v44 = vpack.c.bf16 %v9808_v54, %v9808_v54 }
 0xa09   : > { %v9807_v24 = vmax.f32 %v9788_v63, 0.0  ;;  %10766 = vmatpush3.bf16.msra.mxu1 %v9814_v4 }
 0xa0a   : > { %10767 = vmatprep.subr.bf16.mxu1 %v11585_v1  ;;  %v9840_v21 = vsel %vm9838_vm7, %v9816_v44, 0 }
 0xa0b   : > { %v9815_v39 = vpack.c.bf16 %v9807_v24, %v9806_v34 }
 0xa0d   : > { %10768 = vmatpush3.bf16.msra.mxu1 %v9815_v39 }
 0xa0e   : > { %10769 = vmatprep.subr.bf16.mxu1 %v11585_v1 }
 0xa11   : > { %10770 = vmatpush3.bf16.msra.mxu1 %v9840_v21 }
 0xa14   : > { %10772 = vmatmul.mubr.msk.bf16.vlgmr.msra.gmra.mrb[168].mxu1 %vm9834_vm8, %v11400_v40 }
 0xae7   : > { %v9876_v51 = vpop.f32.mrb[168].mxu1 }
 0xae8   : > { %v10773_v23 = vpop.f32.mrb[169].mxu1  ;;  %v9877_v60 = vadd.f32 %v9876_v51, %v9822_v0 }
 0xae9   : > { %v9879_v57 = vpop.f32.mrb[170].mxu1 }
 0xaea   : > { %v9880_v48 = vadd.f32 %v9879_v57, %v9827_v35  ;;  %v10774_v6 = vpop.f32.mrb[171].mxu1 }
 0xaec   : > { %v9883_v22 = vsel %vm9838_vm7, %v9880_v48, -inf }
 0xaed   : > { %v9884_v56 = vmax.f32 %v9877_v60, %v9883_v22 }
 0xaef   : > { %v9885_v1 = vrot.slane %v9884_v56, 4 }
 0xaf1   : > { %v9886_v42 = vmax.f32 %v9884_v56, %v9885_v1 }
 0xaf3   : > { %v9887_v14 = vrot.slane %v9886_v42, 2 }
 0xaf5   : > { %v9888_v7 = vmax.f32 %v9886_v42, %v9887_v14 }
 0xaf7   : > { %v9889_v12 = vrot.slane %v9888_v7, 1 }
 0xaf9   : > { %v9890_v30 = vmax.f32 %v9888_v7, %v9889_v12 }
 0xafb   : > { %v9891_v46 = vsub.f32 %v9877_v60, %v9890_v30  ;;  %v9892_v8 = vsub.f32 %v9880_v48, %v9890_v30 }
 0xafd   : > { %v9893_v52 = vmul.f32 1.442695, %v9891_v46  ;;  %v9895_v26 = vmul.f32 1.442695, %v9892_v8 }
 0xaff   : > { %11401 = vpow2.f32 %v9893_v52 }
 0xb00   : > { %11403 = vpow2.f32 %v9895_v26 }
 0xb09   : > { %v11402_v55 = vpop.eup %11401 }
 0xb0a   : > { %v11404_v27 = vpop.eup %11403 }
 0xb0b   : > { %v9897_v62 = vsel %vm9838_vm7, %v11404_v27, 0.0 }
 0xb0c   : > { %v9898_v43 = vadd.f32 %v11402_v55, %v9897_v62 }
 0xb0e   : > { %v9899_v32 = vrot.slane %v9898_v43, 4 }
 0xb10   : > { %v9900_v3 = vadd.f32 %v9899_v32, %v9898_v43 }
 0xb12   : > { %v9901_v36 = vrot.slane %v9900_v3, 2 }
 0xb14   : > { %v9902_v2 = vadd.f32 %v9901_v36, %v9900_v3 }
 0xb16   : > { %v9903_v58 = vrot.slane %v9902_v2, 1 }
 0xb18   : > { %v9904_v59 = vadd.f32 %v9903_v58, %v9902_v2 }
 0xb1a   : > { %11405 = vrcp.f32 %v9904_v59 }
 0xb24   : > { %v11406_v33 = vpop.eup %11405 }
 0xb25   : > { %v9907_v29 = vmul.f32 %v11406_v33, %v11404_v27  ;;  %v9906_v15 = vmul.f32 %v11406_v33, %v11402_v55 }
 0xb27   : > { %9908 = vst [vmem:[%s584_s24] sm:$0xff] %v9906_v15  ;;  %9909 = vst [vmem:[%s584_s24 + $0x8] sm:$0x3] %v9907_v29 }
 0xb28   : > { %11533 = shalt.err (!%p11530_p5)
}
 0xb29   : > { %s11534_s24 = scalar_lea.hbm %s17126_s20, 256  ;;  %s11538_s29 = scalar_lea.hbm %s17185_s13, 512 }
 0xb2a   : > { %p11535_p7 = scmp.ne.s32.totalorder %s17126_s20, %s11534_s24  ;;  %p11539_p12 = scmp.lt.u32.totalorder %s17126_s20, %s17185_s13 }
 0xb2b   : > { %p11540_p13 = scmp.lt.u32.totalorder %s11538_s29, %s11534_s24  ;;  %p11542_p1 = scmp.lt.u32.totalorder %s11534_s24, %s17126_s20 }
 0xb2c   : > { %p11536_p10 = pnand %p11535_p7, %p11699_p6 }
 0xb2d   : > { %p11541_p0 = por %p11540_p13, %p11539_p12 }
 0xb2e   : > { %p11537_p11 = pneg %p11536_p10 }
 0xb2f   : > { %p11543_p2 = por %p11542_p1, %p11541_p0 }
 0xb31   : > { %p11544_p3 = pnand %p11543_p2, %p11537_p11 }
 0xb33   : > { %11547 = shalt.err (!%p11544_p3)
}
 0xb34   : > { %s11588_s1 = smov 128   ;;  %s11589_s22 = smov 256  }
 0xb35   : > { %s11590_s2 = smov 8   ;;  %s17874_s23 = scalar_lea.sflag [#allocation4], %s11850_s16 }
 0xb36   : > { %11176 = dma.vmem_to_hbm [thread:$0]  (%p11699_p6), %s17128_s15, 256, %s17126_s20, %s17874_s23, %s11588_s1, %s11589_s22, %s11590_s2  }
 0xb37 PF: > { %s9938_s0 = sand.u32 1, %s11570_s25   ;;  %p11179_p4 = pnand %p9993_p9, %p11703_p8 }
 0xb38   : > { %s9939_s24 = scalar_lea.sflag [#allocation4], %s9938_s0 }
 0xb39   : > { %11565 = dma.done.wait (!%p11179_p4), %s9939_s24, 256  }
 0xb3a   : > { %11567 = vsyncadd (!%p11179_p4), %s9939_s24, 4294967040  ;;  %p23_p5 = scmp.ge.s32.totalorder %s11684_s14, 4   ;;  %s17875_s25 = smov %s11574_s26 }
 0xb3b   : > { %s17876_s26 = smov %s11578_s27  ;;  %s17877_s27 = smov %s11697_s17 }
 0xb3c   : > { %s17878_s28 = smov %s11684_s14  ;;  %25 = sbr.rel (!%p23_p5) target bundleno = 7 (0x7), region = 135 }
 0xb43   :  { %9944 = vsyncpa [#allocation4], 1 }
 0xb44   :  { %9946 = vsyncpa [#allocation4 + $0x1], 1 }

</bundles_post_ra>
